<compile_context>
chip_gen: v7x
topology: tpu7x:2x2x1
jax: 0.10.0
libtpu: 0.0.40
codegen_flags: <defaults>
</compile_context>

<pallas_src>
import jax
import jax.numpy as jnp
from jax.experimental import pallas as pl
from jax.experimental.pallas import tpu as pltpu

EPS = 1e-5  # PyTorch InstanceNorm2d default (affine=False, biased variance)


def residual_block_kernel(x_ref, w1_ref, b1_ref, w2_ref, b2_ref, o_ref):
    """One batch element.

    x_ref : (1, H, W, Cp)   f32  (channels zero-padded to Cp)
    w*_ref: (3, 3*Cp, Cp)   bf16 (grouped by kernel row kh)
    b*_ref: (1, Cp)         f32
    o_ref : (1, H, W, C)    f32  (only the real channels go back to HBM)
    """
    H, W, Cp = x_ref.shape[1], x_ref.shape[2], x_ref.shape[3]
    C = o_ref.shape[3]
    inv_hw = 1.0 / float(H * W)

    x = x_ref[0]                               # (H, W, Cp) f32
    b1 = b1_ref[...].astype(jnp.float32)       # (1, Cp)
    b2 = b2_ref[...].astype(jnp.float32)       # (1, Cp)

    def reflect_pad(y):
        # ReflectionPad2d(1): (H, W, Cp) -> (H+2, W+2, Cp), same dtype.
        yc = jnp.concatenate([y[:, 1:2, :], y, y[:, W - 2:W - 1, :]], axis=1)
        return jnp.concatenate([yc[1:2], yc, yc[H - 2:H - 1]], axis=0)

    def conv3x3(y_bf16, w_ref, b):
        # Reflection pad + 3x3 conv as 3 accumulating MXU matmuls:
        #   acc += (H*W, 3*Cp) @ (3*Cp, Cp)   for kh in {0,1,2}
        # bf16 operands, f32 accumulation; no 9*Cp im2col buffer.
        xp = reflect_pad(y_bf16)                                # (H+2, W+2, Cp)
        cols = jnp.concatenate(
            [xp[:, 0:W, :], xp[:, 1:W + 1, :], xp[:, 2:W + 2, :]],
            axis=-1)                                            # (H+2, W, 3*Cp)
        acc = jnp.dot(cols[0:H].reshape(H * W, 3 * Cp), w_ref[0],
                      preferred_element_type=jnp.float32)
        for kh in (1, 2):                                       # unrolled
            acc = acc + jnp.dot(cols[kh:kh + H].reshape(H * W, 3 * Cp),
                                w_ref[kh],
                                preferred_element_type=jnp.float32)
        return acc + b                                          # (H*W, Cp) f32

    def instance_norm(y):
        # Centered two-pass stats (biased variance, as PyTorch); avoids the
        # catastrophic cancellation of E[y^2] - mean^2 when |mean| >> std.
        mean = jnp.sum(y, axis=0, keepdims=True) * inv_hw
        d = y - mean
        var = jnp.sum(d * d, axis=0, keepdims=True) * inv_hw
        return d * jax.lax.rsqrt(var + EPS)

    # ReflectionPad -> Conv1 -> InstanceNorm -> ReLU
    y = jnp.maximum(
        instance_norm(conv3x3(x.astype(jnp.bfloat16), w1_ref, b1)), 0.0)

    # ReflectionPad -> Conv2 -> InstanceNorm
    z = instance_norm(
        conv3x3(y.reshape(H, W, Cp).astype(jnp.bfloat16), w2_ref, b2))

    # Residual add; ship only the C real channels back to HBM.
    out = (x.reshape(H * W, Cp) + z).reshape(H, W, Cp)
    o_ref[0] = out[:, :, :C].astype(o_ref.dtype)


def _vmem_limit_bytes():
    # ~25% headroom below the physical per-core VMEM (never pin v7x at its
    # full 64 MiB) while still allowing large resident tiles on 128 MiB parts.
    try:
        cap = pltpu.get_tpu_info().vmem_capacity_bytes
    except Exception:
        cap = 64 * 1024 * 1024        # conservative: safe on every generation
    return min(int(cap * 3 // 4), 100 * 1024 * 1024)


def _make_call(N, C, H, W, Cp, single_buffer_consts):
    const_kw = {}
    if single_buffer_consts:
        # Weights/biases have a constant index_map; a second pipeline buffer
        # for them is pure VMEM waste (~0.6 MB at Cp=128).
        const_kw["pipeline_mode"] = pl.Buffered(1)
    w_spec = pl.BlockSpec((3, 3 * Cp, Cp), lambda b: (0, 0, 0), **const_kw)
    b_spec = pl.BlockSpec((1, Cp), lambda b: (0, 0), **const_kw)

    flops = int(N) * 2 * 2 * (H * W) * (9 * Cp) * Cp           # two 3x3 convs
    bytes_accessed = int(N * H * W * Cp * 4                    # x in
                         + N * H * W * C * 4                   # out (C only)
                         + 2 * 9 * Cp * Cp * 2                 # bf16 weights
                         + 2 * Cp * 4)                         # biases
    cost = pl.CostEstimate(flops=flops, transcendentals=2 * int(N) * Cp,
                           bytes_accessed=bytes_accessed)

    return pl.pallas_call(
        residual_block_kernel,
        out_shape=jax.ShapeDtypeStruct((N, H, W, C), jnp.float32),
        grid=(N,),
        in_specs=[
            pl.BlockSpec((1, H, W, Cp), lambda b: (b, 0, 0, 0)),
            w_spec, b_spec, w_spec, b_spec,
        ],
        out_specs=pl.BlockSpec((1, H, W, C), lambda b: (b, 0, 0, 0)),
        compiler_params=pltpu.CompilerParams(
            dimension_semantics=("parallel",),
            vmem_limit_bytes=_vmem_limit_bytes()),
        cost_estimate=cost,
    )


def residual_block(x_nchw, w1, b1, w2, b2):
    """x_nchw: (N, C, H, W); w*: (C, C, 3, 3) PyTorch OIHW; b*: (C,)."""
    N, C, H, W = x_nchw.shape
    assert H >= 2 and W >= 2, "ReflectionPad2d(1) needs H, W >= 2"
    # Sublane-aligned W keeps the (H, W, 3*Cp) -> (H*W, 3*Cp) reshape and the
    # output store free of relayout copies / masked partial stores.
    # TODO(synk): support W % 8 != 0 via spatial padding with masked IN stats.
    assert W % 8 == 0, "W must be a multiple of 8 for this kernel"

    Cp = ((C + 127) // 128) * 128          # lane-dense channel count

    x = jnp.transpose(x_nchw, (0, 2, 3, 1)).astype(jnp.float32)   # NHWC
    if Cp != C:
        x = jnp.pad(x, ((0, 0), (0, 0), (0, 0), (0, Cp - C)))

    def prep_w(w):
        # OIHW -> (kh, kw, cin, cout), zero-pad channels, group rows by kh:
        # (3, 3*Cp, Cp) bf16 (MXU-native input, f32 accumulation in-kernel).
        wt = jnp.transpose(w, (2, 3, 1, 0))
        wt = jnp.pad(wt, ((0, 0), (0, 0), (0, Cp - C), (0, Cp - C)))
        return wt.reshape(3, 3 * Cp, Cp).astype(jnp.bfloat16)

    def prep_b(b):
        return jnp.pad(b, (0, Cp - C)).reshape(1, Cp).astype(jnp.float32)

    args = (x, prep_w(w1), prep_b(b1), prep_w(w2), prep_b(b2))

    out, last_err = None, None
    for single_buffer_consts in (True, False):
        try:
            out = _make_call(N, C, H, W, Cp, single_buffer_consts)(*args)
            break
        except Exception as e:   # pl.Buffered(1) unsupported -> default bufs
            last_err = e
    if out is None:
        raise last_err

    out = out.astype(x_nchw.dtype)
    return jnp.transpose(out, (0, 3, 1, 2))                  # back to NCHW


def residual_block_ref(x, w1, b1, w2, b2, conv_dtype=jnp.float32):
    """Pure-JAX reference matching the PyTorch module (NCHW).

    conv_dtype=bf16 mirrors the kernel's MXU input precision (f32 accumulation)
    for an apples-to-apples numerical comparison.
    """
    def conv(h, w, b):
        hp = jnp.pad(h, ((0, 0), (0, 0), (1, 1), (1, 1)), mode='reflect')
        y = jax.lax.conv_general_dilated(
            hp.astype(conv_dtype), w.astype(conv_dtype), (1, 1), 'VALID',
            dimension_numbers=('NCHW', 'OIHW', 'NCHW'),
            preferred_element_type=jnp.float32)
        return y + b[None, :, None, None]

    def inorm(y):
        m = jnp.mean(y, axis=(2, 3), keepdims=True)
        v = jnp.mean((y - m) ** 2, axis=(2, 3), keepdims=True)
        return (y - m) / jnp.sqrt(v + EPS)

    h = jnp.maximum(inorm(conv(x, w1, b1)), 0.0)
    return x + inorm(conv(h, w2, b2))


if __name__ == "__main__":
    N, C, H, W = 2, 4, 16, 16
    key = jax.random.PRNGKey(0)
    kx, kw1, kb1, kw2, kb2 = jax.random.split(key, 5)

    x = jax.random.normal(kx, (N, C, H, W), dtype=jnp.float32)
    w1 = jax.random.normal(kw1, (C, C, 3, 3), dtype=jnp.float32) * 0.1
    b1 = jax.random.normal(kb1, (C,), dtype=jnp.float32) * 0.1
    w2 = jax.random.normal(kw2, (C, C, 3, 3), dtype=jnp.float32) * 0.1
    b2 = jax.random.normal(kb2, (C,), dtype=jnp.float32) * 0.1

    out = jax.block_until_ready(residual_block(x, w1, b1, w2, b2))
    assert out.shape == (N, C, H, W)

    # Compare against a reference that uses the same bf16 MXU input precision.
    ref_bf16 = residual_block_ref(x, w1, b1, w2, b2, conv_dtype=jnp.bfloat16)
    assert jnp.allclose(out, ref_bf16, atol=1e-2, rtol=1e-2), \
        "mismatch vs bf16-precision reference"
    # Looser sanity check against the full-f32 reference.
    ref_f32 = residual_block_ref(x, w1, b1, w2, b2)
    assert jnp.allclose(out, ref_f32, atol=1e-1, rtol=1e-1), \
        "mismatch vs f32 reference"
    print("KERNEL_OK")
</pallas_src>

<mosaic_0001>
module attributes {stable_mosaic.version = 11 : i64} {
  func.func @residual_block_kernel(%arg0: i32, %arg1: memref<1x16x16x128xf32, #tpu.memory_space<vmem>>, %arg2: memref<3x384x128xbf16, #tpu.memory_space<vmem>>, %arg3: memref<1x128xf32, #tpu.memory_space<vmem>>, %arg4: memref<3x384x128xbf16, #tpu.memory_space<vmem>>, %arg5: memref<1x128xf32, #tpu.memory_space<vmem>>, %arg6: memref<1x16x16x4xf32, #tpu.memory_space<vmem>>) attributes {dimension_semantics = [#tpu.dimension_semantics<parallel>], iteration_bounds = array<i64: 2>, scalar_prefetch = 0 : i64, scratch_operands = 0 : i64, tpu.core_type = #tpu.core_type<tc>, window_params = [{transform_indices = @transform_0, window_bounds = array<i64: 1, 16, 16, 128>}, {pipeline_mode = #tpu.pipeline_mode<synchronous>, transform_indices = @transform_1, window_bounds = array<i64: 3, 384, 128>}, {pipeline_mode = #tpu.pipeline_mode<synchronous>, transform_indices = @transform_2, window_bounds = array<i64: 1, 128>}, {pipeline_mode = #tpu.pipeline_mode<synchronous>, transform_indices = @transform_3, window_bounds = array<i64: 3, 384, 128>}, {pipeline_mode = #tpu.pipeline_mode<synchronous>, transform_indices = @transform_4, window_bounds = array<i64: 1, 128>}, {transform_indices = @transform_5, window_bounds = array<i64: 1, 16, 16, 4>}]} {
    %c0 = arith.constant 0 : index
    %c0_0 = arith.constant 0 : index
    %c0_1 = arith.constant 0 : index
    %c0_2 = arith.constant 0 : index
    %0 = vector.load %arg1[%c0, %c0_0, %c0_1, %c0_2] : memref<1x16x16x128xf32, #tpu.memory_space<vmem>>, vector<1x16x16x128xf32>
    %1 = vector.shape_cast %0 : vector<1x16x16x128xf32> to vector<16x16x128xf32>
    %c0_3 = arith.constant 0 : index
    %c0_4 = arith.constant 0 : index
    %2 = vector.load %arg3[%c0_3, %c0_4] : memref<1x128xf32, #tpu.memory_space<vmem>>, vector<1x128xf32>
    %c0_5 = arith.constant 0 : index
    %c0_6 = arith.constant 0 : index
    %3 = vector.load %arg5[%c0_5, %c0_6] : memref<1x128xf32, #tpu.memory_space<vmem>>, vector<1x128xf32>
    %4 = arith.truncf %1 : vector<16x16x128xf32> to vector<16x16x128xbf16>
    %5 = vector.extract_strided_slice %4 {offsets = [0, 1, 0], sizes = [16, 1, 128], strides = [1, 1, 1]} : vector<16x16x128xbf16> to vector<16x1x128xbf16>
    %6 = vector.extract_strided_slice %4 {offsets = [0, 14, 0], sizes = [16, 1, 128], strides = [1, 1, 1]} : vector<16x16x128xbf16> to vector<16x1x128xbf16>
    %7 = tpu.concatenate %5, %4, %6 in 1 : vector<16x1x128xbf16>, vector<16x16x128xbf16>, vector<16x1x128xbf16> -> vector<16x18x128xbf16>
    %8 = vector.extract_strided_slice %7 {offsets = [1, 0, 0], sizes = [1, 18, 128], strides = [1, 1, 1]} : vector<16x18x128xbf16> to vector<1x18x128xbf16>
    %9 = vector.extract_strided_slice %7 {offsets = [14, 0, 0], sizes = [1, 18, 128], strides = [1, 1, 1]} : vector<16x18x128xbf16> to vector<1x18x128xbf16>
    %10 = tpu.concatenate %8, %7, %9 in 0 : vector<1x18x128xbf16>, vector<16x18x128xbf16>, vector<1x18x128xbf16> -> vector<18x18x128xbf16>
    %11 = vector.extract_strided_slice %10 {offsets = [0, 0, 0], sizes = [18, 16, 128], strides = [1, 1, 1]} : vector<18x18x128xbf16> to vector<18x16x128xbf16>
    %12 = vector.extract_strided_slice %10 {offsets = [0, 1, 0], sizes = [18, 16, 128], strides = [1, 1, 1]} : vector<18x18x128xbf16> to vector<18x16x128xbf16>
    %13 = vector.extract_strided_slice %10 {offsets = [0, 2, 0], sizes = [18, 16, 128], strides = [1, 1, 1]} : vector<18x18x128xbf16> to vector<18x16x128xbf16>
    %14 = tpu.concatenate %11, %12, %13 in 2 : vector<18x16x128xbf16>, vector<18x16x128xbf16>, vector<18x16x128xbf16> -> vector<18x16x384xbf16>
    %15 = vector.extract_strided_slice %14 {offsets = [0, 0, 0], sizes = [16, 16, 384], strides = [1, 1, 1]} : vector<18x16x384xbf16> to vector<16x16x384xbf16>
    %16 = vector.shape_cast %15 : vector<16x16x384xbf16> to vector<256x384xbf16>
    %c0_7 = arith.constant 0 : index
    %c0_8 = arith.constant 0 : index
    %c0_9 = arith.constant 0 : index
    %17 = vector.load %arg2[%c0_7, %c0_8, %c0_9] : memref<3x384x128xbf16, #tpu.memory_space<vmem>>, vector<1x384x128xbf16>
    %18 = vector.shape_cast %17 : vector<1x384x128xbf16> to vector<384x128xbf16>
    %cst = arith.constant dense<0.000000e+00> : vector<256x128xf32>
    %19 = tpu.matmul %16, %18, %cst {dimension_numbers = #tpu.dot_dimension_numbers<[1], [0], [0], [1], [0, 0, 1, 1], [], []>} : vector<256x384xbf16>, vector<384x128xbf16>, vector<256x128xf32> -> vector<256x128xf32>
    %20 = vector.extract_strided_slice %14 {offsets = [1, 0, 0], sizes = [16, 16, 384], strides = [1, 1, 1]} : vector<18x16x384xbf16> to vector<16x16x384xbf16>
    %21 = vector.shape_cast %20 : vector<16x16x384xbf16> to vector<256x384xbf16>
    %c1 = arith.constant 1 : index
    %c0_10 = arith.constant 0 : index
    %c0_11 = arith.constant 0 : index
    %22 = vector.load %arg2[%c1, %c0_10, %c0_11] : memref<3x384x128xbf16, #tpu.memory_space<vmem>>, vector<1x384x128xbf16>
    %23 = vector.shape_cast %22 : vector<1x384x128xbf16> to vector<384x128xbf16>
    %cst_12 = arith.constant dense<0.000000e+00> : vector<256x128xf32>
    %24 = tpu.matmul %21, %23, %cst_12 {dimension_numbers = #tpu.dot_dimension_numbers<[1], [0], [0], [1], [0, 0, 1, 1], [], []>} : vector<256x384xbf16>, vector<384x128xbf16>, vector<256x128xf32> -> vector<256x128xf32>
    %25 = arith.addf %19, %24 : vector<256x128xf32>
    %26 = vector.extract_strided_slice %14 {offsets = [2, 0, 0], sizes = [16, 16, 384], strides = [1, 1, 1]} : vector<18x16x384xbf16> to vector<16x16x384xbf16>
    %27 = vector.shape_cast %26 : vector<16x16x384xbf16> to vector<256x384xbf16>
    %c2 = arith.constant 2 : index
    %c0_13 = arith.constant 0 : index
    %c0_14 = arith.constant 0 : index
    %28 = vector.load %arg2[%c2, %c0_13, %c0_14] : memref<3x384x128xbf16, #tpu.memory_space<vmem>>, vector<1x384x128xbf16>
    %29 = vector.shape_cast %28 : vector<1x384x128xbf16> to vector<384x128xbf16>
    %cst_15 = arith.constant dense<0.000000e+00> : vector<256x128xf32>
    %30 = tpu.matmul %27, %29, %cst_15 {dimension_numbers = #tpu.dot_dimension_numbers<[1], [0], [0], [1], [0, 0, 1, 1], [], []>} : vector<256x384xbf16>, vector<384x128xbf16>, vector<256x128xf32> -> vector<256x128xf32>
    %31 = arith.addf %25, %30 : vector<256x128xf32>
    %32 = vector.broadcast %2 : vector<1x128xf32> to vector<256x128xf32>
    %33 = arith.addf %31, %32 : vector<256x128xf32>
    %cst_16 = arith.constant dense<0.000000e+00> : vector<128xf32>
    %34 = vector.multi_reduction <add>, %33, %cst_16 [0] : vector<256x128xf32> to vector<128xf32>
    %35 = vector.shape_cast %34 : vector<128xf32> to vector<1x128xf32>
    %cst_17 = arith.constant 3.906250e-03 : f32
    %36 = vector.broadcast %cst_17 : f32 to vector<1x128xf32>
    %37 = arith.mulf %35, %36 : vector<1x128xf32>
    %38 = vector.broadcast %37 : vector<1x128xf32> to vector<256x128xf32>
    %39 = arith.subf %33, %38 : vector<256x128xf32>
    %40 = arith.mulf %39, %39 : vector<256x128xf32>
    %cst_18 = arith.constant dense<0.000000e+00> : vector<128xf32>
    %41 = vector.multi_reduction <add>, %40, %cst_18 [0] : vector<256x128xf32> to vector<128xf32>
    %42 = vector.shape_cast %41 : vector<128xf32> to vector<1x128xf32>
    %cst_19 = arith.constant 3.906250e-03 : f32
    %43 = vector.broadcast %cst_19 : f32 to vector<1x128xf32>
    %44 = arith.mulf %42, %43 : vector<1x128xf32>
    %cst_20 = arith.constant 9.99999974E-6 : f32
    %45 = vector.broadcast %cst_20 : f32 to vector<1x128xf32>
    %46 = arith.addf %44, %45 : vector<1x128xf32>
    %47 = math.rsqrt %46 : vector<1x128xf32>
    %48 = vector.broadcast %47 : vector<1x128xf32> to vector<256x128xf32>
    %49 = arith.mulf %39, %48 : vector<256x128xf32>
    %cst_21 = arith.constant 0.000000e+00 : f32
    %50 = vector.broadcast %cst_21 : f32 to vector<256x128xf32>
    %51 = arith.maximumf %49, %50 : vector<256x128xf32>
    %52 = vector.shape_cast %51 : vector<256x128xf32> to vector<16x16x128xf32>
    %53 = arith.truncf %52 : vector<16x16x128xf32> to vector<16x16x128xbf16>
    %54 = vector.extract_strided_slice %53 {offsets = [0, 1, 0], sizes = [16, 1, 128], strides = [1, 1, 1]} : vector<16x16x128xbf16> to vector<16x1x128xbf16>
    %55 = vector.extract_strided_slice %53 {offsets = [0, 14, 0], sizes = [16, 1, 128], strides = [1, 1, 1]} : vector<16x16x128xbf16> to vector<16x1x128xbf16>
    %56 = tpu.concatenate %54, %53, %55 in 1 : vector<16x1x128xbf16>, vector<16x16x128xbf16>, vector<16x1x128xbf16> -> vector<16x18x128xbf16>
    %57 = vector.extract_strided_slice %56 {offsets = [1, 0, 0], sizes = [1, 18, 128], strides = [1, 1, 1]} : vector<16x18x128xbf16> to vector<1x18x128xbf16>
    %58 = vector.extract_strided_slice %56 {offsets = [14, 0, 0], sizes = [1, 18, 128], strides = [1, 1, 1]} : vector<16x18x128xbf16> to vector<1x18x128xbf16>
    %59 = tpu.concatenate %57, %56, %58 in 0 : vector<1x18x128xbf16>, vector<16x18x128xbf16>, vector<1x18x128xbf16> -> vector<18x18x128xbf16>
    %60 = vector.extract_strided_slice %59 {offsets = [0, 0, 0], sizes = [18, 16, 128], strides = [1, 1, 1]} : vector<18x18x128xbf16> to vector<18x16x128xbf16>
    %61 = vector.extract_strided_slice %59 {offsets = [0, 1, 0], sizes = [18, 16, 128], strides = [1, 1, 1]} : vector<18x18x128xbf16> to vector<18x16x128xbf16>
    %62 = vector.extract_strided_slice %59 {offsets = [0, 2, 0], sizes = [18, 16, 128], strides = [1, 1, 1]} : vector<18x18x128xbf16> to vector<18x16x128xbf16>
    %63 = tpu.concatenate %60, %61, %62 in 2 : vector<18x16x128xbf16>, vector<18x16x128xbf16>, vector<18x16x128xbf16> -> vector<18x16x384xbf16>
    %64 = vector.extract_strided_slice %63 {offsets = [0, 0, 0], sizes = [16, 16, 384], strides = [1, 1, 1]} : vector<18x16x384xbf16> to vector<16x16x384xbf16>
    %65 = vector.shape_cast %64 : vector<16x16x384xbf16> to vector<256x384xbf16>
    %c0_22 = arith.constant 0 : index
    %c0_23 = arith.constant 0 : index
    %c0_24 = arith.constant 0 : index
    %66 = vector.load %arg4[%c0_22, %c0_23, %c0_24] : memref<3x384x128xbf16, #tpu.memory_space<vmem>>, vector<1x384x128xbf16>
    %67 = vector.shape_cast %66 : vector<1x384x128xbf16> to vector<384x128xbf16>
    %cst_25 = arith.constant dense<0.000000e+00> : vector<256x128xf32>
    %68 = tpu.matmul %65, %67, %cst_25 {dimension_numbers = #tpu.dot_dimension_numbers<[1], [0], [0], [1], [0, 0, 1, 1], [], []>} : vector<256x384xbf16>, vector<384x128xbf16>, vector<256x128xf32> -> vector<256x128xf32>
    %69 = vector.extract_strided_slice %63 {offsets = [1, 0, 0], sizes = [16, 16, 384], strides = [1, 1, 1]} : vector<18x16x384xbf16> to vector<16x16x384xbf16>
    %70 = vector.shape_cast %69 : vector<16x16x384xbf16> to vector<256x384xbf16>
    %c1_26 = arith.constant 1 : index
    %c0_27 = arith.constant 0 : index
    %c0_28 = arith.constant 0 : index
    %71 = vector.load %arg4[%c1_26, %c0_27, %c0_28] : memref<3x384x128xbf16, #tpu.memory_space<vmem>>, vector<1x384x128xbf16>
    %72 = vector.shape_cast %71 : vector<1x384x128xbf16> to vector<384x128xbf16>
    %cst_29 = arith.constant dense<0.000000e+00> : vector<256x128xf32>
    %73 = tpu.matmul %70, %72, %cst_29 {dimension_numbers = #tpu.dot_dimension_numbers<[1], [0], [0], [1], [0, 0, 1, 1], [], []>} : vector<256x384xbf16>, vector<384x128xbf16>, vector<256x128xf32> -> vector<256x128xf32>
    %74 = arith.addf %68, %73 : vector<256x128xf32>
    %75 = vector.extract_strided_slice %63 {offsets = [2, 0, 0], sizes = [16, 16, 384], strides = [1, 1, 1]} : vector<18x16x384xbf16> to vector<16x16x384xbf16>
    %76 = vector.shape_cast %75 : vector<16x16x384xbf16> to vector<256x384xbf16>
    %c2_30 = arith.constant 2 : index
    %c0_31 = arith.constant 0 : index
    %c0_32 = arith.constant 0 : index
    %77 = vector.load %arg4[%c2_30, %c0_31, %c0_32] : memref<3x384x128xbf16, #tpu.memory_space<vmem>>, vector<1x384x128xbf16>
    %78 = vector.shape_cast %77 : vector<1x384x128xbf16> to vector<384x128xbf16>
    %cst_33 = arith.constant dense<0.000000e+00> : vector<256x128xf32>
    %79 = tpu.matmul %76, %78, %cst_33 {dimension_numbers = #tpu.dot_dimension_numbers<[1], [0], [0], [1], [0, 0, 1, 1], [], []>} : vector<256x384xbf16>, vector<384x128xbf16>, vector<256x128xf32> -> vector<256x128xf32>
    %80 = arith.addf %74, %79 : vector<256x128xf32>
    %81 = vector.broadcast %3 : vector<1x128xf32> to vector<256x128xf32>
    %82 = arith.addf %80, %81 : vector<256x128xf32>
    %cst_34 = arith.constant dense<0.000000e+00> : vector<128xf32>
    %83 = vector.multi_reduction <add>, %82, %cst_34 [0] : vector<256x128xf32> to vector<128xf32>
    %84 = vector.shape_cast %83 : vector<128xf32> to vector<1x128xf32>
    %cst_35 = arith.constant 3.906250e-03 : f32
    %85 = vector.broadcast %cst_35 : f32 to vector<1x128xf32>
    %86 = arith.mulf %84, %85 : vector<1x128xf32>
    %87 = vector.broadcast %86 : vector<1x128xf32> to vector<256x128xf32>
    %88 = arith.subf %82, %87 : vector<256x128xf32>
    %89 = arith.mulf %88, %88 : vector<256x128xf32>
    %cst_36 = arith.constant dense<0.000000e+00> : vector<128xf32>
    %90 = vector.multi_reduction <add>, %89, %cst_36 [0] : vector<256x128xf32> to vector<128xf32>
    %91 = vector.shape_cast %90 : vector<128xf32> to vector<1x128xf32>
    %cst_37 = arith.constant 3.906250e-03 : f32
    %92 = vector.broadcast %cst_37 : f32 to vector<1x128xf32>
    %93 = arith.mulf %91, %92 : vector<1x128xf32>
    %cst_38 = arith.constant 9.99999974E-6 : f32
    %94 = vector.broadcast %cst_38 : f32 to vector<1x128xf32>
    %95 = arith.addf %93, %94 : vector<1x128xf32>
    %96 = math.rsqrt %95 : vector<1x128xf32>
    %97 = vector.broadcast %96 : vector<1x128xf32> to vector<256x128xf32>
    %98 = arith.mulf %88, %97 : vector<256x128xf32>
    %99 = vector.shape_cast %1 : vector<16x16x128xf32> to vector<256x128xf32>
    %100 = arith.addf %99, %98 : vector<256x128xf32>
    %101 = vector.shape_cast %100 : vector<256x128xf32> to vector<16x16x128xf32>
    %102 = vector.extract_strided_slice %101 {offsets = [0, 0, 0], sizes = [16, 16, 4], strides = [1, 1, 1]} : vector<16x16x128xf32> to vector<16x16x4xf32>
    %c0_39 = arith.constant 0 : index
    %c0_40 = arith.constant 0 : index
    %c0_41 = arith.constant 0 : index
    %c0_42 = arith.constant 0 : index
    %103 = vector.load %arg6[%c0_39, %c0_40, %c0_41, %c0_42] : memref<1x16x16x4xf32, #tpu.memory_space<vmem>>, vector<1x16x16x4xf32>
    %104 = vector.shape_cast %103 : vector<1x16x16x4xf32> to vector<16x16x4xf32>
    %105 = vector.shape_cast %102 : vector<16x16x4xf32> to vector<1x16x16x4xf32>
    tpu.vector_store %arg6[%c0_39, %c0_40, %c0_41, %c0_42], %105 {strides = array<i32>} : memref<1x16x16x4xf32, #tpu.memory_space<vmem>>, vector<1x16x16x4xf32>,
    return
  }
  func.func @transform_0(%arg0: i32) -> (i32, i32, i32, i32) {
    %c0_i32 = arith.constant 0 : i32
    %c0_i32_0 = arith.constant 0 : i32
    %c0_i32_1 = arith.constant 0 : i32
    %c0_i32_2 = arith.constant 0 : i32
    return %arg0, %c0_i32, %c0_i32_0, %c0_i32_1 : i32, i32, i32, i32
  }
  func.func @transform_1(%arg0: i32) -> (i32, i32, i32) {
    %c0_i32 = arith.constant 0 : i32
    %c0_i32_0 = arith.constant 0 : i32
    %c0_i32_1 = arith.constant 0 : i32
    %c0_i32_2 = arith.constant 0 : i32
    return %c0_i32, %c0_i32_0, %c0_i32_1 : i32, i32, i32
  }
  func.func @transform_2(%arg0: i32) -> (i32, i32) {
    %c0_i32 = arith.constant 0 : i32
    %c0_i32_0 = arith.constant 0 : i32
    %c0_i32_1 = arith.constant 0 : i32
    return %c0_i32, %c0_i32_0 : i32, i32
  }
  func.func @transform_3(%arg0: i32) -> (i32, i32, i32) {
    %c0_i32 = arith.constant 0 : i32
    %c0_i32_0 = arith.constant 0 : i32
    %c0_i32_1 = arith.constant 0 : i32
    %c0_i32_2 = arith.constant 0 : i32
    return %c0_i32, %c0_i32_0, %c0_i32_1 : i32, i32, i32
  }
  func.func @transform_4(%arg0: i32) -> (i32, i32) {
    %c0_i32 = arith.constant 0 : i32
    %c0_i32_0 = arith.constant 0 : i32
    %c0_i32_1 = arith.constant 0 : i32
    return %c0_i32, %c0_i32_0 : i32, i32
  }
  func.func @transform_5(%arg0: i32) -> (i32, i32, i32, i32) {
    %c0_i32 = arith.constant 0 : i32
    %c0_i32_0 = arith.constant 0 : i32
    %c0_i32_1 = arith.constant 0 : i32
    %c0_i32_2 = arith.constant 0 : i32
    return %arg0, %c0_i32, %c0_i32_0, %c0_i32_1 : i32, i32, i32, i32
  }
}

module attributes {stable_mosaic.version = 11 : i64} {
  func.func @residual_block_kernel(%arg0: i32, %arg1: memref<1x16x16x128xf32, #tpu.memory_space<vmem>>, %arg2: memref<3x384x128xbf16, #tpu.memory_space<vmem>>, %arg3: memref<1x128xf32, #tpu.memory_space<vmem>>, %arg4: memref<3x384x128xbf16, #tpu.memory_space<vmem>>, %arg5: memref<1x128xf32, #tpu.memory_space<vmem>>, %arg6: memref<1x16x16x4xf32, #tpu.memory_space<vmem>>) attributes {dimension_semantics = [#tpu.dimension_semantics<parallel>], iteration_bounds = array<i64: 2>, scalar_prefetch = 0 : i64, scratch_operands = 0 : i64, tpu.core_type = #tpu.core_type<tc>, window_params = [{transform_indices = @transform_0, window_bounds = array<i64: 1, 16, 16, 128>}, {pipeline_mode = #tpu.pipeline_mode<synchronous>, transform_indices = @transform_1, window_bounds = array<i64: 3, 384, 128>}, {pipeline_mode = #tpu.pipeline_mode<synchronous>, transform_indices = @transform_2, window_bounds = array<i64: 1, 128>}, {pipeline_mode = #tpu.pipeline_mode<synchronous>, transform_indices = @transform_3, window_bounds = array<i64: 3, 384, 128>}, {pipeline_mode = #tpu.pipeline_mode<synchronous>, transform_indices = @transform_4, window_bounds = array<i64: 1, 128>}, {transform_indices = @transform_5, window_bounds = array<i64: 1, 16, 16, 4>}]} {
    %c0 = arith.constant 0 : index
    %c0_0 = arith.constant 0 : index
    %c0_1 = arith.constant 0 : index
    %c0_2 = arith.constant 0 : index
    %0 = vector.load %arg1[%c0, %c0_0, %c0_1, %c0_2] : memref<1x16x16x128xf32, #tpu.memory_space<vmem>>, vector<1x16x16x128xf32>
    %1 = vector.shape_cast %0 : vector<1x16x16x128xf32> to vector<16x16x128xf32>
    %c0_3 = arith.constant 0 : index
    %c0_4 = arith.constant 0 : index
    %2 = vector.load %arg3[%c0_3, %c0_4] : memref<1x128xf32, #tpu.memory_space<vmem>>, vector<1x128xf32>
    %c0_5 = arith.constant 0 : index
    %c0_6 = arith.constant 0 : index
    %3 = vector.load %arg5[%c0_5, %c0_6] : memref<1x128xf32, #tpu.memory_space<vmem>>, vector<1x128xf32>
    %4 = arith.truncf %1 : vector<16x16x128xf32> to vector<16x16x128xbf16>
    %5 = vector.extract_strided_slice %4 {offsets = [0, 1, 0], sizes = [16, 1, 128], strides = [1, 1, 1]} : vector<16x16x128xbf16> to vector<16x1x128xbf16>
    %6 = vector.extract_strided_slice %4 {offsets = [0, 14, 0], sizes = [16, 1, 128], strides = [1, 1, 1]} : vector<16x16x128xbf16> to vector<16x1x128xbf16>
    %7 = tpu.concatenate %5, %4, %6 in 1 : vector<16x1x128xbf16>, vector<16x16x128xbf16>, vector<16x1x128xbf16> -> vector<16x18x128xbf16>
    %8 = vector.extract_strided_slice %7 {offsets = [1, 0, 0], sizes = [1, 18, 128], strides = [1, 1, 1]} : vector<16x18x128xbf16> to vector<1x18x128xbf16>
    %9 = vector.extract_strided_slice %7 {offsets = [14, 0, 0], sizes = [1, 18, 128], strides = [1, 1, 1]} : vector<16x18x128xbf16> to vector<1x18x128xbf16>
    %10 = tpu.concatenate %8, %7, %9 in 0 : vector<1x18x128xbf16>, vector<16x18x128xbf16>, vector<1x18x128xbf16> -> vector<18x18x128xbf16>
    %11 = vector.extract_strided_slice %10 {offsets = [0, 0, 0], sizes = [18, 16, 128], strides = [1, 1, 1]} : vector<18x18x128xbf16> to vector<18x16x128xbf16>
    %12 = vector.extract_strided_slice %10 {offsets = [0, 1, 0], sizes = [18, 16, 128], strides = [1, 1, 1]} : vector<18x18x128xbf16> to vector<18x16x128xbf16>
    %13 = vector.extract_strided_slice %10 {offsets = [0, 2, 0], sizes = [18, 16, 128], strides = [1, 1, 1]} : vector<18x18x128xbf16> to vector<18x16x128xbf16>
    %14 = tpu.concatenate %11, %12, %13 in 2 : vector<18x16x128xbf16>, vector<18x16x128xbf16>, vector<18x16x128xbf16> -> vector<18x16x384xbf16>
    %15 = vector.extract_strided_slice %14 {offsets = [0, 0, 0], sizes = [16, 16, 384], strides = [1, 1, 1]} : vector<18x16x384xbf16> to vector<16x16x384xbf16>
    %16 = vector.shape_cast %15 : vector<16x16x384xbf16> to vector<256x384xbf16>
    %c0_7 = arith.constant 0 : index
    %c0_8 = arith.constant 0 : index
    %c0_9 = arith.constant 0 : index
    %17 = vector.load %arg2[%c0_7, %c0_8, %c0_9] : memref<3x384x128xbf16, #tpu.memory_space<vmem>>, vector<1x384x128xbf16>
    %18 = vector.shape_cast %17 : vector<1x384x128xbf16> to vector<384x128xbf16>
    %cst = arith.constant dense<0.000000e+00> : vector<256x128xf32>
    %19 = tpu.matmul %16, %18, %cst {dimension_numbers = #tpu.dot_dimension_numbers<[1], [0], [0], [1], [0, 0, 1, 1], [], []>} : vector<256x384xbf16>, vector<384x128xbf16>, vector<256x128xf32> -> vector<256x128xf32>
    %20 = vector.extract_strided_slice %14 {offsets = [1, 0, 0], sizes = [16, 16, 384], strides = [1, 1, 1]} : vector<18x16x384xbf16> to vector<16x16x384xbf16>
    %21 = vector.shape_cast %20 : vector<16x16x384xbf16> to vector<256x384xbf16>
    %c1 = arith.constant 1 : index
    %c0_10 = arith.constant 0 : index
    %c0_11 = arith.constant 0 : index
    %22 = vector.load %arg2[%c1, %c0_10, %c0_11] : memref<3x384x128xbf16, #tpu.memory_space<vmem>>, vector<1x384x128xbf16>
    %23 = vector.shape_cast %22 : vector<1x384x128xbf16> to vector<384x128xbf16>
    %cst_12 = arith.constant dense<0.000000e+00> : vector<256x128xf32>
    %24 = tpu.matmul %21, %23, %cst_12 {dimension_numbers = #tpu.dot_dimension_numbers<[1], [0], [0], [1], [0, 0, 1, 1], [], []>} : vector<256x384xbf16>, vector<384x128xbf16>, vector<256x128xf32> -> vector<256x128xf32>
    %25 = arith.addf %19, %24 : vector<256x128xf32>
    %26 = vector.extract_strided_slice %14 {offsets = [2, 0, 0], sizes = [16, 16, 384], strides = [1, 1, 1]} : vector<18x16x384xbf16> to vector<16x16x384xbf16>
    %27 = vector.shape_cast %26 : vector<16x16x384xbf16> to vector<256x384xbf16>
    %c2 = arith.constant 2 : index
    %c0_13 = arith.constant 0 : index
    %c0_14 = arith.constant 0 : index
    %28 = vector.load %arg2[%c2, %c0_13, %c0_14] : memref<3x384x128xbf16, #tpu.memory_space<vmem>>, vector<1x384x128xbf16>
    %29 = vector.shape_cast %28 : vector<1x384x128xbf16> to vector<384x128xbf16>
    %cst_15 = arith.constant dense<0.000000e+00> : vector<256x128xf32>
    %30 = tpu.matmul %27, %29, %cst_15 {dimension_numbers = #tpu.dot_dimension_numbers<[1], [0], [0], [1], [0, 0, 1, 1], [], []>} : vector<256x384xbf16>, vector<384x128xbf16>, vector<256x128xf32> -> vector<256x128xf32>
    %31 = arith.addf %25, %30 : vector<256x128xf32>
    %32 = vector.broadcast %2 : vector<1x128xf32> to vector<256x128xf32>
    %33 = arith.addf %31, %32 : vector<256x128xf32>
    %cst_16 = arith.constant dense<0.000000e+00> : vector<128xf32>
    %34 = vector.multi_reduction <add>, %33, %cst_16 [0] : vector<256x128xf32> to vector<128xf32>
    %35 = vector.shape_cast %34 : vector<128xf32> to vector<1x128xf32>
    %cst_17 = arith.constant 3.906250e-03 : f32
    %36 = vector.broadcast %cst_17 : f32 to vector<1x128xf32>
    %37 = arith.mulf %35, %36 : vector<1x128xf32>
    %38 = vector.broadcast %37 : vector<1x128xf32> to vector<256x128xf32>
    %39 = arith.subf %33, %38 : vector<256x128xf32>
    %40 = arith.mulf %39, %39 : vector<256x128xf32>
    %cst_18 = arith.constant dense<0.000000e+00> : vector<128xf32>
    %41 = vector.multi_reduction <add>, %40, %cst_18 [0] : vector<256x128xf32> to vector<128xf32>
    %42 = vector.shape_cast %41 : vector<128xf32> to vector<1x128xf32>
    %cst_19 = arith.constant 3.906250e-03 : f32
    %43 = vector.broadcast %cst_19 : f32 to vector<1x128xf32>
    %44 = arith.mulf %42, %43 : vector<1x128xf32>
    %cst_20 = arith.constant 9.99999974E-6 : f32
    %45 = vector.broadcast %cst_20 : f32 to vector<1x128xf32>
    %46 = arith.addf %44, %45 : vector<1x128xf32>
    %47 = math.rsqrt %46 : vector<1x128xf32>
    %48 = vector.broadcast %47 : vector<1x128xf32> to vector<256x128xf32>
    %49 = arith.mulf %39, %48 : vector<256x128xf32>
    %cst_21 = arith.constant 0.000000e+00 : f32
    %50 = vector.broadcast %cst_21 : f32 to vector<256x128xf32>
    %51 = arith.maximumf %49, %50 : vector<256x128xf32>
    %52 = vector.shape_cast %51 : vector<256x128xf32> to vector<16x16x128xf32>
    %53 = arith.truncf %52 : vector<16x16x128xf32> to vector<16x16x128xbf16>
    %54 = vector.extract_strided_slice %53 {offsets = [0, 1, 0], sizes = [16, 1, 128], strides = [1, 1, 1]} : vector<16x16x128xbf16> to vector<16x1x128xbf16>
    %55 = vector.extract_strided_slice %53 {offsets = [0, 14, 0], sizes = [16, 1, 128], strides = [1, 1, 1]} : vector<16x16x128xbf16> to vector<16x1x128xbf16>
    %56 = tpu.concatenate %54, %53, %55 in 1 : vector<16x1x128xbf16>, vector<16x16x128xbf16>, vector<16x1x128xbf16> -> vector<16x18x128xbf16>
    %57 = vector.extract_strided_slice %56 {offsets = [1, 0, 0], sizes = [1, 18, 128], strides = [1, 1, 1]} : vector<16x18x128xbf16> to vector<1x18x128xbf16>
    %58 = vector.extract_strided_slice %56 {offsets = [14, 0, 0], sizes = [1, 18, 128], strides = [1, 1, 1]} : vector<16x18x128xbf16> to vector<1x18x128xbf16>
    %59 = tpu.concatenate %57, %56, %58 in 0 : vector<1x18x128xbf16>, vector<16x18x128xbf16>, vector<1x18x128xbf16> -> vector<18x18x128xbf16>
    %60 = vector.extract_strided_slice %59 {offsets = [0, 0, 0], sizes = [18, 16, 128], strides = [1, 1, 1]} : vector<18x18x128xbf16> to vector<18x16x128xbf16>
    %61 = vector.extract_strided_slice %59 {offsets = [0, 1, 0], sizes = [18, 16, 128], strides = [1, 1, 1]} : vector<18x18x128xbf16> to vector<18x16x128xbf16>
    %62 = vector.extract_strided_slice %59 {offsets = [0, 2, 0], sizes = [18, 16, 128], strides = [1, 1, 1]} : vector<18x18x128xbf16> to vector<18x16x128xbf16>
    %63 = tpu.concatenate %60, %61, %62 in 2 : vector<18x16x128xbf16>, vector<18x16x128xbf16>, vector<18x16x128xbf16> -> vector<18x16x384xbf16>
    %64 = vector.extract_strided_slice %63 {offsets = [0, 0, 0], sizes = [16, 16, 384], strides = [1, 1, 1]} : vector<18x16x384xbf16> to vector<16x16x384xbf16>
    %65 = vector.shape_cast %64 : vector<16x16x384xbf16> to vector<256x384xbf16>
    %c0_22 = arith.constant 0 : index
    %c0_23 = arith.constant 0 : index
    %c0_24 = arith.constant 0 : index
    %66 = vector.load %arg4[%c0_22, %c0_23, %c0_24] : memref<3x384x128xbf16, #tpu.memory_space<vmem>>, vector<1x384x128xbf16>
    %67 = vector.shape_cast %66 : vector<1x384x128xbf16> to vector<384x128xbf16>
    %cst_25 = arith.constant dense<0.000000e+00> : vector<256x128xf32>
    %68 = tpu.matmul %65, %67, %cst_25 {dimension_numbers = #tpu.dot_dimension_numbers<[1], [0], [0], [1], [0, 0, 1, 1], [], []>} : vector<256x384xbf16>, vector<384x128xbf16>, vector<256x128xf32> -> vector<256x128xf32>
    %69 = vector.extract_strided_slice %63 {offsets = [1, 0, 0], sizes = [16, 16, 384], strides = [1, 1, 1]} : vector<18x16x384xbf16> to vector<16x16x384xbf16>
    %70 = vector.shape_cast %69 : vector<16x16x384xbf16> to vector<256x384xbf16>
    %c1_26 = arith.constant 1 : index
    %c0_27 = arith.constant 0 : index
    %c0_28 = arith.constant 0 : index
    %71 = vector.load %arg4[%c1_26, %c0_27, %c0_28] : memref<3x384x128xbf16, #tpu.memory_space<vmem>>, vector<1x384x128xbf16>
    %72 = vector.shape_cast %71 : vector<1x384x128xbf16> to vector<384x128xbf16>
    %cst_29 = arith.constant dense<0.000000e+00> : vector<256x128xf32>
    %73 = tpu.matmul %70, %72, %cst_29 {dimension_numbers = #tpu.dot_dimension_numbers<[1], [0], [0], [1], [0, 0, 1, 1], [], []>} : vector<256x384xbf16>, vector<384x128xbf16>, vector<256x128xf32> -> vector<256x128xf32>
    %74 = arith.addf %68, %73 : vector<256x128xf32>
    %75 = vector.extract_strided_slice %63 {offsets = [2, 0, 0], sizes = [16, 16, 384], strides = [1, 1, 1]} : vector<18x16x384xbf16> to vector<16x16x384xbf16>
    %76 = vector.shape_cast %75 : vector<16x16x384xbf16> to vector<256x384xbf16>
    %c2_30 = arith.constant 2 : index
    %c0_31 = arith.constant 0 : index
    %c0_32 = arith.constant 0 : index
    %77 = vector.load %arg4[%c2_30, %c0_31, %c0_32] : memref<3x384x128xbf16, #tpu.memory_space<vmem>>, vector<1x384x128xbf16>
    %78 = vector.shape_cast %77 : vector<1x384x128xbf16> to vector<384x128xbf16>
    %cst_33 = arith.constant dense<0.000000e+00> : vector<256x128xf32>
    %79 = tpu.matmul %76, %78, %cst_33 {dimension_numbers = #tpu.dot_dimension_numbers<[1], [0], [0], [1], [0, 0, 1, 1], [], []>} : vector<256x384xbf16>, vector<384x128xbf16>, vector<256x128xf32> -> vector<256x128xf32>
    %80 = arith.addf %74, %79 : vector<256x128xf32>
    %81 = vector.broadcast %3 : vector<1x128xf32> to vector<256x128xf32>
    %82 = arith.addf %80, %81 : vector<256x128xf32>
    %cst_34 = arith.constant dense<0.000000e+00> : vector<128xf32>
    %83 = vector.multi_reduction <add>, %82, %cst_34 [0] : vector<256x128xf32> to vector<128xf32>
    %84 = vector.shape_cast %83 : vector<128xf32> to vector<1x128xf32>
    %cst_35 = arith.constant 3.906250e-03 : f32
    %85 = vector.broadcast %cst_35 : f32 to vector<1x128xf32>
    %86 = arith.mulf %84, %85 : vector<1x128xf32>
    %87 = vector.broadcast %86 : vector<1x128xf32> to vector<256x128xf32>
    %88 = arith.subf %82, %87 : vector<256x128xf32>
    %89 = arith.mulf %88, %88 : vector<256x128xf32>
    %cst_36 = arith.constant dense<0.000000e+00> : vector<128xf32>
    %90 = vector.multi_reduction <add>, %89, %cst_36 [0] : vector<256x128xf32> to vector<128xf32>
    %91 = vector.shape_cast %90 : vector<128xf32> to vector<1x128xf32>
    %cst_37 = arith.constant 3.906250e-03 : f32
    %92 = vector.broadcast %cst_37 : f32 to vector<1x128xf32>
    %93 = arith.mulf %91, %92 : vector<1x128xf32>
    %cst_38 = arith.constant 9.99999974E-6 : f32
    %94 = vector.broadcast %cst_38 : f32 to vector<1x128xf32>
    %95 = arith.addf %93, %94 : vector<1x128xf32>
    %96 = math.rsqrt %95 : vector<1x128xf32>
    %97 = vector.broadcast %96 : vector<1x128xf32> to vector<256x128xf32>
    %98 = arith.mulf %88, %97 : vector<256x128xf32>
    %99 = vector.shape_cast %1 : vector<16x16x128xf32> to vector<256x128xf32>
    %100 = arith.addf %99, %98 : vector<256x128xf32>
    %101 = vector.shape_cast %100 : vector<256x128xf32> to vector<16x16x128xf32>
    %102 = vector.extract_strided_slice %101 {offsets = [0, 0, 0], sizes = [16, 16, 4], strides = [1, 1, 1]} : vector<16x16x128xf32> to vector<16x16x4xf32>
    %c0_39 = arith.constant 0 : index
    %c0_40 = arith.constant 0 : index
    %c0_41 = arith.constant 0 : index
    %c0_42 = arith.constant 0 : index
    %103 = vector.load %arg6[%c0_39, %c0_40, %c0_41, %c0_42] : memref<1x16x16x4xf32, #tpu.memory_space<vmem>>, vector<1x16x16x4xf32>
    %104 = vector.shape_cast %103 : vector<1x16x16x4xf32> to vector<16x16x4xf32>
    %105 = vector.shape_cast %102 : vector<16x16x4xf32> to vector<1x16x16x4xf32>
    tpu.vector_store %arg6[%c0_39, %c0_40, %c0_41, %c0_42], %105 {strides = array<i32>} : memref<1x16x16x4xf32, #tpu.memory_space<vmem>>, vector<1x16x16x4xf32>,
    return
  }
  func.func @transform_0(%arg0: i32) -> (i32, i32, i32, i32) {
    %c0_i32 = arith.constant 0 : i32
    %c0_i32_0 = arith.constant 0 : i32
    %c0_i32_1 = arith.constant 0 : i32
    %c0_i32_2 = arith.constant 0 : i32
    return %arg0, %c0_i32, %c0_i32_0, %c0_i32_1 : i32, i32, i32, i32
  }
  func.func @transform_1(%arg0: i32) -> (i32, i32, i32) {
    %c0_i32 = arith.constant 0 : i32
    %c0_i32_0 = arith.constant 0 : i32
    %c0_i32_1 = arith.constant 0 : i32
    %c0_i32_2 = arith.constant 0 : i32
    return %c0_i32, %c0_i32_0, %c0_i32_1 : i32, i32, i32
  }
  func.func @transform_2(%arg0: i32) -> (i32, i32) {
    %c0_i32 = arith.constant 0 : i32
    %c0_i32_0 = arith.constant 0 : i32
    %c0_i32_1 = arith.constant 0 : i32
    return %c0_i32, %c0_i32_0 : i32, i32
  }
  func.func @transform_3(%arg0: i32) -> (i32, i32, i32) {
    %c0_i32 = arith.constant 0 : i32
    %c0_i32_0 = arith.constant 0 : i32
    %c0_i32_1 = arith.constant 0 : i32
    %c0_i32_2 = arith.constant 0 : i32
    return %c0_i32, %c0_i32_0, %c0_i32_1 : i32, i32, i32
  }
  func.func @transform_4(%arg0: i32) -> (i32, i32) {
    %c0_i32 = arith.constant 0 : i32
    %c0_i32_0 = arith.constant 0 : i32
    %c0_i32_1 = arith.constant 0 : i32
    return %c0_i32, %c0_i32_0 : i32, i32
  }
  func.func @transform_5(%arg0: i32) -> (i32, i32, i32, i32) {
    %c0_i32 = arith.constant 0 : i32
    %c0_i32_0 = arith.constant 0 : i32
    %c0_i32_1 = arith.constant 0 : i32
    %c0_i32_2 = arith.constant 0 : i32
    return %arg0, %c0_i32, %c0_i32_0, %c0_i32_1 : i32, i32, i32, i32
  }
}

</mosaic_0001>

<bundles_post_ra>
// kernel: tpu_custom_call.1
= control target key start
LH: loop header
LB: loop body
LE: loop exit
PB: predicated region body
PF: predicated region fallthrough
CT: control target
= control target key end

     0   :  { %10 = vsyncpa [#allocation3], 0  ;;  %s9784_s0 = inlined_call_operand.hbm [shape: f32[2,16,16,128], index: 0, kind: input, shape index: {}]   ;;  %s9785_s1 = inlined_call_operand.hbm [shape: bf16[3,384,128], index: 1, kind: input, shape index: {}]   ;;  %s9786_s2 = inlined_call_operand.vmem [shape: f32[1,128], index: 2, kind: input, shape index: {}]   ;;  %s9787_s3 = inlined_call_operand.hbm [shape: bf16[3,384,128], index: 3, kind: input, shape index: {}]   ;;  %s9788_s4 = inlined_call_operand.vmem [shape: f32[1,128], index: 4, kind: input, shape index: {}]   ;;  %s9789_s5 = inlined_call_operand.vmem [shape: f32[2,16,16,4], index: 5, kind: output, shape index: {}]  }
   0x1   :  { %12 = vsyncpa [#allocation3 + $0x1], 0 }
   0x2   :  { %13 = vsyncpa [#allocation5], 0  ;;  %s7156_s18 = smov 0   ;;  %s7158_s19 = smov 0  }
   0x3   :  { %s7160_s20 = smov 0   ;;  %s7162_s21 = smov 0  }
   0x4 LB: > { %s7175_s22 = sadd.s32 4294967295, %s7117_s21   ;;  %p39_p0 = scmp.ne.s32.totalorder %s7109_s19, %s7105_s18  ;;  %s7117_s21 = sphi %s7162_s21, %s9860_s21   ;;  %s7113_s20 = sphi %s7160_s20, %s9859_s20   ;;  %s7109_s19 = sphi %s7158_s19, %s9858_s19   ;;  %s7105_s18 = sphi %s7156_s18, %s9857_s18  }
   0x5   : > { %p9790_p1 = scmp.eq.s32.totalorder %s7175_s22, 0  ;;  %p5162_p2 = scmp.ge.s32.totalorder %s7117_s21, 1 }
   0x6   : > { %p160_p3 = scmp.lt.s32.totalorder %s7117_s21, 3  ;;  %s7119_s25 = smov [#allocation4]  }
   0x7   : > { %p7183_p4 = por %p9790_p1, %p39_p0  ;;  %s172_s26 = sshll.u32 %s7119_s25, 4  ;;  %s173_s26 = int_to_ptr.vmem [resolvable:$true] %s172_s26 }
   0x8   : > { %p7187_p5 = pnand %p5162_p2, %p160_p3  ;;  %s7120_s28 = smov [#allocation6]  }
   0x9   : > { %s9801_s23 = scalar_select %p7183_p4, 1, 0 }
   0xa   : > { %s9802_s24 = scalar_select %p7187_p5, 1, 0 }
   0xb   : > { %p6759_p6 = pneg %p7187_p5  ;;  %s188_s29 = sshll.u32 %s7120_s28, 4  ;;  %s7199_s29 = int_to_ptr.vmem [resolvable:$true] %s188_s29 }
   0xc   : > { %s6993_s7 = scalar_lea.hbm %s9785_s1, 9216 }
   0xd   : > { %p7195_p7 = pnand %p6759_p6, %p9790_p1  ;;  %p6994_p8 = scmp.ne.s32.totalorder %s9785_s1, %s6993_s7 }
   0xe   : > { %p7000_p12 = scmp.lt.u32.totalorder %s6993_s7, %s9785_s1 }
   0xf   : > { %p6995_p9 = pneg %p7195_p7 }
  0x11   : > { %p6996_p10 = pnand %p6995_p9, %p6994_p8 }
  0x13   : > { %p6997_p11 = pneg %p6996_p10 }
  0x15   : > { %p7002_p13 = pnand %p7000_p12, %p6997_p11 }
  0x17   : > { %7005 = shalt.err (!%p7002_p13)
}
  0x18   : > { %s7006_s12 = scalar_lea.vmem %s173_s26, 9216  ;;  %p7014_p6 = scmp.lt.s32.totalorder %s173_s26, %s173_s26 }
  0x19   : > { %p7007_p0 = scmp.ne.s32.totalorder %s173_s26, %s7006_s12  ;;  %p7015_p1 = scmp.lt.s32.totalorder %s7006_s12, %s7006_s12 }
  0x1b   : > { %p7009_p2 = pnand %p7007_p0, %p6995_p9  ;;  %p7016_p4 = por %p7015_p1, %p7014_p6 }
  0x1d   : > { %p7010_p3 = pneg %p7009_p2 }
  0x1f   : > { %p7017_p5 = pnand %p7016_p4, %p7010_p3 }
  0x21   : > { %7020 = shalt.err (!%p7017_p5)
}
  0x22   : > { %s7121_s13 = smov 64   ;;  %s7122_s14 = smov 4  }
  0x23   : > { %6762 = dma.hbm_to_vmem [thread:$0]  (!%p7195_p7), %s9785_s1, 9216, %s173_s26, [#allocation5], %s7121_s13, %s7121_s13, %s7122_s14  }
  0x24   : > { %s7021_s25 = scalar_lea.hbm %s9787_s3, 9216 }
  0x25   : > { %p7022_p8 = scmp.ne.s32.totalorder %s9787_s3, %s7021_s25  ;;  %p7028_p5 = scmp.lt.u32.totalorder %s7021_s25, %s9787_s3 }
  0x27   : > { %p7024_p1 = pnand %p7022_p8, %p6995_p9 }
  0x29   : > { %p7025_p4 = pneg %p7024_p1 }
  0x2b   : > { %p7030_p10 = pnand %p7028_p5, %p7025_p4 }
  0x2d   : > { %7033 = shalt.err (!%p7030_p10)
}
  0x2e   : > { %s7034_s26 = scalar_lea.vmem %s7199_s29, 9216  ;;  %p7042_p0 = scmp.lt.s32.totalorder %s7199_s29, %s7199_s29 }
  0x2f   : > { %p7035_p11 = scmp.ne.s32.totalorder %s7199_s29, %s7034_s26  ;;  %p7043_p2 = scmp.lt.s32.totalorder %s7034_s26, %s7034_s26 }
  0x31   : > { %p7037_p12 = pnand %p7035_p11, %p6995_p9  ;;  %p7044_p3 = por %p7043_p2, %p7042_p0 }
  0x33   : > { %p7038_p13 = pneg %p7037_p12 }
  0x35   : > { %p7045_p6 = pnand %p7044_p3, %p7038_p13 }
  0x37   : > { %7048 = shalt.err (!%p7045_p6)
}
  0x38   : > { %6765 = dma.hbm_to_vmem [thread:$0]  (!%p7195_p7), %s9787_s3, 9216, %s7199_s29, [#allocation5], %s7121_s13, %s7121_s13, %s7122_s14  }
  0x39   : > { %s7249_s10 = sadd.s32 1, %s7117_s21   ;;  %s26_s11 = sadd.s32 1, %s7113_s20 }
  0x3a   : > { %s23_s27 = ssub.s32 %s7117_s21, %s7249_s10  ;;  %p33_p9 = scmp.ne.s32.totalorder %s7113_s20, %s7109_s19 }
  0x3b   : > { %p24_p8 = scmp.eq.s32.totalorder %s23_s27, 0  ;;  %p34_p1 = scmp.eq.s32.totalorder %s7117_s21, 0 }
  0x3c   : > { %p6772_p4 = scmp.lt.s32.totalorder %s7117_s21, 2  ;;  %s205_s12 = sand.u32 1, %s7113_s20  }
  0x3d   : > { %s7260_s15 = scalar_select %p24_p8, %s7113_s20, %s26_s11  }
  0x3e   : > { %p35_p5 = por %p34_p1, %p33_p9  ;;  %s5166_s16 = sshll.u32 %s205_s12, 8 }
  0x3f   : > { %s5323_s17 = sshll.u32 %s7117_s21, 12  ;;  %s209_s29 = scalar_lea.vmem [#allocation2], %s5166_s16 }
  0x40   : > { %s7266_s28 = scalar_lea.hbm %s9784_s0, %s5323_s17  ;;  %s216_s13 = sshll.u32 %s209_s29, 4  ;;  %s7272_s13 = int_to_ptr.vmem [resolvable:$true] %s216_s13 }
  0x41   : > { %p7268_p7 = pnand %p6772_p4, %p35_p5  ;;  %s7274_s21 = scalar_lea.sflag [#allocation3], %s205_s12 }
  0x42   : > { %s7049_s30 = scalar_lea.hbm %s7266_s28, 4096  ;;  %s7054_s26 = scalar_lea.hbm %s9784_s0, 8192 }
  0x43   : > { %p7050_p10 = scmp.ne.s32.totalorder %s7266_s28, %s7049_s30  ;;  %p7051_p11 = pneg %p7268_p7 }
  0x44   : > { %p7055_p0 = scmp.lt.u32.totalorder %s7266_s28, %s9784_s0  ;;  %p7056_p2 = scmp.lt.u32.totalorder %s7054_s26, %s7049_s30 }
  0x45   : > { %p7052_p12 = pnand %p7051_p11, %p7050_p10  ;;  %p7058_p6 = scmp.lt.u32.totalorder %s7049_s30, %s7266_s28 }
  0x46   : > { %p7057_p3 = por %p7056_p2, %p7055_p0 }
  0x47   : > { %p7053_p13 = pneg %p7052_p12 }
  0x48   : > { %p7059_p9 = por %p7058_p6, %p7057_p3 }
  0x4a   : > { %p7060_p8 = pnand %p7059_p9, %p7053_p13 }
  0x4c   : > { %7063 = shalt.err (!%p7060_p8)
}
  0x4d   : > { %s7064_s11 = scalar_lea.vmem %s7272_s13, 4096  ;;  %s7123_s27 = smov [#allocation2]  }
  0x4e   : > { %p7065_p1 = scmp.ne.s32.totalorder %s7272_s13, %s7064_s11  ;;  %s7069_s12 = sshll.u32 %s7123_s27, 4  ;;  %s7070_s12 = int_to_ptr.vmem [resolvable:$false] %s7069_s12 }
  0x4f   : > { %s7071_s16 = scalar_lea.vmem %s7070_s12, 8192  ;;  %p7072_p10 = scmp.lt.s32.totalorder %s7272_s13, %s7070_s12 }
  0x50   : > { %p7067_p4 = pnand %p7065_p1, %p7051_p11  ;;  %p7073_p12 = scmp.lt.s32.totalorder %s7071_s16, %s7064_s11 }
  0x52   : > { %p7068_p5 = pneg %p7067_p4  ;;  %p7074_p0 = por %p7073_p12, %p7072_p10 }
  0x54   : > { %p7075_p2 = pnand %p7074_p0, %p7068_p5 }
  0x56   : > { %7078 = shalt.err (!%p7075_p2)
}
  0x57   : > { %s7124_s17 = smov 128   ;;  %s7125_s18 = smov 8  }
  0x58   : > { %6769 = dma.hbm_to_vmem [thread:$0]  (!%p7268_p7), %s7266_s28, 4096, %s7272_s13, %s7274_s21, %s7124_s17, %s7124_s17, %s7125_s18  }
  0x59   : > { %p9805_p11 = scmp.ne.s32.totalorder %s9802_s24, 0 }
  0x5b   : > { %228 = sbr.rel (%p9805_p11) target bundleno = 1490 (0x5d2), region = 40 }
  0x62   : > { %s230_s25 = sand.u32 1, %s7109_s19   ;;  %p9806_p13 = scmp.ne.s32.totalorder %s9801_s23, 0 }
  0x63   : > { %s5170_s29 = sshll.u32 %s230_s25, 8  ;;  %s231_s30 = scalar_lea.sflag [#allocation3], %s230_s25 }
  0x64   : > { %s7305_s6 = scalar_lea.vmem [#allocation2], %s5170_s29 }
  0x65   : > { %7096 = dma.done.wait (%p9806_p13), %s231_s30, 4096  }
  0x66   : > { %7098 = vsyncadd (%p9806_p13), %s231_s30, 4294963200  ;;  %p9807_p3 = scmp.eq.s32.totalorder %s7175_s22, 0 }
  0x68   : > { %7100 = dma.done.wait (%p9807_p3), [#allocation5], 18432   ;;  %p9808_p7 = pmov %p9807_p3 }
  0x69   : > { %v6813_v0 = vld [vmem:[#allocation4 + $0x100] sm:$0xff]   ;;  %v6817_v4 = vld [vmem:[#allocation4 + $0x108] sm:$0xff]   ;;  %v6821_v8 = vld [vmem:[#allocation4 + $0x110] sm:$0xff]   ;;  %vm517_vm0 = vcmask 1040384   ;;  %vm518_vm1 = vsmask.f32 256 }
  0x6a   : > { %7102 = vsyncadd (%p9808_p7), [#allocation5], 4294948864  ;;  %v6814_v1 = vld [vmem:[#allocation4 + $0x40] sm:$0xff]   ;;  %5325 = vmatprep.subr.bf16.mxu0 %v6813_v0  ;;  %v6818_v5 = vld [vmem:[#allocation4 + $0x48] sm:$0xff]   ;;  %v9809_v54 = vmov 0  ;;  %vm793_vm4 = vcmask 1046528  }
  0x6b   : > { %v6815_v2 = vld [vmem:[#allocation4 + $0xc0] sm:$0xff]   ;;  %5461 = vmatprep.subr.bf16.mxu1 %v6814_v1  ;;  %v6819_v6 = vld [vmem:[#allocation4 + $0xc8] sm:$0xff]   ;;  %v6822_v9 = vld [vmem:[#allocation4 + $0x50] sm:$0xff]   ;;  %vm552_vm3 = vsmask.f32 7424  ;;  %p269_p6 = scmp.lt.s32.totalorder %s7175_s22, 1 }
  0x6c   : > { %v6816_v3 = vld [vmem:[#allocation4] sm:$0xff]   ;;  %5326 = vmatpush3.bf16.msra.mxu0 %v6815_v2  ;;  %v6820_v7 = vld [vmem:[#allocation4 + $0x8] sm:$0xff]   ;;  %v6823_v10 = vld [vmem:[#allocation4 + $0xd0] sm:$0xff]   ;;  %vm5042_vm5 = vcmask 31744  }
  0x6d   : > { %5462 = vmatpush3.bf16.msra.mxu1 %v6816_v3  ;;  %5327 = vmatprep.subr.bf16.mxu0 %v6817_v4  ;;  %v6824_v11 = vld [vmem:[#allocation4 + $0x10] sm:$0xff]   ;;  %v6825_v12 = vld [vmem:[#allocation4 + $0x118] sm:$0xff]   ;;  %v6829_v16 = vld [vmem:[#allocation4 + $0x120] sm:$0xff]   ;;  %s9862_s22 = smov (!%p269_p6, %s7175_s22), 1 }
  0x6e   : > { %5463 = vmatprep.subr.bf16.mxu1 %v6818_v5  ;;  %v6826_v13 = vld [vmem:[#allocation4 + $0x58] sm:$0xff]   ;;  %v6830_v17 = vld [vmem:[#allocation4 + $0x60] sm:$0xff]   ;;  %v6833_v20 = vld [vmem:[#allocation4 + $0x128] sm:$0xff]   ;;  %s5324_s14 = sshll.u32 %s9862_s22, 8 }
  0x6f   : > { %v6827_v14 = vld [vmem:[#allocation4 + $0xd8] sm:$0xff]   ;;  %v6831_v18 = vld [vmem:[#allocation4 + $0xe0] sm:$0xff]   ;;  %v6834_v21 = vld [vmem:[#allocation4 + $0x68] sm:$0xff]   ;;  %s9649_s7 = scalar_lea.vmem %s9789_s5, %s5324_s14 }
  0x70   : > { %5328 = vmatpush3.bf16.msra.mxu0 %v6819_v6  ;;  %v6828_v15 = vld [vmem:[#allocation4 + $0x18] sm:$0xff]   ;;  %v6832_v19 = vld [vmem:[#allocation4 + $0x20] sm:$0xff]   ;;  %v6835_v22 = vld [vmem:[#allocation4 + $0xe8] sm:$0xff]  }
  0x71   : > { %5464 = vmatpush3.bf16.msra.mxu1 %v6820_v7  ;;  %5329 = vmatprep.subr.bf16.mxu0 %v6821_v8  ;;  %v6836_v23 = vld [vmem:[#allocation4 + $0x28] sm:$0xff]   ;;  %v6837_v24 = vld [vmem:[#allocation4 + $0x130] sm:$0xff]   ;;  %v6841_v28 = vld [vmem:[#allocation4 + $0x138] sm:$0xff]  }
  0x72   : > { %5465 = vmatprep.subr.bf16.mxu1 %v6822_v9  ;;  %v6838_v25 = vld [vmem:[#allocation4 + $0x70] sm:$0xff]   ;;  %v6842_v29 = vld [vmem:[#allocation4 + $0x78] sm:$0xff]   ;;  %v275_v32 = vld [vmem:[%s7305_s6] sm:$0xff] }
  0x73   : > { %v6839_v26 = vld [vmem:[#allocation4 + $0xf0] sm:$0xff]   ;;  %v6843_v30 = vld [vmem:[#allocation4 + $0xf8] sm:$0xff]   ;;  %v276_v33 = vld [vmem:[%s7305_s6 + $0x8] sm:$0xff] }
  0x74   : > { %5330 = vmatpush3.bf16.msra.mxu0 %v6823_v10  ;;  %v6840_v27 = vld [vmem:[#allocation4 + $0x30] sm:$0xff]   ;;  %v6844_v31 = vld [vmem:[#allocation4 + $0x38] sm:$0xff]   ;;  %v309_v35 = vpack.c.bf16 %v276_v33, %v275_v32  ;;  %v7319_v38 = vld [vmem:[#allocation4 + $0x140] sm:$0xff]  }
  0x75   : > { %5466 = vmatpush3.bf16.msra.mxu1 %v6824_v11  ;;  %5331 = vmatprep.subr.bf16.mxu0 %v6825_v12  ;;  %v277_v34 = vld [vmem:[%s7305_s6 + $0x10] sm:$0xff]  ;;  %v278_v36 = vld [vmem:[%s7305_s6 + $0x18] sm:$0xff]  ;;  %v279_v39 = vld [vmem:[%s7305_s6 + $0x20] sm:$0xff] }
  0x76   : > { %5467 = vmatprep.subr.bf16.mxu1 %v6826_v13  ;;  %v310_v37 = vpack.c.bf16 %v278_v36, %v277_v34  ;;  %v280_v40 = vld [vmem:[%s7305_s6 + $0x28] sm:$0xff]  ;;  %v326_v41 = vshrl.u32 %v309_v35, 16  ;;  %v390_v42 = vshll.u32 %v309_v35, 16  ;;  %v281_v46 = vld [vmem:[%s7305_s6 + $0x30] sm:$0xff]  ;;  %v282_v47 = vld [vmem:[%s7305_s6 + $0x38] sm:$0xff] }
  0x77   : > { %v311_v43 = vpack.c.bf16 %v280_v40, %v279_v39  ;;  %v283_v52 = vld [vmem:[%s7305_s6 + $0x40] sm:$0xff]  ;;  %v284_v53 = vld [vmem:[%s7305_s6 + $0x48] sm:$0xff]  ;;  %vm7330_vm2 = vmand %vm517_vm0, %vm518_vm1  ;;  %v312_v57 = vpack.c.bf16 %v282_v47, %v281_v46 }
  0x78   : > { %5332 = vmatpush3.bf16.msra.mxu0 %v6827_v14  ;;  %v329_v44 = vshrl.u32 %v310_v37, 16  ;;  %v394_v45 = vshll.u32 %v310_v37, 16  ;;  %v389_v48 = vrot.slane %v326_v41, 7  ;;  %v485_v49 = vrot.slane %v390_v42, 7  ;;  %v6846_v34 = vld [vmem:[#allocation4 + $0x148] sm:$0xff]   ;;  %v287_v47 = vld [vmem:[%s7305_s6 + $0x60] sm:$0xff] }
  0x79   : > { %5468 = vmatpush3.bf16.msra.mxu1 %v6828_v15  ;;  %5333 = vmatprep.subr.bf16.mxu0 %v6829_v16  ;;  %v332_v50 = vshrl.u32 %v311_v43, 16  ;;  %v398_v51 = vshll.u32 %v311_v43, 16  ;;  %v9810_v54 = vsel %vm7330_vm2, 4294967295, %v9809_v54  ;;  %v7343_v1 = vpack.c.bf16 %v284_v53, %v283_v52  ;;  %v6852_v39 = vld [vmem:[#allocation4 + $0x88] sm:$0xff]  }
  0x7a   : > { %5469 = vmatprep.subr.bf16.mxu1 %v6830_v17  ;;  %9811 = vst [vmem:[#allocation9_spill] sm:$0xff] %v9810_v54  ;;  %v393_v55 = vrot.slane %v329_v44, 7  ;;  %v486_v56 = vrot.slane %v394_v45, 7  ;;  %v392_v58 = vor.u32 %v390_v42, %v389_v48  ;;  %v7336_v59 = vsel %vm7330_vm2, %v389_v48, %v485_v49  ;;  %v285_v17 = vld [vmem:[%s7305_s6 + $0x50] sm:$0xff]  ;;  %v288_v48 = vld [vmem:[%s7305_s6 + $0x68] sm:$0xff] }
  0x7b   : > { %v397_v60 = vrot.slane %v332_v50, 7  ;;  %v487_v61 = vrot.slane %v398_v51, 7  ;;  %v573_v62 = vshll.u32 %v7336_v59, 16  ;;  %v335_v5 = vshrl.u32 %v312_v57, 16 }
  0x7c   : > { %5334 = vmatpush3.bf16.msra.mxu0 %v6831_v18  ;;  %v396_v63 = vor.u32 %v394_v45, %v393_v55  ;;  %v7341_v0 = vsel %vm7330_vm2, %v393_v55, %v486_v56  ;;  %v7347_v2 = vsel %vm7330_vm2, %v326_v41, %v392_v58  ;;  %v406_v32 = vshll.u32 %v7343_v1, 16 }
  0x7d   : > { %5470 = vmatpush3.bf16.msra.mxu1 %v6832_v19  ;;  %5335 = vmatprep.subr.bf16.mxu0 %v6833_v20  ;;  %v561_v3 = vshll.u32 %v7341_v0, 16  ;;  %v400_v4 = vor.u32 %v398_v51, %v397_v60  ;;  %v566_v6 = vshrl.u32 %v7347_v2, 16  ;;  %v568_v7 = vshll.u32 %v7347_v2, 16 }
  0x7e   : > { %5471 = vmatprep.subr.bf16.mxu1 %v6834_v21  ;;  %v7354_v8 = vsel %vm7330_vm2, %v329_v44, %v396_v63  ;;  %v7364_v12 = vsel %vm7330_vm2, %v397_v60, %v487_v61  ;;  %v575_v14 = vrot.slane %v573_v62, 1  ;;  %v401_v19 = vrot.slane %v335_v5, 7  ;;  %v6847_v44 = vld [vmem:[#allocation4 + $0x150] sm:$0xff]   ;;  %v290_v62 = vld [vmem:[%s7305_s6 + $0x78] sm:$0xff] }
  0x7f   : > { %v554_v9 = vshrl.u32 %v7354_v8, 16  ;;  %v556_v10 = vshll.u32 %v7354_v8, 16  ;;  %v7360_v11 = vsel %vm7330_vm2, %v332_v50, %v400_v4  ;;  %v570_v13 = vrot.slane %v568_v7, 1  ;;  %v289_v61 = vld [vmem:[%s7305_s6 + $0x70] sm:$0xff] }
  0x80   : > { %5336 = vmatpush3.bf16.msra.mxu0 %v6835_v22  ;;  %v563_v15 = vrot.slane %v561_v3, 1  ;;  %v580_v16 = vshll.u32 %v7360_v11, 16  ;;  %v402_v20 = vshll.u32 %v312_v57, 16  ;;  %v338_v21 = vshrl.u32 %v7343_v1, 16  ;;  %v6848_v57 = vld [vmem:[#allocation4 + $0x158] sm:$0xff]  }
  0x81   : > { %5472 = vmatpush3.bf16.msra.mxu1 %v6836_v23  ;;  %5337 = vmatprep.subr.bf16.mxu0 %v6837_v24  ;;  %v558_v18 = vrot.slane %v556_v10, 1  ;;  %v571_v22 = vor.u32 %v570_v13, %v566_v6  ;;  %v578_v23 = vshrl.u32 %v7360_v11, 16  ;;  %v286_v24 = vld [vmem:[%s7305_s6 + $0x58] sm:$0xff]  ;;  %v489_v51 = vrot.slane %v406_v32, 7  ;;  %v6849_v10 = vld [vmem:[#allocation4 + $0x160] sm:$0xff]  }
  0x82   : > { %5473 = vmatprep.subr.bf16.mxu1 %v6838_v25  ;;  %v6850_v25 = vld [vmem:[#allocation4 + $0x80] sm:$0xff]   ;;  %v488_v35 = vrot.slane %v402_v20, 7  ;;  %v7381_v37 = vpack.c.bf16 %v286_v24, %v285_v17  ;;  %v7405_v56 = vpack.c.bf16 %v288_v48, %v287_v47  ;;  %v6855_v3 = vld [vmem:[#allocation4 + $0x98] sm:$0xff]   ;;  %v7420_v7 = vpack.c.bf16 %v290_v62, %v289_v61  ;;  %v6859_v61 = vld [vmem:[#allocation4 + $0xb0] sm:$0xff]  }
  0x83   : > { %v291_v13 = vld [vmem:[%s7305_s6 + $0x80] sm:$0xff]  ;;  %v297_v62 = vld [vmem:[%s7305_s6 + $0xb0] sm:$0xff] }
  0x84   : > { %5338 = vmatpush3.bf16.msra.mxu0 %v6839_v26  ;;  %v559_v26 = vor.u32 %v558_v18, %v554_v9  ;;  %v7391_v45 = vsel %vm7330_vm2, %v401_v19, %v488_v35  ;;  %v341_v46 = vshrl.u32 %v7381_v37, 16  ;;  %v410_v60 = vshll.u32 %v7381_v37, 16 }
  0x85   : > { %5474 = vmatpush3.bf16.msra.mxu1 %v6840_v27  ;;  %5339 = vmatprep.subr.bf16.mxu0 %v6841_v28  ;;  %v582_v27 = vrot.slane %v580_v16, 1  ;;  %v585_v28 = vshll.u32 %v7364_v12, 16  ;;  %v597_v53 = vshll.u32 %v7391_v45, 16  ;;  %v344_v6 = vshrl.u32 %v7405_v56, 16 }
  0x86   : > { %5475 = vmatprep.subr.bf16.mxu1 %v6842_v29  ;;  %v404_v29 = vor.u32 %v402_v20, %v401_v19  ;;  %v7375_v33 = vsel %vm552_vm3, %v559_v26, %v563_v15  ;;  %v409_v58 = vrot.slane %v341_v46, 7  ;;  %v490_v18 = vrot.slane %v410_v60, 7  ;;  %v6857_v26 = vld [vmem:[#allocation4 + $0xa0] sm:$0xff]  }
  0x87   : > { %1597 = vmatprep.mubr.bf16.mxu1 %v7375_v33  ;;  %v583_v40 = vor.u32 %v582_v27, %v578_v23  ;;  %v587_v41 = vrot.slane %v585_v28, 1  ;;  %v413_v20 = vrot.slane %v344_v6, 7  ;;  %v6851_v23 = vld [vmem:[#allocation4 + $0x168] sm:$0xff]   ;;  %v418_v35 = vshll.u32 %v7420_v7, 16 }
  0x88   : > { %5340 = vmatpush3.bf16.msra.mxu0 %v6843_v30  ;;  %v576_v30 = vsel %vm552_vm3, %v571_v22, %v575_v14  ;;  %v7379_v36 = vsel %vm7330_vm2, %v335_v5, %v404_v29  ;;  %v599_v5 = vrot.slane %v597_v53, 1  ;;  %v412_v9 = vor.u32 %v410_v60, %v409_v58  ;;  %v292_v14 = vld [vmem:[%s7305_s6 + $0x88] sm:$0xff]  ;;  %v6856_v53 = vld [vmem:[#allocation4 + $0x178] sm:$0xff]  }
  0x89   : > { %5476 = vmatpush3.bf16.msra.mxu1 %v6844_v31  ;;  %6141 = vmatprep.subr.bf16.mxu0 %v7319_v38  ;;  %v405_v31 = vrot.slane %v338_v21, 7  ;;  %v592_v42 = vshll.u32 %v7379_v36, 16  ;;  %v7397_v49 = vsel %vm552_vm3, %v583_v40, %v587_v41  ;;  %v590_v50 = vshrl.u32 %v7379_v36, 16  ;;  %v6853_v40 = vld [vmem:[#allocation4 + $0x170] sm:$0xff]   ;;  %v296_v60 = vld [vmem:[%s7305_s6 + $0xa8] sm:$0xff] }
  0x8a   : > { %6189 = vmatprep.subr.bf16.mxu1 %v6850_v25  ;;  %1131 = vmatprep.mubr.bf16.mxu0 %v576_v30  ;;  %9812 = vst [vmem:[#allocation10_spill] sm:$0xff] %v7397_v49  ;;  %v347_v22 = vshrl.u32 %v7420_v7, 16  ;;  %v7433_v24 = vsel %vm7330_vm2, %v341_v46, %v412_v9  ;;  %v7442_v29 = vsel %vm7330_vm2, %v409_v58, %v490_v18  ;;  %v492_v48 = vrot.slane %v418_v35, 7  ;;  %v295_v58 = vld [vmem:[%s7305_s6 + $0xa0] sm:$0xff] }
  0x8b   : > { %1132 = vmatmul.mubr.bf16.vlgmr.msra.gmra.mrb[0].mxu0 %v7347_v2  ;;  %v408_v43 = vor.u32 %v406_v32, %v405_v31  ;;  %v594_v52 = vrot.slane %v592_v42, 1  ;;  %v7415_v63 = vsel %vm7330_vm2, %v405_v31, %v489_v51  ;;  %v616_v31 = vshll.u32 %v7433_v24, 16  ;;  %v6861_v18 = vld [vmem:[#allocation4 + $0x1c0] sm:$0xff]  }
  0x8c   : > { %1598 = vmatmul.mubr.bf16.vlgmr.msra.gmra.mrb[0].mxu1 %v7354_v8  ;;  %6142 = vmatpush3.bf16.msra.mxu0 %v7319_v38  ;;  %v6854_v38 = vld [vmem:[#allocation4 + $0x90] sm:$0xff]   ;;  %v609_v17 = vshll.u32 %v7415_v63, 16  ;;  %v614_v41 = vshrl.u32 %v7433_v24, 16  ;;  %v621_v42 = vshll.u32 %v7442_v29, 16 }
  0x8d   : > { %1139 = vmatprep.mubr.bf16.mxu0 %v7375_v33  ;;  %1605 = vmatprep.mubr.bf16.mxu1 %v576_v30  ;;  %v7403_v55 = vsel %vm7330_vm2, %v338_v21, %v408_v43  ;;  %v595_v4 = vor.u32 %v594_v52, %v590_v50  ;;  %v414_v21 = vshll.u32 %v7405_v56, 16  ;;  %v6858_v30 = vld [vmem:[#allocation4 + $0xa8] sm:$0xff]  }
  0x8e   : > { %6143 = vmatprep.subr.bf16.mxu0 %v6846_v34  ;;  %6190 = vmatpush3.bf16.msra.mxu1 %v6850_v25  ;;  %v604_v1 = vshll.u32 %v7403_v55, 16  ;;  %v602_v15 = vshrl.u32 %v7403_v55, 16  ;;  %v7435_v25 = vpack.c.bf16 %v292_v14, %v291_v13  ;;  %v611_v28 = vrot.slane %v609_v17, 1  ;;  %v299_v14 = vld [vmem:[%s7305_s6 + $0xc0] sm:$0xff]  ;;  %v300_v17 = vld [vmem:[%s7305_s6 + $0xc8] sm:$0xff] }
  0x8f   : > { %6191 = vmatprep.subr.bf16.mxu1 %v6852_v39  ;;  %v7427_v19 = vsel %vm552_vm3, %v595_v4, %v599_v5  ;;  %v416_v32 = vor.u32 %v414_v21, %v413_v20  ;;  %v491_v47 = vrot.slane %v414_v21, 7  ;;  %v623_v9 = vrot.slane %v621_v42, 1 }
  0x90   : > { %6144 = vmatpush3.bf16.msra.mxu0 %v6846_v34  ;;  %v606_v16 = vrot.slane %v604_v1, 1  ;;  %9813 = vst [vmem:[#allocation11_spill] sm:$0xff] %v7427_v19  ;;  %v417_v34 = vrot.slane %v347_v22, 7  ;;  %v350_v37 = vshrl.u32 %v7435_v25, 16  ;;  %v422_v43 = vshll.u32 %v7435_v25, 16  ;;  %v298_v1 = vld [vmem:[%s7305_s6 + $0xb8] sm:$0xff] }
  0x91   : > { %6145 = vmatprep.subr.bf16.mxu0 %v6847_v44  ;;  %v7458_v50 = vsel %vm7330_vm2, %v344_v6, %v416_v32  ;;  %v6860_v6 = vld [vmem:[#allocation4 + $0xb8] sm:$0xff]  }
  0x92   : > { %6192 = vmatpush3.bf16.msra.mxu1 %v6852_v39  ;;  %v607_v27 = vor.u32 %v606_v16, %v602_v15  ;;  %v293_v39 = vld [vmem:[%s7305_s6 + $0x90] sm:$0xff]  ;;  %v420_v51 = vor.u32 %v418_v35, %v417_v34  ;;  %v493_v52 = vrot.slane %v422_v43, 7  ;;  %v421_v56 = vrot.slane %v350_v37, 7 }
  0x93   : > { %1140 = vmatmul.mubr.bf16.gmra.mrb[4].mxu0 %v7354_v8  ;;  %6193 = vmatprep.subr.bf16.mxu1 %v6854_v38  ;;  %v628_v4 = vshll.u32 %v7458_v50, 16  ;;  %v7478_v5 = vsel %vm7330_vm2, %v417_v34, %v492_v48  ;;  %v7521_v48 = vld [vmem:[#allocation4 + $0x200] sm:$0xff]  }
  0x94   : > { %1606 = vmatmul.mubr.bf16.gmra.mrb[4].mxu1 %v7347_v2  ;;  %1147 = vmatprep.mubr.bf16.mxu0 %v7397_v49  ;;  %v7454_v46 = vsel %vm552_vm3, %v607_v27, %v611_v28  ;;  %v7487_v13 = vsel %vm7330_vm2, %v421_v56, %v493_v52  ;;  %v424_v15 = vor.u32 %v422_v43, %v421_v56  ;;  %v302_v27 = vld [vmem:[%s7305_s6 + $0xd8] sm:$0xff]  ;;  %v303_v28 = vld [vmem:[%s7305_s6 + $0xe0] sm:$0xff]  ;;  %v645_v34 = vshll.u32 %v7478_v5, 16 }
  0x95   : > { %1613 = vmatprep.mubr.bf16.mxu1 %v7375_v33  ;;  %6146 = vmatpush3.bf16.msra.mxu0 %v6847_v44  ;;  %v294_v44 = vld [vmem:[%s7305_s6 + $0x98] sm:$0xff]  ;;  %9814 = vst [vmem:[#allocation12_spill] sm:$0xff] %v7454_v46  ;;  %v657_v35 = vshll.u32 %v7487_v13, 16 }
  0x96   : > { %6147 = vmatprep.subr.bf16.mxu0 %v6848_v57  ;;  %6194 = vmatpush3.bf16.msra.mxu1 %v6854_v38  ;;  %v618_v38 = vrot.slane %v616_v31, 1  ;;  %v630_v31 = vrot.slane %v628_v4, 1 }
  0x97   : > { %6195 = vmatprep.subr.bf16.mxu1 %v6855_v3 }
  0x98   : > { %v619_v7 = vor.u32 %v618_v38, %v614_v41  ;;  %v7513_v41 = vsel %vm7330_vm2, %v350_v37, %v424_v15 }
  0x99   : > { %6148 = vmatpush3.bf16.msra.mxu0 %v6848_v57  ;;  %v7462_v57 = vpack.c.bf16 %v294_v44, %v293_v39  ;;  %v305_v39 = vld [vmem:[%s7305_s6 + $0xf0] sm:$0xff]  ;;  %v7518_v44 = vpack.c.bf16 %v300_v17, %v299_v14  ;;  %v650_v4 = vshrl.u32 %v7513_v41, 16 }
  0x9a   : > { %6149 = vmatprep.subr.bf16.mxu0 %v6849_v10  ;;  %6196 = vmatpush3.bf16.msra.mxu1 %v6855_v3  ;;  %v7473_v3 = vsel %vm7330_vm2, %v413_v20, %v491_v47  ;;  %v626_v20 = vshrl.u32 %v7458_v50, 16  ;;  %v306_v47 = vld [vmem:[%s7305_s6 + $0xf8] sm:$0xff] }
  0x9b   : > { %1148 = vmatmul.mubr.bf16.gmra.mrb[8].mxu0 %v7360_v11  ;;  %6197 = vmatprep.subr.bf16.mxu1 %v6857_v26  ;;  %v353_v16 = vshrl.u32 %v7462_v57, 16  ;;  %v633_v21 = vshll.u32 %v7473_v3, 16  ;;  %v426_v43 = vshll.u32 %v7462_v57, 16 }
  0x9c   : > { %1614 = vmatmul.mubr.bf16.gmra.mrb[8].mxu1 %v7354_v8  ;;  %1155 = vmatprep.mubr.bf16.mxu0 %v7427_v19  ;;  %v631_v52 = vor.u32 %v630_v31, %v626_v20 }
  0x9d   : > { %1621 = vmatprep.mubr.bf16.mxu1 %v7397_v49  ;;  %6150 = vmatpush3.bf16.msra.mxu0 %v6849_v10  ;;  %v7483_v10 = vsel %vm7330_vm2, %v347_v22, %v420_v51  ;;  %v7494_v22 = vpack.c.bf16 %v296_v60, %v295_v58  ;;  %v425_v42 = vrot.slane %v353_v16, 7  ;;  %v635_v38 = vrot.slane %v633_v21, 1 }
  0x9e   : > { %6151 = vmatprep.subr.bf16.mxu0 %v6851_v23  ;;  %6198 = vmatpush3.bf16.msra.mxu1 %v6857_v26  ;;  %v301_v26 = vld [vmem:[%s7305_s6 + $0xd0] sm:$0xff]  ;;  %v640_v32 = vshll.u32 %v7483_v10, 16  ;;  %v638_v25 = vshrl.u32 %v7483_v10, 16 }
  0x9f   : > { %6199 = vmatprep.subr.bf16.mxu1 %v6858_v30  ;;  %v356_v51 = vshrl.u32 %v7494_v22, 16  ;;  %v7529_v56 = vpack.c.bf16 %v302_v27, %v301_v26  ;;  %v430_v15 = vshll.u32 %v7494_v22, 16  ;;  %v7545_v20 = vsel %vm552_vm3, %v631_v52, %v635_v38 }
  0xa0   : > { %v642_v60 = vrot.slane %v640_v32, 1  ;;  %9816 = vst [vmem:[#allocation14_spill] sm:$0xff] %v7545_v20  ;;  %v798_v52 = vrot.slane %v7336_v59, 1 }
  0xa1   : > { %6152 = vmatpush3.bf16.msra.mxu0 %v6851_v23  ;;  %v7496_v23 = vpack.c.bf16 %v298_v1, %v297_v62  ;;  %v494_v62 = vrot.slane %v426_v43, 7  ;;  %v7535_v1 = vpack.c.bf16 %v306_v47, %v305_v39  ;;  %v429_v14 = vrot.slane %v356_v51, 7 }
  0xa2   : > { %6153 = vmatprep.subr.bf16.mxu0 %v6853_v40  ;;  %6200 = vmatpush3.bf16.msra.mxu1 %v6858_v30  ;;  %v304_v30 = vld [vmem:[%s7305_s6 + $0xe8] sm:$0xff]  ;;  %v365_v21 = vshrl.u32 %v7529_v56, 16  ;;  %v643_v27 = vor.u32 %v642_v60, %v638_v25  ;;  %v797_v25 = vrot.slane %v7347_v2, 1 }
  0xa3   : > { %1156 = vmatmul.mubr.bf16.gmra.mrb[12].mxu0 %v7379_v36  ;;  %6201 = vmatprep.subr.bf16.mxu1 %v6859_v61  ;;  %v359_v37 = vshrl.u32 %v7496_v23, 16  ;;  %v7531_v58 = vpack.c.bf16 %v304_v30, %v303_v28  ;;  %v7551_v30 = vsel %vm7330_vm2, %v425_v42, %v494_v62  ;;  %v371_v31 = vshrl.u32 %v7535_v1, 16 }
  0xa4   : > { %1622 = vmatmul.mubr.bf16.gmra.mrb[12].mxu1 %v7360_v11  ;;  %1163 = vmatprep.mubr.bf16.mxu0 %v7454_v46  ;;  %v441_v57 = vrot.slane %v365_v21, 7  ;;  %v450_v38 = vshll.u32 %v7535_v1, 16 }
  0xa5   : > { %1629 = vmatprep.mubr.bf16.mxu1 %v7427_v19  ;;  %6154 = vmatpush3.bf16.msra.mxu0 %v6853_v40  ;;  %v7507_v40 = vsel %vm552_vm3, %v619_v7, %v623_v9  ;;  %v428_v7 = vor.u32 %v426_v43, %v425_v42  ;;  %v362_v9 = vshrl.u32 %v7518_v44, 16  ;;  %v433_v17 = vrot.slane %v359_v37, 7 }
  0xa6   : > { %6155 = vmatprep.subr.bf16.mxu0 %v6856_v53  ;;  %6202 = vmatpush3.bf16.msra.mxu1 %v6859_v61  ;;  %9815 = vst [vmem:[#allocation13_spill] sm:$0xff] %v7507_v40  ;;  %v652_v61 = vshll.u32 %v7513_v41, 16  ;;  %v368_v26 = vshrl.u32 %v7531_v58, 16  ;;  %v442_v42 = vshll.u32 %v7529_v56, 16 }
  0xa7   : > { %6203 = vmatprep.subr.bf16.mxu1 %v6860_v6  ;;  %v7558_v22 = vsel %vm7330_vm2, %v353_v16, %v428_v7  ;;  %v437_v32 = vrot.slane %v362_v9, 7  ;;  %v446_v16 = vshll.u32 %v7531_v58, 16 }
  0xa8   : > { %v654_v28 = vrot.slane %v652_v61, 1  ;;  %v445_v47 = vrot.slane %v368_v26, 7  ;;  %v669_v61 = vshll.u32 %v7551_v30, 16  ;;  %v664_v7 = vshll.u32 %v7558_v22, 16 }
  0xa9   : > { %6156 = vmatpush3.bf16.msra.mxu0 %v6856_v53  ;;  %v647_v53 = vrot.slane %v645_v34, 1  ;;  %v438_v34 = vshll.u32 %v7518_v44, 16  ;;  %v449_v44 = vrot.slane %v371_v31, 7  ;;  %v444_v59 = vor.u32 %v442_v42, %v441_v57 }
  0xaa   : > { %5597 = vmatprep.subr.bf16.mxu0 %v6861_v18  ;;  %6204 = vmatpush3.bf16.msra.mxu1 %v6860_v6  ;;  %v7539_v6 = vrot.slane %v657_v35, 1  ;;  %v434_v18 = vshll.u32 %v7496_v23, 16  ;;  %v495_v23 = vrot.slane %v430_v15, 7  ;;  %v432_v35 = vor.u32 %v430_v15, %v429_v14 }
  0xab   : > { %1164 = vmatmul.mubr.bf16.gmra.mrb[16].mxu0 %v7403_v55  ;;  %6237 = vmatprep.subr.bf16.mxu1 %v7521_v48  ;;  %v7571_v56 = vsel %vm552_vm3, %v643_v27, %v647_v53  ;;  %v655_v60 = vor.u32 %v654_v28, %v650_v4  ;;  %v440_v62 = vor.u32 %v438_v34, %v437_v32  ;;  %v497_v1 = vrot.slane %v438_v34, 7 }
  0xac   : > { %1630 = vmatmul.mubr.bf16.gmra.mrb[16].mxu1 %v7379_v36  ;;  %1171 = vmatprep.mubr.bf16.mxu0 %v7507_v40  ;;  %v436_v39 = vor.u32 %v434_v18, %v433_v17  ;;  %v496_v43 = vrot.slane %v434_v18, 7  ;;  %v7577_v58 = vsel %vm7330_vm2, %v356_v51, %v432_v35  ;;  %v498_v15 = vrot.slane %v442_v42, 7 }
  0xad   : > { %1637 = vmatprep.mubr.bf16.mxu1 %v7454_v46  ;;  %v7581_v2 = vsel %vm7330_vm2, %v429_v14, %v495_v23  ;;  %v499_v18 = vrot.slane %v446_v16, 7  ;;  %v7584_v53 = vsel %vm793_vm4, %v797_v25, %v798_v52  ;;  %v448_v51 = vor.u32 %v446_v16, %v445_v47 }
  0xae   : > { %v7588_v4 = vsel %vm7330_vm2, %v359_v37, %v436_v39  ;;  %v7592_v27 = vsel %vm7330_vm2, %v433_v17, %v496_v43  ;;  %v452_v28 = vor.u32 %v450_v38, %v449_v44  ;;  %v662_v34 = vshrl.u32 %v7558_v22, 16 }
  0xaf   : > { %v671_v35 = vrot.slane %v669_v61, 1  ;;  %v676_v14 = vshll.u32 %v7577_v58, 16  ;;  %v7598_v23 = vsel %vm7330_vm2, %v362_v9, %v440_v62  ;;  %v666_v42 = vrot.slane %v664_v7, 1 }
  0xb0   : > { %v681_v37 = vshll.u32 %v7581_v2, 16  ;;  %v7604_v17 = vsel %vm7330_vm2, %v437_v32, %v497_v1  ;;  %v7608_v39 = vsel %vm7330_vm2, %v441_v57, %v498_v15  ;;  %v688_v9 = vshll.u32 %v7588_v4, 16 }
  0xb1   : > { %v693_v43 = vshll.u32 %v7592_v27, 16  ;;  %v7616_v16 = vsel %vm7330_vm2, %v365_v21, %v444_v59  ;;  %v7620_v32 = vsel %vm7330_vm2, %v445_v47, %v499_v18  ;;  %v700_v57 = vshll.u32 %v7598_v23, 16 }
  0xb2   : > { %v7626_v25 = vsel %vm7330_vm2, %v368_v26, %v448_v51  ;;  %v500_v52 = vrot.slane %v450_v38, 7  ;;  %v7630_v61 = vsel %vm7330_vm2, %v371_v31, %v452_v28  ;;  %v674_v21 = vshrl.u32 %v7577_v58, 16 }
  0xb3   : > { %1172 = vmatmul.mubr.bf16.gmra.mrb[20].mxu0 %v7433_v24  ;;  %v678_v62 = vrot.slane %v676_v14, 1  ;;  %v705_v7 = vshll.u32 %v7604_v17, 16  ;;  %v717_v47 = vshll.u32 %v7608_v39, 16  ;;  %v683_v1 = vrot.slane %v681_v37, 1 }
  0xb4   : > { %1638 = vmatmul.mubr.bf16.gmra.mrb[20].mxu1 %v7403_v55  ;;  %1179 = vmatprep.mubr.bf16.mxu0 %v7545_v20  ;;  %v686_v15 = vshrl.u32 %v7588_v4, 16  ;;  %v712_v59 = vshll.u32 %v7616_v16, 16  ;;  %v729_v26 = vshll.u32 %v7620_v32, 16  ;;  %v690_v18 = vrot.slane %v688_v9, 1 }
  0xb5   : > { %1645 = vmatprep.mubr.bf16.mxu1 %v7507_v40  ;;  %v695_v38 = vrot.slane %v693_v43, 1  ;;  %v724_v51 = vshll.u32 %v7626_v25, 16  ;;  %v736_v31 = vshll.u32 %v7630_v61, 16  ;;  %v7642_v28 = vsel %vm552_vm3, %v655_v60, %v7539_v6 }
  0xb6   : > { %v698_v14 = vshrl.u32 %v7598_v23, 16  ;;  %v7647_v37 = vsel %vm7330_vm2, %v449_v44, %v500_v52  ;;  %v707_v40 = vrot.slane %v705_v7, 1  ;;  %v710_v46 = vshrl.u32 %v7616_v16, 16 }
  0xb7   : > { %v719_v9 = vrot.slane %v717_v47, 1  ;;  %v722_v43 = vshrl.u32 %v7626_v25, 16  ;;  %v714_v19 = vrot.slane %v712_v59, 1  ;;  %v731_v49 = vrot.slane %v729_v26, 1 }
  0xb8   : > { %v726_v6 = vrot.slane %v724_v51, 1  ;;  %v734_v60 = vshrl.u32 %v7630_v61, 16  ;;  %v741_v44 = vshll.u32 %v7647_v37, 16  ;;  %v667_v52 = vor.u32 %v666_v42, %v662_v34 }
  0xb9   : > { %v679_v47 = vor.u32 %v678_v62, %v674_v21  ;;  %v691_v34 = vor.u32 %v690_v18, %v686_v15  ;;  %v715_v62 = vor.u32 %v714_v19, %v710_v46  ;;  %v795_v26 = vrot.slane %v7341_v0, 1  ;;  %v6863_v0 = vld [vmem:[#allocation4 + $0x1c8] sm:$0xff]  }
  0xba   : > { %v7658_v7 = vsel %vm552_vm3, %v667_v52, %v671_v35  ;;  %v743_v46 = vrot.slane %v741_v44, 1  ;;  %v801_v51 = vrot.slane %v7364_v12, 1  ;;  %v806_v12 = vrot.slane %v7403_v55, 1  ;;  %v6865_v44 = vld [vmem:[#allocation4 + $0x1d0] sm:$0xff]  }
  0xbb   : > { %1180 = vmatmul.mubr.bf16.gmra.mrb[24].mxu0 %v7458_v50  ;;  %v7665_v59 = vsel %vm552_vm3, %v679_v47, %v683_v1  ;;  %v7672_v35 = vsel %vm552_vm3, %v691_v34, %v695_v38  ;;  %v7686_v1 = vsel %vm552_vm3, %v715_v62, %v719_v9  ;;  %v800_v38 = vrot.slane %v7360_v11, 1  ;;  %v6872_v9 = vld [vmem:[#allocation4 + $0x208] sm:$0xff]   ;;  %v6866_v47 = vld [vmem:[#allocation4 + $0x190] sm:$0xff]   ;;  %v6867_v34 = vld [vmem:[#allocation4 + $0x1d8] sm:$0xff]  }
  0xbc   : > { %1646 = vmatmul.mubr.bf16.gmra.mrb[24].mxu1 %v7433_v24  ;;  %1187 = vmatprep.mubr.bf16.mxu0 %v7571_v56  ;;  %v812_v62 = vrot.slane %v7458_v50, 1 }
  0xbd   : > { %1653 = vmatprep.mubr.bf16.mxu1 %v7545_v20  ;;  %v702_v20 = vrot.slane %v700_v57, 1  ;;  %v738_v57 = vrot.slane %v736_v31, 1  ;;  %v6862_v31 = vld [vmem:[#allocation4 + $0x180] sm:$0xff]  }
  0xbf   : > { %v703_v42 = vor.u32 %v702_v20, %v698_v14  ;;  %v739_v19 = vor.u32 %v738_v57, %v734_v60  ;;  %v7718_v14 = vsel %vm793_vm4, %v800_v38, %v801_v51  ;;  %v6864_v60 = vld [vmem:[#allocation4 + $0x188] sm:$0xff]   ;;  %v807_v57 = vrot.slane %v7415_v63, 1  ;;  %v6876_v63 = vld [vmem:[#allocation4 + $0x218] sm:$0xff]  }
  0xc0   : > { %v6873_v51 = vld [vmem:[#allocation4 + $0x1e8] sm:$0xff]  }
  0xc1   : > { %v7679_v21 = vsel %vm552_vm3, %v703_v42, %v707_v40  ;;  %v727_v40 = vor.u32 %v726_v6, %v722_v43  ;;  %v7700_v15 = vsel %vm552_vm3, %v739_v19, %v743_v46  ;;  %v803_v43 = vrot.slane %v7379_v36, 1  ;;  %v6868_v19 = vld [vmem:[#allocation4 + $0x198] sm:$0xff]   ;;  %v6869_v46 = vld [vmem:[#allocation4 + $0x1e0] sm:$0xff]  }
  0xc2   : > { %v804_v6 = vrot.slane %v7391_v45, 1  ;;  %v7733_v45 = vsel %vm793_vm4, %v806_v12, %v807_v57  ;;  %v810_v42 = vrot.slane %v7442_v29, 1  ;;  %v6871_v29 = vld [vmem:[#allocation4 + $0x1a0] sm:$0xff]   ;;  %v6882_v12 = vld [vmem:[#allocation4 + $0x230] sm:$0xff]  }
  0xc3   : > { %1188 = vmatmul.mubr.bf16.gmra.mrb[28].mxu0 %v7483_v10  ;;  %v7693_v20 = vsel %vm552_vm3, %v727_v40, %v731_v49  ;;  %v794_v49 = vrot.slane %v7354_v8, 1  ;;  %v813_v40 = vrot.slane %v7473_v3, 1  ;;  %v6880_v3 = vld [vmem:[#allocation4 + $0x228] sm:$0xff]  }
  0xc4   : > { %1654 = vmatmul.mubr.bf16.gmra.mrb[28].mxu1 %v7458_v50  ;;  %1195 = vmatprep.mubr.bf16.mxu0 %v7642_v28  ;;  %v7730_v52 = vsel %vm793_vm4, %v803_v43, %v804_v6  ;;  %v819_v43 = vrot.slane %v7487_v13, 1  ;;  %v6875_v6 = vld [vmem:[#allocation4 + $0x1a8] sm:$0xff]   ;;  %v6884_v13 = vld [vmem:[#allocation4 + $0x238] sm:$0xff]  }
  0xc5   : > { %1661 = vmatprep.mubr.bf16.mxu1 %v7571_v56  ;;  %v7709_v18 = vsel %vm793_vm4, %v794_v49, %v795_v26  ;;  %v6878_v49 = vld [vmem:[#allocation4 + $0x220] sm:$0xff]   ;;  %v7747_v38 = vsel %vm793_vm4, %v812_v62, %v813_v40 }
  0xcb   : > { %1196 = vmatmul.mubr.bf16.gmra.mrb[32].mxu0 %v7513_v41 }
  0xcc   : > { %1662 = vmatmul.mubr.bf16.gmra.mrb[32].mxu1 %v7483_v10  ;;  %1203 = vmatprep.mubr.bf16.mxu0 %v7658_v7 }
  0xcd   : > { %1669 = vmatprep.mubr.bf16.mxu1 %v7642_v28 }
  0xd3   : > { %1204 = vmatmul.mubr.bf16.gmra.mrb[36].mxu0 %v7558_v22 }
  0xd4   : > { %1670 = vmatmul.mubr.bf16.gmra.mrb[36].mxu1 %v7513_v41  ;;  %1211 = vmatprep.mubr.bf16.mxu0 %v7665_v59 }
  0xd5   : > { %1677 = vmatprep.mubr.bf16.mxu1 %v7658_v7 }
  0xdb   : > { %1212 = vmatmul.mubr.bf16.gmra.mrb[40].mxu0 %v7577_v58 }
  0xdc   : > { %1678 = vmatmul.mubr.bf16.gmra.mrb[40].mxu1 %v7558_v22  ;;  %1219 = vmatprep.mubr.bf16.mxu0 %v7672_v35 }
  0xdd   : > { %1685 = vmatprep.mubr.bf16.mxu1 %v7665_v59 }
  0xe3   : > { %1220 = vmatmul.mubr.bf16.gmra.mrb[44].mxu0 %v7588_v4 }
  0xe4   : > { %1686 = vmatmul.mubr.bf16.gmra.mrb[44].mxu1 %v7577_v58  ;;  %1227 = vmatprep.mubr.bf16.mxu0 %v7679_v21 }
  0xe5   : > { %1693 = vmatprep.mubr.bf16.mxu1 %v7672_v35 }
  0xeb   : > { %1228 = vmatmul.mubr.bf16.gmra.mrb[48].mxu0 %v7598_v23 }
  0xec   : > { %1694 = vmatmul.mubr.bf16.gmra.mrb[48].mxu1 %v7588_v4  ;;  %1235 = vmatprep.mubr.bf16.mxu0 %v7686_v1 }
  0xed   : > { %1701 = vmatprep.mubr.bf16.mxu1 %v7679_v21 }
  0xf3   : > { %1236 = vmatmul.mubr.bf16.gmra.mrb[52].mxu0 %v7616_v16 }
  0xf4   : > { %1702 = vmatmul.mubr.bf16.gmra.mrb[52].mxu1 %v7598_v23  ;;  %1243 = vmatprep.mubr.bf16.mxu0 %v7693_v20 }
  0xf5   : > { %1709 = vmatprep.mubr.bf16.mxu1 %v7686_v1 }
  0xfb   : > { %1244 = vmatmul.mubr.bf16.gmra.mrb[56].mxu0 %v7626_v25 }
  0xfc   : > { %1710 = vmatmul.mubr.bf16.gmra.mrb[56].mxu1 %v7616_v16  ;;  %1251 = vmatprep.mubr.bf16.mxu0 %v7700_v15 }
  0xfd   : > { %1717 = vmatprep.mubr.bf16.mxu1 %v7693_v20 }
 0x103   : > { %1252 = vmatmul.mubr.bf16.gmra.mrb[60].mxu0 %v7630_v61 }
 0x104   : > { %1718 = vmatmul.mubr.bf16.gmra.mrb[60].mxu1 %v7626_v25  ;;  %6157 = vmatprep.mubr.bf16.mxu0 %v7584_v53 }
 0x105   : > { %6205 = vmatprep.mubr.bf16.mxu1 %v7709_v18 }
 0x10b   : > { %6158 = vmatmul.mubr.bf16.vlgmr.msra.gmra.mrb[64].mxu0 %v7709_v18 }
 0x10c   : > { %6206 = vmatmul.mubr.bf16.vlgmr.msra.gmra.mrb[64].mxu1 %v7584_v53  ;;  %5598 = vmatpush3.bf16.msra.mxu0 %v6862_v31  ;;  %v6874_v53 = vld [vmem:[#allocation4 + $0x210] sm:$0xff]   ;;  %v815_v31 = vrot.slane %v7483_v10, 1 }
 0x10d   : > { %6161 = vmatprep.mubr.bf16.mxu0 %v7718_v14  ;;  %6209 = vmatprep.mubr.bf16.mxu1 %v7709_v18 }
 0x10e   : > { %5599 = vmatprep.subr.bf16.mxu0 %v6863_v0  ;;  %6238 = vmatpush3.bf16.msra.mxu1 %v7521_v48  ;;  %v809_v48 = vrot.slane %v7433_v24, 1  ;;  %v816_v0 = vrot.slane %v7478_v5, 1  ;;  %v6879_v5 = vld [vmem:[#allocation4 + $0x1b0] sm:$0xff]  }
 0x10f   : > { %6239 = vmatprep.subr.bf16.mxu1 %v6872_v9 }
 0x110   : > { %5600 = vmatpush3.bf16.msra.mxu0 %v6864_v60  ;;  %v7744_v26 = vsel %vm793_vm4, %v809_v48, %v810_v42  ;;  %v6877_v60 = vld [vmem:[#allocation4 + $0x1f0] sm:$0xff]   ;;  %v7758_v57 = vsel %vm793_vm4, %v815_v31, %v816_v0  ;;  %v825_v48 = vrot.slane %v7581_v2, 1  ;;  %v6883_v42 = vld [vmem:[#allocation4 + $0x1b8] sm:$0xff]   ;;  %v828_v2 = vrot.slane %v7592_v27, 1 }
 0x111   : > { %5601 = vmatprep.subr.bf16.mxu0 %v6865_v44  ;;  %v834_v27 = vrot.slane %v7608_v39, 1  ;;  %v839_v39 = vrot.slane %v7630_v61, 1 }
 0x112   : > { %6240 = vmatpush3.bf16.msra.mxu1 %v6872_v9  ;;  %v818_v9 = vrot.slane %v7513_v41, 1 }
 0x113   : > { %6162 = vmatmul.mubr.bf16.gmra.mrb[68].mxu0 %v7730_v52  ;;  %6241 = vmatprep.subr.bf16.mxu1 %v6874_v53 }
 0x114   : > { %6210 = vmatmul.mubr.bf16.gmra.mrb[68].mxu1 %v7718_v14  ;;  %6165 = vmatprep.mubr.bf16.mxu0 %v7733_v45  ;;  %v7761_v44 = vsel %vm793_vm4, %v818_v9, %v819_v43  ;;  %v840_v9 = vrot.slane %v7647_v37, 1  ;;  %v9817_v43 = vld [vmem:[#allocation10_spill] sm:$0xff]  ;;  %v9818_v37 = vld [vmem:[#allocation11_spill] sm:$0xff] }
 0x115   : > { %6213 = vmatprep.mubr.bf16.mxu1 %v7730_v52  ;;  %5602 = vmatpush3.bf16.msra.mxu0 %v6866_v47  ;;  %v821_v47 = vrot.slane %v7558_v22, 1 }
 0x116   : > { %5603 = vmatprep.subr.bf16.mxu0 %v6867_v34  ;;  %6242 = vmatpush3.bf16.msra.mxu1 %v6874_v53  ;;  %v6881_v53 = vld [vmem:[#allocation4 + $0x1f8] sm:$0xff]   ;;  %v822_v34 = vrot.slane %v7551_v30, 1  ;;  %v827_v30 = vrot.slane %v7588_v4, 1 }
 0x117   : > { %6243 = vmatprep.subr.bf16.mxu1 %v6876_v63 }
 0x118   : > { %v823_v62 = vsel %vm793_vm4, %v821_v47, %v822_v34 }
 0x119   : > { %5604 = vmatpush3.bf16.msra.mxu0 %v6868_v19  ;;  %v830_v19 = vrot.slane %v7598_v23, 1 }
 0x11a   : > { %5605 = vmatprep.subr.bf16.mxu0 %v6869_v46  ;;  %6244 = vmatpush3.bf16.msra.mxu1 %v6876_v63  ;;  %v824_v63 = vrot.slane %v7577_v58, 1  ;;  %v831_v46 = vrot.slane %v7604_v17, 1  ;;  %v836_v17 = vrot.slane %v7626_v25, 1 }
 0x11b   : > { %6166 = vmatmul.mubr.bf16.gmra.mrb[72].mxu0 %v7744_v26  ;;  %6245 = vmatprep.subr.bf16.mxu1 %v6878_v49 }
 0x11c   : > { %6214 = vmatmul.mubr.bf16.gmra.mrb[72].mxu1 %v7733_v45  ;;  %6169 = vmatprep.mubr.bf16.mxu0 %v7747_v38  ;;  %v7773_v40 = vsel %vm793_vm4, %v824_v63, %v825_v48 }
 0x11d   : > { %6217 = vmatprep.mubr.bf16.mxu1 %v7744_v26  ;;  %5606 = vmatpush3.bf16.msra.mxu0 %v6871_v29  ;;  %v7785_v29 = vsel %vm793_vm4, %v830_v19, %v831_v46 }
 0x11e   : > { %5607 = vmatprep.subr.bf16.mxu0 %v6873_v51  ;;  %6246 = vmatpush3.bf16.msra.mxu1 %v6878_v49  ;;  %v7782_v49 = vsel %vm793_vm4, %v827_v30, %v828_v2  ;;  %v833_v51 = vrot.slane %v7616_v16, 1 }
 0x11f   : > { %6247 = vmatprep.subr.bf16.mxu1 %v6880_v3 }
 0x120   : > { %v7796_v31 = vsel %vm793_vm4, %v833_v51, %v834_v27 }
 0x121   : > { %5608 = vmatpush3.bf16.msra.mxu0 %v6875_v6 }
 0x122   : > { %5609 = vmatprep.subr.bf16.mxu0 %v6877_v60  ;;  %6248 = vmatpush3.bf16.msra.mxu1 %v6880_v3  ;;  %v837_v3 = vrot.slane %v7620_v32, 1  ;;  %v7808_v32 = vsel %vm793_vm4, %v839_v39, %v840_v9 }
 0x123   : > { %6170 = vmatmul.mubr.bf16.gmra.mrb[76].mxu0 %v7758_v57  ;;  %6249 = vmatprep.subr.bf16.mxu1 %v6882_v12 }
 0x124   : > { %6218 = vmatmul.mubr.bf16.gmra.mrb[76].mxu1 %v7747_v38  ;;  %6173 = vmatprep.mubr.bf16.mxu0 %v7761_v44  ;;  %v7799_v0 = vsel %vm793_vm4, %v836_v17, %v837_v3 }
 0x125   : > { %6221 = vmatprep.mubr.bf16.mxu1 %v7758_v57  ;;  %5610 = vmatpush3.bf16.msra.mxu0 %v6879_v5 }
 0x126   : > { %5611 = vmatprep.subr.bf16.mxu0 %v6881_v53  ;;  %6250 = vmatpush3.bf16.msra.mxu1 %v6882_v12 }
 0x127   : > { %6251 = vmatprep.subr.bf16.mxu1 %v6884_v13 }
 0x129   : > { %5612 = vmatpush3.bf16.msra.mxu0 %v6883_v42 }
 0x12a   : > { %6252 = vmatpush3.bf16.msra.mxu1 %v6884_v13 }
 0x12b   : > { %6174 = vmatmul.mubr.bf16.gmra.mrb[80].mxu0 %v823_v62 }
 0x12c   : > { %6222 = vmatmul.mubr.bf16.gmra.mrb[80].mxu1 %v7761_v44  ;;  %6177 = vmatprep.mubr.bf16.mxu0 %v7773_v40 }
 0x12d   : > { %6225 = vmatprep.mubr.bf16.mxu1 %v823_v62 }
 0x133   : > { %6178 = vmatmul.mubr.bf16.gmra.mrb[84].mxu0 %v7782_v49 }
 0x134   : > { %6226 = vmatmul.mubr.bf16.gmra.mrb[84].mxu1 %v7773_v40  ;;  %6181 = vmatprep.mubr.bf16.mxu0 %v7785_v29 }
 0x135   : > { %6229 = vmatprep.mubr.bf16.mxu1 %v7782_v49 }
 0x13b   : > { %6182 = vmatmul.mubr.bf16.gmra.mrb[88].mxu0 %v7796_v31 }
 0x13c   : > { %6230 = vmatmul.mubr.bf16.gmra.mrb[88].mxu1 %v7785_v29  ;;  %6185 = vmatprep.mubr.bf16.mxu0 %v7799_v0 }
 0x13d   : > { %6233 = vmatprep.mubr.bf16.mxu1 %v7796_v31 }
 0x143   : > { %6186 = vmatmul.mubr.bf16.gmra.mrb[92].mxu0 %v7808_v32 }
 0x144   : > { %6234 = vmatmul.mubr.bf16.gmra.mrb[92].mxu1 %v7799_v0  ;;  %2112 = vmatprep.mubr.bf16.mxu0 %v7375_v33  ;;  %v9819_v33 = vld [vmem:[#allocation12_spill] sm:$0xff] }
 0x145   : > { %6253 = vmatprep.mubr.bf16.mxu1 %v7709_v18 }
 0x14b   : > { %2113 = vmatmul.mubr.bf16.vlgmr.msra.gmra.mrb[96].mxu0 %v7354_v8 }
 0x14c   : > { %6254 = vmatmul.mubr.bf16.vlgmr.msra.gmra.mrb[64].mxu1 %v7718_v14  ;;  %2120 = vmatprep.mubr.bf16.mxu0 %v9817_v43 }
 0x14d   : > { %6257 = vmatprep.mubr.bf16.mxu1 %v7730_v52 }
 0x153   : > { %2121 = vmatmul.mubr.bf16.gmra.mrb[100].mxu0 %v7360_v11 }
 0x154   : > { %6258 = vmatmul.mubr.bf16.gmra.mrb[68].mxu1 %v7733_v45  ;;  %2128 = vmatprep.mubr.bf16.mxu0 %v9818_v37 }
 0x155   : > { %6261 = vmatprep.mubr.bf16.mxu1 %v7744_v26 }
 0x15b   : > { %2129 = vmatmul.mubr.bf16.gmra.mrb[104].mxu0 %v7379_v36 }
 0x15c   : > { %6262 = vmatmul.mubr.bf16.gmra.mrb[72].mxu1 %v7747_v38  ;;  %2136 = vmatprep.mubr.bf16.mxu0 %v9819_v33  ;;  %v9820_v38 = vld [vmem:[#allocation13_spill] sm:$0xff] }
 0x15d   : > { %6265 = vmatprep.mubr.bf16.mxu1 %v7758_v57 }
 0x15e   : > { %v5341_v8 = vpop.f32.mrb[0].mxu0 }
 0x15f   : > { %v5342_v18 = vpop.f32.mrb[1].mxu0  ;;  %v5477_v14 = vpop.f32.mrb[0].mxu1 }
 0x160   : > { %v5344_v52 = vpop.f32.mrb[2].mxu0  ;;  %v5478_v6 = vpop.f32.mrb[1].mxu1  ;;  %v7826_v11 = vadd.f32 %v5342_v18, %v5341_v8 }
 0x161   : > { %v5345_v45 = vpop.f32.mrb[3].mxu0  ;;  %v7828_v60 = vadd.f32 %v5478_v6, %v5477_v14  ;;  %v5480_v12 = vpop.f32.mrb[2].mxu1 }
 0x162   : > { %v5481_v26 = vpop.f32.mrb[3].mxu1  ;;  %v7830_v5 = vadd.f32 %v5345_v45, %v5344_v52 }
 0x163   : > { %2137 = vmatmul.mubr.bf16.gmra.mrb[108].mxu0 %v7403_v55  ;;  %v7833_v36 = vadd.f32 %v5481_v26, %v5480_v12 }
 0x164   : > { %6266 = vmatmul.mubr.bf16.gmra.mrb[76].mxu1 %v7761_v44  ;;  %2144 = vmatprep.mubr.bf16.mxu0 %v9820_v38 }
 0x165   : > { %6269 = vmatprep.mubr.bf16.mxu1 %v823_v62  ;;  %v9821_v62 = vld [vmem:[#allocation14_spill] sm:$0xff] }
 0x166   : > { %v5347_v57 = vpop.f32.mrb[4].mxu0 }
 0x167   : > { %v5348_v53 = vpop.f32.mrb[5].mxu0  ;;  %v5483_v13 = vpop.f32.mrb[4].mxu1 }
 0x168   : > { %v5350_v47 = vpop.f32.mrb[6].mxu0  ;;  %v5484_v34 = vpop.f32.mrb[5].mxu1  ;;  %v7837_v63 = vadd.f32 %v5348_v53, %v5347_v57 }
 0x169   : > { %v5351_v48 = vpop.f32.mrb[7].mxu0  ;;  %v7839_v42 = vadd.f32 %v5484_v34, %v5483_v13  ;;  %v5486_v30 = vpop.f32.mrb[6].mxu1 }
 0x16a   : > { %v5487_v2 = vpop.f32.mrb[7].mxu1  ;;  %v7841_v55 = vadd.f32 %v5351_v48, %v5350_v47 }
 0x16b   : > { %2145 = vmatmul.mubr.bf16.gmra.mrb[112].mxu0 %v7433_v24  ;;  %v7844_v44 = vadd.f32 %v5487_v2, %v5486_v30 }
 0x16c   : > { %6270 = vmatmul.mubr.bf16.gmra.mrb[80].mxu1 %v7773_v40  ;;  %2152 = vmatprep.mubr.bf16.mxu0 %v9821_v62 }
 0x16d   : > { %6273 = vmatprep.mubr.bf16.mxu1 %v7782_v49 }
 0x16e   : > { %v5353_v19 = vpop.f32.mrb[8].mxu0 }
 0x16f   : > { %v5354_v46 = vpop.f32.mrb[9].mxu0  ;;  %v5489_v51 = vpop.f32.mrb[8].mxu1 }
 0x170   : > { %v5356_v27 = vpop.f32.mrb[10].mxu0  ;;  %v5490_v17 = vpop.f32.mrb[9].mxu1  ;;  %v7849_v3 = vadd.f32 %v5354_v46, %v5353_v19 }
 0x171   : > { %v5357_v39 = vpop.f32.mrb[11].mxu0  ;;  %v7851_v9 = vadd.f32 %v5490_v17, %v5489_v51  ;;  %v5492_v43 = vpop.f32.mrb[10].mxu1 }
 0x172   : > { %v5493_v24 = vpop.f32.mrb[11].mxu1  ;;  %v7853_v37 = vadd.f32 %v5357_v39, %v5356_v27 }
 0x173   : > { %2153 = vmatmul.mubr.bf16.gmra.mrb[116].mxu0 %v7458_v50  ;;  %v7856_v40 = vadd.f32 %v5493_v24, %v5492_v43 }
 0x174   : > { %6274 = vmatmul.mubr.bf16.gmra.mrb[84].mxu1 %v7785_v29  ;;  %2160 = vmatprep.mubr.bf16.mxu0 %v7571_v56 }
 0x175   : > { %6277 = vmatprep.mubr.bf16.mxu1 %v7796_v31 }
 0x176   : > { %v5359_v49 = vpop.f32.mrb[12].mxu0 }
 0x177   : > { %v5360_v33 = vpop.f32.mrb[13].mxu0  ;;  %v5495_v8 = vpop.f32.mrb[12].mxu1 }
 0x178   : > { %v5362_v18 = vpop.f32.mrb[14].mxu0  ;;  %v5496_v14 = vpop.f32.mrb[13].mxu1  ;;  %v7861_v52 = vadd.f32 %v5360_v33, %v5359_v49 }
 0x179   : > { %v5363_v6 = vpop.f32.mrb[15].mxu0  ;;  %v7863_v45 = vadd.f32 %v5496_v14, %v5495_v8  ;;  %v5498_v12 = vpop.f32.mrb[14].mxu1 }
 0x17a   : > { %v5499_v50 = vpop.f32.mrb[15].mxu1  ;;  %v7865_v26 = vadd.f32 %v5363_v6, %v5362_v18 }
 0x17b   : > { %2161 = vmatmul.mubr.bf16.gmra.mrb[120].mxu0 %v7483_v10  ;;  %v7868_v29 = vadd.f32 %v5499_v50, %v5498_v12 }
 0x17c   : > { %6278 = vmatmul.mubr.bf16.gmra.mrb[88].mxu1 %v7799_v0  ;;  %2168 = vmatprep.mubr.bf16.mxu0 %v7642_v28 }
 0x17d   : > { %6281 = vmatprep.mubr.bf16.mxu1 %v7808_v32 }
 0x17e   : > { %v5365_v56 = vpop.f32.mrb[16].mxu0 }
 0x17f   : > { %v5366_v31 = vpop.f32.mrb[17].mxu0  ;;  %v5501_v38 = vpop.f32.mrb[16].mxu1 }
 0x180   : > { %v5368_v57 = vpop.f32.mrb[18].mxu0  ;;  %v5502_v53 = vpop.f32.mrb[17].mxu1  ;;  %v7873_v13 = vadd.f32 %v5366_v31, %v5365_v56 }
 0x181   : > { %v5369_v47 = vpop.f32.mrb[19].mxu0  ;;  %v7875_v34 = vadd.f32 %v5502_v53, %v5501_v38  ;;  %v5504_v48 = vpop.f32.mrb[18].mxu1 }
 0x182   : > { %v5505_v10 = vpop.f32.mrb[19].mxu1  ;;  %v7877_v30 = vadd.f32 %v5369_v47, %v5368_v57 }
 0x183   : > { %2169 = vmatmul.mubr.bf16.gmra.mrb[124].mxu0 %v7513_v41  ;;  %v7880_v2 = vadd.f32 %v5505_v10, %v5504_v48 }
 0x184   : > { %6282 = vmatmul.mubr.bf16.gmra.mrb[92].mxu1 %v7799_v0  ;;  %2176 = vmatprep.mubr.bf16.mxu0 %v7658_v7 }
 0x186   : > { %v5371_v28 = vpop.f32.mrb[20].mxu0 }
 0x187   : > { %v5372_v32 = vpop.f32.mrb[21].mxu0  ;;  %v5507_v62 = vpop.f32.mrb[20].mxu1 }
 0x188   : > { %v5374_v19 = vpop.f32.mrb[22].mxu0  ;;  %v5508_v46 = vpop.f32.mrb[21].mxu1  ;;  %v7884_v51 = vadd.f32 %v5372_v32, %v5371_v28 }
 0x189   : > { %v5375_v27 = vpop.f32.mrb[23].mxu0  ;;  %v7886_v17 = vadd.f32 %v5508_v46, %v5507_v62  ;;  %v5510_v39 = vpop.f32.mrb[22].mxu1 }
 0x18a   : > { %v5511_v43 = vpop.f32.mrb[23].mxu1  ;;  %v7888_v24 = vadd.f32 %v5375_v27, %v5374_v19 }
 0x18b   : > { %2177 = vmatmul.mubr.bf16.gmra.mrb[128].mxu0 %v7558_v22  ;;  %v7891_v41 = vadd.f32 %v5511_v43, %v5510_v39 }
 0x18c   : > { %2184 = vmatprep.mubr.bf16.mxu0 %v7665_v59 }
 0x18e   : > { %v5377_v7 = vpop.f32.mrb[24].mxu0 }
 0x18f   : > { %v5378_v0 = vpop.f32.mrb[25].mxu0  ;;  %v5513_v49 = vpop.f32.mrb[24].mxu1 }
 0x190   : > { %v5380_v33 = vpop.f32.mrb[26].mxu0  ;;  %v5514_v8 = vpop.f32.mrb[25].mxu1  ;;  %v7894_v18 = vadd.f32 %v5378_v0, %v5377_v7 }
 0x191   : > { %v5381_v14 = vpop.f32.mrb[27].mxu0  ;;  %v7896_v6 = vadd.f32 %v5514_v8, %v5513_v49  ;;  %v5516_v12 = vpop.f32.mrb[26].mxu1 }
 0x192   : > { %v5517_v50 = vpop.f32.mrb[27].mxu1  ;;  %v7898_v56 = vadd.f32 %v5381_v14, %v5380_v33 }
 0x193   : > { %2185 = vmatmul.mubr.bf16.gmra.mrb[132].mxu0 %v7577_v58  ;;  %v7901_v22 = vadd.f32 %v5517_v50, %v5516_v12 }
 0x194   : > { %2192 = vmatprep.mubr.bf16.mxu0 %v7672_v35 }
 0x196   : > { %v5383_v59 = vpop.f32.mrb[28].mxu0 }
 0x197   : > { %v5384_v31 = vpop.f32.mrb[29].mxu0  ;;  %v5519_v38 = vpop.f32.mrb[28].mxu1 }
 0x198   : > { %v5386_v57 = vpop.f32.mrb[30].mxu0  ;;  %v5520_v53 = vpop.f32.mrb[29].mxu1  ;;  %v7904_v47 = vadd.f32 %v5384_v31, %v5383_v59 }
 0x199   : > { %v5387_v48 = vpop.f32.mrb[31].mxu0  ;;  %v7906_v10 = vadd.f32 %v5520_v53, %v5519_v38  ;;  %v5522_v28 = vpop.f32.mrb[30].mxu1 }
 0x19a   : > { %v5523_v32 = vpop.f32.mrb[31].mxu1  ;;  %v7908_v62 = vadd.f32 %v5387_v48, %v5386_v57 }
 0x19b   : > { %2193 = vmatmul.mubr.bf16.gmra.mrb[136].mxu0 %v7588_v4  ;;  %v7911_v58 = vadd.f32 %v5523_v32, %v5522_v28 }
 0x19c   : > { %2200 = vmatprep.mubr.bf16.mxu0 %v7679_v21 }
 0x19e   : > { %v5389_v35 = vpop.f32.mrb[32].mxu0 }
 0x19f   : > { %v5390_v19 = vpop.f32.mrb[33].mxu0  ;;  %v5525_v46 = vpop.f32.mrb[32].mxu1 }
 0x1a0   : > { %v7914_v27 = vadd.f32 %v5390_v19, %v5389_v35  ;;  %v5392_v39 = vpop.f32.mrb[34].mxu0  ;;  %v5526_v43 = vpop.f32.mrb[33].mxu1 }
 0x1a1   : > { %v5393_v7 = vpop.f32.mrb[35].mxu0  ;;  %v7916_v0 = vadd.f32 %v5526_v43, %v5525_v46  ;;  %v5528_v49 = vpop.f32.mrb[34].mxu1 }
 0x1a2   : > { %v7918_v33 = vadd.f32 %v5393_v7, %v5392_v39  ;;  %v5529_v8 = vpop.f32.mrb[35].mxu1 }
 0x1a3   : > { %2201 = vmatmul.mubr.bf16.gmra.mrb[140].mxu0 %v7598_v23  ;;  %v7921_v4 = vadd.f32 %v5529_v8, %v5528_v49 }
 0x1a4   : > { %2208 = vmatprep.mubr.bf16.mxu0 %v7686_v1 }
 0x1a6   : > { %v5395_v21 = vpop.f32.mrb[36].mxu0 }
 0x1a7   : > { %v5396_v14 = vpop.f32.mrb[37].mxu0  ;;  %v5531_v12 = vpop.f32.mrb[36].mxu1 }
 0x1a8   : > { %v7924_v50 = vadd.f32 %v5396_v14, %v5395_v21  ;;  %v5398_v59 = vpop.f32.mrb[38].mxu0  ;;  %v5532_v31 = vpop.f32.mrb[37].mxu1 }
 0x1a9   : > { %v5399_v38 = vpop.f32.mrb[39].mxu0  ;;  %v7926_v57 = vadd.f32 %v5532_v31, %v5531_v12  ;;  %v5534_v53 = vpop.f32.mrb[38].mxu1 }
 0x1aa   : > { %v7928_v48 = vadd.f32 %v5399_v38, %v5398_v59  ;;  %v5535_v28 = vpop.f32.mrb[39].mxu1 }
 0x1ab   : > { %2209 = vmatmul.mubr.bf16.gmra.mrb[144].mxu0 %v7616_v16  ;;  %v7931_v23 = vadd.f32 %v5535_v28, %v5534_v53 }
 0x1ac   : > { %2216 = vmatprep.mubr.bf16.mxu0 %v7693_v20 }
 0x1ae   : > { %v5401_v1 = vpop.f32.mrb[40].mxu0 }
 0x1af   : > { %v5402_v32 = vpop.f32.mrb[41].mxu0  ;;  %v5537_v35 = vpop.f32.mrb[40].mxu1 }
 0x1b0   : > { %v7934_v19 = vadd.f32 %v5402_v32, %v5401_v1  ;;  %v5404_v46 = vpop.f32.mrb[42].mxu0  ;;  %v5538_v39 = vpop.f32.mrb[41].mxu1 }
 0x1b1   : > { %v5405_v43 = vpop.f32.mrb[43].mxu0  ;;  %v7936_v7 = vadd.f32 %v5538_v39, %v5537_v35  ;;  %v5540_v49 = vpop.f32.mrb[42].mxu1 }
 0x1b2   : > { %v7938_v8 = vadd.f32 %v5405_v43, %v5404_v46  ;;  %v5541_v21 = vpop.f32.mrb[43].mxu1 }
 0x1b3   : > { %2217 = vmatmul.mubr.bf16.gmra.mrb[148].mxu0 %v7626_v25  ;;  %v7941_v16 = vadd.f32 %v5541_v21, %v5540_v49 }
 0x1b4   : > { %9822 = vst [vmem:[#allocation10_spill] sm:$0xff] %v7938_v8  ;;  %2224 = vmatprep.mubr.bf16.mxu0 %v7700_v15 }
 0x1b5   : > { %9823 = vst [vmem:[#allocation11_spill] sm:$0xff] %v7941_v16 }
 0x1b6   : > { %v5407_v14 = vpop.f32.mrb[44].mxu0 }
 0x1b7   : > { %v5408_v12 = vpop.f32.mrb[45].mxu0  ;;  %v5543_v59 = vpop.f32.mrb[44].mxu1 }
 0x1b8   : > { %v7944_v31 = vadd.f32 %v5408_v12, %v5407_v14  ;;  %v5410_v38 = vpop.f32.mrb[46].mxu0  ;;  %v5544_v53 = vpop.f32.mrb[45].mxu1 }
 0x1b9   : > { %v5411_v28 = vpop.f32.mrb[47].mxu0  ;;  %v7946_v1 = vadd.f32 %v5544_v53, %v5543_v59  ;;  %v5546_v32 = vpop.f32.mrb[46].mxu1 }
 0x1ba   : > { %v7948_v35 = vadd.f32 %v5411_v28, %v5410_v38  ;;  %v5547_v46 = vpop.f32.mrb[47].mxu1 }
 0x1bb   : > { %2225 = vmatmul.mubr.bf16.gmra.mrb[152].mxu0 %v7630_v61  ;;  %v7951_v39 = vadd.f32 %v5547_v46, %v5546_v32 }
 0x1bc   : > { %2232 = vmatprep.mubr.bf16.mxu0 %v7693_v20 }
 0x1bd   : > { %9824 = vst [vmem:[#allocation12_spill] sm:$0xff] %v7951_v39 }
 0x1be   : > { %v5413_v15 = vpop.f32.mrb[48].mxu0 }
 0x1bf   : > { %v5414_v43 = vpop.f32.mrb[49].mxu0  ;;  %v5549_v49 = vpop.f32.mrb[48].mxu1 }
 0x1c0   : > { %v7954_v21 = vadd.f32 %v5414_v43, %v5413_v15  ;;  %v5416_v14 = vpop.f32.mrb[50].mxu0  ;;  %v5550_v12 = vpop.f32.mrb[49].mxu1 }
 0x1c1   : > { %v5417_v54 = vpop.f32.mrb[51].mxu0  ;;  %v7956_v59 = vadd.f32 %v5550_v12, %v5549_v49  ;;  %v5552_v53 = vpop.f32.mrb[50].mxu1 }
 0x1c2   : > { %9825 = vst [vmem:[#allocation13_spill] sm:$0xff] %v7954_v21  ;;  %v7958_v38 = vadd.f32 %v5417_v54, %v5416_v14  ;;  %v5553_v28 = vpop.f32.mrb[51].mxu1 }
 0x1c3   : > { %9826 = vst [vmem:[#allocation14_spill] sm:$0xff] %v7956_v59  ;;  %2233 = vmatmul.mubr.bf16.gmra.mrb[156].mxu0 %v7626_v25  ;;  %v7961_v61 = vadd.f32 %v5553_v28, %v5552_v53 }
 0x1c4   : > { %9827 = vst [vmem:[#allocation15_spill] sm:$0xff] %v7958_v38 }
 0x1c5   : > { %9828 = vst [vmem:[#allocation16_spill] sm:$0xff] %v7961_v61 }
 0x1c6   : > { %v5419_v32 = vpop.f32.mrb[52].mxu0 }
 0x1c7   : > { %v5420_v20 = vpop.f32.mrb[53].mxu0  ;;  %v5555_v46 = vpop.f32.mrb[52].mxu1 }
 0x1c8   : > { %v7963_v16 = vadd.f32 %v5420_v20, %v5419_v32  ;;  %v5422_v15 = vpop.f32.mrb[54].mxu0  ;;  %v5556_v43 = vpop.f32.mrb[53].mxu1 }
 0x1c9   : > { %v5423_v21 = vpop.f32.mrb[55].mxu0  ;;  %v7965_v39 = vadd.f32 %v5556_v43, %v5555_v46  ;;  %v5558_v49 = vpop.f32.mrb[54].mxu1 }
 0x1ca   : > { %9829 = vst [vmem:[#allocation17_spill] sm:$0xff] %v7963_v16  ;;  %v7967_v12 = vadd.f32 %v5423_v21, %v5422_v15  ;;  %v5559_v54 = vpop.f32.mrb[55].mxu1 }
 0x1cb   : > { %9830 = vst [vmem:[#allocation18_spill] sm:$0xff] %v7965_v39  ;;  %v7969_v14 = vadd.f32 %v5559_v54, %v5558_v49 }
 0x1cc   : > { %9831 = vst [vmem:[#allocation19_spill] sm:$0xff] %v7967_v12 }
 0x1cd   : > { %9832 = vst [vmem:[#allocation20_spill] sm:$0xff] %v7969_v14 }
 0x1ce   : > { %v5425_v38 = vpop.f32.mrb[56].mxu0 }
 0x1cf   : > { %v5426_v25 = vpop.f32.mrb[57].mxu0  ;;  %v5561_v53 = vpop.f32.mrb[56].mxu1 }
 0x1d0   : > { %v7971_v28 = vadd.f32 %v5426_v25, %v5425_v38  ;;  %v5428_v61 = vpop.f32.mrb[58].mxu0  ;;  %v5562_v59 = vpop.f32.mrb[57].mxu1 }
 0x1d1   : > { %v5429_v32 = vpop.f32.mrb[59].mxu0  ;;  %v7973_v20 = vadd.f32 %v5562_v59, %v5561_v53  ;;  %v5564_v16 = vpop.f32.mrb[58].mxu1 }
 0x1d2   : > { %9833 = vst [vmem:[#allocation21_spill] sm:$0xff] %v7971_v28  ;;  %v7975_v8 = vadd.f32 %v5429_v32, %v5428_v61  ;;  %v5565_v46 = vpop.f32.mrb[59].mxu1 }
 0x1d3   : > { %v7977_v43 = vadd.f32 %v5565_v46, %v5564_v16 }
 0x1d5   : > { %9834 = vst [vmem:[#allocation22_spill] sm:$0xff] %v7977_v43 }
 0x1d6   : > { %v5431_v21 = vpop.f32.mrb[60].mxu0 }
 0x1d7   : > { %v5432_v15 = vpop.f32.mrb[61].mxu0  ;;  %v5567_v49 = vpop.f32.mrb[60].mxu1 }
 0x1d8   : > { %v7979_v54 = vadd.f32 %v5432_v15, %v5431_v21  ;;  %v5434_v14 = vpop.f32.mrb[62].mxu0  ;;  %v5568_v12 = vpop.f32.mrb[61].mxu1 }
 0x1d9   : > { %v5435_v38 = vpop.f32.mrb[63].mxu0  ;;  %v7981_v25 = vadd.f32 %v5568_v12, %v5567_v49  ;;  %v5570_v28 = vpop.f32.mrb[62].mxu1 }
 0x1da   : > { %v7983_v39 = vadd.f32 %v5435_v38, %v5434_v14  ;;  %v5571_v59 = vpop.f32.mrb[63].mxu1 }
 0x1db   : > { %v7985_v53 = vadd.f32 %v5571_v59, %v5570_v28 }
 0x1de   : > { %v6159_v61 = vpop.f32.mrb[64].mxu0 }
 0x1df   : > { %v1303_v16 = vadd.f32 %v6159_v61, %v7837_v63  ;;  %v1294_v32 = vpop.f32.mrb[65].mxu0 }
 0x1e0   : > { %v1295_v46 = vadd.f32 %v7826_v11, %v1294_v32  ;;  %v6160_v43 = vpop.f32.mrb[66].mxu0 }
 0x1e1   : > { %v7990_v21 = vadd.f32 %v7839_v42, %v1303_v16  ;;  %v1306_v15 = vadd.f32 %v6160_v43, %v7841_v55  ;;  %v1297_v12 = vpop.f32.mrb[67].mxu0 }
 0x1e2   : > { %v7994_v49 = vadd.f32 %v7828_v60, %v1295_v46  ;;  %v1298_v14 = vadd.f32 %v7830_v5, %v1297_v12 }
 0x1e3   : > { %v7998_v28 = vadd.f32 %v7844_v44, %v1306_v15 }
 0x1e4   : > { %v8001_v63 = vadd.f32 %v7833_v36, %v1298_v14 }
 0x1e6   : > { %v6163_v38 = vpop.f32.mrb[68].mxu0 }
 0x1e7   : > { %v1319_v11 = vadd.f32 %v6163_v38, %v7861_v52  ;;  %v1310_v59 = vpop.f32.mrb[69].mxu0 }
 0x1e8   : > { %v1311_v42 = vadd.f32 %v7849_v3, %v1310_v59  ;;  %v6164_v61 = vpop.f32.mrb[70].mxu0 }
 0x1e9   : > { %v8006_v55 = vadd.f32 %v7863_v45, %v1319_v11  ;;  %v1322_v60 = vadd.f32 %v6164_v61, %v7865_v26  ;;  %v1313_v43 = vpop.f32.mrb[71].mxu0 }
 0x1ea   : > { %v8010_v5 = vadd.f32 %v7851_v9, %v1311_v42  ;;  %v1314_v44 = vadd.f32 %v7853_v37, %v1313_v43 }
 0x1eb   : > { %v8014_v36 = vadd.f32 %v7868_v29, %v1322_v60 }
 0x1ec   : > { %v8017_v52 = vadd.f32 %v7856_v40, %v1314_v44 }
 0x1ee   : > { %v6167_v16 = vpop.f32.mrb[72].mxu0 }
 0x1ef   : > { %v1335_v3 = vadd.f32 %v6167_v16, %v7884_v51  ;;  %v1326_v32 = vpop.f32.mrb[73].mxu0 }
 0x1f0   : > { %v1327_v45 = vadd.f32 %v7873_v13, %v1326_v32  ;;  %v6168_v46 = vpop.f32.mrb[74].mxu0 }
 0x1f1   : > { %v8022_v26 = vadd.f32 %v7886_v17, %v1335_v3  ;;  %v1338_v9 = vadd.f32 %v6168_v46, %v7888_v24  ;;  %v1329_v15 = vpop.f32.mrb[75].mxu0  ;;  %v9837_v46 = vld [vmem:[#allocation11_spill] sm:$0xff] }
 0x1f2   : > { %v8026_v37 = vadd.f32 %v7875_v34, %v1327_v45  ;;  %v1330_v29 = vadd.f32 %v7877_v30, %v1329_v15 }
 0x1f3   : > { %v8030_v40 = vadd.f32 %v7891_v41, %v1338_v9 }
 0x1f4   : > { %v8033_v51 = vadd.f32 %v7880_v2, %v1330_v29 }
 0x1f6   : > { %v6171_v12 = vpop.f32.mrb[76].mxu0 }
 0x1f7   : > { %v1351_v13 = vadd.f32 %v6171_v12, %v7904_v47  ;;  %v1342_v14 = vpop.f32.mrb[77].mxu0 }
 0x1f8   : > { %v1343_v17 = vadd.f32 %v7894_v18, %v1342_v14  ;;  %v6172_v38 = vpop.f32.mrb[78].mxu0 }
 0x1f9   : > { %v8038_v24 = vadd.f32 %v7906_v10, %v1351_v13  ;;  %v1354_v34 = vadd.f32 %v6172_v38, %v7908_v62  ;;  %v1345_v11 = vpop.f32.mrb[79].mxu0 }
 0x1fa   : > { %v8042_v30 = vadd.f32 %v7896_v6, %v1343_v17  ;;  %v1346_v41 = vadd.f32 %v7898_v56, %v1345_v11 }
 0x1fb   : > { %v8046_v2 = vadd.f32 %v7911_v58, %v1354_v34  ;;  %v9842_v34 = vld [vmem:[#allocation14_spill] sm:$0xff] }
 0x1fc   : > { %v8049_v47 = vadd.f32 %v7901_v22, %v1346_v41  ;;  %v9843_v41 = vld [vmem:[#allocation15_spill] sm:$0xff] }
 0x1fe   : > { %v6175_v59 = vpop.f32.mrb[80].mxu0 }
 0x1ff   : > { %v1367_v18 = vadd.f32 %v6175_v59, %v7924_v50  ;;  %v1358_v42 = vpop.f32.mrb[81].mxu0 }
 0x200   : > { %v1359_v10 = vadd.f32 %v7914_v27, %v1358_v42  ;;  %v6176_v61 = vpop.f32.mrb[82].mxu0 }
 0x201   : > { %v8054_v62 = vadd.f32 %v7926_v57, %v1367_v18  ;;  %v1370_v6 = vadd.f32 %v6176_v61, %v7928_v48  ;;  %v1361_v60 = vpop.f32.mrb[83].mxu0  ;;  %v9844_v18 = vld [vmem:[#allocation20_spill] sm:$0xff] }
 0x202   : > { %v8058_v56 = vadd.f32 %v7916_v0, %v1359_v10  ;;  %v1362_v58 = vadd.f32 %v7918_v33, %v1361_v60  ;;  %v9845_v10 = vld [vmem:[#allocation16_spill] sm:$0xff] }
 0x203   : > { %v8062_v22 = vadd.f32 %v7931_v23, %v1370_v6  ;;  %v9835_v23 = vld [vmem:[#allocation10_spill] sm:$0xff] }
 0x204   : > { %v8065_v50 = vadd.f32 %v7921_v4, %v1362_v58  ;;  %v9836_v4 = vld [vmem:[#allocation12_spill] sm:$0xff] }
 0x206   : > { %v6179_v43 = vpop.f32.mrb[84].mxu0 }
 0x207   : > { %v1383_v27 = vadd.f32 %v6179_v43, %v7944_v31  ;;  %v1374_v44 = vpop.f32.mrb[85].mxu0  ;;  %v9846_v43 = vld [vmem:[#allocation21_spill] sm:$0xff] }
 0x208   : > { %v1375_v57 = vadd.f32 %v7934_v19, %v1374_v44  ;;  %v6180_v16 = vpop.f32.mrb[86].mxu0  ;;  %v9838_v19 = vld [vmem:[#allocation17_spill] sm:$0xff] }
 0x209   : > { %v8070_v48 = vadd.f32 %v7946_v1, %v1383_v27  ;;  %v1386_v0 = vadd.f32 %v6180_v16, %v7948_v35  ;;  %v1377_v3 = vpop.f32.mrb[87].mxu0  ;;  %v9839_v1 = vld [vmem:[#allocation13_spill] sm:$0xff]  ;;  %v9840_v35 = vld [vmem:[#allocation18_spill] sm:$0xff] }
 0x20a   : > { %v8074_v33 = vadd.f32 %v7936_v7, %v1375_v57  ;;  %v1378_v32 = vadd.f32 %v9835_v23, %v1377_v3  ;;  %v9841_v7 = vld [vmem:[#allocation19_spill] sm:$0xff] }
 0x20b   : > { %v8078_v45 = vadd.f32 %v9836_v4, %v1386_v0  ;;  %v9847_v4 = vld [vmem:[#allocation22_spill] sm:$0xff] }
 0x20c   : > { %v8081_v31 = vadd.f32 %v9837_v46, %v1378_v32 }
 0x20e   : > { %v6183_v9 = vpop.f32.mrb[88].mxu0 }
 0x20f   : > { %v1399_v15 = vadd.f32 %v6183_v9, %v9838_v19  ;;  %v1390_v29 = vpop.f32.mrb[89].mxu0 }
 0x210   : > { %v1391_v12 = vadd.f32 %v9839_v1, %v1390_v29  ;;  %v6184_v13 = vpop.f32.mrb[90].mxu0 }
 0x211   : > { %v8086_v14 = vadd.f32 %v9840_v35, %v1399_v15  ;;  %v1402_v17 = vadd.f32 %v6184_v13, %v9841_v7  ;;  %v1393_v38 = vpop.f32.mrb[91].mxu0 }
 0x212   : > { %v8090_v11 = vadd.f32 %v9842_v34, %v1391_v12  ;;  %v1394_v59 = vadd.f32 %v9843_v41, %v1393_v38 }
 0x213   : > { %v8094_v42 = vadd.f32 %v9844_v18, %v1402_v17 }
 0x214   : > { %v8097_v61 = vadd.f32 %v9845_v10, %v1394_v59 }
 0x216   : > { %v6187_v6 = vpop.f32.mrb[92].mxu0 }
 0x217   : > { %v1415_v60 = vadd.f32 %v6187_v6, %v7979_v54  ;;  %v1406_v58 = vpop.f32.mrb[93].mxu0 }
 0x218   : > { %v1407_v27 = vadd.f32 %v9846_v43, %v1406_v58  ;;  %v6188_v44 = vpop.f32.mrb[94].mxu0 }
 0x219   : > { %v8102_v57 = vadd.f32 %v7981_v25, %v1415_v60  ;;  %v1418_v16 = vadd.f32 %v6188_v44, %v7983_v39  ;;  %v1409_v0 = vpop.f32.mrb[95].mxu0 }
 0x21a   : > { %v8106_v3 = vadd.f32 %v7973_v20, %v1407_v27  ;;  %v1410_v23 = vadd.f32 %v7975_v8, %v1409_v0 }
 0x21b   : > { %v8110_v32 = vadd.f32 %v7985_v53, %v1418_v16 }
 0x21c   : > { %v8113_v54 = vadd.f32 %v9847_v4, %v1410_v23 }
 0x21e   : > { %v5613_v46 = vpop.f32.mrb[96].mxu0 }
 0x21f   : > { %v6255_v9 = vpop.f32.mrb[64].mxu1  ;;  %v5614_v19 = vpop.f32.mrb[97].mxu0 }
 0x220   : > { %v5615_v15 = vadd.f32 %v5614_v19, %v5613_v46  ;;  %v2275_v25 = vpop.f32.mrb[65].mxu1  ;;  %v5616_v29 = vpop.f32.mrb[98].mxu0 }
 0x221   : > { %v6256_v1 = vpop.f32.mrb[66].mxu1  ;;  %v5617_v39 = vpop.f32.mrb[99].mxu0 }
 0x222   : > { %v6435_v12 = vadd.f32 %v5615_v15, %v7994_v49  ;;  %v5618_v20 = vadd.f32 %v5617_v39, %v5616_v29  ;;  %v2278_v13 = vpop.f32.mrb[67].mxu1 }
 0x224   : > { %v6436_v35 = vadd.f32 %v6435_v12, %v2275_v25  ;;  %v6443_v8 = vadd.f32 %v5618_v20, %v8001_v63 }
 0x226   : > { %v6444_v53 = vadd.f32 %v6443_v8, %v2278_v13  ;;  %v5619_v7 = vpop.f32.mrb[100].mxu0 }
 0x227   : > { %v6259_v17 = vpop.f32.mrb[68].mxu1  ;;  %v5620_v38 = vpop.f32.mrb[101].mxu0 }
 0x228   : > { %v5621_v34 = vadd.f32 %v5620_v38, %v5619_v7  ;;  %v2291_v41 = vpop.f32.mrb[69].mxu1  ;;  %v5622_v59 = vpop.f32.mrb[102].mxu0 }
 0x229   : > { %v6260_v18 = vpop.f32.mrb[70].mxu1  ;;  %v5623_v10 = vpop.f32.mrb[103].mxu0 }
 0x22a   : > { %v6431_v6 = vadd.f32 %v5621_v34, %v7990_v21  ;;  %v5624_v60 = vadd.f32 %v5623_v10, %v5622_v59  ;;  %v2294_v58 = vpop.f32.mrb[71].mxu1 }
 0x22c   : > { %v6432_v43 = vadd.f32 %v6431_v6, %v6255_v9  ;;  %v6439_v49 = vadd.f32 %v5624_v60, %v7998_v28 }
 0x22e   : > { %v6440_v27 = vadd.f32 %v6439_v49, %v6256_v1  ;;  %v5625_v44 = vpop.f32.mrb[104].mxu0 }
 0x22f   : > { %v8119_v16 = vpop.f32.mrb[72].mxu1  ;;  %v5626_v63 = vpop.f32.mrb[105].mxu0 }
 0x230   : > { %v5627_v0 = vadd.f32 %v5626_v63, %v5625_v44  ;;  %v2307_v23 = vpop.f32.mrb[73].mxu1  ;;  %v5628_v4 = vpop.f32.mrb[106].mxu0 }
 0x231   : > { %v8121_v46 = vpop.f32.mrb[74].mxu1  ;;  %v5629_v19 = vpop.f32.mrb[107].mxu0 }
 0x232   : > { %v6451_v15 = vadd.f32 %v5627_v0, %v8010_v5  ;;  %v5630_v25 = vadd.f32 %v5629_v19, %v5628_v4  ;;  %v2310_v21 = vpop.f32.mrb[75].mxu1 }
 0x234   : > { %v6452_v29 = vadd.f32 %v6451_v15, %v2291_v41  ;;  %v6459_v9 = vadd.f32 %v5630_v25, %v8017_v52  ;;  %v8137_v52 = vld [vmem:[%s9786_s2] ss:$0 sm:$0xff] }
 0x235   : > { %v8140_v41 = vadd.f32 %v6444_v53, %v8137_v52  ;;  %v8144_v60 = vadd.f32 %v6436_v35, %v8137_v52 }
 0x236   : > { %v6460_v39 = vadd.f32 %v6459_v9, %v2294_v58  ;;  %v5631_v28 = vpop.f32.mrb[108].mxu0  ;;  %v8147_v58 = vadd.f32 %v6432_v43, %v8137_v52  ;;  %v8159_v43 = vadd.f32 %v6440_v27, %v8137_v52  ;;  %v8165_v9 = vadd.f32 %v6452_v29, %v8137_v52 }
 0x237   : > { %v8125_v1 = vpop.f32.mrb[76].mxu1  ;;  %v5632_v12 = vpop.f32.mrb[109].mxu0  ;;  %v2472_v0 = vadd.f32 %v8140_v41, %v8144_v60 }
 0x238   : > { %v5633_v20 = vadd.f32 %v5632_v12, %v5631_v28  ;;  %v8127_v13 = vpop.f32.mrb[77].mxu1  ;;  %v5634_v8 = vpop.f32.mrb[110].mxu0 }
 0x239   : > { %v8129_v7 = vpop.f32.mrb[78].mxu1  ;;  %v5635_v38 = vpop.f32.mrb[111].mxu0  ;;  %v2473_v35 = vadd.f32 %v2472_v0, %v8147_v58 }
 0x23a   : > { %v6447_v34 = vadd.f32 %v5633_v20, %v8006_v55  ;;  %v5636_v5 = vadd.f32 %v5635_v38, %v5634_v8  ;;  %v8132_v59 = vpop.f32.mrb[79].mxu1 }
 0x23b   : > { %v2474_v20 = vadd.f32 %v2473_v35, %v8159_v43 }
 0x23c   : > { %v6448_v10 = vadd.f32 %v6447_v34, %v6259_v17  ;;  %v6455_v6 = vadd.f32 %v5636_v5, %v8014_v36 }
 0x23d   : > { %v2475_v27 = vadd.f32 %v2474_v20, %v8165_v9 }
 0x23e   : > { %v6456_v55 = vadd.f32 %v6455_v6, %v6260_v18  ;;  %v5637_v49 = vpop.f32.mrb[112].mxu0 }
 0x23f   : > { %v8149_v44 = vpop.f32.mrb[80].mxu1  ;;  %v5638_v63 = vpop.f32.mrb[113].mxu0 }
 0x240   : > { %v5639_v4 = vadd.f32 %v5638_v63, %v5637_v49  ;;  %v8153_v53 = vpop.f32.mrb[81].mxu1  ;;  %v5640_v17 = vpop.f32.mrb[114].mxu0 }
 0x241   : > { %v8155_v19 = vpop.f32.mrb[82].mxu1  ;;  %v5641_v36 = vpop.f32.mrb[115].mxu0 }
 0x242   : > { %v6467_v18 = vadd.f32 %v5639_v4, %v8026_v37  ;;  %v5642_v15 = vadd.f32 %v5641_v36, %v5640_v17  ;;  %v8162_v25 = vpop.f32.mrb[83].mxu1  ;;  %v8173_v37 = vadd.f32 %v6460_v39, %v8137_v52 }
 0x244   : > { %v6468_v28 = vadd.f32 %v6467_v18, %v2307_v23  ;;  %v6475_v12 = vadd.f32 %v5642_v15, %v8033_v51  ;;  %v8180_v51 = vadd.f32 %v6448_v10, %v8137_v52  ;;  %v2476_v17 = vadd.f32 %v2475_v27, %v8173_v37 }
 0x245   : > { %v8190_v18 = vadd.f32 %v6456_v55, %v8137_v52 }
 0x246   : > { %v6476_v8 = vadd.f32 %v6475_v12, %v2310_v21  ;;  %v5643_v38 = vpop.f32.mrb[116].mxu0  ;;  %v2477_v35 = vadd.f32 %v2476_v17, %v8180_v51  ;;  %v8196_v20 = vadd.f32 %v6468_v28, %v8137_v52 }
 0x247   : > { %v8169_v34 = vpop.f32.mrb[84].mxu1  ;;  %v5644_v5 = vpop.f32.mrb[117].mxu0 }
 0x248   : > { %v5645_v6 = vadd.f32 %v5644_v5, %v5643_v38  ;;  %v8175_v49 = vpop.f32.mrb[85].mxu1  ;;  %v5646_v29 = vpop.f32.mrb[118].mxu0 }
 0x249   : > { %v8177_v63 = vpop.f32.mrb[86].mxu1  ;;  %v5647_v23 = vpop.f32.mrb[119].mxu0 }
 0x24a   : > { %v6463_v21 = vadd.f32 %v5645_v6, %v8022_v26  ;;  %v5648_v0 = vadd.f32 %v5647_v23, %v5646_v29  ;;  %v8183_v4 = vpop.f32.mrb[87].mxu1  ;;  %v2478_v6 = vadd.f32 %v2477_v35, %v8190_v18 }
 0x24c   : > { %v6464_v39 = vadd.f32 %v6463_v21, %v8119_v16  ;;  %v6471_v36 = vadd.f32 %v5648_v0, %v8030_v40  ;;  %v2479_v23 = vadd.f32 %v2478_v6, %v8196_v20  ;;  %v8208_v21 = vadd.f32 %v6476_v8, %v8137_v52 }
 0x24e   : > { %v6472_v15 = vadd.f32 %v6471_v36, %v8121_v46  ;;  %v5649_v10 = vpop.f32.mrb[120].mxu0  ;;  %v8213_v17 = vadd.f32 %v6464_v39, %v8137_v52 }
 0x24f   : > { %v8193_v12 = vpop.f32.mrb[88].mxu1  ;;  %v5650_v26 = vpop.f32.mrb[121].mxu0 }
 0x250   : > { %v5651_v38 = vadd.f32 %v5650_v26, %v5649_v10  ;;  %v8198_v5 = vpop.f32.mrb[89].mxu1  ;;  %v5652_v16 = vpop.f32.mrb[122].mxu0  ;;  %9848 = vst [vmem:[#allocation10_spill] sm:$0xff] %v8213_v17  ;;  %v2480_v26 = vadd.f32 %v2479_v23, %v8208_v21  ;;  %v8225_v39 = vadd.f32 %v6472_v15, %v8137_v52 }
 0x251   : > { %v8200_v27 = vpop.f32.mrb[90].mxu1  ;;  %v5653_v40 = vpop.f32.mrb[123].mxu0 }
 0x252   : > { %v6483_v55 = vadd.f32 %v5651_v38, %v8042_v30  ;;  %v5654_v29 = vadd.f32 %v5653_v40, %v5652_v16  ;;  %v8204_v46 = vpop.f32.mrb[91].mxu1 }
 0x254   : > { %v6484_v28 = vadd.f32 %v6483_v55, %v8127_v13  ;;  %v6491_v0 = vadd.f32 %v5654_v29, %v8049_v47  ;;  %v2481_v47 = vadd.f32 %v2480_v26, %v8213_v17 }
 0x256   : > { %v6492_v36 = vadd.f32 %v6491_v0, %v8132_v59  ;;  %v5655_v35 = vpop.f32.mrb[124].mxu0  ;;  %v8231_v29 = vadd.f32 %v6484_v28, %v8137_v52 }
 0x257   : > { %v8216_v10 = vpop.f32.mrb[92].mxu1  ;;  %v5656_v30 = vpop.f32.mrb[125].mxu0 }
 0x258   : > { %v5657_v38 = vadd.f32 %v5656_v30, %v5655_v35  ;;  %v8219_v16 = vpop.f32.mrb[93].mxu1  ;;  %v5658_v8 = vpop.f32.mrb[126].mxu0  ;;  %v2482_v35 = vadd.f32 %v2481_v47, %v8225_v39 }
 0x259   : > { %v8221_v40 = vpop.f32.mrb[94].mxu1  ;;  %v5659_v13 = vpop.f32.mrb[127].mxu0 }
 0x25a   : > { %v6479_v59 = vadd.f32 %v5657_v38, %v8038_v24  ;;  %v5660_v6 = vadd.f32 %v5659_v13, %v5658_v8  ;;  %v8228_v55 = vpop.f32.mrb[95].mxu1  ;;  %v2483_v15 = vadd.f32 %v2482_v35, %v8231_v29  ;;  %v8239_v24 = vadd.f32 %v6492_v36, %v8137_v52 }
 0x25c   : > { %v6480_v23 = vadd.f32 %v6479_v59, %v8125_v1  ;;  %v6487_v0 = vadd.f32 %v5660_v6, %v8046_v2  ;;  %v2484_v47 = vadd.f32 %v2483_v15, %v8239_v24 }
 0x25e   : > { %v6488_v30 = vadd.f32 %v6487_v0, %v8129_v7  ;;  %v5661_v26 = vpop.f32.mrb[128].mxu0  ;;  %v8242_v28 = vadd.f32 %v6480_v23, %v8137_v52 }
 0x25f   : > { %v5662_v17 = vpop.f32.mrb[129].mxu0 }
 0x260   : > { %v5663_v38 = vadd.f32 %v5662_v17, %v5661_v26  ;;  %v5664_v8 = vpop.f32.mrb[130].mxu0  ;;  %v2485_v6 = vadd.f32 %v2484_v47, %v8242_v28  ;;  %v8250_v36 = vadd.f32 %v6488_v30, %v8137_v52 }
 0x261   : > { %v5665_v13 = vpop.f32.mrb[131].mxu0 }
 0x262   : > { %v6499_v1 = vadd.f32 %v5663_v38, %v8058_v56  ;;  %v5666_v2 = vadd.f32 %v5665_v13, %v5664_v8  ;;  %v2486_v15 = vadd.f32 %v2485_v6, %v8250_v36 }
 0x264   : > { %v6500_v7 = vadd.f32 %v6499_v1, %v8153_v53  ;;  %v6507_v59 = vadd.f32 %v5666_v2, %v8065_v50 }
 0x266   : > { %v6508_v17 = vadd.f32 %v6507_v59, %v8162_v25  ;;  %v5667_v0 = vpop.f32.mrb[132].mxu0  ;;  %v8254_v23 = vadd.f32 %v6500_v7, %v8137_v52 }
 0x267   : > { %v5668_v35 = vpop.f32.mrb[133].mxu0 }
 0x268   : > { %v5669_v56 = vadd.f32 %v5668_v35, %v5667_v0  ;;  %v5670_v26 = vpop.f32.mrb[134].mxu0  ;;  %v2487_v8 = vadd.f32 %v2486_v15, %v8254_v23  ;;  %v8260_v30 = vadd.f32 %v6508_v17, %v8137_v52 }
 0x269   : > { %v5671_v38 = vpop.f32.mrb[135].mxu0 }
 0x26a   : > { %v6495_v53 = vadd.f32 %v5669_v56, %v8054_v62  ;;  %v5672_v50 = vadd.f32 %v5671_v38, %v5670_v26  ;;  %v2488_v59 = vadd.f32 %v2487_v8, %v8260_v30 }
 0x26c   : > { %v6496_v25 = vadd.f32 %v6495_v53, %v8149_v44  ;;  %v6503_v13 = vadd.f32 %v5672_v50, %v8062_v22 }
 0x26e   : > { %v8265_v1 = vadd.f32 %v6496_v25, %v8137_v52  ;;  %v6504_v2 = vadd.f32 %v6503_v13, %v8155_v19  ;;  %v5673_v47 = vpop.f32.mrb[136].mxu0 }
 0x26f   : > { %v5674_v7 = vpop.f32.mrb[137].mxu0 }
 0x270   : > { %v5675_v62 = vadd.f32 %v5674_v7, %v5673_v47  ;;  %v5676_v6 = vpop.f32.mrb[138].mxu0  ;;  %v2489_v35 = vadd.f32 %v2488_v59, %v8265_v1  ;;  %v8271_v17 = vadd.f32 %v6504_v2, %v8137_v52 }
 0x271   : > { %v5677_v0 = vpop.f32.mrb[139].mxu0 }
 0x272   : > { %v6515_v44 = vadd.f32 %v5675_v62, %v8074_v33  ;;  %v5678_v22 = vadd.f32 %v5677_v0, %v5676_v6  ;;  %v2490_v19 = vadd.f32 %v2489_v35, %v8271_v17 }
 0x274   : > { %v6516_v56 = vadd.f32 %v6515_v44, %v8175_v49  ;;  %v6523_v26 = vadd.f32 %v5678_v22, %v8081_v31 }
 0x276   : > { %v8278_v38 = vadd.f32 %v6516_v56, %v8137_v52  ;;  %v6524_v15 = vadd.f32 %v6523_v26, %v8183_v4  ;;  %v5679_v53 = vpop.f32.mrb[140].mxu0 }
 0x277   : > { %v5680_v50 = vpop.f32.mrb[141].mxu0 }
 0x278   : > { %v2491_v8 = vadd.f32 %v2490_v19, %v8278_v38  ;;  %v8283_v25 = vadd.f32 %v6524_v15, %v8137_v52  ;;  %v5681_v33 = vadd.f32 %v5680_v50, %v5679_v53  ;;  %v5682_v13 = vpop.f32.mrb[142].mxu0 }
 0x279   : > { %v5683_v2 = vpop.f32.mrb[143].mxu0 }
 0x27a   : > { %v2492_v49 = vadd.f32 %v2491_v8, %v8283_v25  ;;  %v6511_v31 = vadd.f32 %v5681_v33, %v8070_v48  ;;  %v5684_v47 = vadd.f32 %v5683_v2, %v5682_v13 }
 0x27c   : > { %v6512_v7 = vadd.f32 %v6511_v31, %v8169_v34  ;;  %v6519_v59 = vadd.f32 %v5684_v47, %v8078_v45 }
 0x27e   : > { %v8290_v4 = vadd.f32 %v6512_v7, %v8137_v52  ;;  %v6520_v62 = vadd.f32 %v6519_v59, %v8177_v63  ;;  %v5685_v6 = vpop.f32.mrb[144].mxu0 }
 0x27f   : > { %v5686_v0 = vpop.f32.mrb[145].mxu0 }
 0x280   : > { %v2493_v35 = vadd.f32 %v2492_v49, %v8290_v4  ;;  %v8295_v44 = vadd.f32 %v6520_v62, %v8137_v52  ;;  %v5687_v22 = vadd.f32 %v5686_v0, %v5685_v6  ;;  %v5688_v56 = vpop.f32.mrb[146].mxu0 }
 0x281   : > { %v5689_v48 = vpop.f32.mrb[147].mxu0 }
 0x282   : > { %v2494_v26 = vadd.f32 %v2493_v35, %v8295_v44  ;;  %v6531_v34 = vadd.f32 %v5687_v22, %v8090_v11  ;;  %v5690_v45 = vadd.f32 %v5689_v48, %v5688_v56 }
 0x284   : > { %v6532_v19 = vadd.f32 %v6531_v34, %v8198_v5  ;;  %v6539_v15 = vadd.f32 %v5690_v45, %v8097_v61 }
 0x286   : > { %v8302_v63 = vadd.f32 %v6532_v19, %v8137_v52  ;;  %v6540_v53 = vadd.f32 %v6539_v15, %v8204_v46  ;;  %v5691_v50 = vpop.f32.mrb[148].mxu0 }
 0x287   : > { %v5692_v8 = vpop.f32.mrb[149].mxu0 }
 0x288   : > { %v2495_v33 = vadd.f32 %v2494_v26, %v8302_v63  ;;  %v8307_v13 = vadd.f32 %v6540_v53, %v8137_v52  ;;  %v5693_v2 = vadd.f32 %v5692_v8, %v5691_v50  ;;  %v5694_v49 = vpop.f32.mrb[150].mxu0 }
 0x289   : > { %v5695_v11 = vpop.f32.mrb[151].mxu0 }
 0x28a   : > { %v2496_v31 = vadd.f32 %v2495_v33, %v8307_v13  ;;  %v6527_v5 = vadd.f32 %v5693_v2, %v8086_v14  ;;  %v5696_v61 = vadd.f32 %v5695_v11, %v5694_v49  ;;  %v6887_v2 = vld [vmem:[#allocation6 + $0x140] sm:$0xff]  }
 0x28b   : > { %6285 = vmatprep.subr.bf16.mxu1 %v6887_v2 }
 0x28c   : > { %v6528_v47 = vadd.f32 %v6527_v5, %v8193_v12  ;;  %v6535_v7 = vadd.f32 %v5696_v61, %v8094_v42  ;;  %6286 = vmatpush3.bf16.msra.mxu1 %v6887_v2  ;;  %v6888_v5 = vld [vmem:[#allocation6 + $0x148] sm:$0xff]  }
 0x28d   : > { %6287 = vmatprep.subr.bf16.mxu1 %v6888_v5  ;;  %v6904_v2 = vld [vmem:[#allocation6 + $0xe8] sm:$0xff]  }
 0x28e   : > { %v8314_v46 = vadd.f32 %v6528_v47, %v8137_v52  ;;  %v6536_v59 = vadd.f32 %v6535_v7, %v8200_v27  ;;  %v5697_v62 = vpop.f32.mrb[152].mxu0  ;;  %v6886_v7 = vld [vmem:[#allocation6 + $0xc0] sm:$0xff]  }
 0x28f   : > { %v5698_v6 = vpop.f32.mrb[153].mxu0 }
 0x290   : > { %v2497_v0 = vadd.f32 %v2496_v31, %v8314_v46  ;;  %v8319_v35 = vadd.f32 %v6536_v59, %v8137_v52  ;;  %v5699_v22 = vadd.f32 %v5698_v6, %v5697_v62  ;;  %v5700_v56 = vpop.f32.mrb[154].mxu0  ;;  %v6885_v31 = vld [vmem:[#allocation6 + $0x100] sm:$0xff]   ;;  %6288 = vmatpush3.bf16.msra.mxu1 %v6888_v5  ;;  %v6890_v6 = vld [vmem:[#allocation6 + $0xc8] sm:$0xff]  }
 0x291   : > { %v5701_v14 = vpop.f32.mrb[155].mxu0  ;;  %5733 = vmatprep.subr.bf16.mxu0 %v6885_v31 }
 0x292   : > { %v2498_v48 = vadd.f32 %v2497_v0, %v8319_v35  ;;  %v6547_v12 = vadd.f32 %v5699_v22, %v8106_v3  ;;  %v5702_v42 = vadd.f32 %v5701_v14, %v5700_v56  ;;  %5734 = vmatpush3.bf16.msra.mxu0 %v6886_v7  ;;  %v6893_v22 = vld [vmem:[#allocation6 + $0x110] sm:$0xff]   ;;  %v6907_v7 = vld [vmem:[#allocation6 + $0x138] sm:$0xff]  }
 0x293   : > { %v6894_v14 = vld [vmem:[#allocation6 + $0xd0] sm:$0xff]  }
 0x294   : > { %v6548_v26 = vadd.f32 %v6547_v12, %v8219_v16  ;;  %v6555_v34 = vadd.f32 %v5702_v42, %v8113_v54  ;;  %v6897_v12 = vld [vmem:[#allocation6 + $0x118] sm:$0xff]  }
 0x296   : > { %v8326_v27 = vadd.f32 %v6548_v26, %v8137_v52  ;;  %v6556_v45 = vadd.f32 %v6555_v34, %v8228_v55  ;;  %v5703_v19 = vpop.f32.mrb[156].mxu0  ;;  %v6898_v26 = vld [vmem:[#allocation6 + $0xd8] sm:$0xff]  }
 0x297   : > { %v5704_v15 = vpop.f32.mrb[157].mxu0 }
 0x298   : > { %v2499_v53 = vadd.f32 %v2498_v48, %v8326_v27  ;;  %v8331_v50 = vadd.f32 %v6556_v45, %v8137_v52  ;;  %v5705_v8 = vadd.f32 %v5704_v15, %v5703_v19  ;;  %v5706_v33 = vpop.f32.mrb[158].mxu0  ;;  %v6895_v48 = vld [vmem:[#allocation6 + $0x160] sm:$0xff]   ;;  %v6896_v45 = vld [vmem:[#allocation6 + $0x168] sm:$0xff]  }
 0x299   : > { %v5707_v3 = vpop.f32.mrb[159].mxu0  ;;  %v6900_v19 = vld [vmem:[#allocation6 + $0x120] sm:$0xff]  }
 0x29a   : > { %v2500_v16 = vadd.f32 %v2499_v53, %v8331_v50  ;;  %v6543_v54 = vadd.f32 %v5705_v8, %v8102_v57  ;;  %v5708_v49 = vadd.f32 %v5707_v3, %v5706_v33  ;;  %v6901_v15 = vld [vmem:[#allocation6 + $0xe0] sm:$0xff]   ;;  %v6899_v8 = vld [vmem:[#allocation6 + $0x170] sm:$0xff]   ;;  %v6902_v33 = vld [vmem:[#allocation6 + $0x128] sm:$0xff]  }
 0x29b   : > { %v6903_v3 = vld [vmem:[#allocation6 + $0x178] sm:$0xff]  }
 0x29c   : > { %v6544_v11 = vadd.f32 %v6543_v54, %v8216_v10  ;;  %v6551_v55 = vadd.f32 %v5708_v49, %v8110_v32  ;;  %v6889_v10 = vld [vmem:[#allocation6 + $0x108] sm:$0xff]   ;;  %v6891_v32 = vld [vmem:[#allocation6 + $0x150] sm:$0xff]  }
 0x29d   : > { %5735 = vmatprep.subr.bf16.mxu0 %v6889_v10  ;;  %6289 = vmatprep.subr.bf16.mxu1 %v6891_v32  ;;  %v6905_v54 = vld [vmem:[#allocation6 + $0x130] sm:$0xff]  }
 0x29e   : > { %v8338_v61 = vadd.f32 %v6544_v11, %v8137_v52  ;;  %v6552_v47 = vadd.f32 %v6551_v55, %v8221_v40  ;;  %5736 = vmatpush3.bf16.msra.mxu0 %v6890_v6  ;;  %6290 = vmatpush3.bf16.msra.mxu1 %v6891_v32  ;;  %v6892_v40 = vld [vmem:[#allocation6 + $0x158] sm:$0xff]   ;;  %v6906_v49 = vld [vmem:[#allocation6 + $0xf0] sm:$0xff]  }
 0x29f   : > { %6291 = vmatprep.subr.bf16.mxu1 %v6892_v40  ;;  %5737 = vmatprep.subr.bf16.mxu0 %v6893_v22 }
 0x2a0   : > { %v2501_v59 = vadd.f32 %v2500_v16, %v8338_v61  ;;  %v8343_v57 = vadd.f32 %v6552_v47, %v8137_v52 }
 0x2a2   : > { %v2502_v62 = vadd.f32 %v2501_v59, %v8343_v57  ;;  %6292 = vmatpush3.bf16.msra.mxu1 %v6892_v40  ;;  %5738 = vmatpush3.bf16.msra.mxu0 %v6894_v14  ;;  %v6909_v59 = vld [vmem:[#allocation6 + $0xf8] sm:$0xff]  }
 0x2a3   : > { %6293 = vmatprep.subr.bf16.mxu1 %v6895_v48  ;;  %5739 = vmatprep.subr.bf16.mxu0 %v6897_v12 }
 0x2a4   : > { %v2503_v0 = vrot.slane %v2502_v62, 4 }
 0x2a6   : > { %v2504_v56 = vadd.f32 %v2503_v0, %v2502_v62  ;;  %6294 = vmatpush3.bf16.msra.mxu1 %v6895_v48  ;;  %5740 = vmatpush3.bf16.msra.mxu0 %v6898_v26 }
 0x2a7   : > { %6295 = vmatprep.subr.bf16.mxu1 %v6896_v45  ;;  %5741 = vmatprep.subr.bf16.mxu0 %v6900_v19 }
 0x2a8   : > { %v2505_v52 = vrot.slane %v2504_v56, 2 }
 0x2aa   : > { %v2506_v42 = vadd.f32 %v2505_v52, %v2504_v56  ;;  %6296 = vmatpush3.bf16.msra.mxu1 %v6896_v45  ;;  %5742 = vmatpush3.bf16.msra.mxu0 %v6901_v15 }
 0x2ab   : > { %6297 = vmatprep.subr.bf16.mxu1 %v6899_v8  ;;  %5743 = vmatprep.subr.bf16.mxu0 %v6902_v33 }
 0x2ac   : > { %v2507_v34 = vrot.slane %v2506_v42, 1 }
 0x2ae   : > { %v2508_v53 = vadd.f32 %v2507_v34, %v2506_v42  ;;  %6298 = vmatpush3.bf16.msra.mxu1 %v6899_v8  ;;  %5744 = vmatpush3.bf16.msra.mxu0 %v6904_v2  ;;  %v9849_v42 = vld [vmem:[#allocation10_spill] sm:$0xff] }
 0x2af   : > { %6299 = vmatprep.subr.bf16.mxu1 %v6903_v3  ;;  %5745 = vmatprep.subr.bf16.mxu0 %v6905_v54 }
 0x2b0   : > { %v8346_v16 = vmul.f32 0.00390625, %v2508_v53 }
 0x2b2   : > { %v8350_v11 = vsub.f32 %v8278_v38, %v8346_v16  ;;  %v8354_v55 = vsub.f32 %v8283_v25, %v8346_v16  ;;  %v8358_v31 = vsub.f32 %v8290_v4, %v8346_v16  ;;  %v8362_v5 = vsub.f32 %v8295_v44, %v8346_v16  ;;  %6300 = vmatpush3.bf16.msra.mxu1 %v6903_v3 }
 0x2b3   : > { %v8366_v47 = vsub.f32 %v8302_v63, %v8346_v16  ;;  %v8370_v38 = vsub.f32 %v8307_v13, %v8346_v16  ;;  %v8374_v25 = vsub.f32 %v8314_v46, %v8346_v16  ;;  %v8378_v4 = vsub.f32 %v8319_v35, %v8346_v16  ;;  %5746 = vmatpush3.bf16.msra.mxu0 %v6906_v49 }
 0x2b4   : > { %v8382_v44 = vsub.f32 %v8326_v27, %v8346_v16  ;;  %v8386_v63 = vsub.f32 %v8331_v50, %v8346_v16  ;;  %v8390_v13 = vsub.f32 %v8338_v61, %v8346_v16  ;;  %v8394_v46 = vsub.f32 %v8343_v57, %v8346_v16  ;;  %v8404_v50 = vld [vmem:[#allocation6 + $0x80] sm:$0xff]   ;;  %5747 = vmatprep.subr.bf16.mxu0 %v6907_v7 }
 0x2b5   : > { %v8398_v35 = vsub.f32 %v8144_v60, %v8346_v16  ;;  %v8402_v27 = vsub.f32 %v8140_v41, %v8346_v16  ;;  %6333 = vmatprep.subr.bf16.mxu1 %v8404_v50  ;;  %v8409_v61 = vsub.f32 %v8147_v58, %v8346_v16  ;;  %v8417_v41 = vsub.f32 %v8159_v43, %v8346_v16 }
 0x2b6   : > { %v8421_v10 = vsub.f32 %v8165_v9, %v8346_v16  ;;  %v8427_v62 = vsub.f32 %v8173_v37, %v8346_v16  ;;  %v8433_v43 = vsub.f32 %v8180_v51, %v8346_v16  ;;  %v8439_v22 = vsub.f32 %v8190_v18, %v8346_v16 }
 0x2b7   : > { %v2542_v57 = vmul.f32 %v8398_v35, %v8398_v35  ;;  %v2543_v60 = vmul.f32 %v8402_v27, %v8402_v27  ;;  %5748 = vmatpush3.bf16.msra.mxu0 %v6909_v59  ;;  %v2544_v32 = vmul.f32 %v8409_v61, %v8409_v61  ;;  %v2545_v6 = vmul.f32 %v8417_v41, %v8417_v41 }
 0x2b8   : > { %v2546_v9 = vmul.f32 %v8421_v10, %v8421_v10  ;;  %v2547_v37 = vmul.f32 %v8427_v62, %v8427_v62  ;;  %v8445_v14 = vsub.f32 %v8196_v20, %v8346_v16  ;;  %v2548_v51 = vmul.f32 %v8433_v43, %v8433_v43 }
 0x2b9   : > { %v2574_v58 = vadd.f32 %v2543_v60, %v2542_v57  ;;  %v8451_v48 = vsub.f32 %v8208_v21, %v8346_v16  ;;  %v2549_v18 = vmul.f32 %v8439_v22, %v8439_v22  ;;  %v8457_v26 = vsub.f32 %v9849_v42, %v8346_v16 }
 0x2ba   : > { %v2550_v20 = vmul.f32 %v8445_v14, %v8445_v14  ;;  %v8463_v45 = vsub.f32 %v8225_v39, %v8346_v16  ;;  %v8469_v15 = vsub.f32 %v8231_v29, %v8346_v16  ;;  %v8475_v33 = vsub.f32 %v8239_v24, %v8346_v16 }
 0x2bb   : > { %v2575_v0 = vadd.f32 %v2574_v58, %v2544_v32  ;;  %v2551_v21 = vmul.f32 %v8451_v48, %v8451_v48  ;;  %v2552_v53 = vmul.f32 %v8457_v26, %v8457_v26  ;;  %v8481_v2 = vsub.f32 %v8242_v28, %v8346_v16 }
 0x2bc   : > { %v2553_v39 = vmul.f32 %v8463_v45, %v8463_v45  ;;  %v2554_v29 = vmul.f32 %v8469_v15, %v8469_v15  ;;  %v8487_v49 = vsub.f32 %v8250_v36, %v8346_v16  ;;  %v2555_v24 = vmul.f32 %v8475_v33, %v8475_v33 }
 0x2bd   : > { %v2576_v40 = vadd.f32 %v2575_v0, %v2545_v6  ;;  %v8493_v59 = vsub.f32 %v8254_v23, %v8346_v16  ;;  %v2556_v28 = vmul.f32 %v8481_v2, %v8481_v2  ;;  %v8499_v60 = vsub.f32 %v8260_v30, %v8346_v16 }
 0x2be   : > { %v2557_v36 = vmul.f32 %v8487_v49, %v8487_v49  ;;  %v8505_v58 = vsub.f32 %v8265_v1, %v8346_v16  ;;  %v8511_v0 = vsub.f32 %v8271_v17, %v8346_v16  ;;  %v2563_v17 = vmul.f32 %v8354_v55, %v8354_v55 }
 0x2bf   : > { %v2577_v56 = vadd.f32 %v2576_v40, %v2546_v9  ;;  %v2558_v23 = vmul.f32 %v8493_v59, %v8493_v59  ;;  %v2559_v30 = vmul.f32 %v8499_v60, %v8499_v60  ;;  %v2565_v42 = vmul.f32 %v8362_v5, %v8362_v5 }
 0x2c0   : > { %v2560_v40 = vmul.f32 %v8505_v58, %v8505_v58  ;;  %v2561_v1 = vmul.f32 %v8511_v0, %v8511_v0 }
 0x2c1   : > { %v2578_v52 = vadd.f32 %v2577_v56, %v2547_v37 }
 0x2c3   : > { %v2579_v12 = vadd.f32 %v2578_v52, %v2548_v51  ;;  %v2562_v51 = vmul.f32 %v8350_v11, %v8350_v11 }
 0x2c5   : > { %v2580_v34 = vadd.f32 %v2579_v12, %v2549_v18  ;;  %v2564_v18 = vmul.f32 %v8358_v31, %v8358_v31 }
 0x2c7   : > { %v2581_v19 = vadd.f32 %v2580_v34, %v2550_v20  ;;  %v2566_v34 = vmul.f32 %v8366_v47, %v8366_v47 }
 0x2c9   : > { %v2582_v8 = vadd.f32 %v2581_v19, %v2551_v21  ;;  %v2567_v19 = vmul.f32 %v8370_v38, %v8370_v38 }
 0x2cb   : > { %v2583_v3 = vadd.f32 %v2582_v8, %v2552_v53  ;;  %v2568_v8 = vmul.f32 %v8374_v25, %v8374_v25 }
 0x2cd   : > { %v2584_v54 = vadd.f32 %v2583_v3, %v2553_v39  ;;  %v2569_v3 = vmul.f32 %v8378_v4, %v8378_v4 }
 0x2cf   : > { %v2585_v7 = vadd.f32 %v2584_v54, %v2554_v29  ;;  %v2570_v54 = vmul.f32 %v8382_v44, %v8382_v44 }
 0x2d1   : > { %v2586_v57 = vadd.f32 %v2585_v7, %v2555_v24  ;;  %v2571_v7 = vmul.f32 %v8386_v63, %v8386_v63 }
 0x2d3   : > { %v2587_v32 = vadd.f32 %v2586_v57, %v2556_v28  ;;  %v6917_v57 = vld [vmem:[#allocation6 + $0x40] sm:$0xff]  }
 0x2d4   : > { %5869 = vmatprep.subr.bf16.mxu0 %v6917_v57 }
 0x2d5   : > { %v2588_v6 = vadd.f32 %v2587_v32, %v2557_v36  ;;  %v2572_v36 = vmul.f32 %v8390_v13, %v8390_v13 }
 0x2d7   : > { %v2589_v9 = vadd.f32 %v2588_v6, %v2558_v23  ;;  %v2573_v23 = vmul.f32 %v8394_v46, %v8394_v46 }
 0x2d9   : > { %v2590_v37 = vadd.f32 %v2589_v9, %v2559_v30 }
 0x2db   : > { %v2591_v56 = vadd.f32 %v2590_v37, %v2560_v40 }
 0x2dd   : > { %v2592_v52 = vadd.f32 %v2591_v56, %v2561_v1 }
 0x2df   : > { %v2593_v16 = vadd.f32 %v2592_v52, %v2562_v51 }
 0x2e1   : > { %v2594_v12 = vadd.f32 %v2593_v16, %v2563_v17 }
 0x2e3   : > { %v2595_v20 = vadd.f32 %v2594_v12, %v2564_v18 }
 0x2e5   : > { %v2596_v21 = vadd.f32 %v2595_v20, %v2565_v42 }
 0x2e7   : > { %v2597_v53 = vadd.f32 %v2596_v21, %v2566_v34 }
 0x2e9   : > { %v2598_v39 = vadd.f32 %v2597_v53, %v2567_v19 }
 0x2eb   : > { %v2599_v29 = vadd.f32 %v2598_v39, %v2568_v8 }
 0x2ed   : > { %v2600_v24 = vadd.f32 %v2599_v29, %v2569_v3 }
 0x2ef   : > { %v2601_v28 = vadd.f32 %v2600_v24, %v2570_v54 }
 0x2f1   : > { %v2602_v32 = vadd.f32 %v2601_v28, %v2571_v7 }
 0x2f3   : > { %v2603_v6 = vadd.f32 %v2602_v32, %v2572_v36 }
 0x2f5   : > { %v2604_v30 = vadd.f32 %v2603_v6, %v2573_v23 }
 0x2f7   : > { %v2605_v9 = vrot.slane %v2604_v30, 4 }
 0x2f9   : > { %v2606_v40 = vadd.f32 %v2605_v9, %v2604_v30 }
 0x2fb   : > { %v2607_v37 = vrot.slane %v2606_v40, 2 }
 0x2fd   : > { %v2608_v1 = vadd.f32 %v2607_v37, %v2606_v40 }
 0x2ff   : > { %v2609_v56 = vrot.slane %v2608_v1, 1 }
 0x301   : > { %v2610_v51 = vadd.f32 %v2609_v56, %v2608_v1 }
 0x303   : > { %v2611_v52 = vmul.f32 0.00390625, %v2610_v51 }
 0x305   : > { %v2612_v17 = vadd.f32 1e-05, %v2611_v52 }
 0x307   : > { %6957 = vrsqrt.f32 %v2612_v17 }
 0x311   : > { %v6958_v16 = vpop.eup %6957 }
 0x312   : > { %v8544_v18 = vmul.f32 %v6958_v16, %v8390_v13  ;;  %v8547_v12 = vmul.f32 %v6958_v16, %v8394_v46  ;;  %v2614_v42 = vmul.f32 %v6958_v16, %v8398_v35  ;;  %v2615_v20 = vmul.f32 %v6958_v16, %v8402_v27 }
 0x313   : > { %v2616_v34 = vmul.f32 %v6958_v16, %v8409_v61  ;;  %v2617_v21 = vmul.f32 %v6958_v16, %v8417_v41  ;;  %v2618_v19 = vmul.f32 %v6958_v16, %v8421_v10  ;;  %v2619_v53 = vmul.f32 %v6958_v16, %v8427_v62 }
 0x314   : > { %v2620_v39 = vmul.f32 %v6958_v16, %v8433_v43  ;;  %v2621_v46 = vmul.f32 %v6958_v16, %v8439_v22  ;;  %v2622_v35 = vmul.f32 %v6958_v16, %v8445_v14  ;;  %v2623_v27 = vmul.f32 %v6958_v16, %v8451_v48 }
 0x315   : > { %v2624_v61 = vmul.f32 %v6958_v16, %v8457_v26  ;;  %v2625_v41 = vmul.f32 %v6958_v16, %v8463_v45  ;;  %v8564_v10 = vmul.f32 %v6958_v16, %v8469_v15  ;;  %v8567_v62 = vmul.f32 %v6958_v16, %v8475_v33 }
 0x316   : > { %v8570_v3 = vmul.f32 %v6958_v16, %v8481_v2  ;;  %v8573_v43 = vmul.f32 %v6958_v16, %v8487_v49  ;;  %v8576_v22 = vmul.f32 %v6958_v16, %v8493_v59  ;;  %v8579_v14 = vmul.f32 %v6958_v16, %v8499_v60 }
 0x317   : > { %v8582_v48 = vmul.f32 %v6958_v16, %v8505_v58  ;;  %v8585_v26 = vmul.f32 %v6958_v16, %v8511_v0  ;;  %v8588_v45 = vmul.f32 %v6958_v16, %v8350_v11  ;;  %v8591_v15 = vmul.f32 %v6958_v16, %v8354_v55 }
 0x318   : > { %v8594_v33 = vmul.f32 %v6958_v16, %v8358_v31  ;;  %v8597_v2 = vmul.f32 %v6958_v16, %v8362_v5  ;;  %v8600_v49 = vmul.f32 %v6958_v16, %v8366_v47  ;;  %v8603_v59 = vmul.f32 %v6958_v16, %v8370_v38 }
 0x319   : > { %v8606_v60 = vmul.f32 %v6958_v16, %v8374_v25  ;;  %v8609_v11 = vmul.f32 %v6958_v16, %v8378_v4  ;;  %v8612_v55 = vmul.f32 %v6958_v16, %v8382_v44  ;;  %v8615_v31 = vmul.f32 %v6958_v16, %v8386_v63 }
 0x31a   : > { %v2646_v5 = vmax.f32 %v2614_v42, 0.0  ;;  %v2647_v58 = vmax.f32 %v2615_v20, 0.0  ;;  %v2648_v0 = vmax.f32 %v2616_v34, 0.0  ;;  %v2649_v47 = vmax.f32 %v2617_v21, 0.0  ;;  %v6929_v34 = vld [vmem:[#allocation6 + $0x50] sm:$0xff]  }
 0x31b   : > { %v2650_v29 = vmax.f32 %v2618_v19, 0.0  ;;  %v2651_v54 = vmax.f32 %v2619_v53, 0.0  ;;  %v2652_v38 = vmax.f32 %v2620_v39, 0.0  ;;  %v2653_v24 = vmax.f32 %v2621_v46, 0.0 }
 0x31c   : > { %v2654_v7 = vmax.f32 %v2622_v35, 0.0  ;;  %v2655_v25 = vmax.f32 %v2623_v27, 0.0  ;;  %v2656_v28 = vmax.f32 %v2624_v61, 0.0  ;;  %v2657_v57 = vmax.f32 %v2625_v41, 0.0 }
 0x31d   : > { %v2658_v4 = vmax.f32 %v8564_v10, 0.0  ;;  %v2659_v44 = vmax.f32 %v8567_v62, 0.0  ;;  %v2660_v36 = vmax.f32 %v8570_v3, 0.0  ;;  %v2661_v63 = vmax.f32 %v8573_v43, 0.0 }
 0x31e   : > { %v2662_v32 = vmax.f32 %v8576_v22, 0.0  ;;  %v2663_v23 = vmax.f32 %v8579_v14, 0.0  ;;  %v2664_v6 = vmax.f32 %v8582_v48, 0.0  ;;  %v2665_v30 = vmax.f32 %v8585_v26, 0.0 }
 0x31f   : > { %v2678_v9 = vpack.c.bf16 %v2647_v58, %v2646_v5  ;;  %v2679_v40 = vpack.c.bf16 %v2649_v47, %v2648_v0  ;;  %v2666_v37 = vmax.f32 %v8588_v45, 0.0  ;;  %v2667_v1 = vmax.f32 %v8591_v15, 0.0  ;;  %v6939_v45 = vld [vmem:[#allocation6 + $0x60] sm:$0xff]  }
 0x320   : > { %v2668_v56 = vmax.f32 %v8594_v33, 0.0  ;;  %v2680_v51 = vpack.c.bf16 %v2651_v54, %v2650_v29  ;;  %v2669_v52 = vmax.f32 %v8597_v2, 0.0  ;;  %v2670_v17 = vmax.f32 %v8600_v49, 0.0 }
 0x321   : > { %v2671_v16 = vmax.f32 %v8603_v59, 0.0  ;;  %v8635_v19 = vpack.c.bf16 %v2653_v24, %v2652_v38  ;;  %v2695_v53 = vshrl.u32 %v2678_v9, 16  ;;  %v2698_v39 = vshrl.u32 %v2679_v40, 16 }
 0x322   : > { %v2759_v46 = vshll.u32 %v2678_v9, 16  ;;  %v2763_v35 = vshll.u32 %v2679_v40, 16  ;;  %v8637_v27 = vpack.c.bf16 %v2655_v25, %v2654_v7  ;;  %v8639_v61 = vpack.c.bf16 %v2657_v57, %v2656_v28 }
 0x323   : > { %v2701_v41 = vshrl.u32 %v2680_v51, 16  ;;  %v2767_v10 = vshll.u32 %v2680_v51, 16  ;;  %v2758_v62 = vrot.slane %v2695_v53, 7  ;;  %v2762_v43 = vrot.slane %v2698_v39, 7 }
 0x324   : > { %v2854_v3 = vrot.slane %v2759_v46, 7  ;;  %v2855_v5 = vrot.slane %v2763_v35, 7  ;;  %v8641_v58 = vpack.c.bf16 %v2659_v44, %v2658_v4  ;;  %v8643_v0 = vpack.c.bf16 %v2661_v63, %v2660_v36 }
 0x325   : > { %v2766_v47 = vrot.slane %v2701_v41, 7  ;;  %v2856_v29 = vrot.slane %v2767_v10, 7  ;;  %v2761_v54 = vor.u32 %v2759_v46, %v2758_v62  ;;  %v2765_v7 = vor.u32 %v2763_v35, %v2762_v43 }
 0x326   : > { %v2902_v24 = vsel %vm7330_vm2, %v2758_v62, %v2854_v3  ;;  %v2903_v25 = vsel %vm7330_vm2, %v2762_v43, %v2855_v5  ;;  %v2704_v4 = vshrl.u32 %v8635_v19, 16  ;;  %v2771_v44 = vshll.u32 %v8635_v19, 16 }
 0x327   : > { %v2769_v28 = vor.u32 %v2767_v10, %v2766_v47  ;;  %v8651_v57 = vsel %vm7330_vm2, %v2766_v47, %v2856_v29  ;;  %v8657_v36 = vsel %vm7330_vm2, %v2695_v53, %v2761_v54  ;;  %v3162_v63 = vrot.slane %v2902_v24, 1 }
 0x328   : > { %v8661_v9 = vsel %vm7330_vm2, %v2698_v39, %v2765_v7  ;;  %v3159_v40 = vrot.slane %v2903_v25, 1  ;;  %v3161_v51 = vrot.slane %v8657_v36, 1  ;;  %v3165_v19 = vrot.slane %v8651_v57, 1 }
 0x329   : > { %v3158_v46 = vrot.slane %v8661_v9, 1  ;;  %v8667_v35 = vsel %vm7330_vm2, %v2701_v41, %v2769_v28  ;;  %v2931_v53 = vshrl.u32 %v8657_v36, 16  ;;  %v2933_v62 = vshll.u32 %v8657_v36, 16  ;;  %v6910_v41 = vld [vmem:[#allocation6 + $0x88] sm:$0xff]  }
 0x32a   : > { %v3164_v10 = vrot.slane %v8667_v35, 1  ;;  %v2938_v3 = vshll.u32 %v2902_v24, 16  ;;  %v8674_v39 = vsel %vm793_vm4, %v3161_v51, %v3162_v63  ;;  %v2921_v5 = vshll.u32 %v8661_v9, 16 }
 0x32b   : > { %v8677_v43 = vsel %vm793_vm4, %v3158_v46, %v3159_v40  ;;  %v2926_v47 = vshll.u32 %v2903_v25, 16  ;;  %6301 = vmatprep.mubr.bf16.mxu1 %v8674_v39  ;;  %v2935_v29 = vrot.slane %v2933_v62, 1  ;;  %v2919_v54 = vshrl.u32 %v8661_v9, 16 }
 0x32c   : > { %v2770_v7 = vrot.slane %v2704_v4, 7  ;;  %v2857_v28 = vrot.slane %v2771_v44, 7  ;;  %6302 = vmatmul.mubr.bf16.vlgmr.msra.gmra.mrb[96].mxu1 %v8677_v43  ;;  %v8684_v24 = vsel %vm793_vm4, %v3164_v10, %v3165_v19  ;;  %v2923_v63 = vrot.slane %v2921_v5, 1  ;;  %v6911_v5 = vld [vmem:[#allocation6 + $0x90] sm:$0xff]  }
 0x32d   : > { %v2707_v40 = vshrl.u32 %v8637_v27, 16  ;;  %v2775_v51 = vshll.u32 %v8637_v27, 16  ;;  %6305 = vmatprep.mubr.bf16.mxu1 %v8684_v24  ;;  %6334 = vmatpush3.bf16.msra.mxu1 %v8404_v50  ;;  %v2936_v25 = vor.u32 %v2935_v29, %v2931_v53  ;;  %v2940_v46 = vrot.slane %v2938_v3, 1  ;;  %v6918_v53 = vld [vmem:[#allocation6] sm:$0xff]  }
 0x32e   : > { %v2773_v62 = vor.u32 %v2771_v44, %v2770_v7  ;;  %v8692_v13 = vsel %vm7330_vm2, %v2770_v7, %v2857_v28  ;;  %v2924_v8 = vor.u32 %v2923_v63, %v2919_v54  ;;  %v2928_v20 = vrot.slane %v2926_v47, 1  ;;  %6335 = vmatprep.subr.bf16.mxu1 %v6910_v41  ;;  %v6923_v7 = vld [vmem:[#allocation6 + $0x48] sm:$0xff]  }
 0x32f   : > { %v2774_v19 = vrot.slane %v2707_v40, 7  ;;  %v2858_v10 = vrot.slane %v2775_v51, 7  ;;  %v8695_v42 = vsel %vm552_vm3, %v2936_v25, %v2940_v46  ;;  %v2943_v50 = vshrl.u32 %v8667_v35, 16 }
 0x330   : > { %v8699_v27 = vsel %vm7330_vm2, %v2704_v4, %v2773_v62  ;;  %v2945_v44 = vshll.u32 %v8667_v35, 16  ;;  %3495 = vmatprep.mubr.bf16.mxu0 %v8695_v42  ;;  %v3168_v47 = vrot.slane %v8692_v13, 1  ;;  %v8712_v4 = vsel %vm552_vm3, %v2924_v8, %v2928_v20  ;;  %v6912_v20 = vld [vmem:[#allocation6 + $0x98] sm:$0xff]  }
 0x331   : > { %v3167_v3 = vrot.slane %v8699_v27, 1  ;;  %v2777_v29 = vor.u32 %v2775_v51, %v2774_v19  ;;  %v8708_v54 = vsel %vm7330_vm2, %v2774_v19, %v2858_v10  ;;  %3496 = vmatmul.mubr.bf16.vlgmr.msra.gmra.mrb[160].mxu0 %v8657_v36  ;;  %6336 = vmatpush3.bf16.msra.mxu1 %v6910_v41  ;;  %v2950_v63 = vshll.u32 %v8651_v57, 16 }
 0x332   : > { %v2947_v28 = vrot.slane %v2945_v44, 1  ;;  %v2710_v25 = vshrl.u32 %v8639_v61, 16  ;;  %3503 = vmatprep.mubr.bf16.mxu0 %v8712_v4  ;;  %v3171_v46 = vrot.slane %v8708_v54, 1  ;;  %v2779_v62 = vshll.u32 %v8639_v61, 16  ;;  %6337 = vmatprep.subr.bf16.mxu1 %v6911_v5  ;;  %v6924_v44 = vld [vmem:[#allocation6 + $0x8] sm:$0xff]  }
 0x333   : > { %v8719_v51 = vsel %vm7330_vm2, %v2707_v40, %v2777_v29  ;;  %v2713_v8 = vshrl.u32 %v8641_v58, 16  ;;  %v8725_v41 = vsel %vm793_vm4, %v3167_v3, %v3168_v47  ;;  %v2783_v10 = vshll.u32 %v8641_v58, 16  ;;  %5870 = vmatpush3.bf16.msra.mxu0 %v6918_v53 }
 0x334   : > { %v3170_v57 = vrot.slane %v8719_v51, 1  ;;  %v2778_v19 = vrot.slane %v2710_v25, 7  ;;  %6306 = vmatmul.mubr.bf16.gmra.mrb[100].mxu1 %v8725_v41  ;;  %v2948_v40 = vor.u32 %v2947_v28, %v2943_v50  ;;  %v2859_v29 = vrot.slane %v2779_v62, 7  ;;  %5871 = vmatprep.subr.bf16.mxu0 %v6923_v7 }
 0x335   : > { %v2782_v21 = vrot.slane %v2713_v8, 7  ;;  %v2957_v61 = vshll.u32 %v8699_v27, 16  ;;  %v8735_v3 = vpack.c.bf16 %v2663_v23, %v2662_v32  ;;  %v2860_v53 = vrot.slane %v2783_v10, 7  ;;  %6338 = vmatpush3.bf16.msra.mxu1 %v6911_v5  ;;  %v6913_v32 = vld [vmem:[#allocation6 + $0xa0] sm:$0xff]  }
 0x336   : > { %v8738_v47 = vsel %vm793_vm4, %v3170_v57, %v3171_v46  ;;  %v2781_v58 = vor.u32 %v2779_v62, %v2778_v19  ;;  %v8744_v50 = vpack.c.bf16 %v2665_v30, %v2664_v6  ;;  %v2952_v7 = vrot.slane %v2950_v63, 1  ;;  %6339 = vmatprep.subr.bf16.mxu1 %v6912_v20  ;;  %v6930_v30 = vld [vmem:[#allocation6 + $0x10] sm:$0xff]   ;;  %v6935_v46 = vld [vmem:[#allocation6 + $0x58] sm:$0xff]  }
 0x337   : > { %6309 = vmatprep.mubr.bf16.mxu1 %v8738_v47  ;;  %v8749_v22 = vsel %vm7330_vm2, %v2778_v19, %v2859_v29  ;;  %v2785_v14 = vor.u32 %v2783_v10, %v2782_v21  ;;  %v8757_v48 = vsel %vm7330_vm2, %v2782_v21, %v2860_v53  ;;  %v2955_v26 = vshrl.u32 %v8699_v27, 16  ;;  %5872 = vmatpush3.bf16.msra.mxu0 %v6924_v44 }
 0x338   : > { %v8753_v23 = vsel %vm7330_vm2, %v2710_v25, %v2781_v58  ;;  %v2716_v6 = vshrl.u32 %v8643_v0, 16  ;;  %v8762_v5 = vsel %vm552_vm3, %v2948_v40, %v2952_v7  ;;  %v2959_v25 = vrot.slane %v2957_v61, 1  ;;  %5873 = vmatprep.subr.bf16.mxu0 %v6929_v34  ;;  %v6914_v40 = vld [vmem:[#allocation6 + $0xa8] sm:$0xff]   ;;  %v6936_v58 = vld [vmem:[#allocation6 + $0x18] sm:$0xff]  }
 0x339   : > { %v3173_v28 = vrot.slane %v8753_v23, 1  ;;  %v8767_v63 = vsel %vm7330_vm2, %v2713_v8, %v2785_v14  ;;  %3504 = vmatmul.mubr.bf16.gmra.mrb[164].mxu0 %v8661_v9  ;;  %v3174_v21 = vrot.slane %v8749_v22, 1  ;;  %v2787_v19 = vshll.u32 %v8643_v0, 16  ;;  %6340 = vmatpush3.bf16.msra.mxu1 %v6912_v20 }
 0x33a   : > { %v3176_v62 = vrot.slane %v8767_v63, 1  ;;  %v2786_v57 = vrot.slane %v2716_v6, 7  ;;  %3511 = vmatprep.mubr.bf16.mxu0 %v8762_v5  ;;  %v3177_v10 = vrot.slane %v8757_v48, 1  ;;  %v2962_v8 = vshll.u32 %v8692_v13, 16  ;;  %6341 = vmatprep.subr.bf16.mxu1 %v6913_v32 }
 0x33b   : > { %v2719_v44 = vshrl.u32 %v8735_v3, 16  ;;  %v2791_v34 = vshll.u32 %v8735_v3, 16  ;;  %v8782_v29 = vpack.c.bf16 %v2667_v1, %v2666_v37  ;;  %v8785_v0 = vsel %vm793_vm4, %v3173_v28, %v3174_v21  ;;  %5874 = vmatpush3.bf16.msra.mxu0 %v6930_v30 }
 0x33c   : > { %v2789_v20 = vor.u32 %v2787_v19, %v2786_v57  ;;  %v2861_v61 = vrot.slane %v2787_v19, 7  ;;  %6310 = vmatmul.mubr.bf16.gmra.mrb[104].mxu1 %v8785_v0  ;;  %v8789_v13 = vsel %vm793_vm4, %v3176_v62, %v3177_v10  ;;  %v2960_v3 = vor.u32 %v2959_v25, %v2955_v26  ;;  %5875 = vmatprep.subr.bf16.mxu0 %v6935_v46  ;;  %v6915_v25 = vld [vmem:[#allocation6 + $0xb0] sm:$0xff]  }
 0x33d   : > { %v2790_v53 = vrot.slane %v2719_v44, 7  ;;  %v2862_v7 = vrot.slane %v2791_v34, 7  ;;  %6313 = vmatprep.mubr.bf16.mxu1 %v8789_v13  ;;  %v2969_v1 = vshll.u32 %v8719_v51, 16  ;;  %v2722_v14 = vshrl.u32 %v8744_v50, 16  ;;  %6342 = vmatpush3.bf16.msra.mxu1 %v6913_v32 }
 0x33e   : > { %v8794_v15 = vsel %vm7330_vm2, %v2716_v6, %v2789_v20  ;;  %v8798_v37 = vsel %vm7330_vm2, %v2786_v57, %v2861_v61  ;;  %v8806_v26 = vpack.c.bf16 %v2669_v52, %v2668_v56  ;;  %v2964_v30 = vrot.slane %v2962_v8, 1  ;;  %6343 = vmatprep.subr.bf16.mxu1 %v6914_v40  ;;  %v6940_v56 = vld [vmem:[#allocation6 + $0x20] sm:$0xff]   ;;  %v6916_v61 = vld [vmem:[#allocation6 + $0xb8] sm:$0xff]  }
 0x33f   : > { %v2793_v28 = vor.u32 %v2791_v34, %v2790_v53  ;;  %v2795_v6 = vshll.u32 %v8744_v50, 16  ;;  %v8813_v46 = vpack.c.bf16 %v2671_v16, %v2670_v17  ;;  %v3179_v32 = vrot.slane %v8794_v15, 1  ;;  %5876 = vmatpush3.bf16.msra.mxu0 %v6936_v58  ;;  %v6941_v17 = vld [vmem:[#allocation6 + $0x68] sm:$0xff]  }
 0x340   : > { %v8818_v33 = vsel %vm7330_vm2, %v2790_v53, %v2862_v7  ;;  %v2794_v2 = vrot.slane %v2722_v14, 7  ;;  %v8821_v52 = vsel %vm552_vm3, %v2960_v3, %v2964_v30  ;;  %v3180_v50 = vrot.slane %v8798_v37, 1  ;;  %5877 = vmatprep.subr.bf16.mxu0 %v6939_v45 }
 0x341   : > { %v8826_v49 = vsel %vm7330_vm2, %v2719_v44, %v2793_v28  ;;  %v2725_v59 = vshrl.u32 %v8782_v29, 16  ;;  %3512 = vmatmul.mubr.bf16.gmra.mrb[168].mxu0 %v8667_v35  ;;  %v2971_v21 = vrot.slane %v2969_v1, 1  ;;  %v2799_v57 = vshll.u32 %v8782_v29, 16  ;;  %6344 = vmatpush3.bf16.msra.mxu1 %v6914_v40  ;;  %v6945_v1 = vld [vmem:[#allocation6 + $0x70] sm:$0xff]  }
 0x342   : > { %v3182_v16 = vrot.slane %v8826_v49, 1  ;;  %v2797_v62 = vor.u32 %v2795_v6, %v2794_v2  ;;  %v9851_v19 = vmax.f32 %v8612_v55, 0.0  ;;  %v9852_v10 = vmax.f32 %v8615_v31, 0.0  ;;  %3519 = vmatprep.mubr.bf16.mxu0 %v8821_v52  ;;  %6345 = vmatprep.subr.bf16.mxu1 %v6915_v25  ;;  %v6943_v31 = vld [vmem:[#allocation6 + $0x28] sm:$0xff]  }
 0x343   : > { %v3183_v44 = vrot.slane %v8818_v33, 1  ;;  %v2863_v34 = vrot.slane %v2795_v6, 7  ;;  %v2798_v20 = vrot.slane %v2725_v59, 7  ;;  %v8841_v58 = vsel %vm793_vm4, %v3179_v32, %v3180_v50  ;;  %5878 = vmatpush3.bf16.msra.mxu0 %v6940_v56 }
 0x344   : > { %v8836_v8 = vpack.c.bf16 %v9852_v10, %v9851_v19  ;;  %v2967_v29 = vshrl.u32 %v8719_v51, 16  ;;  %v2974_v40 = vshll.u32 %v8708_v54, 16  ;;  %v2981_v55 = vshll.u32 %v8753_v23, 16  ;;  %6314 = vmatmul.mubr.bf16.gmra.mrb[108].mxu1 %v8841_v58  ;;  %5879 = vmatprep.subr.bf16.mxu0 %v6941_v17  ;;  %v6919_v17 = vld [vmem:[#allocation6 + $0x1c0] sm:$0xff]  }
 0x345   : > { %v8848_v3 = vsel %vm793_vm4, %v3182_v16, %v3183_v44  ;;  %v8852_v53 = vsel %vm7330_vm2, %v2722_v14, %v2797_v62  ;;  %v2801_v7 = vor.u32 %v2799_v57, %v2798_v20  ;;  %v2864_v45 = vrot.slane %v2799_v57, 7  ;;  %6346 = vmatpush3.bf16.msra.mxu1 %v6915_v25  ;;  %v6946_v57 = vld [vmem:[#allocation6 + $0x30] sm:$0xff]  }
 0x346   : > { %v9853_v30 = vmax.f32 %v8606_v60, 0.0  ;;  %v9854_v54 = vmax.f32 %v8609_v11, 0.0  ;;  %6317 = vmatprep.mubr.bf16.mxu1 %v8848_v3  ;;  %v2972_v6 = vor.u32 %v2971_v21, %v2967_v29  ;;  %v2728_v32 = vshrl.u32 %v8806_v26, 16  ;;  %6347 = vmatprep.subr.bf16.mxu1 %v6916_v61 }
 0x347   : > { %v2731_v56 = vshrl.u32 %v8813_v46, 16  ;;  %v2737_v14 = vshrl.u32 %v8836_v8, 16  ;;  %v8866_v50 = vsel %vm7330_vm2, %v2794_v2, %v2863_v34  ;;  %v8870_v60 = vsel %vm7330_vm2, %v2725_v59, %v2801_v7  ;;  %5880 = vmatpush3.bf16.msra.mxu0 %v6943_v31 }
 0x348   : > { %v8858_v28 = vpack.c.bf16 %v9854_v54, %v9853_v30  ;;  %v2803_v11 = vshll.u32 %v8806_v26, 16  ;;  %v2976_v16 = vrot.slane %v2974_v40, 1  ;;  %v3185_v21 = vrot.slane %v8852_v53, 1  ;;  %5881 = vmatprep.subr.bf16.mxu0 %v6945_v1  ;;  %v6947_v26 = vld [vmem:[#allocation6 + $0x78] sm:$0xff]  }
 0x349   : > { %v8876_v25 = vsel %vm7330_vm2, %v2798_v20, %v2864_v45  ;;  %v2802_v62 = vrot.slane %v2728_v32, 7  ;;  %v3188_v2 = vrot.slane %v8870_v60, 1  ;;  %v2983_v19 = vrot.slane %v2981_v55, 1  ;;  %3520 = vmatmul.mubr.bf16.gmra.mrb[172].mxu0 %v8699_v27  ;;  %6348 = vmatpush3.bf16.msra.mxu1 %v6916_v61  ;;  %v6949_v30 = vld [vmem:[#allocation6 + $0x38] sm:$0xff]  }
 0x34a   : > { %v2806_v10 = vrot.slane %v2731_v56, 7  ;;  %v2807_v59 = vshll.u32 %v8813_v46, 16  ;;  %v8882_v44 = vsel %vm552_vm3, %v2972_v6, %v2976_v16  ;;  %v3186_v34 = vrot.slane %v8866_v50, 1  ;;  %6005 = vmatprep.subr.bf16.mxu1 %v6919_v17 }
 0x34b   : > { %v2979_v20 = vshrl.u32 %v8753_v23, 16  ;;  %v2805_v29 = vor.u32 %v2803_v11, %v2802_v62  ;;  %3527 = vmatprep.mubr.bf16.mxu0 %v8882_v44  ;;  %v3189_v40 = vrot.slane %v8876_v25, 1  ;;  %v2986_v55 = vshll.u32 %v8749_v22, 16  ;;  %5882 = vmatpush3.bf16.msra.mxu0 %v6946_v57 }
 0x34c   : > { %v2865_v46 = vrot.slane %v2803_v11, 7  ;;  %v2809_v31 = vor.u32 %v2807_v59, %v2806_v10  ;;  %v8890_v7 = vsel %vm793_vm4, %v3185_v21, %v3186_v34  ;;  %v2866_v45 = vrot.slane %v2807_v59, 7  ;;  %5883 = vmatprep.subr.bf16.mxu0 %v6947_v26 }
 0x34d   : > { %v2734_v1 = vshrl.u32 %v8858_v28, 16  ;;  %6318 = vmatmul.mubr.bf16.gmra.mrb[112].mxu1 %v8890_v7  ;;  %v8895_v61 = vsel %vm793_vm4, %v3188_v2, %v3189_v40  ;;  %v2984_v54 = vor.u32 %v2983_v19, %v2979_v20  ;;  %v8899_v22 = vsel %vm7330_vm2, %v2728_v32, %v2805_v29 }
 0x34e   : > { %v9855_v6 = vmax.f32 %v8544_v18, 0.0  ;;  %v9856_v11 = vmax.f32 %v8547_v12, 0.0  ;;  %6321 = vmatprep.mubr.bf16.mxu1 %v8895_v61  ;;  %v8908_v16 = vsel %vm7330_vm2, %v2731_v56, %v2809_v31  ;;  %v2993_v21 = vshll.u32 %v8767_v63, 16 }
 0x34f   : > { %v2810_v57 = vrot.slane %v2734_v1, 7  ;;  %v2988_v2 = vrot.slane %v2986_v55, 1  ;;  %v8913_v32 = vsel %vm7330_vm2, %v2802_v62, %v2865_v46  ;;  %v2811_v19 = vshll.u32 %v8858_v28, 16  ;;  %5884 = vmatpush3.bf16.msra.mxu0 %v6949_v30 }
 0x350   : > { %v2693_v17 = vpack.c.bf16 %v9856_v11, %v9855_v6  ;;  %v2814_v18 = vrot.slane %v2737_v14, 7  ;;  %v2815_v12 = vshll.u32 %v8836_v8, 16  ;;  %v3191_v59 = vrot.slane %v8899_v22, 1 }
 0x351   : > { %v8922_v56 = vsel %vm7330_vm2, %v2806_v10, %v2866_v45  ;;  %v8925_v26 = vsel %vm552_vm3, %v2984_v54, %v2988_v2  ;;  %v3194_v62 = vrot.slane %v8908_v16, 1  ;;  %v2813_v34 = vor.u32 %v2811_v19, %v2810_v57  ;;  %3528 = vmatmul.mubr.bf16.gmra.mrb[176].mxu0 %v8719_v51 }
 0x352   : > { %v3192_v28 = vrot.slane %v8913_v32, 1  ;;  %v2995_v20 = vrot.slane %v2993_v21, 1  ;;  %v2817_v29 = vor.u32 %v2815_v12, %v2814_v18  ;;  %v2740_v40 = vshrl.u32 %v2693_v17, 16  ;;  %3535 = vmatprep.mubr.bf16.mxu0 %v8925_v26 }
 0x353   : > { %v3195_v55 = vrot.slane %v8922_v56, 1  ;;  %v2867_v10 = vrot.slane %v2811_v19, 7  ;;  %v2991_v31 = vshrl.u32 %v8767_v63, 16  ;;  %v2998_v45 = vshll.u32 %v8757_v48, 16 }
 0x354   : > { %v8933_v46 = vsel %vm793_vm4, %v3191_v59, %v3192_v28  ;;  %v2868_v30 = vrot.slane %v2815_v12, 7  ;;  %v8943_v6 = vsel %vm7330_vm2, %v2734_v1, %v2813_v34  ;;  %v2818_v11 = vrot.slane %v2740_v40, 7 }
 0x355   : > { %6322 = vmatmul.mubr.bf16.gmra.mrb[116].mxu1 %v8933_v46  ;;  %v8939_v54 = vsel %vm793_vm4, %v3194_v62, %v3195_v55  ;;  %v2996_v21 = vor.u32 %v2995_v20, %v2991_v31  ;;  %v8950_v2 = vsel %vm7330_vm2, %v2737_v14, %v2817_v29  ;;  %v3005_v48 = vshll.u32 %v8794_v15, 16 }
 0x356   : > { %6325 = vmatprep.mubr.bf16.mxu1 %v8939_v54  ;;  %v8955_v19 = vsel %vm7330_vm2, %v2810_v57, %v2867_v10  ;;  %v2819_v12 = vshll.u32 %v2693_v17, 16  ;;  %v3000_v59 = vrot.slane %v2998_v45, 1  ;;  %v3197_v1 = vrot.slane %v8943_v6, 1 }
 0x357   : > { %v8960_v62 = vsel %vm7330_vm2, %v2814_v18, %v2868_v30  ;;  %v3200_v8 = vrot.slane %v8950_v2, 1  ;;  %v3198_v28 = vrot.slane %v8955_v19, 1  ;;  %v3007_v57 = vrot.slane %v3005_v48, 1 }
 0x358   : > { %v2821_v34 = vor.u32 %v2819_v12, %v2818_v11  ;;  %v8965_v14 = vsel %vm552_vm3, %v2996_v21, %v3000_v59  ;;  %v3201_v17 = vrot.slane %v8960_v62, 1  ;;  %v2869_v20 = vrot.slane %v2819_v12, 7 }
 0x359   : > { %3536 = vmatmul.mubr.bf16.gmra.mrb[180].mxu0 %v8753_v23  ;;  %v8971_v29 = vsel %vm793_vm4, %v3197_v1, %v3198_v28  ;;  %v3003_v18 = vshrl.u32 %v8794_v15, 16  ;;  %v3010_v55 = vshll.u32 %v8798_v37, 16  ;;  %v3017_v30 = vshll.u32 %v8826_v49, 16 }
 0x35a   : > { %3543 = vmatprep.mubr.bf16.mxu0 %v8965_v14  ;;  %v8977_v10 = vsel %vm793_vm4, %v3200_v8, %v3201_v17  ;;  %v8981_v31 = vsel %vm7330_vm2, %v2740_v40, %v2821_v34  ;;  %v8987_v21 = vsel %vm7330_vm2, %v2818_v11, %v2869_v20  ;;  %v3015_v38 = vshrl.u32 %v8826_v49, 16  ;;  %v6920_v17 = vld [vmem:[#allocation6 + $0x180] sm:$0xff]  }
 0x35b   : > { %v3008_v45 = vor.u32 %v3007_v57, %v3003_v18  ;;  %v3012_v48 = vrot.slane %v3010_v55, 1  ;;  %v3203_v37 = vrot.slane %v8981_v31, 1  ;;  %v3204_v40 = vrot.slane %v8987_v21, 1  ;;  %v6921_v18 = vld [vmem:[#allocation6 + $0x1c8] sm:$0xff]  }
 0x35c   : > { %v3019_v59 = vrot.slane %v3017_v30, 1  ;;  %v3022_v11 = vshll.u32 %v8818_v33, 16  ;;  %v3029_v34 = vshll.u32 %v8852_v53, 16  ;;  %v3027_v33 = vshrl.u32 %v8852_v53, 16  ;;  %v6922_v30 = vld [vmem:[#allocation6 + $0x188] sm:$0xff]  }
 0x35d   : > { %6326 = vmatmul.mubr.bf16.gmra.mrb[120].mxu1 %v8971_v29  ;;  %v8992_v12 = vsel %vm552_vm3, %v3008_v45, %v3012_v48  ;;  %v8997_v1 = vsel %vm793_vm4, %v3203_v37, %v3204_v40  ;;  %v3034_v55 = vshll.u32 %v8866_v50, 16  ;;  %v3041_v48 = vshll.u32 %v8870_v60, 16  ;;  %v6925_v37 = vld [vmem:[#allocation6 + $0x1d0] sm:$0xff]  }
 0x35e   : > { %6329 = vmatprep.mubr.bf16.mxu1 %v8977_v10  ;;  %v3020_v8 = vor.u32 %v3019_v59, %v3015_v38  ;;  %v3024_v28 = vrot.slane %v3022_v11, 1  ;;  %v3031_v20 = vrot.slane %v3029_v34, 1  ;;  %v6926_v50 = vld [vmem:[#allocation6 + $0x190] sm:$0xff]   ;;  %v3039_v11 = vshrl.u32 %v8870_v60, 16 }
 0x35f   : > { %v3036_v40 = vrot.slane %v3034_v55, 1  ;;  %v3043_v38 = vrot.slane %v3041_v48, 1  ;;  %v3058_v48 = vshll.u32 %v8913_v32, 16  ;;  %v6938_v32 = vld [vmem:[#allocation6 + $0x1b0] sm:$0xff]  }
 0x360   : > { %v9006_v57 = vsel %vm552_vm3, %v3020_v8, %v3024_v28  ;;  %v3032_v45 = vor.u32 %v3031_v20, %v3027_v33  ;;  %v3046_v8 = vshll.u32 %v8876_v25, 16  ;;  %v3053_v28 = vshll.u32 %v8899_v22, 16  ;;  %v6931_v20 = vld [vmem:[#allocation6 + $0x1e0] sm:$0xff]  }
 0x361   : > { %3544 = vmatmul.mubr.bf16.gmra.mrb[184].mxu0 %v8767_v63  ;;  %v3044_v34 = vor.u32 %v3043_v38, %v3039_v11  ;;  %v6932_v25 = vld [vmem:[#allocation6 + $0x1a0] sm:$0xff]   ;;  %v6934_v38 = vld [vmem:[#allocation6 + $0x1a8] sm:$0xff]  }
 0x362   : > { %3551 = vmatprep.mubr.bf16.mxu0 %v8992_v12  ;;  %v9016_v59 = vsel %vm552_vm3, %v3032_v45, %v3036_v40  ;;  %v3055_v55 = vrot.slane %v3053_v28, 1  ;;  %v6933_v45 = vld [vmem:[#allocation6 + $0x1e8] sm:$0xff]   ;;  %v3065_v40 = vshll.u32 %v8908_v16, 16  ;;  %v3063_v28 = vshrl.u32 %v8908_v16, 16 }
 0x365   : > { %6330 = vmatmul.mubr.bf16.gmra.mrb[124].mxu1 %v8997_v1 }
 0x366   : > { %6349 = vmatprep.mubr.bf16.mxu1 %v8677_v43 }
 0x369   : > { %3552 = vmatmul.mubr.bf16.gmra.mrb[188].mxu0 %v8794_v15 }
 0x36a   : > { %3559 = vmatprep.mubr.bf16.mxu0 %v9006_v57 }
 0x36d   : > { %6350 = vmatmul.mubr.bf16.vlgmr.msra.gmra.mrb[96].mxu1 %v8674_v39  ;;  %v6927_v39 = vld [vmem:[#allocation6 + $0x1d8] sm:$0xff]  }
 0x36e   : > { %6353 = vmatprep.mubr.bf16.mxu1 %v8677_v43  ;;  %6006 = vmatpush3.bf16.msra.mxu1 %v6920_v17  ;;  %v6928_v17 = vld [vmem:[#allocation6 + $0x198] sm:$0xff]  }
 0x36f   : > { %6007 = vmatprep.subr.bf16.mxu1 %v6921_v18  ;;  %v3048_v18 = vrot.slane %v3046_v8, 1  ;;  %v3067_v8 = vrot.slane %v3065_v40, 1 }
 0x371   : > { %3560 = vmatmul.mubr.bf16.gmra.mrb[192].mxu0 %v8826_v49  ;;  %v9026_v33 = vsel %vm552_vm3, %v3044_v34, %v3048_v18  ;;  %v6942_v34 = vld [vmem:[#allocation6 + $0x1f8] sm:$0xff]   ;;  %v3077_v18 = vshll.u32 %v8943_v6, 16 }
 0x372   : > { %6008 = vmatpush3.bf16.msra.mxu1 %v6922_v30  ;;  %3567 = vmatprep.mubr.bf16.mxu0 %v9016_v59  ;;  %v3051_v30 = vshrl.u32 %v8899_v22, 16 }
 0x373   : > { %6009 = vmatprep.subr.bf16.mxu1 %v6925_v37 }
 0x374   : > { %v3056_v37 = vor.u32 %v3055_v55, %v3051_v30  ;;  %v6944_v55 = vld [vmem:[#allocation6 + $0x1b8] sm:$0xff]  }
 0x375   : > { %6354 = vmatmul.mubr.bf16.gmra.mrb[100].mxu1 %v8684_v24 }
 0x376   : > { %6357 = vmatprep.mubr.bf16.mxu1 %v8725_v41  ;;  %6010 = vmatpush3.bf16.msra.mxu1 %v6926_v50  ;;  %v6937_v50 = vld [vmem:[#allocation6 + $0x1f0] sm:$0xff]  }
 0x377   : > { %6011 = vmatprep.subr.bf16.mxu1 %v6927_v39  ;;  %v3060_v39 = vrot.slane %v3058_v48, 1  ;;  %v3079_v48 = vrot.slane %v3077_v18, 1 }
 0x379   : > { %3568 = vmatmul.mubr.bf16.gmra.mrb[196].mxu0 %v8852_v53  ;;  %v9036_v11 = vsel %vm552_vm3, %v3056_v37, %v3060_v39  ;;  %v3082_v37 = vshll.u32 %v8955_v19, 16  ;;  %v3094_v19 = vshll.u32 %v8960_v62, 16  ;;  %v3106_v62 = vshll.u32 %v8987_v21, 16  ;;  %v6950_v21 = vld [vmem:[#allocation6 + $0x208] sm:$0xff]  }
 0x37a   : > { %6012 = vmatpush3.bf16.msra.mxu1 %v6928_v17  ;;  %3575 = vmatprep.mubr.bf16.mxu0 %v9026_v33  ;;  %v3070_v17 = vshll.u32 %v8922_v56, 16  ;;  %v3075_v56 = vshrl.u32 %v8943_v6, 16 }
 0x37b   : > { %6013 = vmatprep.subr.bf16.mxu1 %v6931_v20  ;;  %v3068_v20 = vor.u32 %v3067_v8, %v3063_v28  ;;  %v3101_v28 = vshll.u32 %v8981_v31, 16 }
 0x37c   : > { %v3080_v40 = vor.u32 %v3079_v48, %v3075_v56  ;;  %v3108_v48 = vrot.slane %v3106_v62, 1 }
 0x37d   : > { %6358 = vmatmul.mubr.bf16.gmra.mrb[104].mxu1 %v8738_v47  ;;  %v3103_v18 = vrot.slane %v3101_v28, 1 }
 0x37e   : > { %6361 = vmatprep.mubr.bf16.mxu1 %v8785_v0  ;;  %6014 = vmatpush3.bf16.msra.mxu1 %v6932_v25  ;;  %v6948_v25 = vld [vmem:[#allocation6 + $0x200] sm:$0xff]  }
 0x37f   : > { %6015 = vmatprep.subr.bf16.mxu1 %v6933_v45  ;;  %v3072_v45 = vrot.slane %v3070_v17, 1  ;;  %v3096_v17 = vrot.slane %v3094_v19, 1 }
 0x381   : > { %3576 = vmatmul.mubr.bf16.gmra.mrb[200].mxu0 %v8870_v60  ;;  %v9046_v30 = vsel %vm552_vm3, %v3068_v20, %v3072_v45 }
 0x382   : > { %6016 = vmatpush3.bf16.msra.mxu1 %v6934_v38  ;;  %3583 = vmatprep.mubr.bf16.mxu0 %v9036_v11  ;;  %v3089_v38 = vshll.u32 %v8950_v2, 16 }
 0x383   : > { %6017 = vmatprep.subr.bf16.mxu1 %v6937_v50  ;;  %v3084_v50 = vrot.slane %v3082_v37, 1  ;;  %v6951_v37 = vld [vmem:[#allocation6 + $0x210] sm:$0xff]  }
 0x384   : > { %v3091_v8 = vrot.slane %v3089_v38, 1  ;;  %v6953_v38 = vld [vmem:[#allocation6 + $0x220] sm:$0xff]  }
 0x385   : > { %6362 = vmatmul.mubr.bf16.gmra.mrb[108].mxu1 %v8789_v13  ;;  %v9056_v39 = vsel %vm552_vm3, %v3080_v40, %v3084_v50  ;;  %v6952_v40 = vld [vmem:[#allocation6 + $0x218] sm:$0xff]  }
 0x386   : > { %6365 = vmatprep.mubr.bf16.mxu1 %v8841_v58  ;;  %6018 = vmatpush3.bf16.msra.mxu1 %v6938_v32  ;;  %v3087_v32 = vshrl.u32 %v8950_v2, 16  ;;  %v6956_v50 = vld [vmem:[#allocation6 + $0x238] sm:$0xff]  }
 0x387   : > { %6019 = vmatprep.subr.bf16.mxu1 %v6942_v34 }
 0x388   : > { %v3092_v34 = vor.u32 %v3091_v8, %v3087_v32 }
 0x389   : > { %3584 = vmatmul.mubr.bf16.gmra.mrb[204].mxu0 %v8899_v22 }
 0x38a   : > { %6020 = vmatpush3.bf16.msra.mxu1 %v6944_v55  ;;  %3591 = vmatprep.mubr.bf16.mxu0 %v9046_v30  ;;  %v9066_v20 = vsel %vm552_vm3, %v3092_v34, %v3096_v17  ;;  %v3099_v55 = vshrl.u32 %v8981_v31, 16 }
 0x38b   : > { %6381 = vmatprep.subr.bf16.mxu1 %v6948_v25 }
 0x38c   : > { %v3104_v45 = vor.u32 %v3103_v18, %v3099_v55 }
 0x38d   : > { %6366 = vmatmul.mubr.bf16.gmra.mrb[112].mxu1 %v8848_v3 }
 0x38e   : > { %6369 = vmatprep.mubr.bf16.mxu1 %v8890_v7  ;;  %v9075_v56 = vsel %vm552_vm3, %v3104_v45, %v3108_v48 }
 0x391   : > { %3592 = vmatmul.mubr.bf16.gmra.mrb[208].mxu0 %v8908_v16 }
 0x392   : > { %3599 = vmatprep.mubr.bf16.mxu0 %v9056_v39 }
 0x395   : > { %6370 = vmatmul.mubr.bf16.gmra.mrb[116].mxu1 %v8895_v61 }
 0x396   : > { %6373 = vmatprep.mubr.bf16.mxu1 %v8933_v46 }
 0x399   : > { %3600 = vmatmul.mubr.bf16.gmra.mrb[212].mxu0 %v8943_v6 }
 0x39a   : > { %3607 = vmatprep.mubr.bf16.mxu0 %v9066_v20 }
 0x39d   : > { %6374 = vmatmul.mubr.bf16.gmra.mrb[120].mxu1 %v8939_v54 }
 0x39e   : > { %6377 = vmatprep.mubr.bf16.mxu1 %v8971_v29 }
 0x3a1   : > { %3608 = vmatmul.mubr.bf16.gmra.mrb[216].mxu0 %v8950_v2 }
 0x3a2   : > { %3615 = vmatprep.mubr.bf16.mxu0 %v9075_v56 }
 0x3a5   : > { %6378 = vmatmul.mubr.bf16.gmra.mrb[124].mxu1 %v8977_v10 }
 0x3a6   : > { %4476 = vmatprep.mubr.bf16.mxu1 %v8712_v4 }
 0x3a9   : > { %3616 = vmatmul.mubr.bf16.gmra.mrb[220].mxu0 %v8981_v31 }
 0x3aa   : > { %3961 = vmatprep.mubr.bf16.mxu0 %v8712_v4 }
 0x3ad   : > { %4477 = vmatmul.mubr.bf16.vlgmr.msra.gmra.mrb[128].mxu1 %v8661_v9 }
 0x3ae   : > { %4484 = vmatprep.mubr.bf16.mxu1 %v8762_v5  ;;  %6382 = vmatpush3.bf16.msra.mxu1 %v6948_v25  ;;  %v6954_v25 = vld [vmem:[#allocation6 + $0x228] sm:$0xff]  }
 0x3af   : > { %6383 = vmatprep.subr.bf16.mxu1 %v6950_v21 }
 0x3b1   : > { %3962 = vmatmul.mubr.bf16.vlgmr.msra.gmra.mrb[224].mxu0 %v8661_v9 }
 0x3b2   : > { %6384 = vmatpush3.bf16.msra.mxu1 %v6950_v21  ;;  %3969 = vmatprep.mubr.bf16.mxu0 %v8695_v42  ;;  %v6955_v42 = vld [vmem:[#allocation6 + $0x230] sm:$0xff]  }
 0x3b3   : > { %6385 = vmatprep.subr.bf16.mxu1 %v6951_v37 }
 0x3b5   : > { %4485 = vmatmul.mubr.bf16.gmra.mrb[132].mxu1 %v8667_v35 }
 0x3b6   : > { %4492 = vmatprep.mubr.bf16.mxu1 %v8821_v52  ;;  %6386 = vmatpush3.bf16.msra.mxu1 %v6951_v37 }
 0x3b7   : > { %6387 = vmatprep.subr.bf16.mxu1 %v6952_v40 }
 0x3b9   : > { %3970 = vmatmul.mubr.bf16.gmra.mrb[228].mxu0 %v8657_v36 }
 0x3ba   : > { %6388 = vmatpush3.bf16.msra.mxu1 %v6952_v40  ;;  %3977 = vmatprep.mubr.bf16.mxu0 %v8712_v4 }
 0x3bb   : > { %6389 = vmatprep.subr.bf16.mxu1 %v6953_v38 }
 0x3bd   : > { %4493 = vmatmul.mubr.bf16.gmra.mrb[136].mxu1 %v8699_v27 }
 0x3be   : > { %4500 = vmatprep.mubr.bf16.mxu1 %v8882_v44  ;;  %6390 = vmatpush3.bf16.msra.mxu1 %v6953_v38 }
 0x3bf   : > { %6391 = vmatprep.subr.bf16.mxu1 %v6954_v25 }
 0x3c1   : > { %3978 = vmatmul.mubr.bf16.gmra.mrb[232].mxu0 %v8661_v9 }
 0x3c2   : > { %6392 = vmatpush3.bf16.msra.mxu1 %v6954_v25  ;;  %3985 = vmatprep.mubr.bf16.mxu0 %v8762_v5 }
 0x3c3   : > { %6393 = vmatprep.subr.bf16.mxu1 %v6955_v42 }
 0x3c5   : > { %4501 = vmatmul.mubr.bf16.gmra.mrb[140].mxu1 %v8719_v51 }
 0x3c6   : > { %4508 = vmatprep.mubr.bf16.mxu1 %v8925_v26  ;;  %6394 = vmatpush3.bf16.msra.mxu1 %v6955_v42 }
 0x3c7   : > { %6395 = vmatprep.subr.bf16.mxu1 %v6956_v50 }
 0x3c9   : > { %3986 = vmatmul.mubr.bf16.gmra.mrb[236].mxu0 %v8667_v35 }
 0x3ca   : > { %6396 = vmatpush3.bf16.msra.mxu1 %v6956_v50  ;;  %3993 = vmatprep.mubr.bf16.mxu0 %v8821_v52 }
 0x3cd   : > { %4509 = vmatmul.mubr.bf16.gmra.mrb[144].mxu1 %v8753_v23 }
 0x3ce   : > { %4516 = vmatprep.mubr.bf16.mxu1 %v8965_v14 }
 0x3d1   : > { %3994 = vmatmul.mubr.bf16.gmra.mrb[240].mxu0 %v8699_v27 }
 0x3d2   : > { %4001 = vmatprep.mubr.bf16.mxu0 %v8882_v44 }
 0x3d5   : > { %4517 = vmatmul.mubr.bf16.gmra.mrb[148].mxu1 %v8767_v63 }
 0x3d6   : > { %4524 = vmatprep.mubr.bf16.mxu1 %v8992_v12 }
 0x3d9   : > { %4002 = vmatmul.mubr.bf16.gmra.mrb[244].mxu0 %v8719_v51 }
 0x3da   : > { %4009 = vmatprep.mubr.bf16.mxu0 %v8925_v26 }
 0x3dd   : > { %4525 = vmatmul.mubr.bf16.gmra.mrb[152].mxu1 %v8794_v15 }
 0x3de   : > { %4532 = vmatprep.mubr.bf16.mxu1 %v9006_v57 }
 0x3e1   : > { %4010 = vmatmul.mubr.bf16.gmra.mrb[248].mxu0 %v8753_v23 }
 0x3e2   : > { %4017 = vmatprep.mubr.bf16.mxu0 %v8965_v14 }
 0x3e5   : > { %4533 = vmatmul.mubr.bf16.gmra.mrb[156].mxu1 %v8826_v49 }
 0x3e6   : > { %4540 = vmatprep.mubr.bf16.mxu1 %v9016_v59 }
 0x3e9   : > { %4018 = vmatmul.mubr.bf16.gmra.mrb[252].mxu0 %v8767_v63 }
 0x3ea   : > { %4025 = vmatprep.mubr.bf16.mxu0 %v8992_v12 }
 0x3ed   : > { %4541 = vmatmul.mubr.bf16.gmra.mrb[160].mxu1 %v8852_v53 }
 0x3ee   : > { %4548 = vmatprep.mubr.bf16.mxu1 %v9026_v33 }
 0x3f1   : > { %4026 = vmatmul.mubr.bf16.gmra.mrb[0].mxu0 %v8794_v15 }
 0x3f2   : > { %4033 = vmatprep.mubr.bf16.mxu0 %v9006_v57 }
 0x3f5   : > { %4549 = vmatmul.mubr.bf16.gmra.mrb[164].mxu1 %v8870_v60 }
 0x3f6   : > { %4556 = vmatprep.mubr.bf16.mxu1 %v9036_v11 }
 0x3f9   : > { %4034 = vmatmul.mubr.bf16.gmra.mrb[4].mxu0 %v8826_v49 }
 0x3fa   : > { %4041 = vmatprep.mubr.bf16.mxu0 %v9016_v59 }
 0x3fd   : > { %4557 = vmatmul.mubr.bf16.gmra.mrb[168].mxu1 %v8899_v22 }
 0x3fe   : > { %4564 = vmatprep.mubr.bf16.mxu1 %v9046_v30 }
 0x401   : > { %4042 = vmatmul.mubr.bf16.gmra.mrb[8].mxu0 %v8852_v53 }
 0x402   : > { %4049 = vmatprep.mubr.bf16.mxu0 %v9026_v33 }
 0x404   : > { %v5749_v36 = vpop.f32.mrb[160].mxu0 }
 0x405   : > { %4565 = vmatmul.mubr.bf16.gmra.mrb[172].mxu1 %v8908_v16  ;;  %v5750_v9 = vpop.f32.mrb[161].mxu0 }
 0x406   : > { %4572 = vmatprep.mubr.bf16.mxu1 %v9056_v39  ;;  %v9128_v35 = vadd.f32 %v5750_v9, %v5749_v36  ;;  %v5752_v27 = vpop.f32.mrb[162].mxu0 }
 0x407   : > { %v5753_v4 = vpop.f32.mrb[163].mxu0 }
 0x408   : > { %v9130_v51 = vadd.f32 %v5753_v4, %v5752_v27 }
 0x409   : > { %4050 = vmatmul.mubr.bf16.gmra.mrb[12].mxu0 %v8870_v60 }
 0x40a   : > { %4057 = vmatprep.mubr.bf16.mxu0 %v9036_v11 }
 0x40c   : > { %v5755_v23 = vpop.f32.mrb[164].mxu0 }
 0x40d   : > { %4573 = vmatmul.mubr.bf16.gmra.mrb[176].mxu1 %v8943_v6  ;;  %v5756_v5 = vpop.f32.mrb[165].mxu0 }
 0x40e   : > { %4580 = vmatprep.mubr.bf16.mxu1 %v9066_v20  ;;  %v9136_v63 = vadd.f32 %v5756_v5, %v5755_v23  ;;  %v5758_v15 = vpop.f32.mrb[166].mxu0 }
 0x40f   : > { %v5759_v52 = vpop.f32.mrb[167].mxu0 }
 0x410   : > { %v9138_v49 = vadd.f32 %v5759_v52, %v5758_v15 }
 0x411   : > { %4058 = vmatmul.mubr.bf16.gmra.mrb[16].mxu0 %v8899_v22 }
 0x412   : > { %4065 = vmatprep.mubr.bf16.mxu0 %v9046_v30 }
 0x414   : > { %v5761_v53 = vpop.f32.mrb[168].mxu0 }
 0x415   : > { %4581 = vmatmul.mubr.bf16.gmra.mrb[180].mxu1 %v8950_v2  ;;  %v5762_v60 = vpop.f32.mrb[169].mxu0 }
 0x416   : > { %4588 = vmatprep.mubr.bf16.mxu1 %v9075_v56  ;;  %v9144_v44 = vadd.f32 %v5762_v60, %v5761_v53  ;;  %v5764_v26 = vpop.f32.mrb[170].mxu0 }
 0x417   : > { %v5765_v14 = vpop.f32.mrb[171].mxu0 }
 0x418   : > { %v9146_v12 = vadd.f32 %v5765_v14, %v5764_v26 }
 0x419   : > { %4066 = vmatmul.mubr.bf16.gmra.mrb[20].mxu0 %v8908_v16 }
 0x41a   : > { %4073 = vmatprep.mubr.bf16.mxu0 %v9056_v39 }
 0x41c   : > { %v5767_v57 = vpop.f32.mrb[172].mxu0 }
 0x41d   : > { %4589 = vmatmul.mubr.bf16.gmra.mrb[184].mxu1 %v8981_v31  ;;  %v5768_v22 = vpop.f32.mrb[173].mxu0 }
 0x41e   : > { %4596 = vmatprep.mubr.bf16.mxu1 %v9066_v20  ;;  %v9152_v59 = vadd.f32 %v5768_v22, %v5767_v57  ;;  %v5770_v33 = vpop.f32.mrb[174].mxu0 }
 0x41f   : > { %v5771_v11 = vpop.f32.mrb[175].mxu0 }
 0x420   : > { %v9154_v30 = vadd.f32 %v5771_v11, %v5770_v33 }
 0x421   : > { %4074 = vmatmul.mubr.bf16.gmra.mrb[24].mxu0 %v8943_v6 }
 0x422   : > { %4081 = vmatprep.mubr.bf16.mxu0 %v9066_v20 }
 0x424   : > { %v5773_v8 = vpop.f32.mrb[176].mxu0 }
 0x425   : > { %4597 = vmatmul.mubr.bf16.gmra.mrb[188].mxu1 %v8950_v2  ;;  %v5774_v16 = vpop.f32.mrb[177].mxu0 }
 0x426   : > { %6397 = vmatprep.mubr.bf16.mxu1 %v8677_v43  ;;  %v9160_v31 = vadd.f32 %v5774_v16, %v5773_v8  ;;  %v5776_v39 = vpop.f32.mrb[178].mxu0 }
 0x427   : > { %v5777_v32 = vpop.f32.mrb[179].mxu0 }
 0x428   : > { %v9162_v19 = vadd.f32 %v5777_v32, %v5776_v39 }
 0x429   : > { %4082 = vmatmul.mubr.bf16.gmra.mrb[28].mxu0 %v8950_v2 }
 0x42c   : > { %v5779_v34 = vpop.f32.mrb[180].mxu0 }
 0x42d   : > { %6398 = vmatmul.mubr.bf16.vlgmr.msra.gmra.mrb[96].mxu1 %v8684_v24  ;;  %v5780_v6 = vpop.f32.mrb[181].mxu0 }
 0x42e   : > { %6401 = vmatprep.mubr.bf16.mxu1 %v8725_v41  ;;  %v9167_v28 = vadd.f32 %v5780_v6, %v5779_v34  ;;  %v5782_v17 = vpop.f32.mrb[182].mxu0 }
 0x42f   : > { %v5783_v20 = vpop.f32.mrb[183].mxu0 }
 0x430   : > { %v9169_v18 = vadd.f32 %v5783_v20, %v5782_v17 }
 0x434   : > { %v5785_v43 = vpop.f32.mrb[184].mxu0 }
 0x435   : > { %6402 = vmatmul.mubr.bf16.gmra.mrb[100].mxu1 %v8738_v47  ;;  %v5786_v55 = vpop.f32.mrb[185].mxu0 }
 0x436   : > { %6405 = vmatprep.mubr.bf16.mxu1 %v8785_v0  ;;  %v9173_v62 = vadd.f32 %v5786_v55, %v5785_v43  ;;  %v5788_v2 = vpop.f32.mrb[186].mxu0 }
 0x437   : > { %v5789_v45 = vpop.f32.mrb[187].mxu0 }
 0x438   : > { %v9175_v24 = vadd.f32 %v5789_v45, %v5788_v2 }
 0x43c   : > { %v5791_v48 = vpop.f32.mrb[188].mxu0 }
 0x43d   : > { %6406 = vmatmul.mubr.bf16.gmra.mrb[104].mxu1 %v8789_v13  ;;  %v5792_v41 = vpop.f32.mrb[189].mxu0 }
 0x43e   : > { %6409 = vmatprep.mubr.bf16.mxu1 %v8841_v58  ;;  %v9179_v56 = vadd.f32 %v5792_v41, %v5791_v48  ;;  %v5794_v21 = vpop.f32.mrb[190].mxu0 }
 0x43f   : > { %v5795_v37 = vpop.f32.mrb[191].mxu0 }
 0x440   : > { %v9181_v47 = vadd.f32 %v5795_v37, %v5794_v21 }
 0x444   : > { %v5797_v40 = vpop.f32.mrb[192].mxu0 }
 0x445   : > { %6410 = vmatmul.mubr.bf16.gmra.mrb[108].mxu1 %v8848_v3  ;;  %v5798_v0 = vpop.f32.mrb[193].mxu0 }
 0x446   : > { %6413 = vmatprep.mubr.bf16.mxu1 %v8890_v7  ;;  %v9185_v38 = vadd.f32 %v5798_v0, %v5797_v40  ;;  %v5800_v25 = vpop.f32.mrb[194].mxu0 }
 0x447   : > { %v5801_v42 = vpop.f32.mrb[195].mxu0 }
 0x448   : > { %v9187_v13 = vadd.f32 %v5801_v42, %v5800_v25 }
 0x44c   : > { %v5803_v50 = vpop.f32.mrb[196].mxu0 }
 0x44d   : > { %6414 = vmatmul.mubr.bf16.gmra.mrb[112].mxu1 %v8895_v61  ;;  %v5804_v58 = vpop.f32.mrb[197].mxu0 }
 0x44e   : > { %6417 = vmatprep.mubr.bf16.mxu1 %v8933_v46  ;;  %v9191_v36 = vadd.f32 %v5804_v58, %v5803_v50  ;;  %v5806_v9 = vpop.f32.mrb[198].mxu0 }
 0x44f   : > { %v5807_v27 = vpop.f32.mrb[199].mxu0 }
 0x450   : > { %v9193_v3 = vadd.f32 %v5807_v27, %v5806_v9 }
 0x454   : > { %v5809_v4 = vpop.f32.mrb[200].mxu0 }
 0x455   : > { %6418 = vmatmul.mubr.bf16.gmra.mrb[116].mxu1 %v8939_v54  ;;  %v5810_v7 = vpop.f32.mrb[201].mxu0 }
 0x456   : > { %6421 = vmatprep.mubr.bf16.mxu1 %v8971_v29  ;;  %v9197_v23 = vadd.f32 %v5810_v7, %v5809_v4  ;;  %v5812_v5 = vpop.f32.mrb[202].mxu0 }
 0x457   : > { %v5813_v15 = vpop.f32.mrb[203].mxu0 }
 0x458   : > { %v9199_v61 = vadd.f32 %v5813_v15, %v5812_v5 }
 0x45c   : > { %v5815_v52 = vpop.f32.mrb[204].mxu0 }
 0x45d   : > { %6422 = vmatmul.mubr.bf16.gmra.mrb[120].mxu1 %v8977_v10  ;;  %v5816_v46 = vpop.f32.mrb[205].mxu0 }
 0x45e   : > { %6425 = vmatprep.mubr.bf16.mxu1 %v8997_v1  ;;  %v9203_v53 = vadd.f32 %v5816_v46, %v5815_v52  ;;  %v5818_v60 = vpop.f32.mrb[206].mxu0 }
 0x45f   : > { %v5819_v26 = vpop.f32.mrb[207].mxu0 }
 0x460   : > { %v9205_v54 = vadd.f32 %v5819_v26, %v5818_v60 }
 0x464   : > { %v5821_v14 = vpop.f32.mrb[208].mxu0 }
 0x465   : > { %6426 = vmatmul.mubr.bf16.gmra.mrb[124].mxu1 %v8977_v10  ;;  %v5822_v29 = vpop.f32.mrb[209].mxu0 }
 0x466   : > { %v9208_v57 = vadd.f32 %v5822_v29, %v5821_v14  ;;  %v5824_v22 = vpop.f32.mrb[210].mxu0 }
 0x467   : > { %v5825_v33 = vpop.f32.mrb[211].mxu0 }
 0x468   : > { %v9210_v11 = vadd.f32 %v5825_v33, %v5824_v22 }
 0x46c   : > { %v5827_v8 = vpop.f32.mrb[212].mxu0 }
 0x46d   : > { %v5828_v16 = vpop.f32.mrb[213].mxu0 }
 0x46e   : > { %v9212_v39 = vadd.f32 %v5828_v16, %v5827_v8  ;;  %v5830_v1 = vpop.f32.mrb[214].mxu0 }
 0x46f   : > { %v5831_v32 = vpop.f32.mrb[215].mxu0 }
 0x470   : > { %v9214_v34 = vadd.f32 %v5831_v32, %v5830_v1 }
 0x474   : > { %v5833_v6 = vpop.f32.mrb[216].mxu0 }
 0x475   : > { %v5834_v17 = vpop.f32.mrb[217].mxu0 }
 0x476   : > { %v9216_v20 = vadd.f32 %v5834_v17, %v5833_v6  ;;  %v5836_v10 = vpop.f32.mrb[218].mxu0 }
 0x477   : > { %v5837_v43 = vpop.f32.mrb[219].mxu0 }
 0x478   : > { %v9218_v55 = vadd.f32 %v5837_v43, %v5836_v10 }
 0x47c   : > { %v5839_v2 = vpop.f32.mrb[220].mxu0 }
 0x47d   : > { %v5840_v45 = vpop.f32.mrb[221].mxu0 }
 0x47e   : > { %v9220_v48 = vadd.f32 %v5840_v45, %v5839_v2  ;;  %v5842_v41 = vpop.f32.mrb[222].mxu0 }
 0x47f   : > { %v5843_v21 = vpop.f32.mrb[223].mxu0 }
 0x480   : > { %v6021_v37 = vpop.f32.mrb[128].mxu1  ;;  %v9222_v40 = vadd.f32 %v5843_v21, %v5842_v41 }
 0x481   : > { %v6022_v0 = vpop.f32.mrb[129].mxu1 }
 0x482   : > { %v6023_v25 = vadd.f32 %v6022_v0, %v6021_v37  ;;  %v6024_v42 = vpop.f32.mrb[130].mxu1 }
 0x483   : > { %v6025_v50 = vpop.f32.mrb[131].mxu1 }
 0x484   : > { %v6026_v58 = vadd.f32 %v6025_v50, %v6024_v42  ;;  %v5885_v9 = vpop.f32.mrb[224].mxu0 }
 0x485   : > { %v5886_v27 = vpop.f32.mrb[225].mxu0 }
 0x486   : > { %v5887_v4 = vadd.f32 %v5886_v27, %v5885_v9  ;;  %v5888_v7 = vpop.f32.mrb[226].mxu0 }
 0x487   : > { %v5889_v5 = vpop.f32.mrb[227].mxu0 }
 0x488   : > { %v6027_v15 = vpop.f32.mrb[132].mxu1  ;;  %v6560_v52 = vadd.f32 %v5887_v4, %v9128_v35  ;;  %v5890_v46 = vadd.f32 %v5889_v5, %v5888_v7 }
 0x489   : > { %v6028_v60 = vpop.f32.mrb[133].mxu1 }
 0x48a   : > { %v6029_v26 = vadd.f32 %v6028_v60, %v6027_v15  ;;  %v6030_v14 = vpop.f32.mrb[134].mxu1  ;;  %v6566_v29 = vadd.f32 %v5890_v46, %v9130_v51  ;;  %v9226_v33 = vadd.f32 %v6560_v52, %v6023_v25 }
 0x48b   : > { %v6031_v22 = vpop.f32.mrb[135].mxu1 }
 0x48c   : > { %v6032_v8 = vadd.f32 %v6031_v22, %v6030_v14  ;;  %v5891_v16 = vpop.f32.mrb[228].mxu0  ;;  %v9228_v1 = vadd.f32 %v6566_v29, %v6026_v58 }
 0x48d   : > { %v5892_v32 = vpop.f32.mrb[229].mxu0 }
 0x48e   : > { %v5893_v6 = vadd.f32 %v5892_v32, %v5891_v16  ;;  %v5894_v17 = vpop.f32.mrb[230].mxu0 }
 0x48f   : > { %v5895_v10 = vpop.f32.mrb[231].mxu0 }
 0x490   : > { %v6033_v43 = vpop.f32.mrb[136].mxu1  ;;  %v6557_v35 = vadd.f32 %v5893_v6, %v9136_v63  ;;  %v5896_v2 = vadd.f32 %v5895_v10, %v5894_v17 }
 0x491   : > { %v6034_v45 = vpop.f32.mrb[137].mxu1 }
 0x492   : > { %v6035_v41 = vadd.f32 %v6034_v45, %v6033_v43  ;;  %v6036_v21 = vpop.f32.mrb[138].mxu1  ;;  %v6563_v51 = vadd.f32 %v5896_v2, %v9138_v49  ;;  %v9232_v0 = vadd.f32 %v6557_v35, %v6029_v26 }
 0x493   : > { %v6037_v37 = vpop.f32.mrb[139].mxu1 }
 0x494   : > { %v6038_v25 = vadd.f32 %v6037_v37, %v6036_v21  ;;  %v5897_v42 = vpop.f32.mrb[232].mxu0  ;;  %v9234_v50 = vadd.f32 %v6563_v51, %v6032_v8 }
 0x495   : > { %v5898_v58 = vpop.f32.mrb[233].mxu0 }
 0x496   : > { %v5899_v9 = vadd.f32 %v5898_v58, %v5897_v42  ;;  %v5900_v27 = vpop.f32.mrb[234].mxu0 }
 0x497   : > { %v5901_v4 = vpop.f32.mrb[235].mxu0 }
 0x498   : > { %v6039_v7 = vpop.f32.mrb[140].mxu1  ;;  %v6572_v63 = vadd.f32 %v5899_v9, %v9144_v44  ;;  %v5902_v5 = vadd.f32 %v5901_v4, %v5900_v27 }
 0x499   : > { %v6040_v15 = vpop.f32.mrb[141].mxu1 }
 0x49a   : > { %v6041_v52 = vadd.f32 %v6040_v15, %v6039_v7  ;;  %v6042_v46 = vpop.f32.mrb[142].mxu1  ;;  %v6578_v49 = vadd.f32 %v5902_v5, %v9146_v12  ;;  %v9238_v26 = vadd.f32 %v6572_v63, %v6035_v41 }
 0x49b   : > { %v6043_v60 = vpop.f32.mrb[143].mxu1 }
 0x49c   : > { %v6044_v14 = vadd.f32 %v6043_v60, %v6042_v46  ;;  %v5903_v29 = vpop.f32.mrb[236].mxu0  ;;  %v9240_v22 = vadd.f32 %v6578_v49, %v6038_v25 }
 0x49d   : > { %v5904_v8 = vpop.f32.mrb[237].mxu0 }
 0x49e   : > { %v5905_v16 = vadd.f32 %v5904_v8, %v5903_v29  ;;  %v5906_v32 = vpop.f32.mrb[238].mxu0 }
 0x49f   : > { %v5907_v6 = vpop.f32.mrb[239].mxu0 }
 0x4a0   : > { %v6045_v17 = vpop.f32.mrb[144].mxu1  ;;  %v6569_v44 = vadd.f32 %v5905_v16, %v9152_v59  ;;  %v5908_v10 = vadd.f32 %v5907_v6, %v5906_v32 }
 0x4a1   : > { %v6046_v43 = vpop.f32.mrb[145].mxu1 }
 0x4a2   : > { %v6047_v35 = vadd.f32 %v6046_v43, %v6045_v17  ;;  %v6048_v2 = vpop.f32.mrb[146].mxu1  ;;  %v6575_v12 = vadd.f32 %v5908_v10, %v9154_v30  ;;  %v9244_v41 = vadd.f32 %v6569_v44, %v6041_v52 }
 0x4a3   : > { %v6049_v45 = vpop.f32.mrb[147].mxu1 }
 0x4a4   : > { %v6050_v21 = vadd.f32 %v6049_v45, %v6048_v2  ;;  %v5909_v51 = vpop.f32.mrb[240].mxu0  ;;  %v9246_v37 = vadd.f32 %v6575_v12, %v6044_v14 }
 0x4a5   : > { %v5910_v25 = vpop.f32.mrb[241].mxu0 }
 0x4a6   : > { %v5911_v42 = vadd.f32 %v5910_v25, %v5909_v51  ;;  %v5912_v58 = vpop.f32.mrb[242].mxu0 }
 0x4a7   : > { %v5913_v9 = vpop.f32.mrb[243].mxu0 }
 0x4a8   : > { %v6051_v27 = vpop.f32.mrb[148].mxu1  ;;  %v6584_v59 = vadd.f32 %v5911_v42, %v9160_v31  ;;  %v5914_v4 = vadd.f32 %v5913_v9, %v5912_v58 }
 0x4a9   : > { %v6052_v7 = vpop.f32.mrb[149].mxu1 }
 0x4aa   : > { %v6053_v63 = vadd.f32 %v6052_v7, %v6051_v27  ;;  %v6054_v5 = vpop.f32.mrb[150].mxu1  ;;  %v6590_v30 = vadd.f32 %v5914_v4, %v9162_v19  ;;  %v9250_v52 = vadd.f32 %v6584_v59, %v6047_v35 }
 0x4ab   : > { %v6055_v15 = vpop.f32.mrb[151].mxu1 }
 0x4ac   : > { %v6056_v46 = vadd.f32 %v6055_v15, %v6054_v5  ;;  %v5915_v49 = vpop.f32.mrb[244].mxu0  ;;  %v9252_v60 = vadd.f32 %v6590_v30, %v6050_v21 }
 0x4ad   : > { %v5916_v14 = vpop.f32.mrb[245].mxu0 }
 0x4ae   : > { %v5917_v29 = vadd.f32 %v5916_v14, %v5915_v49  ;;  %v5918_v8 = vpop.f32.mrb[246].mxu0 }
 0x4af   : > { %v5919_v16 = vpop.f32.mrb[247].mxu0 }
 0x4b0   : > { %v6057_v32 = vpop.f32.mrb[152].mxu1  ;;  %v6581_v31 = vadd.f32 %v5917_v29, %v9167_v28  ;;  %v5920_v6 = vadd.f32 %v5919_v16, %v5918_v8 }
 0x4b1   : > { %v6058_v17 = vpop.f32.mrb[153].mxu1 }
 0x4b2   : > { %v6059_v44 = vadd.f32 %v6058_v17, %v6057_v32  ;;  %v6060_v10 = vpop.f32.mrb[154].mxu1  ;;  %v6587_v19 = vadd.f32 %v5920_v6, %v9169_v18  ;;  %v9256_v35 = vadd.f32 %v6581_v31, %v6053_v63 }
 0x4b3   : > { %v6061_v43 = vpop.f32.mrb[155].mxu1 }
 0x4b4   : > { %v6062_v2 = vadd.f32 %v6061_v43, %v6060_v10  ;;  %v5921_v12 = vpop.f32.mrb[248].mxu0  ;;  %v9258_v45 = vadd.f32 %v6587_v19, %v6056_v46 }
 0x4b5   : > { %v5922_v21 = vpop.f32.mrb[249].mxu0 }
 0x4b6   : > { %v5923_v51 = vadd.f32 %v5922_v21, %v5921_v12  ;;  %v5924_v25 = vpop.f32.mrb[250].mxu0 }
 0x4b7   : > { %v5925_v42 = vpop.f32.mrb[251].mxu0 }
 0x4b8   : > { %v6063_v58 = vpop.f32.mrb[156].mxu1  ;;  %v6596_v28 = vadd.f32 %v5923_v51, %v9173_v62  ;;  %v5926_v9 = vadd.f32 %v5925_v42, %v5924_v25 }
 0x4b9   : > { %v6064_v27 = vpop.f32.mrb[157].mxu1 }
 0x4ba   : > { %v6065_v59 = vadd.f32 %v6064_v27, %v6063_v58  ;;  %v6066_v4 = vpop.f32.mrb[158].mxu1  ;;  %v6602_v18 = vadd.f32 %v5926_v9, %v9175_v24  ;;  %v9262_v63 = vadd.f32 %v6596_v28, %v6059_v44 }
 0x4bb   : > { %v6067_v7 = vpop.f32.mrb[159].mxu1 }
 0x4bc   : > { %v6068_v5 = vadd.f32 %v6067_v7, %v6066_v4  ;;  %v5927_v30 = vpop.f32.mrb[252].mxu0  ;;  %v9264_v15 = vadd.f32 %v6602_v18, %v6062_v2 }
 0x4bd   : > { %v5928_v46 = vpop.f32.mrb[253].mxu0 }
 0x4be   : > { %v5929_v49 = vadd.f32 %v5928_v46, %v5927_v30  ;;  %v5930_v14 = vpop.f32.mrb[254].mxu0 }
 0x4bf   : > { %v5931_v29 = vpop.f32.mrb[255].mxu0 }
 0x4c0   : > { %v6069_v8 = vpop.f32.mrb[160].mxu1  ;;  %v6593_v62 = vadd.f32 %v5929_v49, %v9179_v56  ;;  %v5932_v16 = vadd.f32 %v5931_v29, %v5930_v14 }
 0x4c1   : > { %v6070_v32 = vpop.f32.mrb[161].mxu1 }
 0x4c2   : > { %v6071_v31 = vadd.f32 %v6070_v32, %v6069_v8  ;;  %v6072_v6 = vpop.f32.mrb[162].mxu1  ;;  %v6599_v24 = vadd.f32 %v5932_v16, %v9181_v47  ;;  %v9268_v44 = vadd.f32 %v6593_v62, %v6065_v59 }
 0x4c3   : > { %v6073_v17 = vpop.f32.mrb[163].mxu1 }
 0x4c4   : > { %v6074_v10 = vadd.f32 %v6073_v17, %v6072_v6  ;;  %v5933_v19 = vpop.f32.mrb[0].mxu0  ;;  %v9270_v43 = vadd.f32 %v6599_v24, %v6068_v5 }
 0x4c5   : > { %v5934_v2 = vpop.f32.mrb[1].mxu0 }
 0x4c6   : > { %v5935_v12 = vadd.f32 %v5934_v2, %v5933_v19  ;;  %v5936_v21 = vpop.f32.mrb[2].mxu0 }
 0x4c7   : > { %v5937_v51 = vpop.f32.mrb[3].mxu0 }
 0x4c8   : > { %v6075_v25 = vpop.f32.mrb[164].mxu1  ;;  %v6608_v56 = vadd.f32 %v5935_v12, %v9185_v38  ;;  %v5938_v42 = vadd.f32 %v5937_v51, %v5936_v21 }
 0x4c9   : > { %v6076_v58 = vpop.f32.mrb[165].mxu1 }
 0x4ca   : > { %v6077_v28 = vadd.f32 %v6076_v58, %v6075_v25  ;;  %v6078_v9 = vpop.f32.mrb[166].mxu1  ;;  %v6614_v47 = vadd.f32 %v5938_v42, %v9187_v13  ;;  %v9274_v59 = vadd.f32 %v6608_v56, %v6071_v31 }
 0x4cb   : > { %v6079_v27 = vpop.f32.mrb[167].mxu1 }
 0x4cc   : > { %v6080_v4 = vadd.f32 %v6079_v27, %v6078_v9  ;;  %v5939_v18 = vpop.f32.mrb[4].mxu0  ;;  %v9276_v7 = vadd.f32 %v6614_v47, %v6074_v10 }
 0x4cd   : > { %v5940_v5 = vpop.f32.mrb[5].mxu0 }
 0x4ce   : > { %v5941_v30 = vadd.f32 %v5940_v5, %v5939_v18  ;;  %v5942_v46 = vpop.f32.mrb[6].mxu0 }
 0x4cf   : > { %v5943_v49 = vpop.f32.mrb[7].mxu0 }
 0x4d0   : > { %v6081_v14 = vpop.f32.mrb[168].mxu1  ;;  %v6605_v38 = vadd.f32 %v5941_v30, %v9191_v36  ;;  %v5944_v29 = vadd.f32 %v5943_v49, %v5942_v46 }
 0x4d1   : > { %v6082_v8 = vpop.f32.mrb[169].mxu1 }
 0x4d2   : > { %v6083_v62 = vadd.f32 %v6082_v8, %v6081_v14  ;;  %v6084_v16 = vpop.f32.mrb[170].mxu1  ;;  %v6611_v13 = vadd.f32 %v5944_v29, %v9193_v3  ;;  %v9280_v31 = vadd.f32 %v6605_v38, %v6077_v28 }
 0x4d3   : > { %v6085_v32 = vpop.f32.mrb[171].mxu1 }
 0x4d4   : > { %v6086_v6 = vadd.f32 %v6085_v32, %v6084_v16  ;;  %v5945_v24 = vpop.f32.mrb[8].mxu0  ;;  %v9282_v17 = vadd.f32 %v6611_v13, %v6080_v4 }
 0x4d5   : > { %v5946_v10 = vpop.f32.mrb[9].mxu0 }
 0x4d6   : > { %v5947_v19 = vadd.f32 %v5946_v10, %v5945_v24  ;;  %v5948_v2 = vpop.f32.mrb[10].mxu0 }
 0x4d7   : > { %v5949_v12 = vpop.f32.mrb[11].mxu0 }
 0x4d8   : > { %v6087_v21 = vpop.f32.mrb[172].mxu1  ;;  %v6620_v36 = vadd.f32 %v5947_v19, %v9197_v23  ;;  %v5950_v51 = vadd.f32 %v5949_v12, %v5948_v2 }
 0x4d9   : > { %v6088_v25 = vpop.f32.mrb[173].mxu1 }
 0x4da   : > { %v6089_v56 = vadd.f32 %v6088_v25, %v6087_v21  ;;  %v6090_v42 = vpop.f32.mrb[174].mxu1  ;;  %v6626_v3 = vadd.f32 %v5950_v51, %v9199_v61  ;;  %v9286_v28 = vadd.f32 %v6620_v36, %v6083_v62 }
 0x4db   : > { %v6091_v58 = vpop.f32.mrb[175].mxu1 }
 0x4dc   : > { %v6092_v9 = vadd.f32 %v6091_v58, %v6090_v42  ;;  %v5951_v47 = vpop.f32.mrb[12].mxu0  ;;  %v9288_v27 = vadd.f32 %v6626_v3, %v6086_v6 }
 0x4dd   : > { %v5952_v4 = vpop.f32.mrb[13].mxu0 }
 0x4de   : > { %v5953_v18 = vadd.f32 %v5952_v4, %v5951_v47  ;;  %v5954_v5 = vpop.f32.mrb[14].mxu0 }
 0x4df   : > { %v5955_v30 = vpop.f32.mrb[15].mxu0 }
 0x4e0   : > { %v6093_v46 = vpop.f32.mrb[176].mxu1  ;;  %v6617_v23 = vadd.f32 %v5953_v18, %v9203_v53  ;;  %v5956_v49 = vadd.f32 %v5955_v30, %v5954_v5 }
 0x4e1   : > { %v6094_v14 = vpop.f32.mrb[177].mxu1 }
 0x4e2   : > { %v6095_v38 = vadd.f32 %v6094_v14, %v6093_v46  ;;  %v6096_v29 = vpop.f32.mrb[178].mxu1  ;;  %v6623_v61 = vadd.f32 %v5956_v49, %v9205_v54  ;;  %v9292_v62 = vadd.f32 %v6617_v23, %v6089_v56 }
 0x4e3   : > { %v6097_v8 = vpop.f32.mrb[179].mxu1 }
 0x4e4   : > { %v6098_v16 = vadd.f32 %v6097_v8, %v6096_v29  ;;  %v5957_v13 = vpop.f32.mrb[16].mxu0  ;;  %v9294_v32 = vadd.f32 %v6623_v61, %v6092_v9 }
 0x4e5   : > { %v5958_v6 = vpop.f32.mrb[17].mxu0 }
 0x4e6   : > { %v5959_v24 = vadd.f32 %v5958_v6, %v5957_v13  ;;  %v5960_v10 = vpop.f32.mrb[18].mxu0 }
 0x4e7   : > { %v5961_v19 = vpop.f32.mrb[19].mxu0 }
 0x4e8   : > { %v6099_v2 = vpop.f32.mrb[180].mxu1  ;;  %v6632_v53 = vadd.f32 %v5959_v24, %v9208_v57  ;;  %v5962_v12 = vadd.f32 %v5961_v19, %v5960_v10 }
 0x4e9   : > { %v6100_v21 = vpop.f32.mrb[181].mxu1 }
 0x4ea   : > { %v6101_v36 = vadd.f32 %v6100_v21, %v6099_v2  ;;  %v6102_v51 = vpop.f32.mrb[182].mxu1  ;;  %v6638_v54 = vadd.f32 %v5962_v12, %v9210_v11  ;;  %v9298_v56 = vadd.f32 %v6632_v53, %v6095_v38 }
 0x4eb   : > { %v6103_v25 = vpop.f32.mrb[183].mxu1 }
 0x4ec   : > { %v6104_v42 = vadd.f32 %v6103_v25, %v6102_v51  ;;  %v5963_v3 = vpop.f32.mrb[20].mxu0  ;;  %v9300_v58 = vadd.f32 %v6638_v54, %v6098_v16 }
 0x4ed   : > { %v5964_v9 = vpop.f32.mrb[21].mxu0 }
 0x4ee   : > { %v5965_v47 = vadd.f32 %v5964_v9, %v5963_v3  ;;  %v5966_v4 = vpop.f32.mrb[22].mxu0 }
 0x4ef   : > { %v5967_v18 = vpop.f32.mrb[23].mxu0 }
 0x4f0   : > { %v6105_v5 = vpop.f32.mrb[184].mxu1  ;;  %v6629_v57 = vadd.f32 %v5965_v47, %v9212_v39  ;;  %v5968_v30 = vadd.f32 %v5967_v18, %v5966_v4 }
 0x4f1   : > { %v6106_v46 = vpop.f32.mrb[185].mxu1 }
 0x4f2   : > { %v6107_v23 = vadd.f32 %v6106_v46, %v6105_v5  ;;  %v6108_v49 = vpop.f32.mrb[186].mxu1  ;;  %v6635_v11 = vadd.f32 %v5968_v30, %v9214_v34  ;;  %v9304_v38 = vadd.f32 %v6629_v57, %v6101_v36 }
 0x4f3   : > { %v6109_v14 = vpop.f32.mrb[187].mxu1 }
 0x4f4   : > { %v6110_v29 = vadd.f32 %v6109_v14, %v6108_v49  ;;  %v5969_v61 = vpop.f32.mrb[24].mxu0  ;;  %v9306_v8 = vadd.f32 %v6635_v11, %v6104_v42 }
 0x4f5   : > { %v5970_v16 = vpop.f32.mrb[25].mxu0 }
 0x4f6   : > { %v5971_v13 = vadd.f32 %v5970_v16, %v5969_v61  ;;  %v5972_v6 = vpop.f32.mrb[26].mxu0 }
 0x4f7   : > { %v5973_v24 = vpop.f32.mrb[27].mxu0 }
 0x4f8   : > { %v6111_v10 = vpop.f32.mrb[188].mxu1  ;;  %v6644_v39 = vadd.f32 %v5971_v13, %v9216_v20  ;;  %v5974_v19 = vadd.f32 %v5973_v24, %v5972_v6 }
 0x4f9   : > { %v6112_v2 = vpop.f32.mrb[189].mxu1 }
 0x4fa   : > { %v6113_v53 = vadd.f32 %v6112_v2, %v6111_v10  ;;  %v6114_v12 = vpop.f32.mrb[190].mxu1  ;;  %v6650_v34 = vadd.f32 %v5974_v19, %v9218_v55  ;;  %v9310_v36 = vadd.f32 %v6644_v39, %v6107_v23  ;;  %v9321_v23 = vld [vmem:[%s9788_s4] ss:$0 sm:$0xff] }
 0x4fb   : > { %v6115_v21 = vpop.f32.mrb[191].mxu1 }
 0x4fc   : > { %v6116_v51 = vadd.f32 %v6115_v21, %v6114_v12  ;;  %v5975_v54 = vpop.f32.mrb[28].mxu0  ;;  %v9312_v25 = vadd.f32 %v6650_v34, %v6110_v29 }
 0x4fd   : > { %v5976_v42 = vpop.f32.mrb[29].mxu0 }
 0x4fe   : > { %v5977_v3 = vadd.f32 %v5976_v42, %v5975_v54  ;;  %v5978_v9 = vpop.f32.mrb[30].mxu0 }
 0x4ff   : > { %v5979_v47 = vpop.f32.mrb[31].mxu0 }
 0x500   : > { %v6399_v4 = vpop.f32.mrb[96].mxu1  ;;  %v6641_v20 = vadd.f32 %v5977_v3, %v9220_v48  ;;  %v5980_v18 = vadd.f32 %v5979_v47, %v5978_v9 }
 0x501   : > { %v6559_v5 = vadd.f32 %v9232_v0, %v6399_v4  ;;  %v4639_v57 = vpop.f32.mrb[97].mxu1 }
 0x502   : > { %v6562_v55 = vadd.f32 %v9226_v33, %v4639_v57  ;;  %v6400_v30 = vpop.f32.mrb[98].mxu1  ;;  %v6647_v46 = vadd.f32 %v5980_v18, %v9222_v40  ;;  %v9324_v14 = vadd.f32 %v6641_v20, %v6113_v53 }
 0x503   : > { %v6565_v49 = vadd.f32 %v9234_v50, %v6400_v30  ;;  %v4642_v11 = vpop.f32.mrb[99].mxu1  ;;  %v9336_v40 = vadd.f32 %v6559_v5, %v9321_v23 }
 0x504   : > { %v6568_v48 = vadd.f32 %v9228_v1, %v4642_v11  ;;  %v9327_v29 = vadd.f32 %v6647_v46, %v6116_v51  ;;  %v9330_v0 = vadd.f32 %v6562_v55, %v9321_v23 }
 0x505   : > { %v9342_v1 = vadd.f32 %v6565_v49, %v9321_v23 }
 0x506   : > { %v9333_v33 = vadd.f32 %v6568_v48, %v9321_v23 }
 0x508   : > { %v4836_v61 = vadd.f32 %v9333_v33, %v9330_v0  ;;  %v6403_v50 = vpop.f32.mrb[100].mxu1 }
 0x509   : > { %v6571_v16 = vadd.f32 %v9244_v41, %v6403_v50  ;;  %v4655_v13 = vpop.f32.mrb[101].mxu1 }
 0x50a   : > { %v4837_v6 = vadd.f32 %v4836_v61, %v9336_v40  ;;  %v6574_v24 = vadd.f32 %v9238_v26, %v4655_v13  ;;  %v6404_v10 = vpop.f32.mrb[102].mxu1 }
 0x50b   : > { %v6577_v39 = vadd.f32 %v9246_v37, %v6404_v10  ;;  %v4658_v19 = vpop.f32.mrb[103].mxu1  ;;  %v9357_v21 = vadd.f32 %v6571_v16, %v9321_v23 }
 0x50c   : > { %v9348_v2 = vadd.f32 %v6574_v24, %v9321_v23  ;;  %v4838_v53 = vadd.f32 %v4837_v6, %v9342_v1  ;;  %v6580_v12 = vadd.f32 %v9240_v22, %v4658_v19 }
 0x50d   : > { %v9362_v42 = vadd.f32 %v6577_v39, %v9321_v23 }
 0x50e   : > { %v4839_v41 = vadd.f32 %v4838_v53, %v9348_v2  ;;  %v9354_v34 = vadd.f32 %v6580_v12, %v9321_v23 }
 0x510   : > { %v4840_v26 = vadd.f32 %v4839_v41, %v9354_v34  ;;  %v6407_v51 = vpop.f32.mrb[104].mxu1 }
 0x511   : > { %v6583_v37 = vadd.f32 %v9256_v35, %v6407_v51  ;;  %v4671_v54 = vpop.f32.mrb[105].mxu1 }
 0x512   : > { %v4841_v3 = vadd.f32 %v4840_v26, %v9357_v21  ;;  %v6586_v22 = vadd.f32 %v9250_v52, %v4671_v54  ;;  %v6408_v9 = vpop.f32.mrb[106].mxu1 }
 0x513   : > { %v6589_v47 = vadd.f32 %v9258_v45, %v6408_v9  ;;  %v4674_v4 = vpop.f32.mrb[107].mxu1  ;;  %v9377_v55 = vadd.f32 %v6583_v37, %v9321_v23 }
 0x514   : > { %v9368_v20 = vadd.f32 %v6586_v22, %v9321_v23  ;;  %v4842_v18 = vadd.f32 %v4841_v3, %v9362_v42  ;;  %v6592_v5 = vadd.f32 %v9252_v60, %v4674_v4 }
 0x515   : > { %v9382_v49 = vadd.f32 %v6589_v47, %v9321_v23 }
 0x516   : > { %v4843_v35 = vadd.f32 %v4842_v18, %v9368_v20  ;;  %v9374_v57 = vadd.f32 %v6592_v5, %v9321_v23 }
 0x518   : > { %v4844_v52 = vadd.f32 %v4843_v35, %v9374_v57  ;;  %v6411_v30 = vpop.f32.mrb[108].mxu1 }
 0x519   : > { %v6595_v45 = vadd.f32 %v9268_v44, %v6411_v30  ;;  %v4687_v46 = vpop.f32.mrb[109].mxu1 }
 0x51a   : > { %v4845_v11 = vadd.f32 %v4844_v52, %v9377_v55  ;;  %v6598_v60 = vadd.f32 %v9262_v63, %v4687_v46  ;;  %v6412_v48 = vpop.f32.mrb[110].mxu1 }
 0x51b   : > { %v6601_v61 = vadd.f32 %v9270_v43, %v6412_v48  ;;  %v4690_v50 = vpop.f32.mrb[111].mxu1  ;;  %v9397_v10 = vadd.f32 %v6595_v45, %v9321_v23 }
 0x51c   : > { %v9388_v16 = vadd.f32 %v6598_v60, %v9321_v23  ;;  %v4846_v13 = vadd.f32 %v4845_v11, %v9382_v49  ;;  %v6604_v6 = vadd.f32 %v9264_v15, %v4690_v50 }
 0x51d   : > { %v9402_v53 = vadd.f32 %v6601_v61, %v9321_v23 }
 0x51e   : > { %v4847_v44 = vadd.f32 %v4846_v13, %v9388_v16  ;;  %v9394_v24 = vadd.f32 %v6604_v6, %v9321_v23 }
 0x520   : > { %v4848_v63 = vadd.f32 %v4847_v44, %v9394_v24  ;;  %v6415_v39 = vpop.f32.mrb[112].mxu1 }
 0x521   : > { %v6607_v43 = vadd.f32 %v9280_v31, %v6415_v39  ;;  %v4703_v19 = vpop.f32.mrb[113].mxu1 }
 0x522   : > { %v4849_v12 = vadd.f32 %v4848_v63, %v9397_v10  ;;  %v6610_v15 = vadd.f32 %v9274_v59, %v4703_v19  ;;  %v6416_v41 = vpop.f32.mrb[114].mxu1 }
 0x523   : > { %v6613_v26 = vadd.f32 %v9282_v17, %v6416_v41  ;;  %v4706_v51 = vpop.f32.mrb[115].mxu1  ;;  %v9417_v9 = vadd.f32 %v6607_v43, %v9321_v23 }
 0x524   : > { %v9408_v37 = vadd.f32 %v6610_v15, %v9321_v23  ;;  %v4850_v54 = vadd.f32 %v4849_v12, %v9402_v53  ;;  %v6616_v3 = vadd.f32 %v9276_v7, %v4706_v51 }
 0x525   : > { %v9422_v18 = vadd.f32 %v6613_v26, %v9321_v23 }
 0x526   : > { %v4851_v31 = vadd.f32 %v4850_v54, %v9408_v37  ;;  %v9414_v22 = vadd.f32 %v6616_v3, %v9321_v23 }
 0x528   : > { %v4852_v59 = vadd.f32 %v4851_v31, %v9414_v22  ;;  %v6419_v47 = vpop.f32.mrb[116].mxu1 }
 0x529   : > { %v6619_v17 = vadd.f32 %v9292_v62, %v6419_v47  ;;  %v4719_v4 = vpop.f32.mrb[117].mxu1 }
 0x52a   : > { %v4853_v5 = vadd.f32 %v4852_v59, %v9417_v9  ;;  %v6622_v7 = vadd.f32 %v9286_v28, %v4719_v4  ;;  %v6420_v35 = vpop.f32.mrb[118].mxu1 }
 0x52b   : > { %v6625_v52 = vadd.f32 %v9294_v32, %v6420_v35  ;;  %v4722_v30 = vpop.f32.mrb[119].mxu1  ;;  %v4826_v48 = vadd.f32 %v6619_v17, %v9321_v23 }
 0x52c   : > { %v4824_v45 = vadd.f32 %v6622_v7, %v9321_v23  ;;  %v4854_v46 = vadd.f32 %v4853_v5, %v9422_v18  ;;  %v6628_v11 = vadd.f32 %v9288_v27, %v4722_v30 }
 0x52d   : > { %v4827_v6 = vadd.f32 %v6625_v52, %v9321_v23 }
 0x52e   : > { %v4855_v60 = vadd.f32 %v4854_v46, %v4824_v45  ;;  %v4825_v62 = vadd.f32 %v6628_v11, %v9321_v23 }
 0x530   : > { %v4856_v61 = vadd.f32 %v4855_v60, %v4825_v62  ;;  %v6423_v50 = vpop.f32.mrb[120].mxu1 }
 0x531   : > { %v6631_v13 = vadd.f32 %v9304_v38, %v6423_v50  ;;  %v4735_v28 = vpop.f32.mrb[121].mxu1 }
 0x532   : > { %v4857_v32 = vadd.f32 %v4856_v61, %v4826_v48  ;;  %v6634_v44 = vadd.f32 %v9298_v56, %v4735_v28  ;;  %v6424_v63 = vpop.f32.mrb[122].mxu1 }
 0x533   : > { %v6637_v39 = vadd.f32 %v9306_v8, %v6424_v63  ;;  %v4738_v43 = vpop.f32.mrb[123].mxu1  ;;  %v4830_v38 = vadd.f32 %v6631_v13, %v9321_v23 }
 0x534   : > { %v4828_v27 = vadd.f32 %v6634_v44, %v9321_v23  ;;  %v4858_v19 = vadd.f32 %v4857_v32, %v4827_v6  ;;  %v6640_v12 = vadd.f32 %v9300_v58, %v4738_v43 }
 0x535   : > { %v4831_v56 = vadd.f32 %v6637_v39, %v9321_v23 }
 0x536   : > { %v4859_v15 = vadd.f32 %v4858_v19, %v4828_v27  ;;  %v4829_v41 = vadd.f32 %v6640_v12, %v9321_v23 }
 0x538   : > { %v4860_v26 = vadd.f32 %v4859_v15, %v4829_v41  ;;  %v6427_v51 = vpop.f32.mrb[124].mxu1 }
 0x539   : > { %v6643_v54 = vadd.f32 %v9324_v14, %v6427_v51  ;;  %v4751_v3 = vpop.f32.mrb[125].mxu1 }
 0x53a   : > { %v4861_v31 = vadd.f32 %v4860_v26, %v4830_v38  ;;  %v6646_v8 = vadd.f32 %v9310_v36, %v4751_v3  ;;  %v6428_v59 = vpop.f32.mrb[126].mxu1 }
 0x53b   : > { %v6649_v47 = vadd.f32 %v9327_v29, %v6428_v59  ;;  %v4754_v17 = vpop.f32.mrb[127].mxu1  ;;  %v4834_v14 = vadd.f32 %v6643_v54, %v9321_v23 }
 0x53c   : > { %v4832_v58 = vadd.f32 %v6646_v8, %v9321_v23  ;;  %v4862_v4 = vadd.f32 %v4861_v31, %v4831_v56  ;;  %v6652_v5 = vadd.f32 %v9312_v25, %v4754_v17 }
 0x53d   : > { %v4835_v30 = vadd.f32 %v6649_v47, %v9321_v23 }
 0x53e   : > { %v4863_v7 = vadd.f32 %v4862_v4, %v4832_v58  ;;  %v4833_v35 = vadd.f32 %v6652_v5, %v9321_v23 }
 0x540   : > { %v4864_v52 = vadd.f32 %v4863_v7, %v4833_v35 }
 0x542   : > { %v4865_v46 = vadd.f32 %v4864_v52, %v4834_v14 }
 0x544   : > { %v4866_v11 = vadd.f32 %v4865_v46, %v4835_v30 }
 0x546   : > { %v4867_v36 = vrot.slane %v4866_v11, 4 }
 0x548   : > { %v4868_v60 = vadd.f32 %v4867_v36, %v4866_v11 }
 0x54a   : > { %v4869_v61 = vrot.slane %v4868_v60, 2 }
 0x54c   : > { %v4870_v29 = vadd.f32 %v4869_v61, %v4868_v60 }
 0x54e   : > { %v4871_v50 = vrot.slane %v4870_v29, 1 }
 0x550   : > { %v4872_v13 = vadd.f32 %v4871_v50, %v4870_v29 }
 0x552   : > { %v4873_v28 = vmul.f32 0.00390625, %v4872_v13 }
 0x554   : > { %v9450_v32 = vsub.f32 %v9368_v20, %v4873_v28  ;;  %v9453_v25 = vsub.f32 %v9374_v57, %v4873_v28  ;;  %v9456_v44 = vsub.f32 %v9377_v55, %v4873_v28  ;;  %v9459_v23 = vsub.f32 %v9382_v49, %v4873_v28 }
 0x555   : > { %v9462_v63 = vsub.f32 %v9388_v16, %v4873_v28  ;;  %v9465_v39 = vsub.f32 %v9394_v24, %v4873_v28  ;;  %v9468_v43 = vsub.f32 %v9397_v10, %v4873_v28  ;;  %v9471_v20 = vsub.f32 %v9402_v53, %v4873_v28 }
 0x556   : > { %v9474_v57 = vsub.f32 %v9408_v37, %v4873_v28  ;;  %v9477_v55 = vsub.f32 %v9414_v22, %v4873_v28  ;;  %v9480_v49 = vsub.f32 %v9417_v9, %v4873_v28  ;;  %v9483_v16 = vsub.f32 %v9422_v18, %v4873_v28 }
 0x557   : > { %v9485_v24 = vsub.f32 %v4824_v45, %v4873_v28  ;;  %v9487_v19 = vsub.f32 %v4825_v62, %v4873_v28  ;;  %v9489_v10 = vsub.f32 %v4826_v48, %v4873_v28  ;;  %v9491_v53 = vsub.f32 %v4827_v6, %v4873_v28 }
 0x558   : > { %v9493_v12 = vsub.f32 %v4828_v27, %v4873_v28  ;;  %v9495_v37 = vsub.f32 %v4829_v41, %v4873_v28  ;;  %v9497_v22 = vsub.f32 %v4830_v38, %v4873_v28  ;;  %v9499_v15 = vsub.f32 %v4831_v56, %v4873_v28 }
 0x559   : > { %v9501_v9 = vsub.f32 %v4832_v58, %v4873_v28  ;;  %v9503_v18 = vsub.f32 %v4833_v35, %v4873_v28  ;;  %v9505_v45 = vsub.f32 %v4834_v14, %v4873_v28  ;;  %v9507_v62 = vsub.f32 %v4835_v30, %v4873_v28 }
 0x55a   : > { %v9510_v48 = vsub.f32 %v9330_v0, %v4873_v28  ;;  %v9513_v6 = vsub.f32 %v9333_v33, %v4873_v28  ;;  %v9516_v27 = vsub.f32 %v9336_v40, %v4873_v28  ;;  %v9523_v26 = vsub.f32 %v9342_v1, %v4873_v28 }
 0x55b   : > { %v9526_v51 = vsub.f32 %v9348_v2, %v4873_v28  ;;  %v9531_v54 = vsub.f32 %v9354_v34, %v4873_v28  ;;  %v9536_v56 = vsub.f32 %v9357_v21, %v4873_v28  ;;  %v9541_v2 = vsub.f32 %v9362_v42, %v4873_v28 }
 0x55c   : > { %v4906_v41 = vmul.f32 %v9510_v48, %v9510_v48  ;;  %v4907_v38 = vmul.f32 %v9513_v6, %v9513_v6  ;;  %v4908_v0 = vmul.f32 %v9516_v27, %v9516_v27  ;;  %v4909_v40 = vmul.f32 %v9523_v26, %v9523_v26 }
 0x55d   : > { %v4910_v1 = vmul.f32 %v9526_v51, %v9526_v51  ;;  %v4911_v8 = vmul.f32 %v9531_v54, %v9531_v54  ;;  %v4912_v34 = vmul.f32 %v9536_v56, %v9536_v56  ;;  %v4913_v17 = vmul.f32 %v9541_v2, %v9541_v2 }
 0x55e   : > { %v4938_v33 = vadd.f32 %v4907_v38, %v4906_v41  ;;  %v4914_v58 = vmul.f32 %v9450_v32, %v9450_v32  ;;  %v4915_v42 = vmul.f32 %v9453_v25, %v9453_v25  ;;  %v4916_v7 = vmul.f32 %v9456_v44, %v9456_v44 }
 0x55f   : > { %v4917_v14 = vmul.f32 %v9459_v23, %v9459_v23  ;;  %v4918_v30 = vmul.f32 %v9462_v63, %v9462_v63  ;;  %v4919_v11 = vmul.f32 %v9465_v39, %v9465_v39  ;;  %v4920_v60 = vmul.f32 %v9468_v43, %v9468_v43 }
 0x560   : > { %v4939_v3 = vadd.f32 %v4938_v33, %v4908_v0  ;;  %v4921_v29 = vmul.f32 %v9471_v20, %v9471_v20  ;;  %v4922_v13 = vmul.f32 %v9474_v57, %v9474_v57  ;;  %v4923_v41 = vmul.f32 %v9477_v55, %v9477_v55 }
 0x561   : > { %v4924_v0 = vmul.f32 %v9480_v49, %v9480_v49 }
 0x562   : > { %v4940_v31 = vadd.f32 %v4939_v3, %v4909_v40  ;;  %v4925_v40 = vmul.f32 %v9483_v16, %v9483_v16 }
 0x564   : > { %v4941_v59 = vadd.f32 %v4940_v31, %v4910_v1  ;;  %v4926_v1 = vmul.f32 %v9485_v24, %v9485_v24 }
 0x566   : > { %v4942_v47 = vadd.f32 %v4941_v59, %v4911_v8  ;;  %v4927_v8 = vmul.f32 %v9487_v19, %v9487_v19 }
 0x568   : > { %v4943_v21 = vadd.f32 %v4942_v47, %v4912_v34  ;;  %v4928_v34 = vmul.f32 %v9489_v10, %v9489_v10 }
 0x56a   : > { %v4944_v4 = vadd.f32 %v4943_v21, %v4913_v17  ;;  %v4929_v17 = vmul.f32 %v9491_v53, %v9491_v53 }
 0x56c   : > { %v4945_v5 = vadd.f32 %v4944_v4, %v4914_v58  ;;  %v4930_v58 = vmul.f32 %v9493_v12, %v9493_v12 }
 0x56e   : > { %v4946_v35 = vadd.f32 %v4945_v5, %v4915_v42  ;;  %v4931_v42 = vmul.f32 %v9495_v37, %v9495_v37 }
 0x570   : > { %v4947_v52 = vadd.f32 %v4946_v35, %v4916_v7  ;;  %v4932_v7 = vmul.f32 %v9497_v22, %v9497_v22 }
 0x572   : > { %v4948_v46 = vadd.f32 %v4947_v52, %v4917_v14  ;;  %v4933_v14 = vmul.f32 %v9499_v15, %v9499_v15 }
 0x574   : > { %v4949_v36 = vadd.f32 %v4948_v46, %v4918_v30  ;;  %v4934_v30 = vmul.f32 %v9501_v9, %v9501_v9 }
 0x576   : > { %v4950_v61 = vadd.f32 %v4949_v36, %v4919_v11  ;;  %v4935_v11 = vmul.f32 %v9503_v18, %v9503_v18 }
 0x578   : > { %v4951_v50 = vadd.f32 %v4950_v61, %v4920_v60  ;;  %v4936_v60 = vmul.f32 %v9505_v45, %v9505_v45 }
 0x57a   : > { %v4952_v28 = vadd.f32 %v4951_v50, %v4921_v29  ;;  %v4937_v29 = vmul.f32 %v9507_v62, %v9507_v62 }
 0x57c   : > { %v4953_v38 = vadd.f32 %v4952_v28, %v4922_v13 }
 0x57e   : > { %v4954_v33 = vadd.f32 %v4953_v38, %v4923_v41 }
 0x580   : > { %v4955_v3 = vadd.f32 %v4954_v33, %v4924_v0 }
 0x582   : > { %v4956_v31 = vadd.f32 %v4955_v3, %v4925_v40 }
 0x584   : > { %v4957_v59 = vadd.f32 %v4956_v31, %v4926_v1 }
 0x586   : > { %v4958_v47 = vadd.f32 %v4957_v59, %v4927_v8 }
 0x588   : > { %v4959_v21 = vadd.f32 %v4958_v47, %v4928_v34 }
 0x58a   : > { %v4960_v4 = vadd.f32 %v4959_v21, %v4929_v17 }
 0x58c   : > { %v4961_v5 = vadd.f32 %v4960_v4, %v4930_v58 }
 0x58e   : > { %v4962_v35 = vadd.f32 %v4961_v5, %v4931_v42 }
 0x590   : > { %v4963_v52 = vadd.f32 %v4962_v35, %v4932_v7  ;;  %v6965_v7 = vld [vmem:[%s7305_s6 + $0x20] sm:$0xff]  ;;  %v6966_v35 = vld [vmem:[%s7305_s6 + $0x28] sm:$0xff] }
 0x592   : > { %v4964_v46 = vadd.f32 %v4963_v52, %v4933_v14  ;;  %v6967_v14 = vld [vmem:[%s7305_s6 + $0x30] sm:$0xff] }
 0x594   : > { %v4965_v36 = vadd.f32 %v4964_v46, %v4934_v30  ;;  %v6968_v30 = vld [vmem:[%s7305_s6 + $0x38] sm:$0xff] }
 0x596   : > { %v4966_v61 = vadd.f32 %v4965_v36, %v4935_v11  ;;  %v6969_v11 = vld [vmem:[%s7305_s6 + $0x40] sm:$0xff] }
 0x598   : > { %v4967_v50 = vadd.f32 %v4966_v61, %v4936_v60  ;;  %v6970_v60 = vld [vmem:[%s7305_s6 + $0x48] sm:$0xff] }
 0x59a   : > { %v4968_v13 = vadd.f32 %v4967_v50, %v4937_v29  ;;  %v6971_v29 = vld [vmem:[%s7305_s6 + $0x50] sm:$0xff] }
 0x59c   : > { %v4969_v28 = vrot.slane %v4968_v13, 4 }
 0x59e   : > { %v4970_v41 = vadd.f32 %v4969_v28, %v4968_v13  ;;  %v6972_v13 = vld [vmem:[%s7305_s6 + $0x58] sm:$0xff] }
 0x5a0   : > { %v4971_v38 = vrot.slane %v4970_v41, 2 }
 0x5a2   : > { %v4972_v0 = vadd.f32 %v4971_v38, %v4970_v41  ;;  %v6973_v41 = vld [vmem:[%s7305_s6 + $0x60] sm:$0xff] }
 0x5a4   : > { %v4973_v33 = vrot.slane %v4972_v0, 1 }
 0x5a6   : > { %v4974_v40 = vadd.f32 %v4973_v33, %v4972_v0  ;;  %v6974_v0 = vld [vmem:[%s7305_s6 + $0x68] sm:$0xff] }
 0x5a8   : > { %v4975_v3 = vmul.f32 0.00390625, %v4974_v40  ;;  %v6975_v40 = vld [vmem:[%s7305_s6 + $0x70] sm:$0xff] }
 0x5aa   : > { %v4976_v1 = vadd.f32 1e-05, %v4975_v3 }
 0x5ac   : > { %6959 = vrsqrt.f32 %v4976_v1  ;;  %v6976_v1 = vld [vmem:[%s7305_s6 + $0x78] sm:$0xff] }
 0x5b6   : > { %v6960_v31 = vpop.eup %6959 }
 0x5b7   : > { %v4978_v8 = vmul.f32 %v6960_v31, %v9510_v48  ;;  %v4979_v59 = vmul.f32 %v6960_v31, %v9513_v6  ;;  %v4980_v34 = vmul.f32 %v6960_v31, %v9516_v27  ;;  %v4981_v47 = vmul.f32 %v6960_v31, %v9523_v26 }
 0x5b8   : > { %v4982_v17 = vmul.f32 %v6960_v31, %v9526_v51  ;;  %v4983_v21 = vmul.f32 %v6960_v31, %v9531_v54  ;;  %v4984_v58 = vmul.f32 %v6960_v31, %v9536_v56  ;;  %v4985_v4 = vmul.f32 %v6960_v31, %v9541_v2 }
 0x5b9   : > { %v4986_v42 = vmul.f32 %v6960_v31, %v9450_v32  ;;  %v4987_v5 = vmul.f32 %v6960_v31, %v9453_v25  ;;  %v4988_v48 = vmul.f32 %v6960_v31, %v9456_v44  ;;  %v4989_v6 = vmul.f32 %v6960_v31, %v9459_v23 }
 0x5ba   : > { %v4990_v27 = vmul.f32 %v6960_v31, %v9462_v63  ;;  %v4991_v26 = vmul.f32 %v6960_v31, %v9465_v39  ;;  %v4992_v51 = vmul.f32 %v6960_v31, %v9468_v43  ;;  %v4993_v54 = vmul.f32 %v6960_v31, %v9471_v20 }
 0x5bb   : > { %v4994_v56 = vmul.f32 %v6960_v31, %v9474_v57  ;;  %v4995_v2 = vmul.f32 %v6960_v31, %v9477_v55  ;;  %v4996_v32 = vmul.f32 %v6960_v31, %v9480_v49  ;;  %v4997_v25 = vmul.f32 %v6960_v31, %v9483_v16 }
 0x5bc   : > { %v9623_v44 = vmul.f32 %v6960_v31, %v9485_v24  ;;  %v9626_v23 = vmul.f32 %v6960_v31, %v9487_v19  ;;  %v9629_v63 = vmul.f32 %v6960_v31, %v9489_v10  ;;  %v9632_v39 = vmul.f32 %v6960_v31, %v9491_v53  ;;  %v6961_v10 = vld [vmem:[%s7305_s6] sm:$0xff] }
 0x5bd   : > { %v9635_v43 = vmul.f32 %v6960_v31, %v9493_v12  ;;  %v9638_v20 = vmul.f32 %v6960_v31, %v9495_v37  ;;  %v9641_v57 = vmul.f32 %v6960_v31, %v9497_v22  ;;  %v9644_v55 = vmul.f32 %v6960_v31, %v9499_v15  ;;  %v6962_v12 = vld [vmem:[%s7305_s6 + $0x8] sm:$0xff]  ;;  %v6963_v22 = vld [vmem:[%s7305_s6 + $0x10] sm:$0xff] }
 0x5be   : > { %v9652_v49 = vmul.f32 %v6960_v31, %v9501_v9  ;;  %v9655_v16 = vmul.f32 %v6960_v31, %v9503_v18  ;;  %v9658_v24 = vmul.f32 %v6960_v31, %v9505_v45  ;;  %v9661_v19 = vmul.f32 %v6960_v31, %v9507_v62  ;;  %v6964_v9 = vld [vmem:[%s7305_s6 + $0x18] sm:$0xff] }
 0x5bf   : > { %v5010_v53 = vadd.f32 %v6961_v10, %v4978_v8  ;;  %v5011_v37 = vadd.f32 %v6962_v12, %v4979_v59  ;;  %v5012_v15 = vadd.f32 %v6963_v22, %v4980_v34  ;;  %v5013_v18 = vadd.f32 %v6964_v9, %v4981_v47  ;;  %v6977_v8 = vld [vmem:[%s7305_s6 + $0x80] sm:$0xff]  ;;  %v6978_v34 = vld [vmem:[%s7305_s6 + $0x88] sm:$0xff]  ;;  %v6991_v10 = vld [vmem:[%s7305_s6 + $0xf0] sm:$0xff] }
 0x5c0   : > { %v5014_v45 = vadd.f32 %v6965_v7, %v4982_v17  ;;  %v5015_v62 = vadd.f32 %v6966_v35, %v4983_v21  ;;  %v5016_v52 = vadd.f32 %v6967_v14, %v4984_v58  ;;  %v5017_v46 = vadd.f32 %v6968_v30, %v4985_v4  ;;  %v6979_v17 = vld [vmem:[%s7305_s6 + $0x90] sm:$0xff]  ;;  %v6980_v58 = vld [vmem:[%s7305_s6 + $0x98] sm:$0xff] }
 0x5c1   : > { %v5018_v36 = vadd.f32 %v6969_v11, %v4986_v42  ;;  %v5019_v61 = vadd.f32 %v6970_v60, %v4987_v5  ;;  %v5020_v50 = vadd.f32 %v6971_v29, %v4988_v48  ;;  %v5021_v28 = vadd.f32 %v6972_v13, %v4989_v6  ;;  %5043 = vst.msk [vmem:[%s9649_s7] sm:$0xff] %vm5042_vm5, %v5010_v53  ;;  %v6981_v42 = vld [vmem:[%s7305_s6 + $0xa0] sm:$0xff]  ;;  %v6982_v48 = vld [vmem:[%s7305_s6 + $0xa8] sm:$0xff]  ;;  %v6992_v12 = vld [vmem:[%s7305_s6 + $0xf8] sm:$0xff] }
 0x5c2   : > { %5044 = vst.msk [vmem:[%s9649_s7 + $0x8] sm:$0xff] %vm5042_vm5, %v5011_v37  ;;  %5045 = vst.msk [vmem:[%s9649_s7 + $0x10] sm:$0xff] %vm5042_vm5, %v5012_v15  ;;  %v5022_v38 = vadd.f32 %v6973_v41, %v4990_v27  ;;  %v5023_v33 = vadd.f32 %v6974_v0, %v4991_v26  ;;  %v5024_v3 = vadd.f32 %v6975_v40, %v4992_v51  ;;  %v6983_v27 = vld [vmem:[%s7305_s6 + $0xb0] sm:$0xff]  ;;  %v6984_v51 = vld [vmem:[%s7305_s6 + $0xb8] sm:$0xff] }
 0x5c3   : > { %5046 = vst.msk [vmem:[%s9649_s7 + $0x18] sm:$0xff] %vm5042_vm5, %v5013_v18  ;;  %v5025_v31 = vadd.f32 %v6976_v1, %v4993_v54  ;;  %5047 = vst.msk [vmem:[%s9649_s7 + $0x20] sm:$0xff] %vm5042_vm5, %v5014_v45  ;;  %v5026_v59 = vadd.f32 %v6977_v8, %v4994_v56  ;;  %v5027_v47 = vadd.f32 %v6978_v34, %v4995_v2  ;;  %v6985_v56 = vld [vmem:[%s7305_s6 + $0xc0] sm:$0xff] }
 0x5c4   : > { %5048 = vst.msk [vmem:[%s9649_s7 + $0x28] sm:$0xff] %vm5042_vm5, %v5015_v62  ;;  %5049 = vst.msk [vmem:[%s9649_s7 + $0x30] sm:$0xff] %vm5042_vm5, %v5016_v52  ;;  %v5028_v21 = vadd.f32 %v6979_v17, %v4996_v32  ;;  %v5029_v4 = vadd.f32 %v6980_v58, %v4997_v25  ;;  %v5030_v5 = vadd.f32 %v6981_v42, %v9623_v44  ;;  %v6986_v32 = vld [vmem:[%s7305_s6 + $0xc8] sm:$0xff]  ;;  %v6987_v44 = vld [vmem:[%s7305_s6 + $0xd0] sm:$0xff] }
 0x5c5   : > { %5050 = vst.msk [vmem:[%s9649_s7 + $0x38] sm:$0xff] %vm5042_vm5, %v5017_v46  ;;  %5051 = vst.msk [vmem:[%s9649_s7 + $0x40] sm:$0xff] %vm5042_vm5, %v5018_v36  ;;  %v5031_v6 = vadd.f32 %v6982_v48, %v9626_v23  ;;  %v5032_v26 = vadd.f32 %v6983_v27, %v9629_v63  ;;  %v5033_v54 = vadd.f32 %v6984_v51, %v9632_v39  ;;  %v6988_v63 = vld [vmem:[%s7305_s6 + $0xd8] sm:$0xff] }
 0x5c6   : > { %5052 = vst.msk [vmem:[%s9649_s7 + $0x48] sm:$0xff] %vm5042_vm5, %v5019_v61  ;;  %5053 = vst.msk [vmem:[%s9649_s7 + $0x50] sm:$0xff] %vm5042_vm5, %v5020_v50  ;;  %v5034_v2 = vadd.f32 %v6985_v56, %v9635_v43  ;;  %v5035_v25 = vadd.f32 %v6986_v32, %v9638_v20  ;;  %v5036_v23 = vadd.f32 %v6987_v44, %v9641_v57  ;;  %v6989_v43 = vld [vmem:[%s7305_s6 + $0xe0] sm:$0xff]  ;;  %v6990_v57 = vld [vmem:[%s7305_s6 + $0xe8] sm:$0xff] }
 0x5c7   : > { %5054 = vst.msk [vmem:[%s9649_s7 + $0x58] sm:$0xff] %vm5042_vm5, %v5021_v28  ;;  %5055 = vst.msk [vmem:[%s9649_s7 + $0x60] sm:$0xff] %vm5042_vm5, %v5022_v38  ;;  %v5037_v39 = vadd.f32 %v6988_v63, %v9644_v55  ;;  %v5038_v20 = vadd.f32 %v6989_v43, %v9652_v49  ;;  %v5039_v55 = vadd.f32 %v6990_v57, %v9655_v16 }
 0x5c8   : > { %5056 = vst.msk [vmem:[%s9649_s7 + $0x68] sm:$0xff] %vm5042_vm5, %v5023_v33  ;;  %5057 = vst.msk [vmem:[%s9649_s7 + $0x70] sm:$0xff] %vm5042_vm5, %v5024_v3  ;;  %v5040_v53 = vadd.f32 %v6991_v10, %v9658_v24  ;;  %v5041_v37 = vadd.f32 %v6992_v12, %v9661_v19 }
 0x5c9   : > { %5058 = vst.msk [vmem:[%s9649_s7 + $0x78] sm:$0xff] %vm5042_vm5, %v5025_v31  ;;  %5059 = vst.msk [vmem:[%s9649_s7 + $0x80] sm:$0xff] %vm5042_vm5, %v5026_v59 }
 0x5ca   : > { %5060 = vst.msk [vmem:[%s9649_s7 + $0x88] sm:$0xff] %vm5042_vm5, %v5027_v47  ;;  %5061 = vst.msk [vmem:[%s9649_s7 + $0x90] sm:$0xff] %vm5042_vm5, %v5028_v21 }
 0x5cb   : > { %5062 = vst.msk [vmem:[%s9649_s7 + $0x98] sm:$0xff] %vm5042_vm5, %v5029_v4  ;;  %5063 = vst.msk [vmem:[%s9649_s7 + $0xa0] sm:$0xff] %vm5042_vm5, %v5030_v5 }
 0x5cc   : > { %5064 = vst.msk [vmem:[%s9649_s7 + $0xa8] sm:$0xff] %vm5042_vm5, %v5031_v6  ;;  %5065 = vst.msk [vmem:[%s9649_s7 + $0xb0] sm:$0xff] %vm5042_vm5, %v5032_v26 }
 0x5cd   : > { %5066 = vst.msk [vmem:[%s9649_s7 + $0xb8] sm:$0xff] %vm5042_vm5, %v5033_v54  ;;  %5067 = vst.msk [vmem:[%s9649_s7 + $0xc0] sm:$0xff] %vm5042_vm5, %v5034_v2 }
 0x5ce   : > { %5068 = vst.msk [vmem:[%s9649_s7 + $0xc8] sm:$0xff] %vm5042_vm5, %v5035_v25  ;;  %5069 = vst.msk [vmem:[%s9649_s7 + $0xd0] sm:$0xff] %vm5042_vm5, %v5036_v23 }
 0x5cf   : > { %5070 = vst.msk [vmem:[%s9649_s7 + $0xd8] sm:$0xff] %vm5042_vm5, %v5037_v39  ;;  %5071 = vst.msk [vmem:[%s9649_s7 + $0xe0] sm:$0xff] %vm5042_vm5, %v5038_v20 }
 0x5d0   : > { %5072 = vst.msk [vmem:[%s9649_s7 + $0xe8] sm:$0xff] %vm5042_vm5, %v5039_v55  ;;  %5073 = vst.msk [vmem:[%s9649_s7 + $0xf0] sm:$0xff] %vm5042_vm5, %v5040_v53 }
 0x5d1   : > { %5074 = vst.msk [vmem:[%s9649_s7 + $0xf8] sm:$0xff] %vm5042_vm5, %v5041_v37 }
 0x5d2 PF: > { %p16_p9 = scmp.ge.s32.totalorder %s7249_s10, 4   ;;  %s9857_s18 = smov %s7109_s19 }
 0x5d3   : > { %s9858_s19 = smov %s7113_s20  ;;  %s9859_s20 = smov %s7260_s15 }
 0x5d4   : > { %s9860_s21 = smov %s7249_s10  ;;  %18 = sbr.rel (!%p16_p9) target bundleno = 4 (0x4), region = 92 }
 0x5db   :  { %5096 = vsyncpa [#allocation3], 1 }
 0x5dc   :  { %5098 = vsyncpa [#allocation3 + $0x1], 1 }
 0x5dd   :  { %5099 = vsyncpa [#allocation5], 1 }

// kernel: tpu_custom_call.1
= control target key start
LH: loop header
LB: loop body
LE: loop exit
PB: predicated region body
PF: predicated region fallthrough
CT: control target
= control target key end

     0   :  { %10 = vsyncpa [#allocation3], 0  ;;  %s9784_s0 = inlined_call_operand.hbm [shape: f32[2,16,16,128], index: 0, kind: input, shape index: {}]   ;;  %s9785_s1 = inlined_call_operand.hbm [shape: bf16[3,384,128], index: 1, kind: input, shape index: {}]   ;;  %s9786_s2 = inlined_call_operand.vmem [shape: f32[1,128], index: 2, kind: input, shape index: {}]   ;;  %s9787_s3 = inlined_call_operand.hbm [shape: bf16[3,384,128], index: 3, kind: input, shape index: {}]   ;;  %s9788_s4 = inlined_call_operand.vmem [shape: f32[1,128], index: 4, kind: input, shape index: {}]   ;;  %s9789_s5 = inlined_call_operand.vmem [shape: f32[2,16,16,4], index: 5, kind: output, shape index: {}]  }
   0x1   :  { %12 = vsyncpa [#allocation3 + $0x1], 0 }
   0x2   :  { %13 = vsyncpa [#allocation5], 0  ;;  %s7156_s18 = smov 0   ;;  %s7158_s19 = smov 0  }
   0x3   :  { %s7160_s20 = smov 0   ;;  %s7162_s21 = smov 0  }
   0x4 LB: > { %s7175_s22 = sadd.s32 4294967295, %s7117_s21   ;;  %p39_p0 = scmp.ne.s32.totalorder %s7109_s19, %s7105_s18  ;;  %s7117_s21 = sphi %s7162_s21, %s9860_s21   ;;  %s7113_s20 = sphi %s7160_s20, %s9859_s20   ;;  %s7109_s19 = sphi %s7158_s19, %s9858_s19   ;;  %s7105_s18 = sphi %s7156_s18, %s9857_s18  }
   0x5   : > { %p9790_p1 = scmp.eq.s32.totalorder %s7175_s22, 0  ;;  %p5162_p2 = scmp.ge.s32.totalorder %s7117_s21, 1 }
   0x6   : > { %p160_p3 = scmp.lt.s32.totalorder %s7117_s21, 3  ;;  %s7119_s25 = smov [#allocation4]  }
   0x7   : > { %p7183_p4 = por %p9790_p1, %p39_p0  ;;  %s172_s26 = sshll.u32 %s7119_s25, 4  ;;  %s173_s26 = int_to_ptr.vmem [resolvable:$true] %s172_s26 }
   0x8   : > { %p7187_p5 = pnand %p5162_p2, %p160_p3  ;;  %s7120_s28 = smov [#allocation6]  }
   0x9   : > { %s9801_s23 = scalar_select %p7183_p4, 1, 0 }
   0xa   : > { %s9802_s24 = scalar_select %p7187_p5, 1, 0 }
   0xb   : > { %p6759_p6 = pneg %p7187_p5  ;;  %s188_s29 = sshll.u32 %s7120_s28, 4  ;;  %s7199_s29 = int_to_ptr.vmem [resolvable:$true] %s188_s29 }
   0xc   : > { %s6993_s7 = scalar_lea.hbm %s9785_s1, 9216 }
   0xd   : > { %p7195_p7 = pnand %p6759_p6, %p9790_p1  ;;  %p6994_p8 = scmp.ne.s32.totalorder %s9785_s1, %s6993_s7 }
   0xe   : > { %p7000_p12 = scmp.lt.u32.totalorder %s6993_s7, %s9785_s1 }
   0xf   : > { %p6995_p9 = pneg %p7195_p7 }
  0x11   : > { %p6996_p10 = pnand %p6995_p9, %p6994_p8 }
  0x13   : > { %p6997_p11 = pneg %p6996_p10 }
  0x15   : > { %p7002_p13 = pnand %p7000_p12, %p6997_p11 }
  0x17   : > { %7005 = shalt.err (!%p7002_p13)
}
  0x18   : > { %s7006_s12 = scalar_lea.vmem %s173_s26, 9216  ;;  %p7014_p6 = scmp.lt.s32.totalorder %s173_s26, %s173_s26 }
  0x19   : > { %p7007_p0 = scmp.ne.s32.totalorder %s173_s26, %s7006_s12  ;;  %p7015_p1 = scmp.lt.s32.totalorder %s7006_s12, %s7006_s12 }
  0x1b   : > { %p7009_p2 = pnand %p7007_p0, %p6995_p9  ;;  %p7016_p4 = por %p7015_p1, %p7014_p6 }
  0x1d   : > { %p7010_p3 = pneg %p7009_p2 }
  0x1f   : > { %p7017_p5 = pnand %p7016_p4, %p7010_p3 }
  0x21   : > { %7020 = shalt.err (!%p7017_p5)
}
  0x22   : > { %s7121_s13 = smov 64   ;;  %s7122_s14 = smov 4  }
  0x23   : > { %6762 = dma.hbm_to_vmem [thread:$0]  (!%p7195_p7), %s9785_s1, 9216, %s173_s26, [#allocation5], %s7121_s13, %s7121_s13, %s7122_s14  }
  0x24   : > { %s7021_s25 = scalar_lea.hbm %s9787_s3, 9216 }
  0x25   : > { %p7022_p8 = scmp.ne.s32.totalorder %s9787_s3, %s7021_s25  ;;  %p7028_p5 = scmp.lt.u32.totalorder %s7021_s25, %s9787_s3 }
  0x27   : > { %p7024_p1 = pnand %p7022_p8, %p6995_p9 }
  0x29   : > { %p7025_p4 = pneg %p7024_p1 }
  0x2b   : > { %p7030_p10 = pnand %p7028_p5, %p7025_p4 }
  0x2d   : > { %7033 = shalt.err (!%p7030_p10)
}
  0x2e   : > { %s7034_s26 = scalar_lea.vmem %s7199_s29, 9216  ;;  %p7042_p0 = scmp.lt.s32.totalorder %s7199_s29, %s7199_s29 }
  0x2f   : > { %p7035_p11 = scmp.ne.s32.totalorder %s7199_s29, %s7034_s26  ;;  %p7043_p2 = scmp.lt.s32.totalorder %s7034_s26, %s7034_s26 }
  0x31   : > { %p7037_p12 = pnand %p7035_p11, %p6995_p9  ;;  %p7044_p3 = por %p7043_p2, %p7042_p0 }
  0x33   : > { %p7038_p13 = pneg %p7037_p12 }
  0x35   : > { %p7045_p6 = pnand %p7044_p3, %p7038_p13 }
  0x37   : > { %7048 = shalt.err (!%p7045_p6)
}
  0x38   : > { %6765 = dma.hbm_to_vmem [thread:$0]  (!%p7195_p7), %s9787_s3, 9216, %s7199_s29, [#allocation5], %s7121_s13, %s7121_s13, %s7122_s14  }
  0x39   : > { %s7249_s10 = sadd.s32 1, %s7117_s21   ;;  %s26_s11 = sadd.s32 1, %s7113_s20 }
  0x3a   : > { %s23_s27 = ssub.s32 %s7117_s21, %s7249_s10  ;;  %p33_p9 = scmp.ne.s32.totalorder %s7113_s20, %s7109_s19 }
  0x3b   : > { %p24_p8 = scmp.eq.s32.totalorder %s23_s27, 0  ;;  %p34_p1 = scmp.eq.s32.totalorder %s7117_s21, 0 }
  0x3c   : > { %p6772_p4 = scmp.lt.s32.totalorder %s7117_s21, 2  ;;  %s205_s12 = sand.u32 1, %s7113_s20  }
  0x3d   : > { %s7260_s15 = scalar_select %p24_p8, %s7113_s20, %s26_s11  }
  0x3e   : > { %p35_p5 = por %p34_p1, %p33_p9  ;;  %s5166_s16 = sshll.u32 %s205_s12, 8 }
  0x3f   : > { %s5323_s17 = sshll.u32 %s7117_s21, 12  ;;  %s209_s29 = scalar_lea.vmem [#allocation2], %s5166_s16 }
  0x40   : > { %s7266_s28 = scalar_lea.hbm %s9784_s0, %s5323_s17  ;;  %s216_s13 = sshll.u32 %s209_s29, 4  ;;  %s7272_s13 = int_to_ptr.vmem [resolvable:$true] %s216_s13 }
  0x41   : > { %p7268_p7 = pnand %p6772_p4, %p35_p5  ;;  %s7274_s21 = scalar_lea.sflag [#allocation3], %s205_s12 }
  0x42   : > { %s7049_s30 = scalar_lea.hbm %s7266_s28, 4096  ;;  %s7054_s26 = scalar_lea.hbm %s9784_s0, 8192 }
  0x43   : > { %p7050_p10 = scmp.ne.s32.totalorder %s7266_s28, %s7049_s30  ;;  %p7051_p11 = pneg %p7268_p7 }
  0x44   : > { %p7055_p0 = scmp.lt.u32.totalorder %s7266_s28, %s9784_s0  ;;  %p7056_p2 = scmp.lt.u32.totalorder %s7054_s26, %s7049_s30 }
  0x45   : > { %p7052_p12 = pnand %p7051_p11, %p7050_p10  ;;  %p7058_p6 = scmp.lt.u32.totalorder %s7049_s30, %s7266_s28 }
  0x46   : > { %p7057_p3 = por %p7056_p2, %p7055_p0 }
  0x47   : > { %p7053_p13 = pneg %p7052_p12 }
  0x48   : > { %p7059_p9 = por %p7058_p6, %p7057_p3 }
  0x4a   : > { %p7060_p8 = pnand %p7059_p9, %p7053_p13 }
  0x4c   : > { %7063 = shalt.err (!%p7060_p8)
}
  0x4d   : > { %s7064_s11 = scalar_lea.vmem %s7272_s13, 4096  ;;  %s7123_s27 = smov [#allocation2]  }
  0x4e   : > { %p7065_p1 = scmp.ne.s32.totalorder %s7272_s13, %s7064_s11  ;;  %s7069_s12 = sshll.u32 %s7123_s27, 4  ;;  %s7070_s12 = int_to_ptr.vmem [resolvable:$false] %s7069_s12 }
  0x4f   : > { %s7071_s16 = scalar_lea.vmem %s7070_s12, 8192  ;;  %p7072_p10 = scmp.lt.s32.totalorder %s7272_s13, %s7070_s12 }
  0x50   : > { %p7067_p4 = pnand %p7065_p1, %p7051_p11  ;;  %p7073_p12 = scmp.lt.s32.totalorder %s7071_s16, %s7064_s11 }
  0x52   : > { %p7068_p5 = pneg %p7067_p4  ;;  %p7074_p0 = por %p7073_p12, %p7072_p10 }
  0x54   : > { %p7075_p2 = pnand %p7074_p0, %p7068_p5 }
  0x56   : > { %7078 = shalt.err (!%p7075_p2)
}
  0x57   : > { %s7124_s17 = smov 128   ;;  %s7125_s18 = smov 8  }
  0x58   : > { %6769 = dma.hbm_to_vmem [thread:$0]  (!%p7268_p7), %s7266_s28, 4096, %s7272_s13, %s7274_s21, %s7124_s17, %s7124_s17, %s7125_s18  }
  0x59   : > { %p9805_p11 = scmp.ne.s32.totalorder %s9802_s24, 0 }
  0x5b   : > { %228 = sbr.rel (%p9805_p11) target bundleno = 1490 (0x5d2), region = 40 }
  0x62   : > { %s230_s25 = sand.u32 1, %s7109_s19   ;;  %p9806_p13 = scmp.ne.s32.totalorder %s9801_s23, 0 }
  0x63   : > { %s5170_s29 = sshll.u32 %s230_s25, 8  ;;  %s231_s30 = scalar_lea.sflag [#allocation3], %s230_s25 }
  0x64   : > { %s7305_s6 = scalar_lea.vmem [#allocation2], %s5170_s29 }
  0x65   : > { %7096 = dma.done.wait (%p9806_p13), %s231_s30, 4096  }
  0x66   : > { %7098 = vsyncadd (%p9806_p13), %s231_s30, 4294963200  ;;  %p9807_p3 = scmp.eq.s32.totalorder %s7175_s22, 0 }
  0x68   : > { %7100 = dma.done.wait (%p9807_p3), [#allocation5], 18432   ;;  %p9808_p7 = pmov %p9807_p3 }
  0x69   : > { %v6813_v0 = vld [vmem:[#allocation4 + $0x100] sm:$0xff]   ;;  %v6817_v4 = vld [vmem:[#allocation4 + $0x108] sm:$0xff]   ;;  %v6821_v8 = vld [vmem:[#allocation4 + $0x110] sm:$0xff]   ;;  %vm517_vm0 = vcmask 1040384   ;;  %vm518_vm1 = vsmask.f32 256 }
  0x6a   : > { %7102 = vsyncadd (%p9808_p7), [#allocation5], 4294948864  ;;  %v6814_v1 = vld [vmem:[#allocation4 + $0x40] sm:$0xff]   ;;  %5325 = vmatprep.subr.bf16.mxu0 %v6813_v0  ;;  %v6818_v5 = vld [vmem:[#allocation4 + $0x48] sm:$0xff]   ;;  %v9809_v54 = vmov 0  ;;  %vm793_vm4 = vcmask 1046528  }
  0x6b   : > { %v6815_v2 = vld [vmem:[#allocation4 + $0xc0] sm:$0xff]   ;;  %5461 = vmatprep.subr.bf16.mxu1 %v6814_v1  ;;  %v6819_v6 = vld [vmem:[#allocation4 + $0xc8] sm:$0xff]   ;;  %v6822_v9 = vld [vmem:[#allocation4 + $0x50] sm:$0xff]   ;;  %vm552_vm3 = vsmask.f32 7424  ;;  %p269_p6 = scmp.lt.s32.totalorder %s7175_s22, 1 }
  0x6c   : > { %v6816_v3 = vld [vmem:[#allocation4] sm:$0xff]   ;;  %5326 = vmatpush3.bf16.msra.mxu0 %v6815_v2  ;;  %v6820_v7 = vld [vmem:[#allocation4 + $0x8] sm:$0xff]   ;;  %v6823_v10 = vld [vmem:[#allocation4 + $0xd0] sm:$0xff]   ;;  %vm5042_vm5 = vcmask 31744  }
  0x6d   : > { %5462 = vmatpush3.bf16.msra.mxu1 %v6816_v3  ;;  %5327 = vmatprep.subr.bf16.mxu0 %v6817_v4  ;;  %v6824_v11 = vld [vmem:[#allocation4 + $0x10] sm:$0xff]   ;;  %v6825_v12 = vld [vmem:[#allocation4 + $0x118] sm:$0xff]   ;;  %v6829_v16 = vld [vmem:[#allocation4 + $0x120] sm:$0xff]   ;;  %s9862_s22 = smov (!%p269_p6, %s7175_s22), 1 }
  0x6e   : > { %5463 = vmatprep.subr.bf16.mxu1 %v6818_v5  ;;  %v6826_v13 = vld [vmem:[#allocation4 + $0x58] sm:$0xff]   ;;  %v6830_v17 = vld [vmem:[#allocation4 + $0x60] sm:$0xff]   ;;  %v6833_v20 = vld [vmem:[#allocation4 + $0x128] sm:$0xff]   ;;  %s5324_s14 = sshll.u32 %s9862_s22, 8 }
  0x6f   : > { %v6827_v14 = vld [vmem:[#allocation4 + $0xd8] sm:$0xff]   ;;  %v6831_v18 = vld [vmem:[#allocation4 + $0xe0] sm:$0xff]   ;;  %v6834_v21 = vld [vmem:[#allocation4 + $0x68] sm:$0xff]   ;;  %s9649_s7 = scalar_lea.vmem %s9789_s5, %s5324_s14 }
  0x70   : > { %5328 = vmatpush3.bf16.msra.mxu0 %v6819_v6  ;;  %v6828_v15 = vld [vmem:[#allocation4 + $0x18] sm:$0xff]   ;;  %v6832_v19 = vld [vmem:[#allocation4 + $0x20] sm:$0xff]   ;;  %v6835_v22 = vld [vmem:[#allocation4 + $0xe8] sm:$0xff]  }
  0x71   : > { %5464 = vmatpush3.bf16.msra.mxu1 %v6820_v7  ;;  %5329 = vmatprep.subr.bf16.mxu0 %v6821_v8  ;;  %v6836_v23 = vld [vmem:[#allocation4 + $0x28] sm:$0xff]   ;;  %v6837_v24 = vld [vmem:[#allocation4 + $0x130] sm:$0xff]   ;;  %v6841_v28 = vld [vmem:[#allocation4 + $0x138] sm:$0xff]  }
  0x72   : > { %5465 = vmatprep.subr.bf16.mxu1 %v6822_v9  ;;  %v6838_v25 = vld [vmem:[#allocation4 + $0x70] sm:$0xff]   ;;  %v6842_v29 = vld [vmem:[#allocation4 + $0x78] sm:$0xff]   ;;  %v275_v32 = vld [vmem:[%s7305_s6] sm:$0xff] }
  0x73   : > { %v6839_v26 = vld [vmem:[#allocation4 + $0xf0] sm:$0xff]   ;;  %v6843_v30 = vld [vmem:[#allocation4 + $0xf8] sm:$0xff]   ;;  %v276_v33 = vld [vmem:[%s7305_s6 + $0x8] sm:$0xff] }
  0x74   : > { %5330 = vmatpush3.bf16.msra.mxu0 %v6823_v10  ;;  %v6840_v27 = vld [vmem:[#allocation4 + $0x30] sm:$0xff]   ;;  %v6844_v31 = vld [vmem:[#allocation4 + $0x38] sm:$0xff]   ;;  %v309_v35 = vpack.c.bf16 %v276_v33, %v275_v32  ;;  %v7319_v38 = vld [vmem:[#allocation4 + $0x140] sm:$0xff]  }
  0x75   : > { %5466 = vmatpush3.bf16.msra.mxu1 %v6824_v11  ;;  %5331 = vmatprep.subr.bf16.mxu0 %v6825_v12  ;;  %v277_v34 = vld [vmem:[%s7305_s6 + $0x10] sm:$0xff]  ;;  %v278_v36 = vld [vmem:[%s7305_s6 + $0x18] sm:$0xff]  ;;  %v279_v39 = vld [vmem:[%s7305_s6 + $0x20] sm:$0xff] }
  0x76   : > { %5467 = vmatprep.subr.bf16.mxu1 %v6826_v13  ;;  %v310_v37 = vpack.c.bf16 %v278_v36, %v277_v34  ;;  %v280_v40 = vld [vmem:[%s7305_s6 + $0x28] sm:$0xff]  ;;  %v326_v41 = vshrl.u32 %v309_v35, 16  ;;  %v390_v42 = vshll.u32 %v309_v35, 16  ;;  %v281_v46 = vld [vmem:[%s7305_s6 + $0x30] sm:$0xff]  ;;  %v282_v47 = vld [vmem:[%s7305_s6 + $0x38] sm:$0xff] }
  0x77   : > { %v311_v43 = vpack.c.bf16 %v280_v40, %v279_v39  ;;  %v283_v52 = vld [vmem:[%s7305_s6 + $0x40] sm:$0xff]  ;;  %v284_v53 = vld [vmem:[%s7305_s6 + $0x48] sm:$0xff]  ;;  %vm7330_vm2 = vmand %vm517_vm0, %vm518_vm1  ;;  %v312_v57 = vpack.c.bf16 %v282_v47, %v281_v46 }
  0x78   : > { %5332 = vmatpush3.bf16.msra.mxu0 %v6827_v14  ;;  %v329_v44 = vshrl.u32 %v310_v37, 16  ;;  %v394_v45 = vshll.u32 %v310_v37, 16  ;;  %v389_v48 = vrot.slane %v326_v41, 7  ;;  %v485_v49 = vrot.slane %v390_v42, 7  ;;  %v6846_v34 = vld [vmem:[#allocation4 + $0x148] sm:$0xff]   ;;  %v287_v47 = vld [vmem:[%s7305_s6 + $0x60] sm:$0xff] }
  0x79   : > { %5468 = vmatpush3.bf16.msra.mxu1 %v6828_v15  ;;  %5333 = vmatprep.subr.bf16.mxu0 %v6829_v16  ;;  %v332_v50 = vshrl.u32 %v311_v43, 16  ;;  %v398_v51 = vshll.u32 %v311_v43, 16  ;;  %v9810_v54 = vsel %vm7330_vm2, 4294967295, %v9809_v54  ;;  %v7343_v1 = vpack.c.bf16 %v284_v53, %v283_v52  ;;  %v6852_v39 = vld [vmem:[#allocation4 + $0x88] sm:$0xff]  }
  0x7a   : > { %5469 = vmatprep.subr.bf16.mxu1 %v6830_v17  ;;  %9811 = vst [vmem:[#allocation9_spill] sm:$0xff] %v9810_v54  ;;  %v393_v55 = vrot.slane %v329_v44, 7  ;;  %v486_v56 = vrot.slane %v394_v45, 7  ;;  %v392_v58 = vor.u32 %v390_v42, %v389_v48  ;;  %v7336_v59 = vsel %vm7330_vm2, %v389_v48, %v485_v49  ;;  %v285_v17 = vld [vmem:[%s7305_s6 + $0x50] sm:$0xff]  ;;  %v288_v48 = vld [vmem:[%s7305_s6 + $0x68] sm:$0xff] }
  0x7b   : > { %v397_v60 = vrot.slane %v332_v50, 7  ;;  %v487_v61 = vrot.slane %v398_v51, 7  ;;  %v573_v62 = vshll.u32 %v7336_v59, 16  ;;  %v335_v5 = vshrl.u32 %v312_v57, 16 }
  0x7c   : > { %5334 = vmatpush3.bf16.msra.mxu0 %v6831_v18  ;;  %v396_v63 = vor.u32 %v394_v45, %v393_v55  ;;  %v7341_v0 = vsel %vm7330_vm2, %v393_v55, %v486_v56  ;;  %v7347_v2 = vsel %vm7330_vm2, %v326_v41, %v392_v58  ;;  %v406_v32 = vshll.u32 %v7343_v1, 16 }
  0x7d   : > { %5470 = vmatpush3.bf16.msra.mxu1 %v6832_v19  ;;  %5335 = vmatprep.subr.bf16.mxu0 %v6833_v20  ;;  %v561_v3 = vshll.u32 %v7341_v0, 16  ;;  %v400_v4 = vor.u32 %v398_v51, %v397_v60  ;;  %v566_v6 = vshrl.u32 %v7347_v2, 16  ;;  %v568_v7 = vshll.u32 %v7347_v2, 16 }
  0x7e   : > { %5471 = vmatprep.subr.bf16.mxu1 %v6834_v21  ;;  %v7354_v8 = vsel %vm7330_vm2, %v329_v44, %v396_v63  ;;  %v7364_v12 = vsel %vm7330_vm2, %v397_v60, %v487_v61  ;;  %v575_v14 = vrot.slane %v573_v62, 1  ;;  %v401_v19 = vrot.slane %v335_v5, 7  ;;  %v6847_v44 = vld [vmem:[#allocation4 + $0x150] sm:$0xff]   ;;  %v290_v62 = vld [vmem:[%s7305_s6 + $0x78] sm:$0xff] }
  0x7f   : > { %v554_v9 = vshrl.u32 %v7354_v8, 16  ;;  %v556_v10 = vshll.u32 %v7354_v8, 16  ;;  %v7360_v11 = vsel %vm7330_vm2, %v332_v50, %v400_v4  ;;  %v570_v13 = vrot.slane %v568_v7, 1  ;;  %v289_v61 = vld [vmem:[%s7305_s6 + $0x70] sm:$0xff] }
  0x80   : > { %5336 = vmatpush3.bf16.msra.mxu0 %v6835_v22  ;;  %v563_v15 = vrot.slane %v561_v3, 1  ;;  %v580_v16 = vshll.u32 %v7360_v11, 16  ;;  %v402_v20 = vshll.u32 %v312_v57, 16  ;;  %v338_v21 = vshrl.u32 %v7343_v1, 16  ;;  %v6848_v57 = vld [vmem:[#allocation4 + $0x158] sm:$0xff]  }
  0x81   : > { %5472 = vmatpush3.bf16.msra.mxu1 %v6836_v23  ;;  %5337 = vmatprep.subr.bf16.mxu0 %v6837_v24  ;;  %v558_v18 = vrot.slane %v556_v10, 1  ;;  %v571_v22 = vor.u32 %v570_v13, %v566_v6  ;;  %v578_v23 = vshrl.u32 %v7360_v11, 16  ;;  %v286_v24 = vld [vmem:[%s7305_s6 + $0x58] sm:$0xff]  ;;  %v489_v51 = vrot.slane %v406_v32, 7  ;;  %v6849_v10 = vld [vmem:[#allocation4 + $0x160] sm:$0xff]  }
  0x82   : > { %5473 = vmatprep.subr.bf16.mxu1 %v6838_v25  ;;  %v6850_v25 = vld [vmem:[#allocation4 + $0x80] sm:$0xff]   ;;  %v488_v35 = vrot.slane %v402_v20, 7  ;;  %v7381_v37 = vpack.c.bf16 %v286_v24, %v285_v17  ;;  %v7405_v56 = vpack.c.bf16 %v288_v48, %v287_v47  ;;  %v6855_v3 = vld [vmem:[#allocation4 + $0x98] sm:$0xff]   ;;  %v7420_v7 = vpack.c.bf16 %v290_v62, %v289_v61  ;;  %v6859_v61 = vld [vmem:[#allocation4 + $0xb0] sm:$0xff]  }
  0x83   : > { %v291_v13 = vld [vmem:[%s7305_s6 + $0x80] sm:$0xff]  ;;  %v297_v62 = vld [vmem:[%s7305_s6 + $0xb0] sm:$0xff] }
  0x84   : > { %5338 = vmatpush3.bf16.msra.mxu0 %v6839_v26  ;;  %v559_v26 = vor.u32 %v558_v18, %v554_v9  ;;  %v7391_v45 = vsel %vm7330_vm2, %v401_v19, %v488_v35  ;;  %v341_v46 = vshrl.u32 %v7381_v37, 16  ;;  %v410_v60 = vshll.u32 %v7381_v37, 16 }
  0x85   : > { %5474 = vmatpush3.bf16.msra.mxu1 %v6840_v27  ;;  %5339 = vmatprep.subr.bf16.mxu0 %v6841_v28  ;;  %v582_v27 = vrot.slane %v580_v16, 1  ;;  %v585_v28 = vshll.u32 %v7364_v12, 16  ;;  %v597_v53 = vshll.u32 %v7391_v45, 16  ;;  %v344_v6 = vshrl.u32 %v7405_v56, 16 }
  0x86   : > { %5475 = vmatprep.subr.bf16.mxu1 %v6842_v29  ;;  %v404_v29 = vor.u32 %v402_v20, %v401_v19  ;;  %v7375_v33 = vsel %vm552_vm3, %v559_v26, %v563_v15  ;;  %v409_v58 = vrot.slane %v341_v46, 7  ;;  %v490_v18 = vrot.slane %v410_v60, 7  ;;  %v6857_v26 = vld [vmem:[#allocation4 + $0xa0] sm:$0xff]  }
  0x87   : > { %1597 = vmatprep.mubr.bf16.mxu1 %v7375_v33  ;;  %v583_v40 = vor.u32 %v582_v27, %v578_v23  ;;  %v587_v41 = vrot.slane %v585_v28, 1  ;;  %v413_v20 = vrot.slane %v344_v6, 7  ;;  %v6851_v23 = vld [vmem:[#allocation4 + $0x168] sm:$0xff]   ;;  %v418_v35 = vshll.u32 %v7420_v7, 16 }
  0x88   : > { %5340 = vmatpush3.bf16.msra.mxu0 %v6843_v30  ;;  %v576_v30 = vsel %vm552_vm3, %v571_v22, %v575_v14  ;;  %v7379_v36 = vsel %vm7330_vm2, %v335_v5, %v404_v29  ;;  %v599_v5 = vrot.slane %v597_v53, 1  ;;  %v412_v9 = vor.u32 %v410_v60, %v409_v58  ;;  %v292_v14 = vld [vmem:[%s7305_s6 + $0x88] sm:$0xff]  ;;  %v6856_v53 = vld [vmem:[#allocation4 + $0x178] sm:$0xff]  }
  0x89   : > { %5476 = vmatpush3.bf16.msra.mxu1 %v6844_v31  ;;  %6141 = vmatprep.subr.bf16.mxu0 %v7319_v38  ;;  %v405_v31 = vrot.slane %v338_v21, 7  ;;  %v592_v42 = vshll.u32 %v7379_v36, 16  ;;  %v7397_v49 = vsel %vm552_vm3, %v583_v40, %v587_v41  ;;  %v590_v50 = vshrl.u32 %v7379_v36, 16  ;;  %v6853_v40 = vld [vmem:[#allocation4 + $0x170] sm:$0xff]   ;;  %v296_v60 = vld [vmem:[%s7305_s6 + $0xa8] sm:$0xff] }
  0x8a   : > { %6189 = vmatprep.subr.bf16.mxu1 %v6850_v25  ;;  %1131 = vmatprep.mubr.bf16.mxu0 %v576_v30  ;;  %9812 = vst [vmem:[#allocation10_spill] sm:$0xff] %v7397_v49  ;;  %v347_v22 = vshrl.u32 %v7420_v7, 16  ;;  %v7433_v24 = vsel %vm7330_vm2, %v341_v46, %v412_v9  ;;  %v7442_v29 = vsel %vm7330_vm2, %v409_v58, %v490_v18  ;;  %v492_v48 = vrot.slane %v418_v35, 7  ;;  %v295_v58 = vld [vmem:[%s7305_s6 + $0xa0] sm:$0xff] }
  0x8b   : > { %1132 = vmatmul.mubr.bf16.vlgmr.msra.gmra.mrb[0].mxu0 %v7347_v2  ;;  %v408_v43 = vor.u32 %v406_v32, %v405_v31  ;;  %v594_v52 = vrot.slane %v592_v42, 1  ;;  %v7415_v63 = vsel %vm7330_vm2, %v405_v31, %v489_v51  ;;  %v616_v31 = vshll.u32 %v7433_v24, 16  ;;  %v6861_v18 = vld [vmem:[#allocation4 + $0x1c0] sm:$0xff]  }
  0x8c   : > { %1598 = vmatmul.mubr.bf16.vlgmr.msra.gmra.mrb[0].mxu1 %v7354_v8  ;;  %6142 = vmatpush3.bf16.msra.mxu0 %v7319_v38  ;;  %v6854_v38 = vld [vmem:[#allocation4 + $0x90] sm:$0xff]   ;;  %v609_v17 = vshll.u32 %v7415_v63, 16  ;;  %v614_v41 = vshrl.u32 %v7433_v24, 16  ;;  %v621_v42 = vshll.u32 %v7442_v29, 16 }
  0x8d   : > { %1139 = vmatprep.mubr.bf16.mxu0 %v7375_v33  ;;  %1605 = vmatprep.mubr.bf16.mxu1 %v576_v30  ;;  %v7403_v55 = vsel %vm7330_vm2, %v338_v21, %v408_v43  ;;  %v595_v4 = vor.u32 %v594_v52, %v590_v50  ;;  %v414_v21 = vshll.u32 %v7405_v56, 16  ;;  %v6858_v30 = vld [vmem:[#allocation4 + $0xa8] sm:$0xff]  }
  0x8e   : > { %6143 = vmatprep.subr.bf16.mxu0 %v6846_v34  ;;  %6190 = vmatpush3.bf16.msra.mxu1 %v6850_v25  ;;  %v604_v1 = vshll.u32 %v7403_v55, 16  ;;  %v602_v15 = vshrl.u32 %v7403_v55, 16  ;;  %v7435_v25 = vpack.c.bf16 %v292_v14, %v291_v13  ;;  %v611_v28 = vrot.slane %v609_v17, 1  ;;  %v299_v14 = vld [vmem:[%s7305_s6 + $0xc0] sm:$0xff]  ;;  %v300_v17 = vld [vmem:[%s7305_s6 + $0xc8] sm:$0xff] }
  0x8f   : > { %6191 = vmatprep.subr.bf16.mxu1 %v6852_v39  ;;  %v7427_v19 = vsel %vm552_vm3, %v595_v4, %v599_v5  ;;  %v416_v32 = vor.u32 %v414_v21, %v413_v20  ;;  %v491_v47 = vrot.slane %v414_v21, 7  ;;  %v623_v9 = vrot.slane %v621_v42, 1 }
  0x90   : > { %6144 = vmatpush3.bf16.msra.mxu0 %v6846_v34  ;;  %v606_v16 = vrot.slane %v604_v1, 1  ;;  %9813 = vst [vmem:[#allocation11_spill] sm:$0xff] %v7427_v19  ;;  %v417_v34 = vrot.slane %v347_v22, 7  ;;  %v350_v37 = vshrl.u32 %v7435_v25, 16  ;;  %v422_v43 = vshll.u32 %v7435_v25, 16  ;;  %v298_v1 = vld [vmem:[%s7305_s6 + $0xb8] sm:$0xff] }
  0x91   : > { %6145 = vmatprep.subr.bf16.mxu0 %v6847_v44  ;;  %v7458_v50 = vsel %vm7330_vm2, %v344_v6, %v416_v32  ;;  %v6860_v6 = vld [vmem:[#allocation4 + $0xb8] sm:$0xff]  }
  0x92   : > { %6192 = vmatpush3.bf16.msra.mxu1 %v6852_v39  ;;  %v607_v27 = vor.u32 %v606_v16, %v602_v15  ;;  %v293_v39 = vld [vmem:[%s7305_s6 + $0x90] sm:$0xff]  ;;  %v420_v51 = vor.u32 %v418_v35, %v417_v34  ;;  %v493_v52 = vrot.slane %v422_v43, 7  ;;  %v421_v56 = vrot.slane %v350_v37, 7 }
  0x93   : > { %1140 = vmatmul.mubr.bf16.gmra.mrb[4].mxu0 %v7354_v8  ;;  %6193 = vmatprep.subr.bf16.mxu1 %v6854_v38  ;;  %v628_v4 = vshll.u32 %v7458_v50, 16  ;;  %v7478_v5 = vsel %vm7330_vm2, %v417_v34, %v492_v48  ;;  %v7521_v48 = vld [vmem:[#allocation4 + $0x200] sm:$0xff]  }
  0x94   : > { %1606 = vmatmul.mubr.bf16.gmra.mrb[4].mxu1 %v7347_v2  ;;  %1147 = vmatprep.mubr.bf16.mxu0 %v7397_v49  ;;  %v7454_v46 = vsel %vm552_vm3, %v607_v27, %v611_v28  ;;  %v7487_v13 = vsel %vm7330_vm2, %v421_v56, %v493_v52  ;;  %v424_v15 = vor.u32 %v422_v43, %v421_v56  ;;  %v302_v27 = vld [vmem:[%s7305_s6 + $0xd8] sm:$0xff]  ;;  %v303_v28 = vld [vmem:[%s7305_s6 + $0xe0] sm:$0xff]  ;;  %v645_v34 = vshll.u32 %v7478_v5, 16 }
  0x95   : > { %1613 = vmatprep.mubr.bf16.mxu1 %v7375_v33  ;;  %6146 = vmatpush3.bf16.msra.mxu0 %v6847_v44  ;;  %v294_v44 = vld [vmem:[%s7305_s6 + $0x98] sm:$0xff]  ;;  %9814 = vst [vmem:[#allocation12_spill] sm:$0xff] %v7454_v46  ;;  %v657_v35 = vshll.u32 %v7487_v13, 16 }
  0x96   : > { %6147 = vmatprep.subr.bf16.mxu0 %v6848_v57  ;;  %6194 = vmatpush3.bf16.msra.mxu1 %v6854_v38  ;;  %v618_v38 = vrot.slane %v616_v31, 1  ;;  %v630_v31 = vrot.slane %v628_v4, 1 }
  0x97   : > { %6195 = vmatprep.subr.bf16.mxu1 %v6855_v3 }
  0x98   : > { %v619_v7 = vor.u32 %v618_v38, %v614_v41  ;;  %v7513_v41 = vsel %vm7330_vm2, %v350_v37, %v424_v15 }
  0x99   : > { %6148 = vmatpush3.bf16.msra.mxu0 %v6848_v57  ;;  %v7462_v57 = vpack.c.bf16 %v294_v44, %v293_v39  ;;  %v305_v39 = vld [vmem:[%s7305_s6 + $0xf0] sm:$0xff]  ;;  %v7518_v44 = vpack.c.bf16 %v300_v17, %v299_v14  ;;  %v650_v4 = vshrl.u32 %v7513_v41, 16 }
  0x9a   : > { %6149 = vmatprep.subr.bf16.mxu0 %v6849_v10  ;;  %6196 = vmatpush3.bf16.msra.mxu1 %v6855_v3  ;;  %v7473_v3 = vsel %vm7330_vm2, %v413_v20, %v491_v47  ;;  %v626_v20 = vshrl.u32 %v7458_v50, 16  ;;  %v306_v47 = vld [vmem:[%s7305_s6 + $0xf8] sm:$0xff] }
  0x9b   : > { %1148 = vmatmul.mubr.bf16.gmra.mrb[8].mxu0 %v7360_v11  ;;  %6197 = vmatprep.subr.bf16.mxu1 %v6857_v26  ;;  %v353_v16 = vshrl.u32 %v7462_v57, 16  ;;  %v633_v21 = vshll.u32 %v7473_v3, 16  ;;  %v426_v43 = vshll.u32 %v7462_v57, 16 }
  0x9c   : > { %1614 = vmatmul.mubr.bf16.gmra.mrb[8].mxu1 %v7354_v8  ;;  %1155 = vmatprep.mubr.bf16.mxu0 %v7427_v19  ;;  %v631_v52 = vor.u32 %v630_v31, %v626_v20 }
  0x9d   : > { %1621 = vmatprep.mubr.bf16.mxu1 %v7397_v49  ;;  %6150 = vmatpush3.bf16.msra.mxu0 %v6849_v10  ;;  %v7483_v10 = vsel %vm7330_vm2, %v347_v22, %v420_v51  ;;  %v7494_v22 = vpack.c.bf16 %v296_v60, %v295_v58  ;;  %v425_v42 = vrot.slane %v353_v16, 7  ;;  %v635_v38 = vrot.slane %v633_v21, 1 }
  0x9e   : > { %6151 = vmatprep.subr.bf16.mxu0 %v6851_v23  ;;  %6198 = vmatpush3.bf16.msra.mxu1 %v6857_v26  ;;  %v301_v26 = vld [vmem:[%s7305_s6 + $0xd0] sm:$0xff]  ;;  %v640_v32 = vshll.u32 %v7483_v10, 16  ;;  %v638_v25 = vshrl.u32 %v7483_v10, 16 }
  0x9f   : > { %6199 = vmatprep.subr.bf16.mxu1 %v6858_v30  ;;  %v356_v51 = vshrl.u32 %v7494_v22, 16  ;;  %v7529_v56 = vpack.c.bf16 %v302_v27, %v301_v26  ;;  %v430_v15 = vshll.u32 %v7494_v22, 16  ;;  %v7545_v20 = vsel %vm552_vm3, %v631_v52, %v635_v38 }
  0xa0   : > { %v642_v60 = vrot.slane %v640_v32, 1  ;;  %9816 = vst [vmem:[#allocation14_spill] sm:$0xff] %v7545_v20  ;;  %v798_v52 = vrot.slane %v7336_v59, 1 }
  0xa1   : > { %6152 = vmatpush3.bf16.msra.mxu0 %v6851_v23  ;;  %v7496_v23 = vpack.c.bf16 %v298_v1, %v297_v62  ;;  %v494_v62 = vrot.slane %v426_v43, 7  ;;  %v7535_v1 = vpack.c.bf16 %v306_v47, %v305_v39  ;;  %v429_v14 = vrot.slane %v356_v51, 7 }
  0xa2   : > { %6153 = vmatprep.subr.bf16.mxu0 %v6853_v40  ;;  %6200 = vmatpush3.bf16.msra.mxu1 %v6858_v30  ;;  %v304_v30 = vld [vmem:[%s7305_s6 + $0xe8] sm:$0xff]  ;;  %v365_v21 = vshrl.u32 %v7529_v56, 16  ;;  %v643_v27 = vor.u32 %v642_v60, %v638_v25  ;;  %v797_v25 = vrot.slane %v7347_v2, 1 }
  0xa3   : > { %1156 = vmatmul.mubr.bf16.gmra.mrb[12].mxu0 %v7379_v36  ;;  %6201 = vmatprep.subr.bf16.mxu1 %v6859_v61  ;;  %v359_v37 = vshrl.u32 %v7496_v23, 16  ;;  %v7531_v58 = vpack.c.bf16 %v304_v30, %v303_v28  ;;  %v7551_v30 = vsel %vm7330_vm2, %v425_v42, %v494_v62  ;;  %v371_v31 = vshrl.u32 %v7535_v1, 16 }
  0xa4   : > { %1622 = vmatmul.mubr.bf16.gmra.mrb[12].mxu1 %v7360_v11  ;;  %1163 = vmatprep.mubr.bf16.mxu0 %v7454_v46  ;;  %v441_v57 = vrot.slane %v365_v21, 7  ;;  %v450_v38 = vshll.u32 %v7535_v1, 16 }
  0xa5   : > { %1629 = vmatprep.mubr.bf16.mxu1 %v7427_v19  ;;  %6154 = vmatpush3.bf16.msra.mxu0 %v6853_v40  ;;  %v7507_v40 = vsel %vm552_vm3, %v619_v7, %v623_v9  ;;  %v428_v7 = vor.u32 %v426_v43, %v425_v42  ;;  %v362_v9 = vshrl.u32 %v7518_v44, 16  ;;  %v433_v17 = vrot.slane %v359_v37, 7 }
  0xa6   : > { %6155 = vmatprep.subr.bf16.mxu0 %v6856_v53  ;;  %6202 = vmatpush3.bf16.msra.mxu1 %v6859_v61  ;;  %9815 = vst [vmem:[#allocation13_spill] sm:$0xff] %v7507_v40  ;;  %v652_v61 = vshll.u32 %v7513_v41, 16  ;;  %v368_v26 = vshrl.u32 %v7531_v58, 16  ;;  %v442_v42 = vshll.u32 %v7529_v56, 16 }
  0xa7   : > { %6203 = vmatprep.subr.bf16.mxu1 %v6860_v6  ;;  %v7558_v22 = vsel %vm7330_vm2, %v353_v16, %v428_v7  ;;  %v437_v32 = vrot.slane %v362_v9, 7  ;;  %v446_v16 = vshll.u32 %v7531_v58, 16 }
  0xa8   : > { %v654_v28 = vrot.slane %v652_v61, 1  ;;  %v445_v47 = vrot.slane %v368_v26, 7  ;;  %v669_v61 = vshll.u32 %v7551_v30, 16  ;;  %v664_v7 = vshll.u32 %v7558_v22, 16 }
  0xa9   : > { %6156 = vmatpush3.bf16.msra.mxu0 %v6856_v53  ;;  %v647_v53 = vrot.slane %v645_v34, 1  ;;  %v438_v34 = vshll.u32 %v7518_v44, 16  ;;  %v449_v44 = vrot.slane %v371_v31, 7  ;;  %v444_v59 = vor.u32 %v442_v42, %v441_v57 }
  0xaa   : > { %5597 = vmatprep.subr.bf16.mxu0 %v6861_v18  ;;  %6204 = vmatpush3.bf16.msra.mxu1 %v6860_v6  ;;  %v7539_v6 = vrot.slane %v657_v35, 1  ;;  %v434_v18 = vshll.u32 %v7496_v23, 16  ;;  %v495_v23 = vrot.slane %v430_v15, 7  ;;  %v432_v35 = vor.u32 %v430_v15, %v429_v14 }
  0xab   : > { %1164 = vmatmul.mubr.bf16.gmra.mrb[16].mxu0 %v7403_v55  ;;  %6237 = vmatprep.subr.bf16.mxu1 %v7521_v48  ;;  %v7571_v56 = vsel %vm552_vm3, %v643_v27, %v647_v53  ;;  %v655_v60 = vor.u32 %v654_v28, %v650_v4  ;;  %v440_v62 = vor.u32 %v438_v34, %v437_v32  ;;  %v497_v1 = vrot.slane %v438_v34, 7 }
  0xac   : > { %1630 = vmatmul.mubr.bf16.gmra.mrb[16].mxu1 %v7379_v36  ;;  %1171 = vmatprep.mubr.bf16.mxu0 %v7507_v40  ;;  %v436_v39 = vor.u32 %v434_v18, %v433_v17  ;;  %v496_v43 = vrot.slane %v434_v18, 7  ;;  %v7577_v58 = vsel %vm7330_vm2, %v356_v51, %v432_v35  ;;  %v498_v15 = vrot.slane %v442_v42, 7 }
  0xad   : > { %1637 = vmatprep.mubr.bf16.mxu1 %v7454_v46  ;;  %v7581_v2 = vsel %vm7330_vm2, %v429_v14, %v495_v23  ;;  %v499_v18 = vrot.slane %v446_v16, 7  ;;  %v7584_v53 = vsel %vm793_vm4, %v797_v25, %v798_v52  ;;  %v448_v51 = vor.u32 %v446_v16, %v445_v47 }
  0xae   : > { %v7588_v4 = vsel %vm7330_vm2, %v359_v37, %v436_v39  ;;  %v7592_v27 = vsel %vm7330_vm2, %v433_v17, %v496_v43  ;;  %v452_v28 = vor.u32 %v450_v38, %v449_v44  ;;  %v662_v34 = vshrl.u32 %v7558_v22, 16 }
  0xaf   : > { %v671_v35 = vrot.slane %v669_v61, 1  ;;  %v676_v14 = vshll.u32 %v7577_v58, 16  ;;  %v7598_v23 = vsel %vm7330_vm2, %v362_v9, %v440_v62  ;;  %v666_v42 = vrot.slane %v664_v7, 1 }
  0xb0   : > { %v681_v37 = vshll.u32 %v7581_v2, 16  ;;  %v7604_v17 = vsel %vm7330_vm2, %v437_v32, %v497_v1  ;;  %v7608_v39 = vsel %vm7330_vm2, %v441_v57, %v498_v15  ;;  %v688_v9 = vshll.u32 %v7588_v4, 16 }
  0xb1   : > { %v693_v43 = vshll.u32 %v7592_v27, 16  ;;  %v7616_v16 = vsel %vm7330_vm2, %v365_v21, %v444_v59  ;;  %v7620_v32 = vsel %vm7330_vm2, %v445_v47, %v499_v18  ;;  %v700_v57 = vshll.u32 %v7598_v23, 16 }
  0xb2   : > { %v7626_v25 = vsel %vm7330_vm2, %v368_v26, %v448_v51  ;;  %v500_v52 = vrot.slane %v450_v38, 7  ;;  %v7630_v61 = vsel %vm7330_vm2, %v371_v31, %v452_v28  ;;  %v674_v21 = vshrl.u32 %v7577_v58, 16 }
  0xb3   : > { %1172 = vmatmul.mubr.bf16.gmra.mrb[20].mxu0 %v7433_v24  ;;  %v678_v62 = vrot.slane %v676_v14, 1  ;;  %v705_v7 = vshll.u32 %v7604_v17, 16  ;;  %v717_v47 = vshll.u32 %v7608_v39, 16  ;;  %v683_v1 = vrot.slane %v681_v37, 1 }
  0xb4   : > { %1638 = vmatmul.mubr.bf16.gmra.mrb[20].mxu1 %v7403_v55  ;;  %1179 = vmatprep.mubr.bf16.mxu0 %v7545_v20  ;;  %v686_v15 = vshrl.u32 %v7588_v4, 16  ;;  %v712_v59 = vshll.u32 %v7616_v16, 16  ;;  %v729_v26 = vshll.u32 %v7620_v32, 16  ;;  %v690_v18 = vrot.slane %v688_v9, 1 }
  0xb5   : > { %1645 = vmatprep.mubr.bf16.mxu1 %v7507_v40  ;;  %v695_v38 = vrot.slane %v693_v43, 1  ;;  %v724_v51 = vshll.u32 %v7626_v25, 16  ;;  %v736_v31 = vshll.u32 %v7630_v61, 16  ;;  %v7642_v28 = vsel %vm552_vm3, %v655_v60, %v7539_v6 }
  0xb6   : > { %v698_v14 = vshrl.u32 %v7598_v23, 16  ;;  %v7647_v37 = vsel %vm7330_vm2, %v449_v44, %v500_v52  ;;  %v707_v40 = vrot.slane %v705_v7, 1  ;;  %v710_v46 = vshrl.u32 %v7616_v16, 16 }
  0xb7   : > { %v719_v9 = vrot.slane %v717_v47, 1  ;;  %v722_v43 = vshrl.u32 %v7626_v25, 16  ;;  %v714_v19 = vrot.slane %v712_v59, 1  ;;  %v731_v49 = vrot.slane %v729_v26, 1 }
  0xb8   : > { %v726_v6 = vrot.slane %v724_v51, 1  ;;  %v734_v60 = vshrl.u32 %v7630_v61, 16  ;;  %v741_v44 = vshll.u32 %v7647_v37, 16  ;;  %v667_v52 = vor.u32 %v666_v42, %v662_v34 }
  0xb9   : > { %v679_v47 = vor.u32 %v678_v62, %v674_v21  ;;  %v691_v34 = vor.u32 %v690_v18, %v686_v15  ;;  %v715_v62 = vor.u32 %v714_v19, %v710_v46  ;;  %v795_v26 = vrot.slane %v7341_v0, 1  ;;  %v6863_v0 = vld [vmem:[#allocation4 + $0x1c8] sm:$0xff]  }
  0xba   : > { %v7658_v7 = vsel %vm552_vm3, %v667_v52, %v671_v35  ;;  %v743_v46 = vrot.slane %v741_v44, 1  ;;  %v801_v51 = vrot.slane %v7364_v12, 1  ;;  %v806_v12 = vrot.slane %v7403_v55, 1  ;;  %v6865_v44 = vld [vmem:[#allocation4 + $0x1d0] sm:$0xff]  }
  0xbb   : > { %1180 = vmatmul.mubr.bf16.gmra.mrb[24].mxu0 %v7458_v50  ;;  %v7665_v59 = vsel %vm552_vm3, %v679_v47, %v683_v1  ;;  %v7672_v35 = vsel %vm552_vm3, %v691_v34, %v695_v38  ;;  %v7686_v1 = vsel %vm552_vm3, %v715_v62, %v719_v9  ;;  %v800_v38 = vrot.slane %v7360_v11, 1  ;;  %v6872_v9 = vld [vmem:[#allocation4 + $0x208] sm:$0xff]   ;;  %v6866_v47 = vld [vmem:[#allocation4 + $0x190] sm:$0xff]   ;;  %v6867_v34 = vld [vmem:[#allocation4 + $0x1d8] sm:$0xff]  }
  0xbc   : > { %1646 = vmatmul.mubr.bf16.gmra.mrb[24].mxu1 %v7433_v24  ;;  %1187 = vmatprep.mubr.bf16.mxu0 %v7571_v56  ;;  %v812_v62 = vrot.slane %v7458_v50, 1 }
  0xbd   : > { %1653 = vmatprep.mubr.bf16.mxu1 %v7545_v20  ;;  %v702_v20 = vrot.slane %v700_v57, 1  ;;  %v738_v57 = vrot.slane %v736_v31, 1  ;;  %v6862_v31 = vld [vmem:[#allocation4 + $0x180] sm:$0xff]  }
  0xbf   : > { %v703_v42 = vor.u32 %v702_v20, %v698_v14  ;;  %v739_v19 = vor.u32 %v738_v57, %v734_v60  ;;  %v7718_v14 = vsel %vm793_vm4, %v800_v38, %v801_v51  ;;  %v6864_v60 = vld [vmem:[#allocation4 + $0x188] sm:$0xff]   ;;  %v807_v57 = vrot.slane %v7415_v63, 1  ;;  %v6876_v63 = vld [vmem:[#allocation4 + $0x218] sm:$0xff]  }
  0xc0   : > { %v6873_v51 = vld [vmem:[#allocation4 + $0x1e8] sm:$0xff]  }
  0xc1   : > { %v7679_v21 = vsel %vm552_vm3, %v703_v42, %v707_v40  ;;  %v727_v40 = vor.u32 %v726_v6, %v722_v43  ;;  %v7700_v15 = vsel %vm552_vm3, %v739_v19, %v743_v46  ;;  %v803_v43 = vrot.slane %v7379_v36, 1  ;;  %v6868_v19 = vld [vmem:[#allocation4 + $0x198] sm:$0xff]   ;;  %v6869_v46 = vld [vmem:[#allocation4 + $0x1e0] sm:$0xff]  }
  0xc2   : > { %v804_v6 = vrot.slane %v7391_v45, 1  ;;  %v7733_v45 = vsel %vm793_vm4, %v806_v12, %v807_v57  ;;  %v810_v42 = vrot.slane %v7442_v29, 1  ;;  %v6871_v29 = vld [vmem:[#allocation4 + $0x1a0] sm:$0xff]   ;;  %v6882_v12 = vld [vmem:[#allocation4 + $0x230] sm:$0xff]  }
  0xc3   : > { %1188 = vmatmul.mubr.bf16.gmra.mrb[28].mxu0 %v7483_v10  ;;  %v7693_v20 = vsel %vm552_vm3, %v727_v40, %v731_v49  ;;  %v794_v49 = vrot.slane %v7354_v8, 1  ;;  %v813_v40 = vrot.slane %v7473_v3, 1  ;;  %v6880_v3 = vld [vmem:[#allocation4 + $0x228] sm:$0xff]  }
  0xc4   : > { %1654 = vmatmul.mubr.bf16.gmra.mrb[28].mxu1 %v7458_v50  ;;  %1195 = vmatprep.mubr.bf16.mxu0 %v7642_v28  ;;  %v7730_v52 = vsel %vm793_vm4, %v803_v43, %v804_v6  ;;  %v819_v43 = vrot.slane %v7487_v13, 1  ;;  %v6875_v6 = vld [vmem:[#allocation4 + $0x1a8] sm:$0xff]   ;;  %v6884_v13 = vld [vmem:[#allocation4 + $0x238] sm:$0xff]  }
  0xc5   : > { %1661 = vmatprep.mubr.bf16.mxu1 %v7571_v56  ;;  %v7709_v18 = vsel %vm793_vm4, %v794_v49, %v795_v26  ;;  %v6878_v49 = vld [vmem:[#allocation4 + $0x220] sm:$0xff]   ;;  %v7747_v38 = vsel %vm793_vm4, %v812_v62, %v813_v40 }
  0xcb   : > { %1196 = vmatmul.mubr.bf16.gmra.mrb[32].mxu0 %v7513_v41 }
  0xcc   : > { %1662 = vmatmul.mubr.bf16.gmra.mrb[32].mxu1 %v7483_v10  ;;  %1203 = vmatprep.mubr.bf16.mxu0 %v7658_v7 }
  0xcd   : > { %1669 = vmatprep.mubr.bf16.mxu1 %v7642_v28 }
  0xd3   : > { %1204 = vmatmul.mubr.bf16.gmra.mrb[36].mxu0 %v7558_v22 }
  0xd4   : > { %1670 = vmatmul.mubr.bf16.gmra.mrb[36].mxu1 %v7513_v41  ;;  %1211 = vmatprep.mubr.bf16.mxu0 %v7665_v59 }
  0xd5   : > { %1677 = vmatprep.mubr.bf16.mxu1 %v7658_v7 }
  0xdb   : > { %1212 = vmatmul.mubr.bf16.gmra.mrb[40].mxu0 %v7577_v58 }
  0xdc   : > { %1678 = vmatmul.mubr.bf16.gmra.mrb[40].mxu1 %v7558_v22  ;;  %1219 = vmatprep.mubr.bf16.mxu0 %v7672_v35 }
  0xdd   : > { %1685 = vmatprep.mubr.bf16.mxu1 %v7665_v59 }
  0xe3   : > { %1220 = vmatmul.mubr.bf16.gmra.mrb[44].mxu0 %v7588_v4 }
  0xe4   : > { %1686 = vmatmul.mubr.bf16.gmra.mrb[44].mxu1 %v7577_v58  ;;  %1227 = vmatprep.mubr.bf16.mxu0 %v7679_v21 }
  0xe5   : > { %1693 = vmatprep.mubr.bf16.mxu1 %v7672_v35 }
  0xeb   : > { %1228 = vmatmul.mubr.bf16.gmra.mrb[48].mxu0 %v7598_v23 }
  0xec   : > { %1694 = vmatmul.mubr.bf16.gmra.mrb[48].mxu1 %v7588_v4  ;;  %1235 = vmatprep.mubr.bf16.mxu0 %v7686_v1 }
  0xed   : > { %1701 = vmatprep.mubr.bf16.mxu1 %v7679_v21 }
  0xf3   : > { %1236 = vmatmul.mubr.bf16.gmra.mrb[52].mxu0 %v7616_v16 }
  0xf4   : > { %1702 = vmatmul.mubr.bf16.gmra.mrb[52].mxu1 %v7598_v23  ;;  %1243 = vmatprep.mubr.bf16.mxu0 %v7693_v20 }
  0xf5   : > { %1709 = vmatprep.mubr.bf16.mxu1 %v7686_v1 }
  0xfb   : > { %1244 = vmatmul.mubr.bf16.gmra.mrb[56].mxu0 %v7626_v25 }
  0xfc   : > { %1710 = vmatmul.mubr.bf16.gmra.mrb[56].mxu1 %v7616_v16  ;;  %1251 = vmatprep.mubr.bf16.mxu0 %v7700_v15 }
  0xfd   : > { %1717 = vmatprep.mubr.bf16.mxu1 %v7693_v20 }
 0x103   : > { %1252 = vmatmul.mubr.bf16.gmra.mrb[60].mxu0 %v7630_v61 }
 0x104   : > { %1718 = vmatmul.mubr.bf16.gmra.mrb[60].mxu1 %v7626_v25  ;;  %6157 = vmatprep.mubr.bf16.mxu0 %v7584_v53 }
 0x105   : > { %6205 = vmatprep.mubr.bf16.mxu1 %v7709_v18 }
 0x10b   : > { %6158 = vmatmul.mubr.bf16.vlgmr.msra.gmra.mrb[64].mxu0 %v7709_v18 }
 0x10c   : > { %6206 = vmatmul.mubr.bf16.vlgmr.msra.gmra.mrb[64].mxu1 %v7584_v53  ;;  %5598 = vmatpush3.bf16.msra.mxu0 %v6862_v31  ;;  %v6874_v53 = vld [vmem:[#allocation4 + $0x210] sm:$0xff]   ;;  %v815_v31 = vrot.slane %v7483_v10, 1 }
 0x10d   : > { %6161 = vmatprep.mubr.bf16.mxu0 %v7718_v14  ;;  %6209 = vmatprep.mubr.bf16.mxu1 %v7709_v18 }
 0x10e   : > { %5599 = vmatprep.subr.bf16.mxu0 %v6863_v0  ;;  %6238 = vmatpush3.bf16.msra.mxu1 %v7521_v48  ;;  %v809_v48 = vrot.slane %v7433_v24, 1  ;;  %v816_v0 = vrot.slane %v7478_v5, 1  ;;  %v6879_v5 = vld [vmem:[#allocation4 + $0x1b0] sm:$0xff]  }
 0x10f   : > { %6239 = vmatprep.subr.bf16.mxu1 %v6872_v9 }
 0x110   : > { %5600 = vmatpush3.bf16.msra.mxu0 %v6864_v60  ;;  %v7744_v26 = vsel %vm793_vm4, %v809_v48, %v810_v42  ;;  %v6877_v60 = vld [vmem:[#allocation4 + $0x1f0] sm:$0xff]   ;;  %v7758_v57 = vsel %vm793_vm4, %v815_v31, %v816_v0  ;;  %v825_v48 = vrot.slane %v7581_v2, 1  ;;  %v6883_v42 = vld [vmem:[#allocation4 + $0x1b8] sm:$0xff]   ;;  %v828_v2 = vrot.slane %v7592_v27, 1 }
 0x111   : > { %5601 = vmatprep.subr.bf16.mxu0 %v6865_v44  ;;  %v834_v27 = vrot.slane %v7608_v39, 1  ;;  %v839_v39 = vrot.slane %v7630_v61, 1 }
 0x112   : > { %6240 = vmatpush3.bf16.msra.mxu1 %v6872_v9  ;;  %v818_v9 = vrot.slane %v7513_v41, 1 }
 0x113   : > { %6162 = vmatmul.mubr.bf16.gmra.mrb[68].mxu0 %v7730_v52  ;;  %6241 = vmatprep.subr.bf16.mxu1 %v6874_v53 }
 0x114   : > { %6210 = vmatmul.mubr.bf16.gmra.mrb[68].mxu1 %v7718_v14  ;;  %6165 = vmatprep.mubr.bf16.mxu0 %v7733_v45  ;;  %v7761_v44 = vsel %vm793_vm4, %v818_v9, %v819_v43  ;;  %v840_v9 = vrot.slane %v7647_v37, 1  ;;  %v9817_v43 = vld [vmem:[#allocation10_spill] sm:$0xff]  ;;  %v9818_v37 = vld [vmem:[#allocation11_spill] sm:$0xff] }
 0x115   : > { %6213 = vmatprep.mubr.bf16.mxu1 %v7730_v52  ;;  %5602 = vmatpush3.bf16.msra.mxu0 %v6866_v47  ;;  %v821_v47 = vrot.slane %v7558_v22, 1 }
 0x116   : > { %5603 = vmatprep.subr.bf16.mxu0 %v6867_v34  ;;  %6242 = vmatpush3.bf16.msra.mxu1 %v6874_v53  ;;  %v6881_v53 = vld [vmem:[#allocation4 + $0x1f8] sm:$0xff]   ;;  %v822_v34 = vrot.slane %v7551_v30, 1  ;;  %v827_v30 = vrot.slane %v7588_v4, 1 }
 0x117   : > { %6243 = vmatprep.subr.bf16.mxu1 %v6876_v63 }
 0x118   : > { %v823_v62 = vsel %vm793_vm4, %v821_v47, %v822_v34 }
 0x119   : > { %5604 = vmatpush3.bf16.msra.mxu0 %v6868_v19  ;;  %v830_v19 = vrot.slane %v7598_v23, 1 }
 0x11a   : > { %5605 = vmatprep.subr.bf16.mxu0 %v6869_v46  ;;  %6244 = vmatpush3.bf16.msra.mxu1 %v6876_v63  ;;  %v824_v63 = vrot.slane %v7577_v58, 1  ;;  %v831_v46 = vrot.slane %v7604_v17, 1  ;;  %v836_v17 = vrot.slane %v7626_v25, 1 }
 0x11b   : > { %6166 = vmatmul.mubr.bf16.gmra.mrb[72].mxu0 %v7744_v26  ;;  %6245 = vmatprep.subr.bf16.mxu1 %v6878_v49 }
 0x11c   : > { %6214 = vmatmul.mubr.bf16.gmra.mrb[72].mxu1 %v7733_v45  ;;  %6169 = vmatprep.mubr.bf16.mxu0 %v7747_v38  ;;  %v7773_v40 = vsel %vm793_vm4, %v824_v63, %v825_v48 }
 0x11d   : > { %6217 = vmatprep.mubr.bf16.mxu1 %v7744_v26  ;;  %5606 = vmatpush3.bf16.msra.mxu0 %v6871_v29  ;;  %v7785_v29 = vsel %vm793_vm4, %v830_v19, %v831_v46 }
 0x11e   : > { %5607 = vmatprep.subr.bf16.mxu0 %v6873_v51  ;;  %6246 = vmatpush3.bf16.msra.mxu1 %v6878_v49  ;;  %v7782_v49 = vsel %vm793_vm4, %v827_v30, %v828_v2  ;;  %v833_v51 = vrot.slane %v7616_v16, 1 }
 0x11f   : > { %6247 = vmatprep.subr.bf16.mxu1 %v6880_v3 }
 0x120   : > { %v7796_v31 = vsel %vm793_vm4, %v833_v51, %v834_v27 }
 0x121   : > { %5608 = vmatpush3.bf16.msra.mxu0 %v6875_v6 }
 0x122   : > { %5609 = vmatprep.subr.bf16.mxu0 %v6877_v60  ;;  %6248 = vmatpush3.bf16.msra.mxu1 %v6880_v3  ;;  %v837_v3 = vrot.slane %v7620_v32, 1  ;;  %v7808_v32 = vsel %vm793_vm4, %v839_v39, %v840_v9 }
 0x123   : > { %6170 = vmatmul.mubr.bf16.gmra.mrb[76].mxu0 %v7758_v57  ;;  %6249 = vmatprep.subr.bf16.mxu1 %v6882_v12 }
 0x124   : > { %6218 = vmatmul.mubr.bf16.gmra.mrb[76].mxu1 %v7747_v38  ;;  %6173 = vmatprep.mubr.bf16.mxu0 %v7761_v44  ;;  %v7799_v0 = vsel %vm793_vm4, %v836_v17, %v837_v3 }
 0x125   : > { %6221 = vmatprep.mubr.bf16.mxu1 %v7758_v57  ;;  %5610 = vmatpush3.bf16.msra.mxu0 %v6879_v5 }
 0x126   : > { %5611 = vmatprep.subr.bf16.mxu0 %v6881_v53  ;;  %6250 = vmatpush3.bf16.msra.mxu1 %v6882_v12 }
 0x127   : > { %6251 = vmatprep.subr.bf16.mxu1 %v6884_v13 }
 0x129   : > { %5612 = vmatpush3.bf16.msra.mxu0 %v6883_v42 }
 0x12a   : > { %6252 = vmatpush3.bf16.msra.mxu1 %v6884_v13 }
 0x12b   : > { %6174 = vmatmul.mubr.bf16.gmra.mrb[80].mxu0 %v823_v62 }
 0x12c   : > { %6222 = vmatmul.mubr.bf16.gmra.mrb[80].mxu1 %v7761_v44  ;;  %6177 = vmatprep.mubr.bf16.mxu0 %v7773_v40 }
 0x12d   : > { %6225 = vmatprep.mubr.bf16.mxu1 %v823_v62 }
 0x133   : > { %6178 = vmatmul.mubr.bf16.gmra.mrb[84].mxu0 %v7782_v49 }
 0x134   : > { %6226 = vmatmul.mubr.bf16.gmra.mrb[84].mxu1 %v7773_v40  ;;  %6181 = vmatprep.mubr.bf16.mxu0 %v7785_v29 }
 0x135   : > { %6229 = vmatprep.mubr.bf16.mxu1 %v7782_v49 }
 0x13b   : > { %6182 = vmatmul.mubr.bf16.gmra.mrb[88].mxu0 %v7796_v31 }
 0x13c   : > { %6230 = vmatmul.mubr.bf16.gmra.mrb[88].mxu1 %v7785_v29  ;;  %6185 = vmatprep.mubr.bf16.mxu0 %v7799_v0 }
 0x13d   : > { %6233 = vmatprep.mubr.bf16.mxu1 %v7796_v31 }
 0x143   : > { %6186 = vmatmul.mubr.bf16.gmra.mrb[92].mxu0 %v7808_v32 }
 0x144   : > { %6234 = vmatmul.mubr.bf16.gmra.mrb[92].mxu1 %v7799_v0  ;;  %2112 = vmatprep.mubr.bf16.mxu0 %v7375_v33  ;;  %v9819_v33 = vld [vmem:[#allocation12_spill] sm:$0xff] }
 0x145   : > { %6253 = vmatprep.mubr.bf16.mxu1 %v7709_v18 }
 0x14b   : > { %2113 = vmatmul.mubr.bf16.vlgmr.msra.gmra.mrb[96].mxu0 %v7354_v8 }
 0x14c   : > { %6254 = vmatmul.mubr.bf16.vlgmr.msra.gmra.mrb[64].mxu1 %v7718_v14  ;;  %2120 = vmatprep.mubr.bf16.mxu0 %v9817_v43 }
 0x14d   : > { %6257 = vmatprep.mubr.bf16.mxu1 %v7730_v52 }
 0x153   : > { %2121 = vmatmul.mubr.bf16.gmra.mrb[100].mxu0 %v7360_v11 }
 0x154   : > { %6258 = vmatmul.mubr.bf16.gmra.mrb[68].mxu1 %v7733_v45  ;;  %2128 = vmatprep.mubr.bf16.mxu0 %v9818_v37 }
 0x155   : > { %6261 = vmatprep.mubr.bf16.mxu1 %v7744_v26 }
 0x15b   : > { %2129 = vmatmul.mubr.bf16.gmra.mrb[104].mxu0 %v7379_v36 }
 0x15c   : > { %6262 = vmatmul.mubr.bf16.gmra.mrb[72].mxu1 %v7747_v38  ;;  %2136 = vmatprep.mubr.bf16.mxu0 %v9819_v33  ;;  %v9820_v38 = vld [vmem:[#allocation13_spill] sm:$0xff] }
 0x15d   : > { %6265 = vmatprep.mubr.bf16.mxu1 %v7758_v57 }
 0x15e   : > { %v5341_v8 = vpop.f32.mrb[0].mxu0 }
 0x15f   : > { %v5342_v18 = vpop.f32.mrb[1].mxu0  ;;  %v5477_v14 = vpop.f32.mrb[0].mxu1 }
 0x160   : > { %v5344_v52 = vpop.f32.mrb[2].mxu0  ;;  %v5478_v6 = vpop.f32.mrb[1].mxu1  ;;  %v7826_v11 = vadd.f32 %v5342_v18, %v5341_v8 }
 0x161   : > { %v5345_v45 = vpop.f32.mrb[3].mxu0  ;;  %v7828_v60 = vadd.f32 %v5478_v6, %v5477_v14  ;;  %v5480_v12 = vpop.f32.mrb[2].mxu1 }
 0x162   : > { %v5481_v26 = vpop.f32.mrb[3].mxu1  ;;  %v7830_v5 = vadd.f32 %v5345_v45, %v5344_v52 }
 0x163   : > { %2137 = vmatmul.mubr.bf16.gmra.mrb[108].mxu0 %v7403_v55  ;;  %v7833_v36 = vadd.f32 %v5481_v26, %v5480_v12 }
 0x164   : > { %6266 = vmatmul.mubr.bf16.gmra.mrb[76].mxu1 %v7761_v44  ;;  %2144 = vmatprep.mubr.bf16.mxu0 %v9820_v38 }
 0x165   : > { %6269 = vmatprep.mubr.bf16.mxu1 %v823_v62  ;;  %v9821_v62 = vld [vmem:[#allocation14_spill] sm:$0xff] }
 0x166   : > { %v5347_v57 = vpop.f32.mrb[4].mxu0 }
 0x167   : > { %v5348_v53 = vpop.f32.mrb[5].mxu0  ;;  %v5483_v13 = vpop.f32.mrb[4].mxu1 }
 0x168   : > { %v5350_v47 = vpop.f32.mrb[6].mxu0  ;;  %v5484_v34 = vpop.f32.mrb[5].mxu1  ;;  %v7837_v63 = vadd.f32 %v5348_v53, %v5347_v57 }
 0x169   : > { %v5351_v48 = vpop.f32.mrb[7].mxu0  ;;  %v7839_v42 = vadd.f32 %v5484_v34, %v5483_v13  ;;  %v5486_v30 = vpop.f32.mrb[6].mxu1 }
 0x16a   : > { %v5487_v2 = vpop.f32.mrb[7].mxu1  ;;  %v7841_v55 = vadd.f32 %v5351_v48, %v5350_v47 }
 0x16b   : > { %2145 = vmatmul.mubr.bf16.gmra.mrb[112].mxu0 %v7433_v24  ;;  %v7844_v44 = vadd.f32 %v5487_v2, %v5486_v30 }
 0x16c   : > { %6270 = vmatmul.mubr.bf16.gmra.mrb[80].mxu1 %v7773_v40  ;;  %2152 = vmatprep.mubr.bf16.mxu0 %v9821_v62 }
 0x16d   : > { %6273 = vmatprep.mubr.bf16.mxu1 %v7782_v49 }
 0x16e   : > { %v5353_v19 = vpop.f32.mrb[8].mxu0 }
 0x16f   : > { %v5354_v46 = vpop.f32.mrb[9].mxu0  ;;  %v5489_v51 = vpop.f32.mrb[8].mxu1 }
 0x170   : > { %v5356_v27 = vpop.f32.mrb[10].mxu0  ;;  %v5490_v17 = vpop.f32.mrb[9].mxu1  ;;  %v7849_v3 = vadd.f32 %v5354_v46, %v5353_v19 }
 0x171   : > { %v5357_v39 = vpop.f32.mrb[11].mxu0  ;;  %v7851_v9 = vadd.f32 %v5490_v17, %v5489_v51  ;;  %v5492_v43 = vpop.f32.mrb[10].mxu1 }
 0x172   : > { %v5493_v24 = vpop.f32.mrb[11].mxu1  ;;  %v7853_v37 = vadd.f32 %v5357_v39, %v5356_v27 }
 0x173   : > { %2153 = vmatmul.mubr.bf16.gmra.mrb[116].mxu0 %v7458_v50  ;;  %v7856_v40 = vadd.f32 %v5493_v24, %v5492_v43 }
 0x174   : > { %6274 = vmatmul.mubr.bf16.gmra.mrb[84].mxu1 %v7785_v29  ;;  %2160 = vmatprep.mubr.bf16.mxu0 %v7571_v56 }
 0x175   : > { %6277 = vmatprep.mubr.bf16.mxu1 %v7796_v31 }
 0x176   : > { %v5359_v49 = vpop.f32.mrb[12].mxu0 }
 0x177   : > { %v5360_v33 = vpop.f32.mrb[13].mxu0  ;;  %v5495_v8 = vpop.f32.mrb[12].mxu1 }
 0x178   : > { %v5362_v18 = vpop.f32.mrb[14].mxu0  ;;  %v5496_v14 = vpop.f32.mrb[13].mxu1  ;;  %v7861_v52 = vadd.f32 %v5360_v33, %v5359_v49 }
 0x179   : > { %v5363_v6 = vpop.f32.mrb[15].mxu0  ;;  %v7863_v45 = vadd.f32 %v5496_v14, %v5495_v8  ;;  %v5498_v12 = vpop.f32.mrb[14].mxu1 }
 0x17a   : > { %v5499_v50 = vpop.f32.mrb[15].mxu1  ;;  %v7865_v26 = vadd.f32 %v5363_v6, %v5362_v18 }
 0x17b   : > { %2161 = vmatmul.mubr.bf16.gmra.mrb[120].mxu0 %v7483_v10  ;;  %v7868_v29 = vadd.f32 %v5499_v50, %v5498_v12 }
 0x17c   : > { %6278 = vmatmul.mubr.bf16.gmra.mrb[88].mxu1 %v7799_v0  ;;  %2168 = vmatprep.mubr.bf16.mxu0 %v7642_v28 }
 0x17d   : > { %6281 = vmatprep.mubr.bf16.mxu1 %v7808_v32 }
 0x17e   : > { %v5365_v56 = vpop.f32.mrb[16].mxu0 }
 0x17f   : > { %v5366_v31 = vpop.f32.mrb[17].mxu0  ;;  %v5501_v38 = vpop.f32.mrb[16].mxu1 }
 0x180   : > { %v5368_v57 = vpop.f32.mrb[18].mxu0  ;;  %v5502_v53 = vpop.f32.mrb[17].mxu1  ;;  %v7873_v13 = vadd.f32 %v5366_v31, %v5365_v56 }
 0x181   : > { %v5369_v47 = vpop.f32.mrb[19].mxu0  ;;  %v7875_v34 = vadd.f32 %v5502_v53, %v5501_v38  ;;  %v5504_v48 = vpop.f32.mrb[18].mxu1 }
 0x182   : > { %v5505_v10 = vpop.f32.mrb[19].mxu1  ;;  %v7877_v30 = vadd.f32 %v5369_v47, %v5368_v57 }
 0x183   : > { %2169 = vmatmul.mubr.bf16.gmra.mrb[124].mxu0 %v7513_v41  ;;  %v7880_v2 = vadd.f32 %v5505_v10, %v5504_v48 }
 0x184   : > { %6282 = vmatmul.mubr.bf16.gmra.mrb[92].mxu1 %v7799_v0  ;;  %2176 = vmatprep.mubr.bf16.mxu0 %v7658_v7 }
 0x186   : > { %v5371_v28 = vpop.f32.mrb[20].mxu0 }
 0x187   : > { %v5372_v32 = vpop.f32.mrb[21].mxu0  ;;  %v5507_v62 = vpop.f32.mrb[20].mxu1 }
 0x188   : > { %v5374_v19 = vpop.f32.mrb[22].mxu0  ;;  %v5508_v46 = vpop.f32.mrb[21].mxu1  ;;  %v7884_v51 = vadd.f32 %v5372_v32, %v5371_v28 }
 0x189   : > { %v5375_v27 = vpop.f32.mrb[23].mxu0  ;;  %v7886_v17 = vadd.f32 %v5508_v46, %v5507_v62  ;;  %v5510_v39 = vpop.f32.mrb[22].mxu1 }
 0x18a   : > { %v5511_v43 = vpop.f32.mrb[23].mxu1  ;;  %v7888_v24 = vadd.f32 %v5375_v27, %v5374_v19 }
 0x18b   : > { %2177 = vmatmul.mubr.bf16.gmra.mrb[128].mxu0 %v7558_v22  ;;  %v7891_v41 = vadd.f32 %v5511_v43, %v5510_v39 }
 0x18c   : > { %2184 = vmatprep.mubr.bf16.mxu0 %v7665_v59 }
 0x18e   : > { %v5377_v7 = vpop.f32.mrb[24].mxu0 }
 0x18f   : > { %v5378_v0 = vpop.f32.mrb[25].mxu0  ;;  %v5513_v49 = vpop.f32.mrb[24].mxu1 }
 0x190   : > { %v5380_v33 = vpop.f32.mrb[26].mxu0  ;;  %v5514_v8 = vpop.f32.mrb[25].mxu1  ;;  %v7894_v18 = vadd.f32 %v5378_v0, %v5377_v7 }
 0x191   : > { %v5381_v14 = vpop.f32.mrb[27].mxu0  ;;  %v7896_v6 = vadd.f32 %v5514_v8, %v5513_v49  ;;  %v5516_v12 = vpop.f32.mrb[26].mxu1 }
 0x192   : > { %v5517_v50 = vpop.f32.mrb[27].mxu1  ;;  %v7898_v56 = vadd.f32 %v5381_v14, %v5380_v33 }
 0x193   : > { %2185 = vmatmul.mubr.bf16.gmra.mrb[132].mxu0 %v7577_v58  ;;  %v7901_v22 = vadd.f32 %v5517_v50, %v5516_v12 }
 0x194   : > { %2192 = vmatprep.mubr.bf16.mxu0 %v7672_v35 }
 0x196   : > { %v5383_v59 = vpop.f32.mrb[28].mxu0 }
 0x197   : > { %v5384_v31 = vpop.f32.mrb[29].mxu0  ;;  %v5519_v38 = vpop.f32.mrb[28].mxu1 }
 0x198   : > { %v5386_v57 = vpop.f32.mrb[30].mxu0  ;;  %v5520_v53 = vpop.f32.mrb[29].mxu1  ;;  %v7904_v47 = vadd.f32 %v5384_v31, %v5383_v59 }
 0x199   : > { %v5387_v48 = vpop.f32.mrb[31].mxu0  ;;  %v7906_v10 = vadd.f32 %v5520_v53, %v5519_v38  ;;  %v5522_v28 = vpop.f32.mrb[30].mxu1 }
 0x19a   : > { %v5523_v32 = vpop.f32.mrb[31].mxu1  ;;  %v7908_v62 = vadd.f32 %v5387_v48, %v5386_v57 }
 0x19b   : > { %2193 = vmatmul.mubr.bf16.gmra.mrb[136].mxu0 %v7588_v4  ;;  %v7911_v58 = vadd.f32 %v5523_v32, %v5522_v28 }
 0x19c   : > { %2200 = vmatprep.mubr.bf16.mxu0 %v7679_v21 }
 0x19e   : > { %v5389_v35 = vpop.f32.mrb[32].mxu0 }
 0x19f   : > { %v5390_v19 = vpop.f32.mrb[33].mxu0  ;;  %v5525_v46 = vpop.f32.mrb[32].mxu1 }
 0x1a0   : > { %v7914_v27 = vadd.f32 %v5390_v19, %v5389_v35  ;;  %v5392_v39 = vpop.f32.mrb[34].mxu0  ;;  %v5526_v43 = vpop.f32.mrb[33].mxu1 }
 0x1a1   : > { %v5393_v7 = vpop.f32.mrb[35].mxu0  ;;  %v7916_v0 = vadd.f32 %v5526_v43, %v5525_v46  ;;  %v5528_v49 = vpop.f32.mrb[34].mxu1 }
 0x1a2   : > { %v7918_v33 = vadd.f32 %v5393_v7, %v5392_v39  ;;  %v5529_v8 = vpop.f32.mrb[35].mxu1 }
 0x1a3   : > { %2201 = vmatmul.mubr.bf16.gmra.mrb[140].mxu0 %v7598_v23  ;;  %v7921_v4 = vadd.f32 %v5529_v8, %v5528_v49 }
 0x1a4   : > { %2208 = vmatprep.mubr.bf16.mxu0 %v7686_v1 }
 0x1a6   : > { %v5395_v21 = vpop.f32.mrb[36].mxu0 }
 0x1a7   : > { %v5396_v14 = vpop.f32.mrb[37].mxu0  ;;  %v5531_v12 = vpop.f32.mrb[36].mxu1 }
 0x1a8   : > { %v7924_v50 = vadd.f32 %v5396_v14, %v5395_v21  ;;  %v5398_v59 = vpop.f32.mrb[38].mxu0  ;;  %v5532_v31 = vpop.f32.mrb[37].mxu1 }
 0x1a9   : > { %v5399_v38 = vpop.f32.mrb[39].mxu0  ;;  %v7926_v57 = vadd.f32 %v5532_v31, %v5531_v12  ;;  %v5534_v53 = vpop.f32.mrb[38].mxu1 }
 0x1aa   : > { %v7928_v48 = vadd.f32 %v5399_v38, %v5398_v59  ;;  %v5535_v28 = vpop.f32.mrb[39].mxu1 }
 0x1ab   : > { %2209 = vmatmul.mubr.bf16.gmra.mrb[144].mxu0 %v7616_v16  ;;  %v7931_v23 = vadd.f32 %v5535_v28, %v5534_v53 }
 0x1ac   : > { %2216 = vmatprep.mubr.bf16.mxu0 %v7693_v20 }
 0x1ae   : > { %v5401_v1 = vpop.f32.mrb[40].mxu0 }
 0x1af   : > { %v5402_v32 = vpop.f32.mrb[41].mxu0  ;;  %v5537_v35 = vpop.f32.mrb[40].mxu1 }
 0x1b0   : > { %v7934_v19 = vadd.f32 %v5402_v32, %v5401_v1  ;;  %v5404_v46 = vpop.f32.mrb[42].mxu0  ;;  %v5538_v39 = vpop.f32.mrb[41].mxu1 }
 0x1b1   : > { %v5405_v43 = vpop.f32.mrb[43].mxu0  ;;  %v7936_v7 = vadd.f32 %v5538_v39, %v5537_v35  ;;  %v5540_v49 = vpop.f32.mrb[42].mxu1 }
 0x1b2   : > { %v7938_v8 = vadd.f32 %v5405_v43, %v5404_v46  ;;  %v5541_v21 = vpop.f32.mrb[43].mxu1 }
 0x1b3   : > { %2217 = vmatmul.mubr.bf16.gmra.mrb[148].mxu0 %v7626_v25  ;;  %v7941_v16 = vadd.f32 %v5541_v21, %v5540_v49 }
 0x1b4   : > { %9822 = vst [vmem:[#allocation10_spill] sm:$0xff] %v7938_v8  ;;  %2224 = vmatprep.mubr.bf16.mxu0 %v7700_v15 }
 0x1b5   : > { %9823 = vst [vmem:[#allocation11_spill] sm:$0xff] %v7941_v16 }
 0x1b6   : > { %v5407_v14 = vpop.f32.mrb[44].mxu0 }
 0x1b7   : > { %v5408_v12 = vpop.f32.mrb[45].mxu0  ;;  %v5543_v59 = vpop.f32.mrb[44].mxu1 }
 0x1b8   : > { %v7944_v31 = vadd.f32 %v5408_v12, %v5407_v14  ;;  %v5410_v38 = vpop.f32.mrb[46].mxu0  ;;  %v5544_v53 = vpop.f32.mrb[45].mxu1 }
 0x1b9   : > { %v5411_v28 = vpop.f32.mrb[47].mxu0  ;;  %v7946_v1 = vadd.f32 %v5544_v53, %v5543_v59  ;;  %v5546_v32 = vpop.f32.mrb[46].mxu1 }
 0x1ba   : > { %v7948_v35 = vadd.f32 %v5411_v28, %v5410_v38  ;;  %v5547_v46 = vpop.f32.mrb[47].mxu1 }
 0x1bb   : > { %2225 = vmatmul.mubr.bf16.gmra.mrb[152].mxu0 %v7630_v61  ;;  %v7951_v39 = vadd.f32 %v5547_v46, %v5546_v32 }
 0x1bc   : > { %2232 = vmatprep.mubr.bf16.mxu0 %v7693_v20 }
 0x1bd   : > { %9824 = vst [vmem:[#allocation12_spill] sm:$0xff] %v7951_v39 }
 0x1be   : > { %v5413_v15 = vpop.f32.mrb[48].mxu0 }
 0x1bf   : > { %v5414_v43 = vpop.f32.mrb[49].mxu0  ;;  %v5549_v49 = vpop.f32.mrb[48].mxu1 }
 0x1c0   : > { %v7954_v21 = vadd.f32 %v5414_v43, %v5413_v15  ;;  %v5416_v14 = vpop.f32.mrb[50].mxu0  ;;  %v5550_v12 = vpop.f32.mrb[49].mxu1 }
 0x1c1   : > { %v5417_v54 = vpop.f32.mrb[51].mxu0  ;;  %v7956_v59 = vadd.f32 %v5550_v12, %v5549_v49  ;;  %v5552_v53 = vpop.f32.mrb[50].mxu1 }
 0x1c2   : > { %9825 = vst [vmem:[#allocation13_spill] sm:$0xff] %v7954_v21  ;;  %v7958_v38 = vadd.f32 %v5417_v54, %v5416_v14  ;;  %v5553_v28 = vpop.f32.mrb[51].mxu1 }
 0x1c3   : > { %9826 = vst [vmem:[#allocation14_spill] sm:$0xff] %v7956_v59  ;;  %2233 = vmatmul.mubr.bf16.gmra.mrb[156].mxu0 %v7626_v25  ;;  %v7961_v61 = vadd.f32 %v5553_v28, %v5552_v53 }
 0x1c4   : > { %9827 = vst [vmem:[#allocation15_spill] sm:$0xff] %v7958_v38 }
 0x1c5   : > { %9828 = vst [vmem:[#allocation16_spill] sm:$0xff] %v7961_v61 }
 0x1c6   : > { %v5419_v32 = vpop.f32.mrb[52].mxu0 }
 0x1c7   : > { %v5420_v20 = vpop.f32.mrb[53].mxu0  ;;  %v5555_v46 = vpop.f32.mrb[52].mxu1 }
 0x1c8   : > { %v7963_v16 = vadd.f32 %v5420_v20, %v5419_v32  ;;  %v5422_v15 = vpop.f32.mrb[54].mxu0  ;;  %v5556_v43 = vpop.f32.mrb[53].mxu1 }
 0x1c9   : > { %v5423_v21 = vpop.f32.mrb[55].mxu0  ;;  %v7965_v39 = vadd.f32 %v5556_v43, %v5555_v46  ;;  %v5558_v49 = vpop.f32.mrb[54].mxu1 }
 0x1ca   : > { %9829 = vst [vmem:[#allocation17_spill] sm:$0xff] %v7963_v16  ;;  %v7967_v12 = vadd.f32 %v5423_v21, %v5422_v15  ;;  %v5559_v54 = vpop.f32.mrb[55].mxu1 }
 0x1cb   : > { %9830 = vst [vmem:[#allocation18_spill] sm:$0xff] %v7965_v39  ;;  %v7969_v14 = vadd.f32 %v5559_v54, %v5558_v49 }
 0x1cc   : > { %9831 = vst [vmem:[#allocation19_spill] sm:$0xff] %v7967_v12 }
 0x1cd   : > { %9832 = vst [vmem:[#allocation20_spill] sm:$0xff] %v7969_v14 }
 0x1ce   : > { %v5425_v38 = vpop.f32.mrb[56].mxu0 }
 0x1cf   : > { %v5426_v25 = vpop.f32.mrb[57].mxu0  ;;  %v5561_v53 = vpop.f32.mrb[56].mxu1 }
 0x1d0   : > { %v7971_v28 = vadd.f32 %v5426_v25, %v5425_v38  ;;  %v5428_v61 = vpop.f32.mrb[58].mxu0  ;;  %v5562_v59 = vpop.f32.mrb[57].mxu1 }
 0x1d1   : > { %v5429_v32 = vpop.f32.mrb[59].mxu0  ;;  %v7973_v20 = vadd.f32 %v5562_v59, %v5561_v53  ;;  %v5564_v16 = vpop.f32.mrb[58].mxu1 }
 0x1d2   : > { %9833 = vst [vmem:[#allocation21_spill] sm:$0xff] %v7971_v28  ;;  %v7975_v8 = vadd.f32 %v5429_v32, %v5428_v61  ;;  %v5565_v46 = vpop.f32.mrb[59].mxu1 }
 0x1d3   : > { %v7977_v43 = vadd.f32 %v5565_v46, %v5564_v16 }
 0x1d5   : > { %9834 = vst [vmem:[#allocation22_spill] sm:$0xff] %v7977_v43 }
 0x1d6   : > { %v5431_v21 = vpop.f32.mrb[60].mxu0 }
 0x1d7   : > { %v5432_v15 = vpop.f32.mrb[61].mxu0  ;;  %v5567_v49 = vpop.f32.mrb[60].mxu1 }
 0x1d8   : > { %v7979_v54 = vadd.f32 %v5432_v15, %v5431_v21  ;;  %v5434_v14 = vpop.f32.mrb[62].mxu0  ;;  %v5568_v12 = vpop.f32.mrb[61].mxu1 }
 0x1d9   : > { %v5435_v38 = vpop.f32.mrb[63].mxu0  ;;  %v7981_v25 = vadd.f32 %v5568_v12, %v5567_v49  ;;  %v5570_v28 = vpop.f32.mrb[62].mxu1 }
 0x1da   : > { %v7983_v39 = vadd.f32 %v5435_v38, %v5434_v14  ;;  %v5571_v59 = vpop.f32.mrb[63].mxu1 }
 0x1db   : > { %v7985_v53 = vadd.f32 %v5571_v59, %v5570_v28 }
 0x1de   : > { %v6159_v61 = vpop.f32.mrb[64].mxu0 }
 0x1df   : > { %v1303_v16 = vadd.f32 %v6159_v61, %v7837_v63  ;;  %v1294_v32 = vpop.f32.mrb[65].mxu0 }
 0x1e0   : > { %v1295_v46 = vadd.f32 %v7826_v11, %v1294_v32  ;;  %v6160_v43 = vpop.f32.mrb[66].mxu0 }
 0x1e1   : > { %v7990_v21 = vadd.f32 %v7839_v42, %v1303_v16  ;;  %v1306_v15 = vadd.f32 %v6160_v43, %v7841_v55  ;;  %v1297_v12 = vpop.f32.mrb[67].mxu0 }
 0x1e2   : > { %v7994_v49 = vadd.f32 %v7828_v60, %v1295_v46  ;;  %v1298_v14 = vadd.f32 %v7830_v5, %v1297_v12 }
 0x1e3   : > { %v7998_v28 = vadd.f32 %v7844_v44, %v1306_v15 }
 0x1e4   : > { %v8001_v63 = vadd.f32 %v7833_v36, %v1298_v14 }
 0x1e6   : > { %v6163_v38 = vpop.f32.mrb[68].mxu0 }
 0x1e7   : > { %v1319_v11 = vadd.f32 %v6163_v38, %v7861_v52  ;;  %v1310_v59 = vpop.f32.mrb[69].mxu0 }
 0x1e8   : > { %v1311_v42 = vadd.f32 %v7849_v3, %v1310_v59  ;;  %v6164_v61 = vpop.f32.mrb[70].mxu0 }
 0x1e9   : > { %v8006_v55 = vadd.f32 %v7863_v45, %v1319_v11  ;;  %v1322_v60 = vadd.f32 %v6164_v61, %v7865_v26  ;;  %v1313_v43 = vpop.f32.mrb[71].mxu0 }
 0x1ea   : > { %v8010_v5 = vadd.f32 %v7851_v9, %v1311_v42  ;;  %v1314_v44 = vadd.f32 %v7853_v37, %v1313_v43 }
 0x1eb   : > { %v8014_v36 = vadd.f32 %v7868_v29, %v1322_v60 }
 0x1ec   : > { %v8017_v52 = vadd.f32 %v7856_v40, %v1314_v44 }
 0x1ee   : > { %v6167_v16 = vpop.f32.mrb[72].mxu0 }
 0x1ef   : > { %v1335_v3 = vadd.f32 %v6167_v16, %v7884_v51  ;;  %v1326_v32 = vpop.f32.mrb[73].mxu0 }
 0x1f0   : > { %v1327_v45 = vadd.f32 %v7873_v13, %v1326_v32  ;;  %v6168_v46 = vpop.f32.mrb[74].mxu0 }
 0x1f1   : > { %v8022_v26 = vadd.f32 %v7886_v17, %v1335_v3  ;;  %v1338_v9 = vadd.f32 %v6168_v46, %v7888_v24  ;;  %v1329_v15 = vpop.f32.mrb[75].mxu0  ;;  %v9837_v46 = vld [vmem:[#allocation11_spill] sm:$0xff] }
 0x1f2   : > { %v8026_v37 = vadd.f32 %v7875_v34, %v1327_v45  ;;  %v1330_v29 = vadd.f32 %v7877_v30, %v1329_v15 }
 0x1f3   : > { %v8030_v40 = vadd.f32 %v7891_v41, %v1338_v9 }
 0x1f4   : > { %v8033_v51 = vadd.f32 %v7880_v2, %v1330_v29 }
 0x1f6   : > { %v6171_v12 = vpop.f32.mrb[76].mxu0 }
 0x1f7   : > { %v1351_v13 = vadd.f32 %v6171_v12, %v7904_v47  ;;  %v1342_v14 = vpop.f32.mrb[77].mxu0 }
 0x1f8   : > { %v1343_v17 = vadd.f32 %v7894_v18, %v1342_v14  ;;  %v6172_v38 = vpop.f32.mrb[78].mxu0 }
 0x1f9   : > { %v8038_v24 = vadd.f32 %v7906_v10, %v1351_v13  ;;  %v1354_v34 = vadd.f32 %v6172_v38, %v7908_v62  ;;  %v1345_v11 = vpop.f32.mrb[79].mxu0 }
 0x1fa   : > { %v8042_v30 = vadd.f32 %v7896_v6, %v1343_v17  ;;  %v1346_v41 = vadd.f32 %v7898_v56, %v1345_v11 }
 0x1fb   : > { %v8046_v2 = vadd.f32 %v7911_v58, %v1354_v34  ;;  %v9842_v34 = vld [vmem:[#allocation14_spill] sm:$0xff] }
 0x1fc   : > { %v8049_v47 = vadd.f32 %v7901_v22, %v1346_v41  ;;  %v9843_v41 = vld [vmem:[#allocation15_spill] sm:$0xff] }
 0x1fe   : > { %v6175_v59 = vpop.f32.mrb[80].mxu0 }
 0x1ff   : > { %v1367_v18 = vadd.f32 %v6175_v59, %v7924_v50  ;;  %v1358_v42 = vpop.f32.mrb[81].mxu0 }
 0x200   : > { %v1359_v10 = vadd.f32 %v7914_v27, %v1358_v42  ;;  %v6176_v61 = vpop.f32.mrb[82].mxu0 }
 0x201   : > { %v8054_v62 = vadd.f32 %v7926_v57, %v1367_v18  ;;  %v1370_v6 = vadd.f32 %v6176_v61, %v7928_v48  ;;  %v1361_v60 = vpop.f32.mrb[83].mxu0  ;;  %v9844_v18 = vld [vmem:[#allocation20_spill] sm:$0xff] }
 0x202   : > { %v8058_v56 = vadd.f32 %v7916_v0, %v1359_v10  ;;  %v1362_v58 = vadd.f32 %v7918_v33, %v1361_v60  ;;  %v9845_v10 = vld [vmem:[#allocation16_spill] sm:$0xff] }
 0x203   : > { %v8062_v22 = vadd.f32 %v7931_v23, %v1370_v6  ;;  %v9835_v23 = vld [vmem:[#allocation10_spill] sm:$0xff] }
 0x204   : > { %v8065_v50 = vadd.f32 %v7921_v4, %v1362_v58  ;;  %v9836_v4 = vld [vmem:[#allocation12_spill] sm:$0xff] }
 0x206   : > { %v6179_v43 = vpop.f32.mrb[84].mxu0 }
 0x207   : > { %v1383_v27 = vadd.f32 %v6179_v43, %v7944_v31  ;;  %v1374_v44 = vpop.f32.mrb[85].mxu0  ;;  %v9846_v43 = vld [vmem:[#allocation21_spill] sm:$0xff] }
 0x208   : > { %v1375_v57 = vadd.f32 %v7934_v19, %v1374_v44  ;;  %v6180_v16 = vpop.f32.mrb[86].mxu0  ;;  %v9838_v19 = vld [vmem:[#allocation17_spill] sm:$0xff] }
 0x209   : > { %v8070_v48 = vadd.f32 %v7946_v1, %v1383_v27  ;;  %v1386_v0 = vadd.f32 %v6180_v16, %v7948_v35  ;;  %v1377_v3 = vpop.f32.mrb[87].mxu0  ;;  %v9839_v1 = vld [vmem:[#allocation13_spill] sm:$0xff]  ;;  %v9840_v35 = vld [vmem:[#allocation18_spill] sm:$0xff] }
 0x20a   : > { %v8074_v33 = vadd.f32 %v7936_v7, %v1375_v57  ;;  %v1378_v32 = vadd.f32 %v9835_v23, %v1377_v3  ;;  %v9841_v7 = vld [vmem:[#allocation19_spill] sm:$0xff] }
 0x20b   : > { %v8078_v45 = vadd.f32 %v9836_v4, %v1386_v0  ;;  %v9847_v4 = vld [vmem:[#allocation22_spill] sm:$0xff] }
 0x20c   : > { %v8081_v31 = vadd.f32 %v9837_v46, %v1378_v32 }
 0x20e   : > { %v6183_v9 = vpop.f32.mrb[88].mxu0 }
 0x20f   : > { %v1399_v15 = vadd.f32 %v6183_v9, %v9838_v19  ;;  %v1390_v29 = vpop.f32.mrb[89].mxu0 }
 0x210   : > { %v1391_v12 = vadd.f32 %v9839_v1, %v1390_v29  ;;  %v6184_v13 = vpop.f32.mrb[90].mxu0 }
 0x211   : > { %v8086_v14 = vadd.f32 %v9840_v35, %v1399_v15  ;;  %v1402_v17 = vadd.f32 %v6184_v13, %v9841_v7  ;;  %v1393_v38 = vpop.f32.mrb[91].mxu0 }
 0x212   : > { %v8090_v11 = vadd.f32 %v9842_v34, %v1391_v12  ;;  %v1394_v59 = vadd.f32 %v9843_v41, %v1393_v38 }
 0x213   : > { %v8094_v42 = vadd.f32 %v9844_v18, %v1402_v17 }
 0x214   : > { %v8097_v61 = vadd.f32 %v9845_v10, %v1394_v59 }
 0x216   : > { %v6187_v6 = vpop.f32.mrb[92].mxu0 }
 0x217   : > { %v1415_v60 = vadd.f32 %v6187_v6, %v7979_v54  ;;  %v1406_v58 = vpop.f32.mrb[93].mxu0 }
 0x218   : > { %v1407_v27 = vadd.f32 %v9846_v43, %v1406_v58  ;;  %v6188_v44 = vpop.f32.mrb[94].mxu0 }
 0x219   : > { %v8102_v57 = vadd.f32 %v7981_v25, %v1415_v60  ;;  %v1418_v16 = vadd.f32 %v6188_v44, %v7983_v39  ;;  %v1409_v0 = vpop.f32.mrb[95].mxu0 }
 0x21a   : > { %v8106_v3 = vadd.f32 %v7973_v20, %v1407_v27  ;;  %v1410_v23 = vadd.f32 %v7975_v8, %v1409_v0 }
 0x21b   : > { %v8110_v32 = vadd.f32 %v7985_v53, %v1418_v16 }
 0x21c   : > { %v8113_v54 = vadd.f32 %v9847_v4, %v1410_v23 }
 0x21e   : > { %v5613_v46 = vpop.f32.mrb[96].mxu0 }
 0x21f   : > { %v6255_v9 = vpop.f32.mrb[64].mxu1  ;;  %v5614_v19 = vpop.f32.mrb[97].mxu0 }
 0x220   : > { %v5615_v15 = vadd.f32 %v5614_v19, %v5613_v46  ;;  %v2275_v25 = vpop.f32.mrb[65].mxu1  ;;  %v5616_v29 = vpop.f32.mrb[98].mxu0 }
 0x221   : > { %v6256_v1 = vpop.f32.mrb[66].mxu1  ;;  %v5617_v39 = vpop.f32.mrb[99].mxu0 }
 0x222   : > { %v6435_v12 = vadd.f32 %v5615_v15, %v7994_v49  ;;  %v5618_v20 = vadd.f32 %v5617_v39, %v5616_v29  ;;  %v2278_v13 = vpop.f32.mrb[67].mxu1 }
 0x224   : > { %v6436_v35 = vadd.f32 %v6435_v12, %v2275_v25  ;;  %v6443_v8 = vadd.f32 %v5618_v20, %v8001_v63 }
 0x226   : > { %v6444_v53 = vadd.f32 %v6443_v8, %v2278_v13  ;;  %v5619_v7 = vpop.f32.mrb[100].mxu0 }
 0x227   : > { %v6259_v17 = vpop.f32.mrb[68].mxu1  ;;  %v5620_v38 = vpop.f32.mrb[101].mxu0 }
 0x228   : > { %v5621_v34 = vadd.f32 %v5620_v38, %v5619_v7  ;;  %v2291_v41 = vpop.f32.mrb[69].mxu1  ;;  %v5622_v59 = vpop.f32.mrb[102].mxu0 }
 0x229   : > { %v6260_v18 = vpop.f32.mrb[70].mxu1  ;;  %v5623_v10 = vpop.f32.mrb[103].mxu0 }
 0x22a   : > { %v6431_v6 = vadd.f32 %v5621_v34, %v7990_v21  ;;  %v5624_v60 = vadd.f32 %v5623_v10, %v5622_v59  ;;  %v2294_v58 = vpop.f32.mrb[71].mxu1 }
 0x22c   : > { %v6432_v43 = vadd.f32 %v6431_v6, %v6255_v9  ;;  %v6439_v49 = vadd.f32 %v5624_v60, %v7998_v28 }
 0x22e   : > { %v6440_v27 = vadd.f32 %v6439_v49, %v6256_v1  ;;  %v5625_v44 = vpop.f32.mrb[104].mxu0 }
 0x22f   : > { %v8119_v16 = vpop.f32.mrb[72].mxu1  ;;  %v5626_v63 = vpop.f32.mrb[105].mxu0 }
 0x230   : > { %v5627_v0 = vadd.f32 %v5626_v63, %v5625_v44  ;;  %v2307_v23 = vpop.f32.mrb[73].mxu1  ;;  %v5628_v4 = vpop.f32.mrb[106].mxu0 }
 0x231   : > { %v8121_v46 = vpop.f32.mrb[74].mxu1  ;;  %v5629_v19 = vpop.f32.mrb[107].mxu0 }
 0x232   : > { %v6451_v15 = vadd.f32 %v5627_v0, %v8010_v5  ;;  %v5630_v25 = vadd.f32 %v5629_v19, %v5628_v4  ;;  %v2310_v21 = vpop.f32.mrb[75].mxu1 }
 0x234   : > { %v6452_v29 = vadd.f32 %v6451_v15, %v2291_v41  ;;  %v6459_v9 = vadd.f32 %v5630_v25, %v8017_v52  ;;  %v8137_v52 = vld [vmem:[%s9786_s2] ss:$0 sm:$0xff] }
 0x235   : > { %v8140_v41 = vadd.f32 %v6444_v53, %v8137_v52  ;;  %v8144_v60 = vadd.f32 %v6436_v35, %v8137_v52 }
 0x236   : > { %v6460_v39 = vadd.f32 %v6459_v9, %v2294_v58  ;;  %v5631_v28 = vpop.f32.mrb[108].mxu0  ;;  %v8147_v58 = vadd.f32 %v6432_v43, %v8137_v52  ;;  %v8159_v43 = vadd.f32 %v6440_v27, %v8137_v52  ;;  %v8165_v9 = vadd.f32 %v6452_v29, %v8137_v52 }
 0x237   : > { %v8125_v1 = vpop.f32.mrb[76].mxu1  ;;  %v5632_v12 = vpop.f32.mrb[109].mxu0  ;;  %v2472_v0 = vadd.f32 %v8140_v41, %v8144_v60 }
 0x238   : > { %v5633_v20 = vadd.f32 %v5632_v12, %v5631_v28  ;;  %v8127_v13 = vpop.f32.mrb[77].mxu1  ;;  %v5634_v8 = vpop.f32.mrb[110].mxu0 }
 0x239   : > { %v8129_v7 = vpop.f32.mrb[78].mxu1  ;;  %v5635_v38 = vpop.f32.mrb[111].mxu0  ;;  %v2473_v35 = vadd.f32 %v2472_v0, %v8147_v58 }
 0x23a   : > { %v6447_v34 = vadd.f32 %v5633_v20, %v8006_v55  ;;  %v5636_v5 = vadd.f32 %v5635_v38, %v5634_v8  ;;  %v8132_v59 = vpop.f32.mrb[79].mxu1 }
 0x23b   : > { %v2474_v20 = vadd.f32 %v2473_v35, %v8159_v43 }
 0x23c   : > { %v6448_v10 = vadd.f32 %v6447_v34, %v6259_v17  ;;  %v6455_v6 = vadd.f32 %v5636_v5, %v8014_v36 }
 0x23d   : > { %v2475_v27 = vadd.f32 %v2474_v20, %v8165_v9 }
 0x23e   : > { %v6456_v55 = vadd.f32 %v6455_v6, %v6260_v18  ;;  %v5637_v49 = vpop.f32.mrb[112].mxu0 }
 0x23f   : > { %v8149_v44 = vpop.f32.mrb[80].mxu1  ;;  %v5638_v63 = vpop.f32.mrb[113].mxu0 }
 0x240   : > { %v5639_v4 = vadd.f32 %v5638_v63, %v5637_v49  ;;  %v8153_v53 = vpop.f32.mrb[81].mxu1  ;;  %v5640_v17 = vpop.f32.mrb[114].mxu0 }
 0x241   : > { %v8155_v19 = vpop.f32.mrb[82].mxu1  ;;  %v5641_v36 = vpop.f32.mrb[115].mxu0 }
 0x242   : > { %v6467_v18 = vadd.f32 %v5639_v4, %v8026_v37  ;;  %v5642_v15 = vadd.f32 %v5641_v36, %v5640_v17  ;;  %v8162_v25 = vpop.f32.mrb[83].mxu1  ;;  %v8173_v37 = vadd.f32 %v6460_v39, %v8137_v52 }
 0x244   : > { %v6468_v28 = vadd.f32 %v6467_v18, %v2307_v23  ;;  %v6475_v12 = vadd.f32 %v5642_v15, %v8033_v51  ;;  %v8180_v51 = vadd.f32 %v6448_v10, %v8137_v52  ;;  %v2476_v17 = vadd.f32 %v2475_v27, %v8173_v37 }
 0x245   : > { %v8190_v18 = vadd.f32 %v6456_v55, %v8137_v52 }
 0x246   : > { %v6476_v8 = vadd.f32 %v6475_v12, %v2310_v21  ;;  %v5643_v38 = vpop.f32.mrb[116].mxu0  ;;  %v2477_v35 = vadd.f32 %v2476_v17, %v8180_v51  ;;  %v8196_v20 = vadd.f32 %v6468_v28, %v8137_v52 }
 0x247   : > { %v8169_v34 = vpop.f32.mrb[84].mxu1  ;;  %v5644_v5 = vpop.f32.mrb[117].mxu0 }
 0x248   : > { %v5645_v6 = vadd.f32 %v5644_v5, %v5643_v38  ;;  %v8175_v49 = vpop.f32.mrb[85].mxu1  ;;  %v5646_v29 = vpop.f32.mrb[118].mxu0 }
 0x249   : > { %v8177_v63 = vpop.f32.mrb[86].mxu1  ;;  %v5647_v23 = vpop.f32.mrb[119].mxu0 }
 0x24a   : > { %v6463_v21 = vadd.f32 %v5645_v6, %v8022_v26  ;;  %v5648_v0 = vadd.f32 %v5647_v23, %v5646_v29  ;;  %v8183_v4 = vpop.f32.mrb[87].mxu1  ;;  %v2478_v6 = vadd.f32 %v2477_v35, %v8190_v18 }
 0x24c   : > { %v6464_v39 = vadd.f32 %v6463_v21, %v8119_v16  ;;  %v6471_v36 = vadd.f32 %v5648_v0, %v8030_v40  ;;  %v2479_v23 = vadd.f32 %v2478_v6, %v8196_v20  ;;  %v8208_v21 = vadd.f32 %v6476_v8, %v8137_v52 }
 0x24e   : > { %v6472_v15 = vadd.f32 %v6471_v36, %v8121_v46  ;;  %v5649_v10 = vpop.f32.mrb[120].mxu0  ;;  %v8213_v17 = vadd.f32 %v6464_v39, %v8137_v52 }
 0x24f   : > { %v8193_v12 = vpop.f32.mrb[88].mxu1  ;;  %v5650_v26 = vpop.f32.mrb[121].mxu0 }
 0x250   : > { %v5651_v38 = vadd.f32 %v5650_v26, %v5649_v10  ;;  %v8198_v5 = vpop.f32.mrb[89].mxu1  ;;  %v5652_v16 = vpop.f32.mrb[122].mxu0  ;;  %9848 = vst [vmem:[#allocation10_spill] sm:$0xff] %v8213_v17  ;;  %v2480_v26 = vadd.f32 %v2479_v23, %v8208_v21  ;;  %v8225_v39 = vadd.f32 %v6472_v15, %v8137_v52 }
 0x251   : > { %v8200_v27 = vpop.f32.mrb[90].mxu1  ;;  %v5653_v40 = vpop.f32.mrb[123].mxu0 }
 0x252   : > { %v6483_v55 = vadd.f32 %v5651_v38, %v8042_v30  ;;  %v5654_v29 = vadd.f32 %v5653_v40, %v5652_v16  ;;  %v8204_v46 = vpop.f32.mrb[91].mxu1 }
 0x254   : > { %v6484_v28 = vadd.f32 %v6483_v55, %v8127_v13  ;;  %v6491_v0 = vadd.f32 %v5654_v29, %v8049_v47  ;;  %v2481_v47 = vadd.f32 %v2480_v26, %v8213_v17 }
 0x256   : > { %v6492_v36 = vadd.f32 %v6491_v0, %v8132_v59  ;;  %v5655_v35 = vpop.f32.mrb[124].mxu0  ;;  %v8231_v29 = vadd.f32 %v6484_v28, %v8137_v52 }
 0x257   : > { %v8216_v10 = vpop.f32.mrb[92].mxu1  ;;  %v5656_v30 = vpop.f32.mrb[125].mxu0 }
 0x258   : > { %v5657_v38 = vadd.f32 %v5656_v30, %v5655_v35  ;;  %v8219_v16 = vpop.f32.mrb[93].mxu1  ;;  %v5658_v8 = vpop.f32.mrb[126].mxu0  ;;  %v2482_v35 = vadd.f32 %v2481_v47, %v8225_v39 }
 0x259   : > { %v8221_v40 = vpop.f32.mrb[94].mxu1  ;;  %v5659_v13 = vpop.f32.mrb[127].mxu0 }
 0x25a   : > { %v6479_v59 = vadd.f32 %v5657_v38, %v8038_v24  ;;  %v5660_v6 = vadd.f32 %v5659_v13, %v5658_v8  ;;  %v8228_v55 = vpop.f32.mrb[95].mxu1  ;;  %v2483_v15 = vadd.f32 %v2482_v35, %v8231_v29  ;;  %v8239_v24 = vadd.f32 %v6492_v36, %v8137_v52 }
 0x25c   : > { %v6480_v23 = vadd.f32 %v6479_v59, %v8125_v1  ;;  %v6487_v0 = vadd.f32 %v5660_v6, %v8046_v2  ;;  %v2484_v47 = vadd.f32 %v2483_v15, %v8239_v24 }
 0x25e   : > { %v6488_v30 = vadd.f32 %v6487_v0, %v8129_v7  ;;  %v5661_v26 = vpop.f32.mrb[128].mxu0  ;;  %v8242_v28 = vadd.f32 %v6480_v23, %v8137_v52 }
 0x25f   : > { %v5662_v17 = vpop.f32.mrb[129].mxu0 }
 0x260   : > { %v5663_v38 = vadd.f32 %v5662_v17, %v5661_v26  ;;  %v5664_v8 = vpop.f32.mrb[130].mxu0  ;;  %v2485_v6 = vadd.f32 %v2484_v47, %v8242_v28  ;;  %v8250_v36 = vadd.f32 %v6488_v30, %v8137_v52 }
 0x261   : > { %v5665_v13 = vpop.f32.mrb[131].mxu0 }
 0x262   : > { %v6499_v1 = vadd.f32 %v5663_v38, %v8058_v56  ;;  %v5666_v2 = vadd.f32 %v5665_v13, %v5664_v8  ;;  %v2486_v15 = vadd.f32 %v2485_v6, %v8250_v36 }
 0x264   : > { %v6500_v7 = vadd.f32 %v6499_v1, %v8153_v53  ;;  %v6507_v59 = vadd.f32 %v5666_v2, %v8065_v50 }
 0x266   : > { %v6508_v17 = vadd.f32 %v6507_v59, %v8162_v25  ;;  %v5667_v0 = vpop.f32.mrb[132].mxu0  ;;  %v8254_v23 = vadd.f32 %v6500_v7, %v8137_v52 }
 0x267   : > { %v5668_v35 = vpop.f32.mrb[133].mxu0 }
 0x268   : > { %v5669_v56 = vadd.f32 %v5668_v35, %v5667_v0  ;;  %v5670_v26 = vpop.f32.mrb[134].mxu0  ;;  %v2487_v8 = vadd.f32 %v2486_v15, %v8254_v23  ;;  %v8260_v30 = vadd.f32 %v6508_v17, %v8137_v52 }
 0x269   : > { %v5671_v38 = vpop.f32.mrb[135].mxu0 }
 0x26a   : > { %v6495_v53 = vadd.f32 %v5669_v56, %v8054_v62  ;;  %v5672_v50 = vadd.f32 %v5671_v38, %v5670_v26  ;;  %v2488_v59 = vadd.f32 %v2487_v8, %v8260_v30 }
 0x26c   : > { %v6496_v25 = vadd.f32 %v6495_v53, %v8149_v44  ;;  %v6503_v13 = vadd.f32 %v5672_v50, %v8062_v22 }
 0x26e   : > { %v8265_v1 = vadd.f32 %v6496_v25, %v8137_v52  ;;  %v6504_v2 = vadd.f32 %v6503_v13, %v8155_v19  ;;  %v5673_v47 = vpop.f32.mrb[136].mxu0 }
 0x26f   : > { %v5674_v7 = vpop.f32.mrb[137].mxu0 }
 0x270   : > { %v5675_v62 = vadd.f32 %v5674_v7, %v5673_v47  ;;  %v5676_v6 = vpop.f32.mrb[138].mxu0  ;;  %v2489_v35 = vadd.f32 %v2488_v59, %v8265_v1  ;;  %v8271_v17 = vadd.f32 %v6504_v2, %v8137_v52 }
 0x271   : > { %v5677_v0 = vpop.f32.mrb[139].mxu0 }
 0x272   : > { %v6515_v44 = vadd.f32 %v5675_v62, %v8074_v33  ;;  %v5678_v22 = vadd.f32 %v5677_v0, %v5676_v6  ;;  %v2490_v19 = vadd.f32 %v2489_v35, %v8271_v17 }
 0x274   : > { %v6516_v56 = vadd.f32 %v6515_v44, %v8175_v49  ;;  %v6523_v26 = vadd.f32 %v5678_v22, %v8081_v31 }
 0x276   : > { %v8278_v38 = vadd.f32 %v6516_v56, %v8137_v52  ;;  %v6524_v15 = vadd.f32 %v6523_v26, %v8183_v4  ;;  %v5679_v53 = vpop.f32.mrb[140].mxu0 }
 0x277   : > { %v5680_v50 = vpop.f32.mrb[141].mxu0 }
 0x278   : > { %v2491_v8 = vadd.f32 %v2490_v19, %v8278_v38  ;;  %v8283_v25 = vadd.f32 %v6524_v15, %v8137_v52  ;;  %v5681_v33 = vadd.f32 %v5680_v50, %v5679_v53  ;;  %v5682_v13 = vpop.f32.mrb[142].mxu0 }
 0x279   : > { %v5683_v2 = vpop.f32.mrb[143].mxu0 }
 0x27a   : > { %v2492_v49 = vadd.f32 %v2491_v8, %v8283_v25  ;;  %v6511_v31 = vadd.f32 %v5681_v33, %v8070_v48  ;;  %v5684_v47 = vadd.f32 %v5683_v2, %v5682_v13 }
 0x27c   : > { %v6512_v7 = vadd.f32 %v6511_v31, %v8169_v34  ;;  %v6519_v59 = vadd.f32 %v5684_v47, %v8078_v45 }
 0x27e   : > { %v8290_v4 = vadd.f32 %v6512_v7, %v8137_v52  ;;  %v6520_v62 = vadd.f32 %v6519_v59, %v8177_v63  ;;  %v5685_v6 = vpop.f32.mrb[144].mxu0 }
 0x27f   : > { %v5686_v0 = vpop.f32.mrb[145].mxu0 }
 0x280   : > { %v2493_v35 = vadd.f32 %v2492_v49, %v8290_v4  ;;  %v8295_v44 = vadd.f32 %v6520_v62, %v8137_v52  ;;  %v5687_v22 = vadd.f32 %v5686_v0, %v5685_v6  ;;  %v5688_v56 = vpop.f32.mrb[146].mxu0 }
 0x281   : > { %v5689_v48 = vpop.f32.mrb[147].mxu0 }
 0x282   : > { %v2494_v26 = vadd.f32 %v2493_v35, %v8295_v44  ;;  %v6531_v34 = vadd.f32 %v5687_v22, %v8090_v11  ;;  %v5690_v45 = vadd.f32 %v5689_v48, %v5688_v56 }
 0x284   : > { %v6532_v19 = vadd.f32 %v6531_v34, %v8198_v5  ;;  %v6539_v15 = vadd.f32 %v5690_v45, %v8097_v61 }
 0x286   : > { %v8302_v63 = vadd.f32 %v6532_v19, %v8137_v52  ;;  %v6540_v53 = vadd.f32 %v6539_v15, %v8204_v46  ;;  %v5691_v50 = vpop.f32.mrb[148].mxu0 }
 0x287   : > { %v5692_v8 = vpop.f32.mrb[149].mxu0 }
 0x288   : > { %v2495_v33 = vadd.f32 %v2494_v26, %v8302_v63  ;;  %v8307_v13 = vadd.f32 %v6540_v53, %v8137_v52  ;;  %v5693_v2 = vadd.f32 %v5692_v8, %v5691_v50  ;;  %v5694_v49 = vpop.f32.mrb[150].mxu0 }
 0x289   : > { %v5695_v11 = vpop.f32.mrb[151].mxu0 }
 0x28a   : > { %v2496_v31 = vadd.f32 %v2495_v33, %v8307_v13  ;;  %v6527_v5 = vadd.f32 %v5693_v2, %v8086_v14  ;;  %v5696_v61 = vadd.f32 %v5695_v11, %v5694_v49  ;;  %v6887_v2 = vld [vmem:[#allocation6 + $0x140] sm:$0xff]  }
 0x28b   : > { %6285 = vmatprep.subr.bf16.mxu1 %v6887_v2 }
 0x28c   : > { %v6528_v47 = vadd.f32 %v6527_v5, %v8193_v12  ;;  %v6535_v7 = vadd.f32 %v5696_v61, %v8094_v42  ;;  %6286 = vmatpush3.bf16.msra.mxu1 %v6887_v2  ;;  %v6888_v5 = vld [vmem:[#allocation6 + $0x148] sm:$0xff]  }
 0x28d   : > { %6287 = vmatprep.subr.bf16.mxu1 %v6888_v5  ;;  %v6904_v2 = vld [vmem:[#allocation6 + $0xe8] sm:$0xff]  }
 0x28e   : > { %v8314_v46 = vadd.f32 %v6528_v47, %v8137_v52  ;;  %v6536_v59 = vadd.f32 %v6535_v7, %v8200_v27  ;;  %v5697_v62 = vpop.f32.mrb[152].mxu0  ;;  %v6886_v7 = vld [vmem:[#allocation6 + $0xc0] sm:$0xff]  }
 0x28f   : > { %v5698_v6 = vpop.f32.mrb[153].mxu0 }
 0x290   : > { %v2497_v0 = vadd.f32 %v2496_v31, %v8314_v46  ;;  %v8319_v35 = vadd.f32 %v6536_v59, %v8137_v52  ;;  %v5699_v22 = vadd.f32 %v5698_v6, %v5697_v62  ;;  %v5700_v56 = vpop.f32.mrb[154].mxu0  ;;  %v6885_v31 = vld [vmem:[#allocation6 + $0x100] sm:$0xff]   ;;  %6288 = vmatpush3.bf16.msra.mxu1 %v6888_v5  ;;  %v6890_v6 = vld [vmem:[#allocation6 + $0xc8] sm:$0xff]  }
 0x291   : > { %v5701_v14 = vpop.f32.mrb[155].mxu0  ;;  %5733 = vmatprep.subr.bf16.mxu0 %v6885_v31 }
 0x292   : > { %v2498_v48 = vadd.f32 %v2497_v0, %v8319_v35  ;;  %v6547_v12 = vadd.f32 %v5699_v22, %v8106_v3  ;;  %v5702_v42 = vadd.f32 %v5701_v14, %v5700_v56  ;;  %5734 = vmatpush3.bf16.msra.mxu0 %v6886_v7  ;;  %v6893_v22 = vld [vmem:[#allocation6 + $0x110] sm:$0xff]   ;;  %v6907_v7 = vld [vmem:[#allocation6 + $0x138] sm:$0xff]  }
 0x293   : > { %v6894_v14 = vld [vmem:[#allocation6 + $0xd0] sm:$0xff]  }
 0x294   : > { %v6548_v26 = vadd.f32 %v6547_v12, %v8219_v16  ;;  %v6555_v34 = vadd.f32 %v5702_v42, %v8113_v54  ;;  %v6897_v12 = vld [vmem:[#allocation6 + $0x118] sm:$0xff]  }
 0x296   : > { %v8326_v27 = vadd.f32 %v6548_v26, %v8137_v52  ;;  %v6556_v45 = vadd.f32 %v6555_v34, %v8228_v55  ;;  %v5703_v19 = vpop.f32.mrb[156].mxu0  ;;  %v6898_v26 = vld [vmem:[#allocation6 + $0xd8] sm:$0xff]  }
 0x297   : > { %v5704_v15 = vpop.f32.mrb[157].mxu0 }
 0x298   : > { %v2499_v53 = vadd.f32 %v2498_v48, %v8326_v27  ;;  %v8331_v50 = vadd.f32 %v6556_v45, %v8137_v52  ;;  %v5705_v8 = vadd.f32 %v5704_v15, %v5703_v19  ;;  %v5706_v33 = vpop.f32.mrb[158].mxu0  ;;  %v6895_v48 = vld [vmem:[#allocation6 + $0x160] sm:$0xff]   ;;  %v6896_v45 = vld [vmem:[#allocation6 + $0x168] sm:$0xff]  }
 0x299   : > { %v5707_v3 = vpop.f32.mrb[159].mxu0  ;;  %v6900_v19 = vld [vmem:[#allocation6 + $0x120] sm:$0xff]  }
 0x29a   : > { %v2500_v16 = vadd.f32 %v2499_v53, %v8331_v50  ;;  %v6543_v54 = vadd.f32 %v5705_v8, %v8102_v57  ;;  %v5708_v49 = vadd.f32 %v5707_v3, %v5706_v33  ;;  %v6901_v15 = vld [vmem:[#allocation6 + $0xe0] sm:$0xff]   ;;  %v6899_v8 = vld [vmem:[#allocation6 + $0x170] sm:$0xff]   ;;  %v6902_v33 = vld [vmem:[#allocation6 + $0x128] sm:$0xff]  }
 0x29b   : > { %v6903_v3 = vld [vmem:[#allocation6 + $0x178] sm:$0xff]  }
 0x29c   : > { %v6544_v11 = vadd.f32 %v6543_v54, %v8216_v10  ;;  %v6551_v55 = vadd.f32 %v5708_v49, %v8110_v32  ;;  %v6889_v10 = vld [vmem:[#allocation6 + $0x108] sm:$0xff]   ;;  %v6891_v32 = vld [vmem:[#allocation6 + $0x150] sm:$0xff]  }
 0x29d   : > { %5735 = vmatprep.subr.bf16.mxu0 %v6889_v10  ;;  %6289 = vmatprep.subr.bf16.mxu1 %v6891_v32  ;;  %v6905_v54 = vld [vmem:[#allocation6 + $0x130] sm:$0xff]  }
 0x29e   : > { %v8338_v61 = vadd.f32 %v6544_v11, %v8137_v52  ;;  %v6552_v47 = vadd.f32 %v6551_v55, %v8221_v40  ;;  %5736 = vmatpush3.bf16.msra.mxu0 %v6890_v6  ;;  %6290 = vmatpush3.bf16.msra.mxu1 %v6891_v32  ;;  %v6892_v40 = vld [vmem:[#allocation6 + $0x158] sm:$0xff]   ;;  %v6906_v49 = vld [vmem:[#allocation6 + $0xf0] sm:$0xff]  }
 0x29f   : > { %6291 = vmatprep.subr.bf16.mxu1 %v6892_v40  ;;  %5737 = vmatprep.subr.bf16.mxu0 %v6893_v22 }
 0x2a0   : > { %v2501_v59 = vadd.f32 %v2500_v16, %v8338_v61  ;;  %v8343_v57 = vadd.f32 %v6552_v47, %v8137_v52 }
 0x2a2   : > { %v2502_v62 = vadd.f32 %v2501_v59, %v8343_v57  ;;  %6292 = vmatpush3.bf16.msra.mxu1 %v6892_v40  ;;  %5738 = vmatpush3.bf16.msra.mxu0 %v6894_v14  ;;  %v6909_v59 = vld [vmem:[#allocation6 + $0xf8] sm:$0xff]  }
 0x2a3   : > { %6293 = vmatprep.subr.bf16.mxu1 %v6895_v48  ;;  %5739 = vmatprep.subr.bf16.mxu0 %v6897_v12 }
 0x2a4   : > { %v2503_v0 = vrot.slane %v2502_v62, 4 }
 0x2a6   : > { %v2504_v56 = vadd.f32 %v2503_v0, %v2502_v62  ;;  %6294 = vmatpush3.bf16.msra.mxu1 %v6895_v48  ;;  %5740 = vmatpush3.bf16.msra.mxu0 %v6898_v26 }
 0x2a7   : > { %6295 = vmatprep.subr.bf16.mxu1 %v6896_v45  ;;  %5741 = vmatprep.subr.bf16.mxu0 %v6900_v19 }
 0x2a8   : > { %v2505_v52 = vrot.slane %v2504_v56, 2 }
 0x2aa   : > { %v2506_v42 = vadd.f32 %v2505_v52, %v2504_v56  ;;  %6296 = vmatpush3.bf16.msra.mxu1 %v6896_v45  ;;  %5742 = vmatpush3.bf16.msra.mxu0 %v6901_v15 }
 0x2ab   : > { %6297 = vmatprep.subr.bf16.mxu1 %v6899_v8  ;;  %5743 = vmatprep.subr.bf16.mxu0 %v6902_v33 }
 0x2ac   : > { %v2507_v34 = vrot.slane %v2506_v42, 1 }
 0x2ae   : > { %v2508_v53 = vadd.f32 %v2507_v34, %v2506_v42  ;;  %6298 = vmatpush3.bf16.msra.mxu1 %v6899_v8  ;;  %5744 = vmatpush3.bf16.msra.mxu0 %v6904_v2  ;;  %v9849_v42 = vld [vmem:[#allocation10_spill] sm:$0xff] }
 0x2af   : > { %6299 = vmatprep.subr.bf16.mxu1 %v6903_v3  ;;  %5745 = vmatprep.subr.bf16.mxu0 %v6905_v54 }
 0x2b0   : > { %v8346_v16 = vmul.f32 0.00390625, %v2508_v53 }
 0x2b2   : > { %v8350_v11 = vsub.f32 %v8278_v38, %v8346_v16  ;;  %v8354_v55 = vsub.f32 %v8283_v25, %v8346_v16  ;;  %v8358_v31 = vsub.f32 %v8290_v4, %v8346_v16  ;;  %v8362_v5 = vsub.f32 %v8295_v44, %v8346_v16  ;;  %6300 = vmatpush3.bf16.msra.mxu1 %v6903_v3 }
 0x2b3   : > { %v8366_v47 = vsub.f32 %v8302_v63, %v8346_v16  ;;  %v8370_v38 = vsub.f32 %v8307_v13, %v8346_v16  ;;  %v8374_v25 = vsub.f32 %v8314_v46, %v8346_v16  ;;  %v8378_v4 = vsub.f32 %v8319_v35, %v8346_v16  ;;  %5746 = vmatpush3.bf16.msra.mxu0 %v6906_v49 }
 0x2b4   : > { %v8382_v44 = vsub.f32 %v8326_v27, %v8346_v16  ;;  %v8386_v63 = vsub.f32 %v8331_v50, %v8346_v16  ;;  %v8390_v13 = vsub.f32 %v8338_v61, %v8346_v16  ;;  %v8394_v46 = vsub.f32 %v8343_v57, %v8346_v16  ;;  %v8404_v50 = vld [vmem:[#allocation6 + $0x80] sm:$0xff]   ;;  %5747 = vmatprep.subr.bf16.mxu0 %v6907_v7 }
 0x2b5   : > { %v8398_v35 = vsub.f32 %v8144_v60, %v8346_v16  ;;  %v8402_v27 = vsub.f32 %v8140_v41, %v8346_v16  ;;  %6333 = vmatprep.subr.bf16.mxu1 %v8404_v50  ;;  %v8409_v61 = vsub.f32 %v8147_v58, %v8346_v16  ;;  %v8417_v41 = vsub.f32 %v8159_v43, %v8346_v16 }
 0x2b6   : > { %v8421_v10 = vsub.f32 %v8165_v9, %v8346_v16  ;;  %v8427_v62 = vsub.f32 %v8173_v37, %v8346_v16  ;;  %v8433_v43 = vsub.f32 %v8180_v51, %v8346_v16  ;;  %v8439_v22 = vsub.f32 %v8190_v18, %v8346_v16 }
 0x2b7   : > { %v2542_v57 = vmul.f32 %v8398_v35, %v8398_v35  ;;  %v2543_v60 = vmul.f32 %v8402_v27, %v8402_v27  ;;  %5748 = vmatpush3.bf16.msra.mxu0 %v6909_v59  ;;  %v2544_v32 = vmul.f32 %v8409_v61, %v8409_v61  ;;  %v2545_v6 = vmul.f32 %v8417_v41, %v8417_v41 }
 0x2b8   : > { %v2546_v9 = vmul.f32 %v8421_v10, %v8421_v10  ;;  %v2547_v37 = vmul.f32 %v8427_v62, %v8427_v62  ;;  %v8445_v14 = vsub.f32 %v8196_v20, %v8346_v16  ;;  %v2548_v51 = vmul.f32 %v8433_v43, %v8433_v43 }
 0x2b9   : > { %v2574_v58 = vadd.f32 %v2543_v60, %v2542_v57  ;;  %v8451_v48 = vsub.f32 %v8208_v21, %v8346_v16  ;;  %v2549_v18 = vmul.f32 %v8439_v22, %v8439_v22  ;;  %v8457_v26 = vsub.f32 %v9849_v42, %v8346_v16 }
 0x2ba   : > { %v2550_v20 = vmul.f32 %v8445_v14, %v8445_v14  ;;  %v8463_v45 = vsub.f32 %v8225_v39, %v8346_v16  ;;  %v8469_v15 = vsub.f32 %v8231_v29, %v8346_v16  ;;  %v8475_v33 = vsub.f32 %v8239_v24, %v8346_v16 }
 0x2bb   : > { %v2575_v0 = vadd.f32 %v2574_v58, %v2544_v32  ;;  %v2551_v21 = vmul.f32 %v8451_v48, %v8451_v48  ;;  %v2552_v53 = vmul.f32 %v8457_v26, %v8457_v26  ;;  %v8481_v2 = vsub.f32 %v8242_v28, %v8346_v16 }
 0x2bc   : > { %v2553_v39 = vmul.f32 %v8463_v45, %v8463_v45  ;;  %v2554_v29 = vmul.f32 %v8469_v15, %v8469_v15  ;;  %v8487_v49 = vsub.f32 %v8250_v36, %v8346_v16  ;;  %v2555_v24 = vmul.f32 %v8475_v33, %v8475_v33 }
 0x2bd   : > { %v2576_v40 = vadd.f32 %v2575_v0, %v2545_v6  ;;  %v8493_v59 = vsub.f32 %v8254_v23, %v8346_v16  ;;  %v2556_v28 = vmul.f32 %v8481_v2, %v8481_v2  ;;  %v8499_v60 = vsub.f32 %v8260_v30, %v8346_v16 }
 0x2be   : > { %v2557_v36 = vmul.f32 %v8487_v49, %v8487_v49  ;;  %v8505_v58 = vsub.f32 %v8265_v1, %v8346_v16  ;;  %v8511_v0 = vsub.f32 %v8271_v17, %v8346_v16  ;;  %v2563_v17 = vmul.f32 %v8354_v55, %v8354_v55 }
 0x2bf   : > { %v2577_v56 = vadd.f32 %v2576_v40, %v2546_v9  ;;  %v2558_v23 = vmul.f32 %v8493_v59, %v8493_v59  ;;  %v2559_v30 = vmul.f32 %v8499_v60, %v8499_v60  ;;  %v2565_v42 = vmul.f32 %v8362_v5, %v8362_v5 }
 0x2c0   : > { %v2560_v40 = vmul.f32 %v8505_v58, %v8505_v58  ;;  %v2561_v1 = vmul.f32 %v8511_v0, %v8511_v0 }
 0x2c1   : > { %v2578_v52 = vadd.f32 %v2577_v56, %v2547_v37 }
 0x2c3   : > { %v2579_v12 = vadd.f32 %v2578_v52, %v2548_v51  ;;  %v2562_v51 = vmul.f32 %v8350_v11, %v8350_v11 }
 0x2c5   : > { %v2580_v34 = vadd.f32 %v2579_v12, %v2549_v18  ;;  %v2564_v18 = vmul.f32 %v8358_v31, %v8358_v31 }
 0x2c7   : > { %v2581_v19 = vadd.f32 %v2580_v34, %v2550_v20  ;;  %v2566_v34 = vmul.f32 %v8366_v47, %v8366_v47 }
 0x2c9   : > { %v2582_v8 = vadd.f32 %v2581_v19, %v2551_v21  ;;  %v2567_v19 = vmul.f32 %v8370_v38, %v8370_v38 }
 0x2cb   : > { %v2583_v3 = vadd.f32 %v2582_v8, %v2552_v53  ;;  %v2568_v8 = vmul.f32 %v8374_v25, %v8374_v25 }
 0x2cd   : > { %v2584_v54 = vadd.f32 %v2583_v3, %v2553_v39  ;;  %v2569_v3 = vmul.f32 %v8378_v4, %v8378_v4 }
 0x2cf   : > { %v2585_v7 = vadd.f32 %v2584_v54, %v2554_v29  ;;  %v2570_v54 = vmul.f32 %v8382_v44, %v8382_v44 }
 0x2d1   : > { %v2586_v57 = vadd.f32 %v2585_v7, %v2555_v24  ;;  %v2571_v7 = vmul.f32 %v8386_v63, %v8386_v63 }
 0x2d3   : > { %v2587_v32 = vadd.f32 %v2586_v57, %v2556_v28  ;;  %v6917_v57 = vld [vmem:[#allocation6 + $0x40] sm:$0xff]  }
 0x2d4   : > { %5869 = vmatprep.subr.bf16.mxu0 %v6917_v57 }
 0x2d5   : > { %v2588_v6 = vadd.f32 %v2587_v32, %v2557_v36  ;;  %v2572_v36 = vmul.f32 %v8390_v13, %v8390_v13 }
 0x2d7   : > { %v2589_v9 = vadd.f32 %v2588_v6, %v2558_v23  ;;  %v2573_v23 = vmul.f32 %v8394_v46, %v8394_v46 }
 0x2d9   : > { %v2590_v37 = vadd.f32 %v2589_v9, %v2559_v30 }
 0x2db   : > { %v2591_v56 = vadd.f32 %v2590_v37, %v2560_v40 }
 0x2dd   : > { %v2592_v52 = vadd.f32 %v2591_v56, %v2561_v1 }
 0x2df   : > { %v2593_v16 = vadd.f32 %v2592_v52, %v2562_v51 }
 0x2e1   : > { %v2594_v12 = vadd.f32 %v2593_v16, %v2563_v17 }
 0x2e3   : > { %v2595_v20 = vadd.f32 %v2594_v12, %v2564_v18 }
 0x2e5   : > { %v2596_v21 = vadd.f32 %v2595_v20, %v2565_v42 }
 0x2e7   : > { %v2597_v53 = vadd.f32 %v2596_v21, %v2566_v34 }
 0x2e9   : > { %v2598_v39 = vadd.f32 %v2597_v53, %v2567_v19 }
 0x2eb   : > { %v2599_v29 = vadd.f32 %v2598_v39, %v2568_v8 }
 0x2ed   : > { %v2600_v24 = vadd.f32 %v2599_v29, %v2569_v3 }
 0x2ef   : > { %v2601_v28 = vadd.f32 %v2600_v24, %v2570_v54 }
 0x2f1   : > { %v2602_v32 = vadd.f32 %v2601_v28, %v2571_v7 }
 0x2f3   : > { %v2603_v6 = vadd.f32 %v2602_v32, %v2572_v36 }
 0x2f5   : > { %v2604_v30 = vadd.f32 %v2603_v6, %v2573_v23 }
 0x2f7   : > { %v2605_v9 = vrot.slane %v2604_v30, 4 }
 0x2f9   : > { %v2606_v40 = vadd.f32 %v2605_v9, %v2604_v30 }
 0x2fb   : > { %v2607_v37 = vrot.slane %v2606_v40, 2 }
 0x2fd   : > { %v2608_v1 = vadd.f32 %v2607_v37, %v2606_v40 }
 0x2ff   : > { %v2609_v56 = vrot.slane %v2608_v1, 1 }
 0x301   : > { %v2610_v51 = vadd.f32 %v2609_v56, %v2608_v1 }
 0x303   : > { %v2611_v52 = vmul.f32 0.00390625, %v2610_v51 }
 0x305   : > { %v2612_v17 = vadd.f32 1e-05, %v2611_v52 }
 0x307   : > { %6957 = vrsqrt.f32 %v2612_v17 }
 0x311   : > { %v6958_v16 = vpop.eup %6957 }
 0x312   : > { %v8544_v18 = vmul.f32 %v6958_v16, %v8390_v13  ;;  %v8547_v12 = vmul.f32 %v6958_v16, %v8394_v46  ;;  %v2614_v42 = vmul.f32 %v6958_v16, %v8398_v35  ;;  %v2615_v20 = vmul.f32 %v6958_v16, %v8402_v27 }
 0x313   : > { %v2616_v34 = vmul.f32 %v6958_v16, %v8409_v61  ;;  %v2617_v21 = vmul.f32 %v6958_v16, %v8417_v41  ;;  %v2618_v19 = vmul.f32 %v6958_v16, %v8421_v10  ;;  %v2619_v53 = vmul.f32 %v6958_v16, %v8427_v62 }
 0x314   : > { %v2620_v39 = vmul.f32 %v6958_v16, %v8433_v43  ;;  %v2621_v46 = vmul.f32 %v6958_v16, %v8439_v22  ;;  %v2622_v35 = vmul.f32 %v6958_v16, %v8445_v14  ;;  %v2623_v27 = vmul.f32 %v6958_v16, %v8451_v48 }
 0x315   : > { %v2624_v61 = vmul.f32 %v6958_v16, %v8457_v26  ;;  %v2625_v41 = vmul.f32 %v6958_v16, %v8463_v45  ;;  %v8564_v10 = vmul.f32 %v6958_v16, %v8469_v15  ;;  %v8567_v62 = vmul.f32 %v6958_v16, %v8475_v33 }
 0x316   : > { %v8570_v3 = vmul.f32 %v6958_v16, %v8481_v2  ;;  %v8573_v43 = vmul.f32 %v6958_v16, %v8487_v49  ;;  %v8576_v22 = vmul.f32 %v6958_v16, %v8493_v59  ;;  %v8579_v14 = vmul.f32 %v6958_v16, %v8499_v60 }
 0x317   : > { %v8582_v48 = vmul.f32 %v6958_v16, %v8505_v58  ;;  %v8585_v26 = vmul.f32 %v6958_v16, %v8511_v0  ;;  %v8588_v45 = vmul.f32 %v6958_v16, %v8350_v11  ;;  %v8591_v15 = vmul.f32 %v6958_v16, %v8354_v55 }
 0x318   : > { %v8594_v33 = vmul.f32 %v6958_v16, %v8358_v31  ;;  %v8597_v2 = vmul.f32 %v6958_v16, %v8362_v5  ;;  %v8600_v49 = vmul.f32 %v6958_v16, %v8366_v47  ;;  %v8603_v59 = vmul.f32 %v6958_v16, %v8370_v38 }
 0x319   : > { %v8606_v60 = vmul.f32 %v6958_v16, %v8374_v25  ;;  %v8609_v11 = vmul.f32 %v6958_v16, %v8378_v4  ;;  %v8612_v55 = vmul.f32 %v6958_v16, %v8382_v44  ;;  %v8615_v31 = vmul.f32 %v6958_v16, %v8386_v63 }
 0x31a   : > { %v2646_v5 = vmax.f32 %v2614_v42, 0.0  ;;  %v2647_v58 = vmax.f32 %v2615_v20, 0.0  ;;  %v2648_v0 = vmax.f32 %v2616_v34, 0.0  ;;  %v2649_v47 = vmax.f32 %v2617_v21, 0.0  ;;  %v6929_v34 = vld [vmem:[#allocation6 + $0x50] sm:$0xff]  }
 0x31b   : > { %v2650_v29 = vmax.f32 %v2618_v19, 0.0  ;;  %v2651_v54 = vmax.f32 %v2619_v53, 0.0  ;;  %v2652_v38 = vmax.f32 %v2620_v39, 0.0  ;;  %v2653_v24 = vmax.f32 %v2621_v46, 0.0 }
 0x31c   : > { %v2654_v7 = vmax.f32 %v2622_v35, 0.0  ;;  %v2655_v25 = vmax.f32 %v2623_v27, 0.0  ;;  %v2656_v28 = vmax.f32 %v2624_v61, 0.0  ;;  %v2657_v57 = vmax.f32 %v2625_v41, 0.0 }
 0x31d   : > { %v2658_v4 = vmax.f32 %v8564_v10, 0.0  ;;  %v2659_v44 = vmax.f32 %v8567_v62, 0.0  ;;  %v2660_v36 = vmax.f32 %v8570_v3, 0.0  ;;  %v2661_v63 = vmax.f32 %v8573_v43, 0.0 }
 0x31e   : > { %v2662_v32 = vmax.f32 %v8576_v22, 0.0  ;;  %v2663_v23 = vmax.f32 %v8579_v14, 0.0  ;;  %v2664_v6 = vmax.f32 %v8582_v48, 0.0  ;;  %v2665_v30 = vmax.f32 %v8585_v26, 0.0 }
 0x31f   : > { %v2678_v9 = vpack.c.bf16 %v2647_v58, %v2646_v5  ;;  %v2679_v40 = vpack.c.bf16 %v2649_v47, %v2648_v0  ;;  %v2666_v37 = vmax.f32 %v8588_v45, 0.0  ;;  %v2667_v1 = vmax.f32 %v8591_v15, 0.0  ;;  %v6939_v45 = vld [vmem:[#allocation6 + $0x60] sm:$0xff]  }
 0x320   : > { %v2668_v56 = vmax.f32 %v8594_v33, 0.0  ;;  %v2680_v51 = vpack.c.bf16 %v2651_v54, %v2650_v29  ;;  %v2669_v52 = vmax.f32 %v8597_v2, 0.0  ;;  %v2670_v17 = vmax.f32 %v8600_v49, 0.0 }
 0x321   : > { %v2671_v16 = vmax.f32 %v8603_v59, 0.0  ;;  %v8635_v19 = vpack.c.bf16 %v2653_v24, %v2652_v38  ;;  %v2695_v53 = vshrl.u32 %v2678_v9, 16  ;;  %v2698_v39 = vshrl.u32 %v2679_v40, 16 }
 0x322   : > { %v2759_v46 = vshll.u32 %v2678_v9, 16  ;;  %v2763_v35 = vshll.u32 %v2679_v40, 16  ;;  %v8637_v27 = vpack.c.bf16 %v2655_v25, %v2654_v7  ;;  %v8639_v61 = vpack.c.bf16 %v2657_v57, %v2656_v28 }
 0x323   : > { %v2701_v41 = vshrl.u32 %v2680_v51, 16  ;;  %v2767_v10 = vshll.u32 %v2680_v51, 16  ;;  %v2758_v62 = vrot.slane %v2695_v53, 7  ;;  %v2762_v43 = vrot.slane %v2698_v39, 7 }
 0x324   : > { %v2854_v3 = vrot.slane %v2759_v46, 7  ;;  %v2855_v5 = vrot.slane %v2763_v35, 7  ;;  %v8641_v58 = vpack.c.bf16 %v2659_v44, %v2658_v4  ;;  %v8643_v0 = vpack.c.bf16 %v2661_v63, %v2660_v36 }
 0x325   : > { %v2766_v47 = vrot.slane %v2701_v41, 7  ;;  %v2856_v29 = vrot.slane %v2767_v10, 7  ;;  %v2761_v54 = vor.u32 %v2759_v46, %v2758_v62  ;;  %v2765_v7 = vor.u32 %v2763_v35, %v2762_v43 }
 0x326   : > { %v2902_v24 = vsel %vm7330_vm2, %v2758_v62, %v2854_v3  ;;  %v2903_v25 = vsel %vm7330_vm2, %v2762_v43, %v2855_v5  ;;  %v2704_v4 = vshrl.u32 %v8635_v19, 16  ;;  %v2771_v44 = vshll.u32 %v8635_v19, 16 }
 0x327   : > { %v2769_v28 = vor.u32 %v2767_v10, %v2766_v47  ;;  %v8651_v57 = vsel %vm7330_vm2, %v2766_v47, %v2856_v29  ;;  %v8657_v36 = vsel %vm7330_vm2, %v2695_v53, %v2761_v54  ;;  %v3162_v63 = vrot.slane %v2902_v24, 1 }
 0x328   : > { %v8661_v9 = vsel %vm7330_vm2, %v2698_v39, %v2765_v7  ;;  %v3159_v40 = vrot.slane %v2903_v25, 1  ;;  %v3161_v51 = vrot.slane %v8657_v36, 1  ;;  %v3165_v19 = vrot.slane %v8651_v57, 1 }
 0x329   : > { %v3158_v46 = vrot.slane %v8661_v9, 1  ;;  %v8667_v35 = vsel %vm7330_vm2, %v2701_v41, %v2769_v28  ;;  %v2931_v53 = vshrl.u32 %v8657_v36, 16  ;;  %v2933_v62 = vshll.u32 %v8657_v36, 16  ;;  %v6910_v41 = vld [vmem:[#allocation6 + $0x88] sm:$0xff]  }
 0x32a   : > { %v3164_v10 = vrot.slane %v8667_v35, 1  ;;  %v2938_v3 = vshll.u32 %v2902_v24, 16  ;;  %v8674_v39 = vsel %vm793_vm4, %v3161_v51, %v3162_v63  ;;  %v2921_v5 = vshll.u32 %v8661_v9, 16 }
 0x32b   : > { %v8677_v43 = vsel %vm793_vm4, %v3158_v46, %v3159_v40  ;;  %v2926_v47 = vshll.u32 %v2903_v25, 16  ;;  %6301 = vmatprep.mubr.bf16.mxu1 %v8674_v39  ;;  %v2935_v29 = vrot.slane %v2933_v62, 1  ;;  %v2919_v54 = vshrl.u32 %v8661_v9, 16 }
 0x32c   : > { %v2770_v7 = vrot.slane %v2704_v4, 7  ;;  %v2857_v28 = vrot.slane %v2771_v44, 7  ;;  %6302 = vmatmul.mubr.bf16.vlgmr.msra.gmra.mrb[96].mxu1 %v8677_v43  ;;  %v8684_v24 = vsel %vm793_vm4, %v3164_v10, %v3165_v19  ;;  %v2923_v63 = vrot.slane %v2921_v5, 1  ;;  %v6911_v5 = vld [vmem:[#allocation6 + $0x90] sm:$0xff]  }
 0x32d   : > { %v2707_v40 = vshrl.u32 %v8637_v27, 16  ;;  %v2775_v51 = vshll.u32 %v8637_v27, 16  ;;  %6305 = vmatprep.mubr.bf16.mxu1 %v8684_v24  ;;  %6334 = vmatpush3.bf16.msra.mxu1 %v8404_v50  ;;  %v2936_v25 = vor.u32 %v2935_v29, %v2931_v53  ;;  %v2940_v46 = vrot.slane %v2938_v3, 1  ;;  %v6918_v53 = vld [vmem:[#allocation6] sm:$0xff]  }
 0x32e   : > { %v2773_v62 = vor.u32 %v2771_v44, %v2770_v7  ;;  %v8692_v13 = vsel %vm7330_vm2, %v2770_v7, %v2857_v28  ;;  %v2924_v8 = vor.u32 %v2923_v63, %v2919_v54  ;;  %v2928_v20 = vrot.slane %v2926_v47, 1  ;;  %6335 = vmatprep.subr.bf16.mxu1 %v6910_v41  ;;  %v6923_v7 = vld [vmem:[#allocation6 + $0x48] sm:$0xff]  }
 0x32f   : > { %v2774_v19 = vrot.slane %v2707_v40, 7  ;;  %v2858_v10 = vrot.slane %v2775_v51, 7  ;;  %v8695_v42 = vsel %vm552_vm3, %v2936_v25, %v2940_v46  ;;  %v2943_v50 = vshrl.u32 %v8667_v35, 16 }
 0x330   : > { %v8699_v27 = vsel %vm7330_vm2, %v2704_v4, %v2773_v62  ;;  %v2945_v44 = vshll.u32 %v8667_v35, 16  ;;  %3495 = vmatprep.mubr.bf16.mxu0 %v8695_v42  ;;  %v3168_v47 = vrot.slane %v8692_v13, 1  ;;  %v8712_v4 = vsel %vm552_vm3, %v2924_v8, %v2928_v20  ;;  %v6912_v20 = vld [vmem:[#allocation6 + $0x98] sm:$0xff]  }
 0x331   : > { %v3167_v3 = vrot.slane %v8699_v27, 1  ;;  %v2777_v29 = vor.u32 %v2775_v51, %v2774_v19  ;;  %v8708_v54 = vsel %vm7330_vm2, %v2774_v19, %v2858_v10  ;;  %3496 = vmatmul.mubr.bf16.vlgmr.msra.gmra.mrb[160].mxu0 %v8657_v36  ;;  %6336 = vmatpush3.bf16.msra.mxu1 %v6910_v41  ;;  %v2950_v63 = vshll.u32 %v8651_v57, 16 }
 0x332   : > { %v2947_v28 = vrot.slane %v2945_v44, 1  ;;  %v2710_v25 = vshrl.u32 %v8639_v61, 16  ;;  %3503 = vmatprep.mubr.bf16.mxu0 %v8712_v4  ;;  %v3171_v46 = vrot.slane %v8708_v54, 1  ;;  %v2779_v62 = vshll.u32 %v8639_v61, 16  ;;  %6337 = vmatprep.subr.bf16.mxu1 %v6911_v5  ;;  %v6924_v44 = vld [vmem:[#allocation6 + $0x8] sm:$0xff]  }
 0x333   : > { %v8719_v51 = vsel %vm7330_vm2, %v2707_v40, %v2777_v29  ;;  %v2713_v8 = vshrl.u32 %v8641_v58, 16  ;;  %v8725_v41 = vsel %vm793_vm4, %v3167_v3, %v3168_v47  ;;  %v2783_v10 = vshll.u32 %v8641_v58, 16  ;;  %5870 = vmatpush3.bf16.msra.mxu0 %v6918_v53 }
 0x334   : > { %v3170_v57 = vrot.slane %v8719_v51, 1  ;;  %v2778_v19 = vrot.slane %v2710_v25, 7  ;;  %6306 = vmatmul.mubr.bf16.gmra.mrb[100].mxu1 %v8725_v41  ;;  %v2948_v40 = vor.u32 %v2947_v28, %v2943_v50  ;;  %v2859_v29 = vrot.slane %v2779_v62, 7  ;;  %5871 = vmatprep.subr.bf16.mxu0 %v6923_v7 }
 0x335   : > { %v2782_v21 = vrot.slane %v2713_v8, 7  ;;  %v2957_v61 = vshll.u32 %v8699_v27, 16  ;;  %v8735_v3 = vpack.c.bf16 %v2663_v23, %v2662_v32  ;;  %v2860_v53 = vrot.slane %v2783_v10, 7  ;;  %6338 = vmatpush3.bf16.msra.mxu1 %v6911_v5  ;;  %v6913_v32 = vld [vmem:[#allocation6 + $0xa0] sm:$0xff]  }
 0x336   : > { %v8738_v47 = vsel %vm793_vm4, %v3170_v57, %v3171_v46  ;;  %v2781_v58 = vor.u32 %v2779_v62, %v2778_v19  ;;  %v8744_v50 = vpack.c.bf16 %v2665_v30, %v2664_v6  ;;  %v2952_v7 = vrot.slane %v2950_v63, 1  ;;  %6339 = vmatprep.subr.bf16.mxu1 %v6912_v20  ;;  %v6930_v30 = vld [vmem:[#allocation6 + $0x10] sm:$0xff]   ;;  %v6935_v46 = vld [vmem:[#allocation6 + $0x58] sm:$0xff]  }
 0x337   : > { %6309 = vmatprep.mubr.bf16.mxu1 %v8738_v47  ;;  %v8749_v22 = vsel %vm7330_vm2, %v2778_v19, %v2859_v29  ;;  %v2785_v14 = vor.u32 %v2783_v10, %v2782_v21  ;;  %v8757_v48 = vsel %vm7330_vm2, %v2782_v21, %v2860_v53  ;;  %v2955_v26 = vshrl.u32 %v8699_v27, 16  ;;  %5872 = vmatpush3.bf16.msra.mxu0 %v6924_v44 }
 0x338   : > { %v8753_v23 = vsel %vm7330_vm2, %v2710_v25, %v2781_v58  ;;  %v2716_v6 = vshrl.u32 %v8643_v0, 16  ;;  %v8762_v5 = vsel %vm552_vm3, %v2948_v40, %v2952_v7  ;;  %v2959_v25 = vrot.slane %v2957_v61, 1  ;;  %5873 = vmatprep.subr.bf16.mxu0 %v6929_v34  ;;  %v6914_v40 = vld [vmem:[#allocation6 + $0xa8] sm:$0xff]   ;;  %v6936_v58 = vld [vmem:[#allocation6 + $0x18] sm:$0xff]  }
 0x339   : > { %v3173_v28 = vrot.slane %v8753_v23, 1  ;;  %v8767_v63 = vsel %vm7330_vm2, %v2713_v8, %v2785_v14  ;;  %3504 = vmatmul.mubr.bf16.gmra.mrb[164].mxu0 %v8661_v9  ;;  %v3174_v21 = vrot.slane %v8749_v22, 1  ;;  %v2787_v19 = vshll.u32 %v8643_v0, 16  ;;  %6340 = vmatpush3.bf16.msra.mxu1 %v6912_v20 }
 0x33a   : > { %v3176_v62 = vrot.slane %v8767_v63, 1  ;;  %v2786_v57 = vrot.slane %v2716_v6, 7  ;;  %3511 = vmatprep.mubr.bf16.mxu0 %v8762_v5  ;;  %v3177_v10 = vrot.slane %v8757_v48, 1  ;;  %v2962_v8 = vshll.u32 %v8692_v13, 16  ;;  %6341 = vmatprep.subr.bf16.mxu1 %v6913_v32 }
 0x33b   : > { %v2719_v44 = vshrl.u32 %v8735_v3, 16  ;;  %v2791_v34 = vshll.u32 %v8735_v3, 16  ;;  %v8782_v29 = vpack.c.bf16 %v2667_v1, %v2666_v37  ;;  %v8785_v0 = vsel %vm793_vm4, %v3173_v28, %v3174_v21  ;;  %5874 = vmatpush3.bf16.msra.mxu0 %v6930_v30 }
 0x33c   : > { %v2789_v20 = vor.u32 %v2787_v19, %v2786_v57  ;;  %v2861_v61 = vrot.slane %v2787_v19, 7  ;;  %6310 = vmatmul.mubr.bf16.gmra.mrb[104].mxu1 %v8785_v0  ;;  %v8789_v13 = vsel %vm793_vm4, %v3176_v62, %v3177_v10  ;;  %v2960_v3 = vor.u32 %v2959_v25, %v2955_v26  ;;  %5875 = vmatprep.subr.bf16.mxu0 %v6935_v46  ;;  %v6915_v25 = vld [vmem:[#allocation6 + $0xb0] sm:$0xff]  }
 0x33d   : > { %v2790_v53 = vrot.slane %v2719_v44, 7  ;;  %v2862_v7 = vrot.slane %v2791_v34, 7  ;;  %6313 = vmatprep.mubr.bf16.mxu1 %v8789_v13  ;;  %v2969_v1 = vshll.u32 %v8719_v51, 16  ;;  %v2722_v14 = vshrl.u32 %v8744_v50, 16  ;;  %6342 = vmatpush3.bf16.msra.mxu1 %v6913_v32 }
 0x33e   : > { %v8794_v15 = vsel %vm7330_vm2, %v2716_v6, %v2789_v20  ;;  %v8798_v37 = vsel %vm7330_vm2, %v2786_v57, %v2861_v61  ;;  %v8806_v26 = vpack.c.bf16 %v2669_v52, %v2668_v56  ;;  %v2964_v30 = vrot.slane %v2962_v8, 1  ;;  %6343 = vmatprep.subr.bf16.mxu1 %v6914_v40  ;;  %v6940_v56 = vld [vmem:[#allocation6 + $0x20] sm:$0xff]   ;;  %v6916_v61 = vld [vmem:[#allocation6 + $0xb8] sm:$0xff]  }
 0x33f   : > { %v2793_v28 = vor.u32 %v2791_v34, %v2790_v53  ;;  %v2795_v6 = vshll.u32 %v8744_v50, 16  ;;  %v8813_v46 = vpack.c.bf16 %v2671_v16, %v2670_v17  ;;  %v3179_v32 = vrot.slane %v8794_v15, 1  ;;  %5876 = vmatpush3.bf16.msra.mxu0 %v6936_v58  ;;  %v6941_v17 = vld [vmem:[#allocation6 + $0x68] sm:$0xff]  }
 0x340   : > { %v8818_v33 = vsel %vm7330_vm2, %v2790_v53, %v2862_v7  ;;  %v2794_v2 = vrot.slane %v2722_v14, 7  ;;  %v8821_v52 = vsel %vm552_vm3, %v2960_v3, %v2964_v30  ;;  %v3180_v50 = vrot.slane %v8798_v37, 1  ;;  %5877 = vmatprep.subr.bf16.mxu0 %v6939_v45 }
 0x341   : > { %v8826_v49 = vsel %vm7330_vm2, %v2719_v44, %v2793_v28  ;;  %v2725_v59 = vshrl.u32 %v8782_v29, 16  ;;  %3512 = vmatmul.mubr.bf16.gmra.mrb[168].mxu0 %v8667_v35  ;;  %v2971_v21 = vrot.slane %v2969_v1, 1  ;;  %v2799_v57 = vshll.u32 %v8782_v29, 16  ;;  %6344 = vmatpush3.bf16.msra.mxu1 %v6914_v40  ;;  %v6945_v1 = vld [vmem:[#allocation6 + $0x70] sm:$0xff]  }
 0x342   : > { %v3182_v16 = vrot.slane %v8826_v49, 1  ;;  %v2797_v62 = vor.u32 %v2795_v6, %v2794_v2  ;;  %v9851_v19 = vmax.f32 %v8612_v55, 0.0  ;;  %v9852_v10 = vmax.f32 %v8615_v31, 0.0  ;;  %3519 = vmatprep.mubr.bf16.mxu0 %v8821_v52  ;;  %6345 = vmatprep.subr.bf16.mxu1 %v6915_v25  ;;  %v6943_v31 = vld [vmem:[#allocation6 + $0x28] sm:$0xff]  }
 0x343   : > { %v3183_v44 = vrot.slane %v8818_v33, 1  ;;  %v2863_v34 = vrot.slane %v2795_v6, 7  ;;  %v2798_v20 = vrot.slane %v2725_v59, 7  ;;  %v8841_v58 = vsel %vm793_vm4, %v3179_v32, %v3180_v50  ;;  %5878 = vmatpush3.bf16.msra.mxu0 %v6940_v56 }
 0x344   : > { %v8836_v8 = vpack.c.bf16 %v9852_v10, %v9851_v19  ;;  %v2967_v29 = vshrl.u32 %v8719_v51, 16  ;;  %v2974_v40 = vshll.u32 %v8708_v54, 16  ;;  %v2981_v55 = vshll.u32 %v8753_v23, 16  ;;  %6314 = vmatmul.mubr.bf16.gmra.mrb[108].mxu1 %v8841_v58  ;;  %5879 = vmatprep.subr.bf16.mxu0 %v6941_v17  ;;  %v6919_v17 = vld [vmem:[#allocation6 + $0x1c0] sm:$0xff]  }
 0x345   : > { %v8848_v3 = vsel %vm793_vm4, %v3182_v16, %v3183_v44  ;;  %v8852_v53 = vsel %vm7330_vm2, %v2722_v14, %v2797_v62  ;;  %v2801_v7 = vor.u32 %v2799_v57, %v2798_v20  ;;  %v2864_v45 = vrot.slane %v2799_v57, 7  ;;  %6346 = vmatpush3.bf16.msra.mxu1 %v6915_v25  ;;  %v6946_v57 = vld [vmem:[#allocation6 + $0x30] sm:$0xff]  }
 0x346   : > { %v9853_v30 = vmax.f32 %v8606_v60, 0.0  ;;  %v9854_v54 = vmax.f32 %v8609_v11, 0.0  ;;  %6317 = vmatprep.mubr.bf16.mxu1 %v8848_v3  ;;  %v2972_v6 = vor.u32 %v2971_v21, %v2967_v29  ;;  %v2728_v32 = vshrl.u32 %v8806_v26, 16  ;;  %6347 = vmatprep.subr.bf16.mxu1 %v6916_v61 }
 0x347   : > { %v2731_v56 = vshrl.u32 %v8813_v46, 16  ;;  %v2737_v14 = vshrl.u32 %v8836_v8, 16  ;;  %v8866_v50 = vsel %vm7330_vm2, %v2794_v2, %v2863_v34  ;;  %v8870_v60 = vsel %vm7330_vm2, %v2725_v59, %v2801_v7  ;;  %5880 = vmatpush3.bf16.msra.mxu0 %v6943_v31 }
 0x348   : > { %v8858_v28 = vpack.c.bf16 %v9854_v54, %v9853_v30  ;;  %v2803_v11 = vshll.u32 %v8806_v26, 16  ;;  %v2976_v16 = vrot.slane %v2974_v40, 1  ;;  %v3185_v21 = vrot.slane %v8852_v53, 1  ;;  %5881 = vmatprep.subr.bf16.mxu0 %v6945_v1  ;;  %v6947_v26 = vld [vmem:[#allocation6 + $0x78] sm:$0xff]  }
 0x349   : > { %v8876_v25 = vsel %vm7330_vm2, %v2798_v20, %v2864_v45  ;;  %v2802_v62 = vrot.slane %v2728_v32, 7  ;;  %v3188_v2 = vrot.slane %v8870_v60, 1  ;;  %v2983_v19 = vrot.slane %v2981_v55, 1  ;;  %3520 = vmatmul.mubr.bf16.gmra.mrb[172].mxu0 %v8699_v27  ;;  %6348 = vmatpush3.bf16.msra.mxu1 %v6916_v61  ;;  %v6949_v30 = vld [vmem:[#allocation6 + $0x38] sm:$0xff]  }
 0x34a   : > { %v2806_v10 = vrot.slane %v2731_v56, 7  ;;  %v2807_v59 = vshll.u32 %v8813_v46, 16  ;;  %v8882_v44 = vsel %vm552_vm3, %v2972_v6, %v2976_v16  ;;  %v3186_v34 = vrot.slane %v8866_v50, 1  ;;  %6005 = vmatprep.subr.bf16.mxu1 %v6919_v17 }
 0x34b   : > { %v2979_v20 = vshrl.u32 %v8753_v23, 16  ;;  %v2805_v29 = vor.u32 %v2803_v11, %v2802_v62  ;;  %3527 = vmatprep.mubr.bf16.mxu0 %v8882_v44  ;;  %v3189_v40 = vrot.slane %v8876_v25, 1  ;;  %v2986_v55 = vshll.u32 %v8749_v22, 16  ;;  %5882 = vmatpush3.bf16.msra.mxu0 %v6946_v57 }
 0x34c   : > { %v2865_v46 = vrot.slane %v2803_v11, 7  ;;  %v2809_v31 = vor.u32 %v2807_v59, %v2806_v10  ;;  %v8890_v7 = vsel %vm793_vm4, %v3185_v21, %v3186_v34  ;;  %v2866_v45 = vrot.slane %v2807_v59, 7  ;;  %5883 = vmatprep.subr.bf16.mxu0 %v6947_v26 }
 0x34d   : > { %v2734_v1 = vshrl.u32 %v8858_v28, 16  ;;  %6318 = vmatmul.mubr.bf16.gmra.mrb[112].mxu1 %v8890_v7  ;;  %v8895_v61 = vsel %vm793_vm4, %v3188_v2, %v3189_v40  ;;  %v2984_v54 = vor.u32 %v2983_v19, %v2979_v20  ;;  %v8899_v22 = vsel %vm7330_vm2, %v2728_v32, %v2805_v29 }
 0x34e   : > { %v9855_v6 = vmax.f32 %v8544_v18, 0.0  ;;  %v9856_v11 = vmax.f32 %v8547_v12, 0.0  ;;  %6321 = vmatprep.mubr.bf16.mxu1 %v8895_v61  ;;  %v8908_v16 = vsel %vm7330_vm2, %v2731_v56, %v2809_v31  ;;  %v2993_v21 = vshll.u32 %v8767_v63, 16 }
 0x34f   : > { %v2810_v57 = vrot.slane %v2734_v1, 7  ;;  %v2988_v2 = vrot.slane %v2986_v55, 1  ;;  %v8913_v32 = vsel %vm7330_vm2, %v2802_v62, %v2865_v46  ;;  %v2811_v19 = vshll.u32 %v8858_v28, 16  ;;  %5884 = vmatpush3.bf16.msra.mxu0 %v6949_v30 }
 0x350   : > { %v2693_v17 = vpack.c.bf16 %v9856_v11, %v9855_v6  ;;  %v2814_v18 = vrot.slane %v2737_v14, 7  ;;  %v2815_v12 = vshll.u32 %v8836_v8, 16  ;;  %v3191_v59 = vrot.slane %v8899_v22, 1 }
 0x351   : > { %v8922_v56 = vsel %vm7330_vm2, %v2806_v10, %v2866_v45  ;;  %v8925_v26 = vsel %vm552_vm3, %v2984_v54, %v2988_v2  ;;  %v3194_v62 = vrot.slane %v8908_v16, 1  ;;  %v2813_v34 = vor.u32 %v2811_v19, %v2810_v57  ;;  %3528 = vmatmul.mubr.bf16.gmra.mrb[176].mxu0 %v8719_v51 }
 0x352   : > { %v3192_v28 = vrot.slane %v8913_v32, 1  ;;  %v2995_v20 = vrot.slane %v2993_v21, 1  ;;  %v2817_v29 = vor.u32 %v2815_v12, %v2814_v18  ;;  %v2740_v40 = vshrl.u32 %v2693_v17, 16  ;;  %3535 = vmatprep.mubr.bf16.mxu0 %v8925_v26 }
 0x353   : > { %v3195_v55 = vrot.slane %v8922_v56, 1  ;;  %v2867_v10 = vrot.slane %v2811_v19, 7  ;;  %v2991_v31 = vshrl.u32 %v8767_v63, 16  ;;  %v2998_v45 = vshll.u32 %v8757_v48, 16 }
 0x354   : > { %v8933_v46 = vsel %vm793_vm4, %v3191_v59, %v3192_v28  ;;  %v2868_v30 = vrot.slane %v2815_v12, 7  ;;  %v8943_v6 = vsel %vm7330_vm2, %v2734_v1, %v2813_v34  ;;  %v2818_v11 = vrot.slane %v2740_v40, 7 }
 0x355   : > { %6322 = vmatmul.mubr.bf16.gmra.mrb[116].mxu1 %v8933_v46  ;;  %v8939_v54 = vsel %vm793_vm4, %v3194_v62, %v3195_v55  ;;  %v2996_v21 = vor.u32 %v2995_v20, %v2991_v31  ;;  %v8950_v2 = vsel %vm7330_vm2, %v2737_v14, %v2817_v29  ;;  %v3005_v48 = vshll.u32 %v8794_v15, 16 }
 0x356   : > { %6325 = vmatprep.mubr.bf16.mxu1 %v8939_v54  ;;  %v8955_v19 = vsel %vm7330_vm2, %v2810_v57, %v2867_v10  ;;  %v2819_v12 = vshll.u32 %v2693_v17, 16  ;;  %v3000_v59 = vrot.slane %v2998_v45, 1  ;;  %v3197_v1 = vrot.slane %v8943_v6, 1 }
 0x357   : > { %v8960_v62 = vsel %vm7330_vm2, %v2814_v18, %v2868_v30  ;;  %v3200_v8 = vrot.slane %v8950_v2, 1  ;;  %v3198_v28 = vrot.slane %v8955_v19, 1  ;;  %v3007_v57 = vrot.slane %v3005_v48, 1 }
 0x358   : > { %v2821_v34 = vor.u32 %v2819_v12, %v2818_v11  ;;  %v8965_v14 = vsel %vm552_vm3, %v2996_v21, %v3000_v59  ;;  %v3201_v17 = vrot.slane %v8960_v62, 1  ;;  %v2869_v20 = vrot.slane %v2819_v12, 7 }
 0x359   : > { %3536 = vmatmul.mubr.bf16.gmra.mrb[180].mxu0 %v8753_v23  ;;  %v8971_v29 = vsel %vm793_vm4, %v3197_v1, %v3198_v28  ;;  %v3003_v18 = vshrl.u32 %v8794_v15, 16  ;;  %v3010_v55 = vshll.u32 %v8798_v37, 16  ;;  %v3017_v30 = vshll.u32 %v8826_v49, 16 }
 0x35a   : > { %3543 = vmatprep.mubr.bf16.mxu0 %v8965_v14  ;;  %v8977_v10 = vsel %vm793_vm4, %v3200_v8, %v3201_v17  ;;  %v8981_v31 = vsel %vm7330_vm2, %v2740_v40, %v2821_v34  ;;  %v8987_v21 = vsel %vm7330_vm2, %v2818_v11, %v2869_v20  ;;  %v3015_v38 = vshrl.u32 %v8826_v49, 16  ;;  %v6920_v17 = vld [vmem:[#allocation6 + $0x180] sm:$0xff]  }
 0x35b   : > { %v3008_v45 = vor.u32 %v3007_v57, %v3003_v18  ;;  %v3012_v48 = vrot.slane %v3010_v55, 1  ;;  %v3203_v37 = vrot.slane %v8981_v31, 1  ;;  %v3204_v40 = vrot.slane %v8987_v21, 1  ;;  %v6921_v18 = vld [vmem:[#allocation6 + $0x1c8] sm:$0xff]  }
 0x35c   : > { %v3019_v59 = vrot.slane %v3017_v30, 1  ;;  %v3022_v11 = vshll.u32 %v8818_v33, 16  ;;  %v3029_v34 = vshll.u32 %v8852_v53, 16  ;;  %v3027_v33 = vshrl.u32 %v8852_v53, 16  ;;  %v6922_v30 = vld [vmem:[#allocation6 + $0x188] sm:$0xff]  }
 0x35d   : > { %6326 = vmatmul.mubr.bf16.gmra.mrb[120].mxu1 %v8971_v29  ;;  %v8992_v12 = vsel %vm552_vm3, %v3008_v45, %v3012_v48  ;;  %v8997_v1 = vsel %vm793_vm4, %v3203_v37, %v3204_v40  ;;  %v3034_v55 = vshll.u32 %v8866_v50, 16  ;;  %v3041_v48 = vshll.u32 %v8870_v60, 16  ;;  %v6925_v37 = vld [vmem:[#allocation6 + $0x1d0] sm:$0xff]  }
 0x35e   : > { %6329 = vmatprep.mubr.bf16.mxu1 %v8977_v10  ;;  %v3020_v8 = vor.u32 %v3019_v59, %v3015_v38  ;;  %v3024_v28 = vrot.slane %v3022_v11, 1  ;;  %v3031_v20 = vrot.slane %v3029_v34, 1  ;;  %v6926_v50 = vld [vmem:[#allocation6 + $0x190] sm:$0xff]   ;;  %v3039_v11 = vshrl.u32 %v8870_v60, 16 }
 0x35f   : > { %v3036_v40 = vrot.slane %v3034_v55, 1  ;;  %v3043_v38 = vrot.slane %v3041_v48, 1  ;;  %v3058_v48 = vshll.u32 %v8913_v32, 16  ;;  %v6938_v32 = vld [vmem:[#allocation6 + $0x1b0] sm:$0xff]  }
 0x360   : > { %v9006_v57 = vsel %vm552_vm3, %v3020_v8, %v3024_v28  ;;  %v3032_v45 = vor.u32 %v3031_v20, %v3027_v33  ;;  %v3046_v8 = vshll.u32 %v8876_v25, 16  ;;  %v3053_v28 = vshll.u32 %v8899_v22, 16  ;;  %v6931_v20 = vld [vmem:[#allocation6 + $0x1e0] sm:$0xff]  }
 0x361   : > { %3544 = vmatmul.mubr.bf16.gmra.mrb[184].mxu0 %v8767_v63  ;;  %v3044_v34 = vor.u32 %v3043_v38, %v3039_v11  ;;  %v6932_v25 = vld [vmem:[#allocation6 + $0x1a0] sm:$0xff]   ;;  %v6934_v38 = vld [vmem:[#allocation6 + $0x1a8] sm:$0xff]  }
 0x362   : > { %3551 = vmatprep.mubr.bf16.mxu0 %v8992_v12  ;;  %v9016_v59 = vsel %vm552_vm3, %v3032_v45, %v3036_v40  ;;  %v3055_v55 = vrot.slane %v3053_v28, 1  ;;  %v6933_v45 = vld [vmem:[#allocation6 + $0x1e8] sm:$0xff]   ;;  %v3065_v40 = vshll.u32 %v8908_v16, 16  ;;  %v3063_v28 = vshrl.u32 %v8908_v16, 16 }
 0x365   : > { %6330 = vmatmul.mubr.bf16.gmra.mrb[124].mxu1 %v8997_v1 }
 0x366   : > { %6349 = vmatprep.mubr.bf16.mxu1 %v8677_v43 }
 0x369   : > { %3552 = vmatmul.mubr.bf16.gmra.mrb[188].mxu0 %v8794_v15 }
 0x36a   : > { %3559 = vmatprep.mubr.bf16.mxu0 %v9006_v57 }
 0x36d   : > { %6350 = vmatmul.mubr.bf16.vlgmr.msra.gmra.mrb[96].mxu1 %v8674_v39  ;;  %v6927_v39 = vld [vmem:[#allocation6 + $0x1d8] sm:$0xff]  }
 0x36e   : > { %6353 = vmatprep.mubr.bf16.mxu1 %v8677_v43  ;;  %6006 = vmatpush3.bf16.msra.mxu1 %v6920_v17  ;;  %v6928_v17 = vld [vmem:[#allocation6 + $0x198] sm:$0xff]  }
 0x36f   : > { %6007 = vmatprep.subr.bf16.mxu1 %v6921_v18  ;;  %v3048_v18 = vrot.slane %v3046_v8, 1  ;;  %v3067_v8 = vrot.slane %v3065_v40, 1 }
 0x371   : > { %3560 = vmatmul.mubr.bf16.gmra.mrb[192].mxu0 %v8826_v49  ;;  %v9026_v33 = vsel %vm552_vm3, %v3044_v34, %v3048_v18  ;;  %v6942_v34 = vld [vmem:[#allocation6 + $0x1f8] sm:$0xff]   ;;  %v3077_v18 = vshll.u32 %v8943_v6, 16 }
 0x372   : > { %6008 = vmatpush3.bf16.msra.mxu1 %v6922_v30  ;;  %3567 = vmatprep.mubr.bf16.mxu0 %v9016_v59  ;;  %v3051_v30 = vshrl.u32 %v8899_v22, 16 }
 0x373   : > { %6009 = vmatprep.subr.bf16.mxu1 %v6925_v37 }
 0x374   : > { %v3056_v37 = vor.u32 %v3055_v55, %v3051_v30  ;;  %v6944_v55 = vld [vmem:[#allocation6 + $0x1b8] sm:$0xff]  }
 0x375   : > { %6354 = vmatmul.mubr.bf16.gmra.mrb[100].mxu1 %v8684_v24 }
 0x376   : > { %6357 = vmatprep.mubr.bf16.mxu1 %v8725_v41  ;;  %6010 = vmatpush3.bf16.msra.mxu1 %v6926_v50  ;;  %v6937_v50 = vld [vmem:[#allocation6 + $0x1f0] sm:$0xff]  }
 0x377   : > { %6011 = vmatprep.subr.bf16.mxu1 %v6927_v39  ;;  %v3060_v39 = vrot.slane %v3058_v48, 1  ;;  %v3079_v48 = vrot.slane %v3077_v18, 1 }
 0x379   : > { %3568 = vmatmul.mubr.bf16.gmra.mrb[196].mxu0 %v8852_v53  ;;  %v9036_v11 = vsel %vm552_vm3, %v3056_v37, %v3060_v39  ;;  %v3082_v37 = vshll.u32 %v8955_v19, 16  ;;  %v3094_v19 = vshll.u32 %v8960_v62, 16  ;;  %v3106_v62 = vshll.u32 %v8987_v21, 16  ;;  %v6950_v21 = vld [vmem:[#allocation6 + $0x208] sm:$0xff]  }
 0x37a   : > { %6012 = vmatpush3.bf16.msra.mxu1 %v6928_v17  ;;  %3575 = vmatprep.mubr.bf16.mxu0 %v9026_v33  ;;  %v3070_v17 = vshll.u32 %v8922_v56, 16  ;;  %v3075_v56 = vshrl.u32 %v8943_v6, 16 }
 0x37b   : > { %6013 = vmatprep.subr.bf16.mxu1 %v6931_v20  ;;  %v3068_v20 = vor.u32 %v3067_v8, %v3063_v28  ;;  %v3101_v28 = vshll.u32 %v8981_v31, 16 }
 0x37c   : > { %v3080_v40 = vor.u32 %v3079_v48, %v3075_v56  ;;  %v3108_v48 = vrot.slane %v3106_v62, 1 }
 0x37d   : > { %6358 = vmatmul.mubr.bf16.gmra.mrb[104].mxu1 %v8738_v47  ;;  %v3103_v18 = vrot.slane %v3101_v28, 1 }
 0x37e   : > { %6361 = vmatprep.mubr.bf16.mxu1 %v8785_v0  ;;  %6014 = vmatpush3.bf16.msra.mxu1 %v6932_v25  ;;  %v6948_v25 = vld [vmem:[#allocation6 + $0x200] sm:$0xff]  }
 0x37f   : > { %6015 = vmatprep.subr.bf16.mxu1 %v6933_v45  ;;  %v3072_v45 = vrot.slane %v3070_v17, 1  ;;  %v3096_v17 = vrot.slane %v3094_v19, 1 }
 0x381   : > { %3576 = vmatmul.mubr.bf16.gmra.mrb[200].mxu0 %v8870_v60  ;;  %v9046_v30 = vsel %vm552_vm3, %v3068_v20, %v3072_v45 }
 0x382   : > { %6016 = vmatpush3.bf16.msra.mxu1 %v6934_v38  ;;  %3583 = vmatprep.mubr.bf16.mxu0 %v9036_v11  ;;  %v3089_v38 = vshll.u32 %v8950_v2, 16 }
 0x383   : > { %6017 = vmatprep.subr.bf16.mxu1 %v6937_v50  ;;  %v3084_v50 = vrot.slane %v3082_v37, 1  ;;  %v6951_v37 = vld [vmem:[#allocation6 + $0x210] sm:$0xff]  }
 0x384   : > { %v3091_v8 = vrot.slane %v3089_v38, 1  ;;  %v6953_v38 = vld [vmem:[#allocation6 + $0x220] sm:$0xff]  }
 0x385   : > { %6362 = vmatmul.mubr.bf16.gmra.mrb[108].mxu1 %v8789_v13  ;;  %v9056_v39 = vsel %vm552_vm3, %v3080_v40, %v3084_v50  ;;  %v6952_v40 = vld [vmem:[#allocation6 + $0x218] sm:$0xff]  }
 0x386   : > { %6365 = vmatprep.mubr.bf16.mxu1 %v8841_v58  ;;  %6018 = vmatpush3.bf16.msra.mxu1 %v6938_v32  ;;  %v3087_v32 = vshrl.u32 %v8950_v2, 16  ;;  %v6956_v50 = vld [vmem:[#allocation6 + $0x238] sm:$0xff]  }
 0x387   : > { %6019 = vmatprep.subr.bf16.mxu1 %v6942_v34 }
 0x388   : > { %v3092_v34 = vor.u32 %v3091_v8, %v3087_v32 }
 0x389   : > { %3584 = vmatmul.mubr.bf16.gmra.mrb[204].mxu0 %v8899_v22 }
 0x38a   : > { %6020 = vmatpush3.bf16.msra.mxu1 %v6944_v55  ;;  %3591 = vmatprep.mubr.bf16.mxu0 %v9046_v30  ;;  %v9066_v20 = vsel %vm552_vm3, %v3092_v34, %v3096_v17  ;;  %v3099_v55 = vshrl.u32 %v8981_v31, 16 }
 0x38b   : > { %6381 = vmatprep.subr.bf16.mxu1 %v6948_v25 }
 0x38c   : > { %v3104_v45 = vor.u32 %v3103_v18, %v3099_v55 }
 0x38d   : > { %6366 = vmatmul.mubr.bf16.gmra.mrb[112].mxu1 %v8848_v3 }
 0x38e   : > { %6369 = vmatprep.mubr.bf16.mxu1 %v8890_v7  ;;  %v9075_v56 = vsel %vm552_vm3, %v3104_v45, %v3108_v48 }
 0x391   : > { %3592 = vmatmul.mubr.bf16.gmra.mrb[208].mxu0 %v8908_v16 }
 0x392   : > { %3599 = vmatprep.mubr.bf16.mxu0 %v9056_v39 }
 0x395   : > { %6370 = vmatmul.mubr.bf16.gmra.mrb[116].mxu1 %v8895_v61 }
 0x396   : > { %6373 = vmatprep.mubr.bf16.mxu1 %v8933_v46 }
 0x399   : > { %3600 = vmatmul.mubr.bf16.gmra.mrb[212].mxu0 %v8943_v6 }
 0x39a   : > { %3607 = vmatprep.mubr.bf16.mxu0 %v9066_v20 }
 0x39d   : > { %6374 = vmatmul.mubr.bf16.gmra.mrb[120].mxu1 %v8939_v54 }
 0x39e   : > { %6377 = vmatprep.mubr.bf16.mxu1 %v8971_v29 }
 0x3a1   : > { %3608 = vmatmul.mubr.bf16.gmra.mrb[216].mxu0 %v8950_v2 }
 0x3a2   : > { %3615 = vmatprep.mubr.bf16.mxu0 %v9075_v56 }
 0x3a5   : > { %6378 = vmatmul.mubr.bf16.gmra.mrb[124].mxu1 %v8977_v10 }
 0x3a6   : > { %4476 = vmatprep.mubr.bf16.mxu1 %v8712_v4 }
 0x3a9   : > { %3616 = vmatmul.mubr.bf16.gmra.mrb[220].mxu0 %v8981_v31 }
 0x3aa   : > { %3961 = vmatprep.mubr.bf16.mxu0 %v8712_v4 }
 0x3ad   : > { %4477 = vmatmul.mubr.bf16.vlgmr.msra.gmra.mrb[128].mxu1 %v8661_v9 }
 0x3ae   : > { %4484 = vmatprep.mubr.bf16.mxu1 %v8762_v5  ;;  %6382 = vmatpush3.bf16.msra.mxu1 %v6948_v25  ;;  %v6954_v25 = vld [vmem:[#allocation6 + $0x228] sm:$0xff]  }
 0x3af   : > { %6383 = vmatprep.subr.bf16.mxu1 %v6950_v21 }
 0x3b1   : > { %3962 = vmatmul.mubr.bf16.vlgmr.msra.gmra.mrb[224].mxu0 %v8661_v9 }
 0x3b2   : > { %6384 = vmatpush3.bf16.msra.mxu1 %v6950_v21  ;;  %3969 = vmatprep.mubr.bf16.mxu0 %v8695_v42  ;;  %v6955_v42 = vld [vmem:[#allocation6 + $0x230] sm:$0xff]  }
 0x3b3   : > { %6385 = vmatprep.subr.bf16.mxu1 %v6951_v37 }
 0x3b5   : > { %4485 = vmatmul.mubr.bf16.gmra.mrb[132].mxu1 %v8667_v35 }
 0x3b6   : > { %4492 = vmatprep.mubr.bf16.mxu1 %v8821_v52  ;;  %6386 = vmatpush3.bf16.msra.mxu1 %v6951_v37 }
 0x3b7   : > { %6387 = vmatprep.subr.bf16.mxu1 %v6952_v40 }
 0x3b9   : > { %3970 = vmatmul.mubr.bf16.gmra.mrb[228].mxu0 %v8657_v36 }
 0x3ba   : > { %6388 = vmatpush3.bf16.msra.mxu1 %v6952_v40  ;;  %3977 = vmatprep.mubr.bf16.mxu0 %v8712_v4 }
 0x3bb   : > { %6389 = vmatprep.subr.bf16.mxu1 %v6953_v38 }
 0x3bd   : > { %4493 = vmatmul.mubr.bf16.gmra.mrb[136].mxu1 %v8699_v27 }
 0x3be   : > { %4500 = vmatprep.mubr.bf16.mxu1 %v8882_v44  ;;  %6390 = vmatpush3.bf16.msra.mxu1 %v6953_v38 }
 0x3bf   : > { %6391 = vmatprep.subr.bf16.mxu1 %v6954_v25 }
 0x3c1   : > { %3978 = vmatmul.mubr.bf16.gmra.mrb[232].mxu0 %v8661_v9 }
 0x3c2   : > { %6392 = vmatpush3.bf16.msra.mxu1 %v6954_v25  ;;  %3985 = vmatprep.mubr.bf16.mxu0 %v8762_v5 }
 0x3c3   : > { %6393 = vmatprep.subr.bf16.mxu1 %v6955_v42 }
 0x3c5   : > { %4501 = vmatmul.mubr.bf16.gmra.mrb[140].mxu1 %v8719_v51 }
 0x3c6   : > { %4508 = vmatprep.mubr.bf16.mxu1 %v8925_v26  ;;  %6394 = vmatpush3.bf16.msra.mxu1 %v6955_v42 }
 0x3c7   : > { %6395 = vmatprep.subr.bf16.mxu1 %v6956_v50 }
 0x3c9   : > { %3986 = vmatmul.mubr.bf16.gmra.mrb[236].mxu0 %v8667_v35 }
 0x3ca   : > { %6396 = vmatpush3.bf16.msra.mxu1 %v6956_v50  ;;  %3993 = vmatprep.mubr.bf16.mxu0 %v8821_v52 }
 0x3cd   : > { %4509 = vmatmul.mubr.bf16.gmra.mrb[144].mxu1 %v8753_v23 }
 0x3ce   : > { %4516 = vmatprep.mubr.bf16.mxu1 %v8965_v14 }
 0x3d1   : > { %3994 = vmatmul.mubr.bf16.gmra.mrb[240].mxu0 %v8699_v27 }
 0x3d2   : > { %4001 = vmatprep.mubr.bf16.mxu0 %v8882_v44 }
 0x3d5   : > { %4517 = vmatmul.mubr.bf16.gmra.mrb[148].mxu1 %v8767_v63 }
 0x3d6   : > { %4524 = vmatprep.mubr.bf16.mxu1 %v8992_v12 }
 0x3d9   : > { %4002 = vmatmul.mubr.bf16.gmra.mrb[244].mxu0 %v8719_v51 }
 0x3da   : > { %4009 = vmatprep.mubr.bf16.mxu0 %v8925_v26 }
 0x3dd   : > { %4525 = vmatmul.mubr.bf16.gmra.mrb[152].mxu1 %v8794_v15 }
 0x3de   : > { %4532 = vmatprep.mubr.bf16.mxu1 %v9006_v57 }
 0x3e1   : > { %4010 = vmatmul.mubr.bf16.gmra.mrb[248].mxu0 %v8753_v23 }
 0x3e2   : > { %4017 = vmatprep.mubr.bf16.mxu0 %v8965_v14 }
 0x3e5   : > { %4533 = vmatmul.mubr.bf16.gmra.mrb[156].mxu1 %v8826_v49 }
 0x3e6   : > { %4540 = vmatprep.mubr.bf16.mxu1 %v9016_v59 }
 0x3e9   : > { %4018 = vmatmul.mubr.bf16.gmra.mrb[252].mxu0 %v8767_v63 }
 0x3ea   : > { %4025 = vmatprep.mubr.bf16.mxu0 %v8992_v12 }
 0x3ed   : > { %4541 = vmatmul.mubr.bf16.gmra.mrb[160].mxu1 %v8852_v53 }
 0x3ee   : > { %4548 = vmatprep.mubr.bf16.mxu1 %v9026_v33 }
 0x3f1   : > { %4026 = vmatmul.mubr.bf16.gmra.mrb[0].mxu0 %v8794_v15 }
 0x3f2   : > { %4033 = vmatprep.mubr.bf16.mxu0 %v9006_v57 }
 0x3f5   : > { %4549 = vmatmul.mubr.bf16.gmra.mrb[164].mxu1 %v8870_v60 }
 0x3f6   : > { %4556 = vmatprep.mubr.bf16.mxu1 %v9036_v11 }
 0x3f9   : > { %4034 = vmatmul.mubr.bf16.gmra.mrb[4].mxu0 %v8826_v49 }
 0x3fa   : > { %4041 = vmatprep.mubr.bf16.mxu0 %v9016_v59 }
 0x3fd   : > { %4557 = vmatmul.mubr.bf16.gmra.mrb[168].mxu1 %v8899_v22 }
 0x3fe   : > { %4564 = vmatprep.mubr.bf16.mxu1 %v9046_v30 }
 0x401   : > { %4042 = vmatmul.mubr.bf16.gmra.mrb[8].mxu0 %v8852_v53 }
 0x402   : > { %4049 = vmatprep.mubr.bf16.mxu0 %v9026_v33 }
 0x404   : > { %v5749_v36 = vpop.f32.mrb[160].mxu0 }
 0x405   : > { %4565 = vmatmul.mubr.bf16.gmra.mrb[172].mxu1 %v8908_v16  ;;  %v5750_v9 = vpop.f32.mrb[161].mxu0 }
 0x406   : > { %4572 = vmatprep.mubr.bf16.mxu1 %v9056_v39  ;;  %v9128_v35 = vadd.f32 %v5750_v9, %v5749_v36  ;;  %v5752_v27 = vpop.f32.mrb[162].mxu0 }
 0x407   : > { %v5753_v4 = vpop.f32.mrb[163].mxu0 }
 0x408   : > { %v9130_v51 = vadd.f32 %v5753_v4, %v5752_v27 }
 0x409   : > { %4050 = vmatmul.mubr.bf16.gmra.mrb[12].mxu0 %v8870_v60 }
 0x40a   : > { %4057 = vmatprep.mubr.bf16.mxu0 %v9036_v11 }
 0x40c   : > { %v5755_v23 = vpop.f32.mrb[164].mxu0 }
 0x40d   : > { %4573 = vmatmul.mubr.bf16.gmra.mrb[176].mxu1 %v8943_v6  ;;  %v5756_v5 = vpop.f32.mrb[165].mxu0 }
 0x40e   : > { %4580 = vmatprep.mubr.bf16.mxu1 %v9066_v20  ;;  %v9136_v63 = vadd.f32 %v5756_v5, %v5755_v23  ;;  %v5758_v15 = vpop.f32.mrb[166].mxu0 }
 0x40f   : > { %v5759_v52 = vpop.f32.mrb[167].mxu0 }
 0x410   : > { %v9138_v49 = vadd.f32 %v5759_v52, %v5758_v15 }
 0x411   : > { %4058 = vmatmul.mubr.bf16.gmra.mrb[16].mxu0 %v8899_v22 }
 0x412   : > { %4065 = vmatprep.mubr.bf16.mxu0 %v9046_v30 }
 0x414   : > { %v5761_v53 = vpop.f32.mrb[168].mxu0 }
 0x415   : > { %4581 = vmatmul.mubr.bf16.gmra.mrb[180].mxu1 %v8950_v2  ;;  %v5762_v60 = vpop.f32.mrb[169].mxu0 }
 0x416   : > { %4588 = vmatprep.mubr.bf16.mxu1 %v9075_v56  ;;  %v9144_v44 = vadd.f32 %v5762_v60, %v5761_v53  ;;  %v5764_v26 = vpop.f32.mrb[170].mxu0 }
 0x417   : > { %v5765_v14 = vpop.f32.mrb[171].mxu0 }
 0x418   : > { %v9146_v12 = vadd.f32 %v5765_v14, %v5764_v26 }
 0x419   : > { %4066 = vmatmul.mubr.bf16.gmra.mrb[20].mxu0 %v8908_v16 }
 0x41a   : > { %4073 = vmatprep.mubr.bf16.mxu0 %v9056_v39 }
 0x41c   : > { %v5767_v57 = vpop.f32.mrb[172].mxu0 }
 0x41d   : > { %4589 = vmatmul.mubr.bf16.gmra.mrb[184].mxu1 %v8981_v31  ;;  %v5768_v22 = vpop.f32.mrb[173].mxu0 }
 0x41e   : > { %4596 = vmatprep.mubr.bf16.mxu1 %v9066_v20  ;;  %v9152_v59 = vadd.f32 %v5768_v22, %v5767_v57  ;;  %v5770_v33 = vpop.f32.mrb[174].mxu0 }
 0x41f   : > { %v5771_v11 = vpop.f32.mrb[175].mxu0 }
 0x420   : > { %v9154_v30 = vadd.f32 %v5771_v11, %v5770_v33 }
 0x421   : > { %4074 = vmatmul.mubr.bf16.gmra.mrb[24].mxu0 %v8943_v6 }
 0x422   : > { %4081 = vmatprep.mubr.bf16.mxu0 %v9066_v20 }
 0x424   : > { %v5773_v8 = vpop.f32.mrb[176].mxu0 }
 0x425   : > { %4597 = vmatmul.mubr.bf16.gmra.mrb[188].mxu1 %v8950_v2  ;;  %v5774_v16 = vpop.f32.mrb[177].mxu0 }
 0x426   : > { %6397 = vmatprep.mubr.bf16.mxu1 %v8677_v43  ;;  %v9160_v31 = vadd.f32 %v5774_v16, %v5773_v8  ;;  %v5776_v39 = vpop.f32.mrb[178].mxu0 }
 0x427   : > { %v5777_v32 = vpop.f32.mrb[179].mxu0 }
 0x428   : > { %v9162_v19 = vadd.f32 %v5777_v32, %v5776_v39 }
 0x429   : > { %4082 = vmatmul.mubr.bf16.gmra.mrb[28].mxu0 %v8950_v2 }
 0x42c   : > { %v5779_v34 = vpop.f32.mrb[180].mxu0 }
 0x42d   : > { %6398 = vmatmul.mubr.bf16.vlgmr.msra.gmra.mrb[96].mxu1 %v8684_v24  ;;  %v5780_v6 = vpop.f32.mrb[181].mxu0 }
 0x42e   : > { %6401 = vmatprep.mubr.bf16.mxu1 %v8725_v41  ;;  %v9167_v28 = vadd.f32 %v5780_v6, %v5779_v34  ;;  %v5782_v17 = vpop.f32.mrb[182].mxu0 }
 0x42f   : > { %v5783_v20 = vpop.f32.mrb[183].mxu0 }
 0x430   : > { %v9169_v18 = vadd.f32 %v5783_v20, %v5782_v17 }
 0x434   : > { %v5785_v43 = vpop.f32.mrb[184].mxu0 }
 0x435   : > { %6402 = vmatmul.mubr.bf16.gmra.mrb[100].mxu1 %v8738_v47  ;;  %v5786_v55 = vpop.f32.mrb[185].mxu0 }
 0x436   : > { %6405 = vmatprep.mubr.bf16.mxu1 %v8785_v0  ;;  %v9173_v62 = vadd.f32 %v5786_v55, %v5785_v43  ;;  %v5788_v2 = vpop.f32.mrb[186].mxu0 }
 0x437   : > { %v5789_v45 = vpop.f32.mrb[187].mxu0 }
 0x438   : > { %v9175_v24 = vadd.f32 %v5789_v45, %v5788_v2 }
 0x43c   : > { %v5791_v48 = vpop.f32.mrb[188].mxu0 }
 0x43d   : > { %6406 = vmatmul.mubr.bf16.gmra.mrb[104].mxu1 %v8789_v13  ;;  %v5792_v41 = vpop.f32.mrb[189].mxu0 }
 0x43e   : > { %6409 = vmatprep.mubr.bf16.mxu1 %v8841_v58  ;;  %v9179_v56 = vadd.f32 %v5792_v41, %v5791_v48  ;;  %v5794_v21 = vpop.f32.mrb[190].mxu0 }
 0x43f   : > { %v5795_v37 = vpop.f32.mrb[191].mxu0 }
 0x440   : > { %v9181_v47 = vadd.f32 %v5795_v37, %v5794_v21 }
 0x444   : > { %v5797_v40 = vpop.f32.mrb[192].mxu0 }
 0x445   : > { %6410 = vmatmul.mubr.bf16.gmra.mrb[108].mxu1 %v8848_v3  ;;  %v5798_v0 = vpop.f32.mrb[193].mxu0 }
 0x446   : > { %6413 = vmatprep.mubr.bf16.mxu1 %v8890_v7  ;;  %v9185_v38 = vadd.f32 %v5798_v0, %v5797_v40  ;;  %v5800_v25 = vpop.f32.mrb[194].mxu0 }
 0x447   : > { %v5801_v42 = vpop.f32.mrb[195].mxu0 }
 0x448   : > { %v9187_v13 = vadd.f32 %v5801_v42, %v5800_v25 }
 0x44c   : > { %v5803_v50 = vpop.f32.mrb[196].mxu0 }
 0x44d   : > { %6414 = vmatmul.mubr.bf16.gmra.mrb[112].mxu1 %v8895_v61  ;;  %v5804_v58 = vpop.f32.mrb[197].mxu0 }
 0x44e   : > { %6417 = vmatprep.mubr.bf16.mxu1 %v8933_v46  ;;  %v9191_v36 = vadd.f32 %v5804_v58, %v5803_v50  ;;  %v5806_v9 = vpop.f32.mrb[198].mxu0 }
 0x44f   : > { %v5807_v27 = vpop.f32.mrb[199].mxu0 }
 0x450   : > { %v9193_v3 = vadd.f32 %v5807_v27, %v5806_v9 }
 0x454   : > { %v5809_v4 = vpop.f32.mrb[200].mxu0 }
 0x455   : > { %6418 = vmatmul.mubr.bf16.gmra.mrb[116].mxu1 %v8939_v54  ;;  %v5810_v7 = vpop.f32.mrb[201].mxu0 }
 0x456   : > { %6421 = vmatprep.mubr.bf16.mxu1 %v8971_v29  ;;  %v9197_v23 = vadd.f32 %v5810_v7, %v5809_v4  ;;  %v5812_v5 = vpop.f32.mrb[202].mxu0 }
 0x457   : > { %v5813_v15 = vpop.f32.mrb[203].mxu0 }
 0x458   : > { %v9199_v61 = vadd.f32 %v5813_v15, %v5812_v5 }
 0x45c   : > { %v5815_v52 = vpop.f32.mrb[204].mxu0 }
 0x45d   : > { %6422 = vmatmul.mubr.bf16.gmra.mrb[120].mxu1 %v8977_v10  ;;  %v5816_v46 = vpop.f32.mrb[205].mxu0 }
 0x45e   : > { %6425 = vmatprep.mubr.bf16.mxu1 %v8997_v1  ;;  %v9203_v53 = vadd.f32 %v5816_v46, %v5815_v52  ;;  %v5818_v60 = vpop.f32.mrb[206].mxu0 }
 0x45f   : > { %v5819_v26 = vpop.f32.mrb[207].mxu0 }
 0x460   : > { %v9205_v54 = vadd.f32 %v5819_v26, %v5818_v60 }
 0x464   : > { %v5821_v14 = vpop.f32.mrb[208].mxu0 }
 0x465   : > { %6426 = vmatmul.mubr.bf16.gmra.mrb[124].mxu1 %v8977_v10  ;;  %v5822_v29 = vpop.f32.mrb[209].mxu0 }
 0x466   : > { %v9208_v57 = vadd.f32 %v5822_v29, %v5821_v14  ;;  %v5824_v22 = vpop.f32.mrb[210].mxu0 }
 0x467   : > { %v5825_v33 = vpop.f32.mrb[211].mxu0 }
 0x468   : > { %v9210_v11 = vadd.f32 %v5825_v33, %v5824_v22 }
 0x46c   : > { %v5827_v8 = vpop.f32.mrb[212].mxu0 }
 0x46d   : > { %v5828_v16 = vpop.f32.mrb[213].mxu0 }
 0x46e   : > { %v9212_v39 = vadd.f32 %v5828_v16, %v5827_v8  ;;  %v5830_v1 = vpop.f32.mrb[214].mxu0 }
 0x46f   : > { %v5831_v32 = vpop.f32.mrb[215].mxu0 }
 0x470   : > { %v9214_v34 = vadd.f32 %v5831_v32, %v5830_v1 }
 0x474   : > { %v5833_v6 = vpop.f32.mrb[216].mxu0 }
 0x475   : > { %v5834_v17 = vpop.f32.mrb[217].mxu0 }
 0x476   : > { %v9216_v20 = vadd.f32 %v5834_v17, %v5833_v6  ;;  %v5836_v10 = vpop.f32.mrb[218].mxu0 }
 0x477   : > { %v5837_v43 = vpop.f32.mrb[219].mxu0 }
 0x478   : > { %v9218_v55 = vadd.f32 %v5837_v43, %v5836_v10 }
 0x47c   : > { %v5839_v2 = vpop.f32.mrb[220].mxu0 }
 0x47d   : > { %v5840_v45 = vpop.f32.mrb[221].mxu0 }
 0x47e   : > { %v9220_v48 = vadd.f32 %v5840_v45, %v5839_v2  ;;  %v5842_v41 = vpop.f32.mrb[222].mxu0 }
 0x47f   : > { %v5843_v21 = vpop.f32.mrb[223].mxu0 }
 0x480   : > { %v6021_v37 = vpop.f32.mrb[128].mxu1  ;;  %v9222_v40 = vadd.f32 %v5843_v21, %v5842_v41 }
 0x481   : > { %v6022_v0 = vpop.f32.mrb[129].mxu1 }
 0x482   : > { %v6023_v25 = vadd.f32 %v6022_v0, %v6021_v37  ;;  %v6024_v42 = vpop.f32.mrb[130].mxu1 }
 0x483   : > { %v6025_v50 = vpop.f32.mrb[131].mxu1 }
 0x484   : > { %v6026_v58 = vadd.f32 %v6025_v50, %v6024_v42  ;;  %v5885_v9 = vpop.f32.mrb[224].mxu0 }
 0x485   : > { %v5886_v27 = vpop.f32.mrb[225].mxu0 }
 0x486   : > { %v5887_v4 = vadd.f32 %v5886_v27, %v5885_v9  ;;  %v5888_v7 = vpop.f32.mrb[226].mxu0 }
 0x487   : > { %v5889_v5 = vpop.f32.mrb[227].mxu0 }
 0x488   : > { %v6027_v15 = vpop.f32.mrb[132].mxu1  ;;  %v6560_v52 = vadd.f32 %v5887_v4, %v9128_v35  ;;  %v5890_v46 = vadd.f32 %v5889_v5, %v5888_v7 }
 0x489   : > { %v6028_v60 = vpop.f32.mrb[133].mxu1 }
 0x48a   : > { %v6029_v26 = vadd.f32 %v6028_v60, %v6027_v15  ;;  %v6030_v14 = vpop.f32.mrb[134].mxu1  ;;  %v6566_v29 = vadd.f32 %v5890_v46, %v9130_v51  ;;  %v9226_v33 = vadd.f32 %v6560_v52, %v6023_v25 }
 0x48b   : > { %v6031_v22 = vpop.f32.mrb[135].mxu1 }
 0x48c   : > { %v6032_v8 = vadd.f32 %v6031_v22, %v6030_v14  ;;  %v5891_v16 = vpop.f32.mrb[228].mxu0  ;;  %v9228_v1 = vadd.f32 %v6566_v29, %v6026_v58 }
 0x48d   : > { %v5892_v32 = vpop.f32.mrb[229].mxu0 }
 0x48e   : > { %v5893_v6 = vadd.f32 %v5892_v32, %v5891_v16  ;;  %v5894_v17 = vpop.f32.mrb[230].mxu0 }
 0x48f   : > { %v5895_v10 = vpop.f32.mrb[231].mxu0 }
 0x490   : > { %v6033_v43 = vpop.f32.mrb[136].mxu1  ;;  %v6557_v35 = vadd.f32 %v5893_v6, %v9136_v63  ;;  %v5896_v2 = vadd.f32 %v5895_v10, %v5894_v17 }
 0x491   : > { %v6034_v45 = vpop.f32.mrb[137].mxu1 }
 0x492   : > { %v6035_v41 = vadd.f32 %v6034_v45, %v6033_v43  ;;  %v6036_v21 = vpop.f32.mrb[138].mxu1  ;;  %v6563_v51 = vadd.f32 %v5896_v2, %v9138_v49  ;;  %v9232_v0 = vadd.f32 %v6557_v35, %v6029_v26 }
 0x493   : > { %v6037_v37 = vpop.f32.mrb[139].mxu1 }
 0x494   : > { %v6038_v25 = vadd.f32 %v6037_v37, %v6036_v21  ;;  %v5897_v42 = vpop.f32.mrb[232].mxu0  ;;  %v9234_v50 = vadd.f32 %v6563_v51, %v6032_v8 }
 0x495   : > { %v5898_v58 = vpop.f32.mrb[233].mxu0 }
 0x496   : > { %v5899_v9 = vadd.f32 %v5898_v58, %v5897_v42  ;;  %v5900_v27 = vpop.f32.mrb[234].mxu0 }
 0x497   : > { %v5901_v4 = vpop.f32.mrb[235].mxu0 }
 0x498   : > { %v6039_v7 = vpop.f32.mrb[140].mxu1  ;;  %v6572_v63 = vadd.f32 %v5899_v9, %v9144_v44  ;;  %v5902_v5 = vadd.f32 %v5901_v4, %v5900_v27 }
 0x499   : > { %v6040_v15 = vpop.f32.mrb[141].mxu1 }
 0x49a   : > { %v6041_v52 = vadd.f32 %v6040_v15, %v6039_v7  ;;  %v6042_v46 = vpop.f32.mrb[142].mxu1  ;;  %v6578_v49 = vadd.f32 %v5902_v5, %v9146_v12  ;;  %v9238_v26 = vadd.f32 %v6572_v63, %v6035_v41 }
 0x49b   : > { %v6043_v60 = vpop.f32.mrb[143].mxu1 }
 0x49c   : > { %v6044_v14 = vadd.f32 %v6043_v60, %v6042_v46  ;;  %v5903_v29 = vpop.f32.mrb[236].mxu0  ;;  %v9240_v22 = vadd.f32 %v6578_v49, %v6038_v25 }
 0x49d   : > { %v5904_v8 = vpop.f32.mrb[237].mxu0 }
 0x49e   : > { %v5905_v16 = vadd.f32 %v5904_v8, %v5903_v29  ;;  %v5906_v32 = vpop.f32.mrb[238].mxu0 }
 0x49f   : > { %v5907_v6 = vpop.f32.mrb[239].mxu0 }
 0x4a0   : > { %v6045_v17 = vpop.f32.mrb[144].mxu1  ;;  %v6569_v44 = vadd.f32 %v5905_v16, %v9152_v59  ;;  %v5908_v10 = vadd.f32 %v5907_v6, %v5906_v32 }
 0x4a1   : > { %v6046_v43 = vpop.f32.mrb[145].mxu1 }
 0x4a2   : > { %v6047_v35 = vadd.f32 %v6046_v43, %v6045_v17  ;;  %v6048_v2 = vpop.f32.mrb[146].mxu1  ;;  %v6575_v12 = vadd.f32 %v5908_v10, %v9154_v30  ;;  %v9244_v41 = vadd.f32 %v6569_v44, %v6041_v52 }
 0x4a3   : > { %v6049_v45 = vpop.f32.mrb[147].mxu1 }
 0x4a4   : > { %v6050_v21 = vadd.f32 %v6049_v45, %v6048_v2  ;;  %v5909_v51 = vpop.f32.mrb[240].mxu0  ;;  %v9246_v37 = vadd.f32 %v6575_v12, %v6044_v14 }
 0x4a5   : > { %v5910_v25 = vpop.f32.mrb[241].mxu0 }
 0x4a6   : > { %v5911_v42 = vadd.f32 %v5910_v25, %v5909_v51  ;;  %v5912_v58 = vpop.f32.mrb[242].mxu0 }
 0x4a7   : > { %v5913_v9 = vpop.f32.mrb[243].mxu0 }
 0x4a8   : > { %v6051_v27 = vpop.f32.mrb[148].mxu1  ;;  %v6584_v59 = vadd.f32 %v5911_v42, %v9160_v31  ;;  %v5914_v4 = vadd.f32 %v5913_v9, %v5912_v58 }
 0x4a9   : > { %v6052_v7 = vpop.f32.mrb[149].mxu1 }
 0x4aa   : > { %v6053_v63 = vadd.f32 %v6052_v7, %v6051_v27  ;;  %v6054_v5 = vpop.f32.mrb[150].mxu1  ;;  %v6590_v30 = vadd.f32 %v5914_v4, %v9162_v19  ;;  %v9250_v52 = vadd.f32 %v6584_v59, %v6047_v35 }
 0x4ab   : > { %v6055_v15 = vpop.f32.mrb[151].mxu1 }
 0x4ac   : > { %v6056_v46 = vadd.f32 %v6055_v15, %v6054_v5  ;;  %v5915_v49 = vpop.f32.mrb[244].mxu0  ;;  %v9252_v60 = vadd.f32 %v6590_v30, %v6050_v21 }
 0x4ad   : > { %v5916_v14 = vpop.f32.mrb[245].mxu0 }
 0x4ae   : > { %v5917_v29 = vadd.f32 %v5916_v14, %v5915_v49  ;;  %v5918_v8 = vpop.f32.mrb[246].mxu0 }
 0x4af   : > { %v5919_v16 = vpop.f32.mrb[247].mxu0 }
 0x4b0   : > { %v6057_v32 = vpop.f32.mrb[152].mxu1  ;;  %v6581_v31 = vadd.f32 %v5917_v29, %v9167_v28  ;;  %v5920_v6 = vadd.f32 %v5919_v16, %v5918_v8 }
 0x4b1   : > { %v6058_v17 = vpop.f32.mrb[153].mxu1 }
 0x4b2   : > { %v6059_v44 = vadd.f32 %v6058_v17, %v6057_v32  ;;  %v6060_v10 = vpop.f32.mrb[154].mxu1  ;;  %v6587_v19 = vadd.f32 %v5920_v6, %v9169_v18  ;;  %v9256_v35 = vadd.f32 %v6581_v31, %v6053_v63 }
 0x4b3   : > { %v6061_v43 = vpop.f32.mrb[155].mxu1 }
 0x4b4   : > { %v6062_v2 = vadd.f32 %v6061_v43, %v6060_v10  ;;  %v5921_v12 = vpop.f32.mrb[248].mxu0  ;;  %v9258_v45 = vadd.f32 %v6587_v19, %v6056_v46 }
 0x4b5   : > { %v5922_v21 = vpop.f32.mrb[249].mxu0 }
 0x4b6   : > { %v5923_v51 = vadd.f32 %v5922_v21, %v5921_v12  ;;  %v5924_v25 = vpop.f32.mrb[250].mxu0 }
 0x4b7   : > { %v5925_v42 = vpop.f32.mrb[251].mxu0 }
 0x4b8   : > { %v6063_v58 = vpop.f32.mrb[156].mxu1  ;;  %v6596_v28 = vadd.f32 %v5923_v51, %v9173_v62  ;;  %v5926_v9 = vadd.f32 %v5925_v42, %v5924_v25 }
 0x4b9   : > { %v6064_v27 = vpop.f32.mrb[157].mxu1 }
 0x4ba   : > { %v6065_v59 = vadd.f32 %v6064_v27, %v6063_v58  ;;  %v6066_v4 = vpop.f32.mrb[158].mxu1  ;;  %v6602_v18 = vadd.f32 %v5926_v9, %v9175_v24  ;;  %v9262_v63 = vadd.f32 %v6596_v28, %v6059_v44 }
 0x4bb   : > { %v6067_v7 = vpop.f32.mrb[159].mxu1 }
 0x4bc   : > { %v6068_v5 = vadd.f32 %v6067_v7, %v6066_v4  ;;  %v5927_v30 = vpop.f32.mrb[252].mxu0  ;;  %v9264_v15 = vadd.f32 %v6602_v18, %v6062_v2 }
 0x4bd   : > { %v5928_v46 = vpop.f32.mrb[253].mxu0 }
 0x4be   : > { %v5929_v49 = vadd.f32 %v5928_v46, %v5927_v30  ;;  %v5930_v14 = vpop.f32.mrb[254].mxu0 }
 0x4bf   : > { %v5931_v29 = vpop.f32.mrb[255].mxu0 }
 0x4c0   : > { %v6069_v8 = vpop.f32.mrb[160].mxu1  ;;  %v6593_v62 = vadd.f32 %v5929_v49, %v9179_v56  ;;  %v5932_v16 = vadd.f32 %v5931_v29, %v5930_v14 }
 0x4c1   : > { %v6070_v32 = vpop.f32.mrb[161].mxu1 }
 0x4c2   : > { %v6071_v31 = vadd.f32 %v6070_v32, %v6069_v8  ;;  %v6072_v6 = vpop.f32.mrb[162].mxu1  ;;  %v6599_v24 = vadd.f32 %v5932_v16, %v9181_v47  ;;  %v9268_v44 = vadd.f32 %v6593_v62, %v6065_v59 }
 0x4c3   : > { %v6073_v17 = vpop.f32.mrb[163].mxu1 }
 0x4c4   : > { %v6074_v10 = vadd.f32 %v6073_v17, %v6072_v6  ;;  %v5933_v19 = vpop.f32.mrb[0].mxu0  ;;  %v9270_v43 = vadd.f32 %v6599_v24, %v6068_v5 }
 0x4c5   : > { %v5934_v2 = vpop.f32.mrb[1].mxu0 }
 0x4c6   : > { %v5935_v12 = vadd.f32 %v5934_v2, %v5933_v19  ;;  %v5936_v21 = vpop.f32.mrb[2].mxu0 }
 0x4c7   : > { %v5937_v51 = vpop.f32.mrb[3].mxu0 }
 0x4c8   : > { %v6075_v25 = vpop.f32.mrb[164].mxu1  ;;  %v6608_v56 = vadd.f32 %v5935_v12, %v9185_v38  ;;  %v5938_v42 = vadd.f32 %v5937_v51, %v5936_v21 }
 0x4c9   : > { %v6076_v58 = vpop.f32.mrb[165].mxu1 }
 0x4ca   : > { %v6077_v28 = vadd.f32 %v6076_v58, %v6075_v25  ;;  %v6078_v9 = vpop.f32.mrb[166].mxu1  ;;  %v6614_v47 = vadd.f32 %v5938_v42, %v9187_v13  ;;  %v9274_v59 = vadd.f32 %v6608_v56, %v6071_v31 }
 0x4cb   : > { %v6079_v27 = vpop.f32.mrb[167].mxu1 }
 0x4cc   : > { %v6080_v4 = vadd.f32 %v6079_v27, %v6078_v9  ;;  %v5939_v18 = vpop.f32.mrb[4].mxu0  ;;  %v9276_v7 = vadd.f32 %v6614_v47, %v6074_v10 }
 0x4cd   : > { %v5940_v5 = vpop.f32.mrb[5].mxu0 }
 0x4ce   : > { %v5941_v30 = vadd.f32 %v5940_v5, %v5939_v18  ;;  %v5942_v46 = vpop.f32.mrb[6].mxu0 }
 0x4cf   : > { %v5943_v49 = vpop.f32.mrb[7].mxu0 }
 0x4d0   : > { %v6081_v14 = vpop.f32.mrb[168].mxu1  ;;  %v6605_v38 = vadd.f32 %v5941_v30, %v9191_v36  ;;  %v5944_v29 = vadd.f32 %v5943_v49, %v5942_v46 }
 0x4d1   : > { %v6082_v8 = vpop.f32.mrb[169].mxu1 }
 0x4d2   : > { %v6083_v62 = vadd.f32 %v6082_v8, %v6081_v14  ;;  %v6084_v16 = vpop.f32.mrb[170].mxu1  ;;  %v6611_v13 = vadd.f32 %v5944_v29, %v9193_v3  ;;  %v9280_v31 = vadd.f32 %v6605_v38, %v6077_v28 }
 0x4d3   : > { %v6085_v32 = vpop.f32.mrb[171].mxu1 }
 0x4d4   : > { %v6086_v6 = vadd.f32 %v6085_v32, %v6084_v16  ;;  %v5945_v24 = vpop.f32.mrb[8].mxu0  ;;  %v9282_v17 = vadd.f32 %v6611_v13, %v6080_v4 }
 0x4d5   : > { %v5946_v10 = vpop.f32.mrb[9].mxu0 }
 0x4d6   : > { %v5947_v19 = vadd.f32 %v5946_v10, %v5945_v24  ;;  %v5948_v2 = vpop.f32.mrb[10].mxu0 }
 0x4d7   : > { %v5949_v12 = vpop.f32.mrb[11].mxu0 }
 0x4d8   : > { %v6087_v21 = vpop.f32.mrb[172].mxu1  ;;  %v6620_v36 = vadd.f32 %v5947_v19, %v9197_v23  ;;  %v5950_v51 = vadd.f32 %v5949_v12, %v5948_v2 }
 0x4d9   : > { %v6088_v25 = vpop.f32.mrb[173].mxu1 }
 0x4da   : > { %v6089_v56 = vadd.f32 %v6088_v25, %v6087_v21  ;;  %v6090_v42 = vpop.f32.mrb[174].mxu1  ;;  %v6626_v3 = vadd.f32 %v5950_v51, %v9199_v61  ;;  %v9286_v28 = vadd.f32 %v6620_v36, %v6083_v62 }
 0x4db   : > { %v6091_v58 = vpop.f32.mrb[175].mxu1 }
 0x4dc   : > { %v6092_v9 = vadd.f32 %v6091_v58, %v6090_v42  ;;  %v5951_v47 = vpop.f32.mrb[12].mxu0  ;;  %v9288_v27 = vadd.f32 %v6626_v3, %v6086_v6 }
 0x4dd   : > { %v5952_v4 = vpop.f32.mrb[13].mxu0 }
 0x4de   : > { %v5953_v18 = vadd.f32 %v5952_v4, %v5951_v47  ;;  %v5954_v5 = vpop.f32.mrb[14].mxu0 }
 0x4df   : > { %v5955_v30 = vpop.f32.mrb[15].mxu0 }
 0x4e0   : > { %v6093_v46 = vpop.f32.mrb[176].mxu1  ;;  %v6617_v23 = vadd.f32 %v5953_v18, %v9203_v53  ;;  %v5956_v49 = vadd.f32 %v5955_v30, %v5954_v5 }
 0x4e1   : > { %v6094_v14 = vpop.f32.mrb[177].mxu1 }
 0x4e2   : > { %v6095_v38 = vadd.f32 %v6094_v14, %v6093_v46  ;;  %v6096_v29 = vpop.f32.mrb[178].mxu1  ;;  %v6623_v61 = vadd.f32 %v5956_v49, %v9205_v54  ;;  %v9292_v62 = vadd.f32 %v6617_v23, %v6089_v56 }
 0x4e3   : > { %v6097_v8 = vpop.f32.mrb[179].mxu1 }
 0x4e4   : > { %v6098_v16 = vadd.f32 %v6097_v8, %v6096_v29  ;;  %v5957_v13 = vpop.f32.mrb[16].mxu0  ;;  %v9294_v32 = vadd.f32 %v6623_v61, %v6092_v9 }
 0x4e5   : > { %v5958_v6 = vpop.f32.mrb[17].mxu0 }
 0x4e6   : > { %v5959_v24 = vadd.f32 %v5958_v6, %v5957_v13  ;;  %v5960_v10 = vpop.f32.mrb[18].mxu0 }
 0x4e7   : > { %v5961_v19 = vpop.f32.mrb[19].mxu0 }
 0x4e8   : > { %v6099_v2 = vpop.f32.mrb[180].mxu1  ;;  %v6632_v53 = vadd.f32 %v5959_v24, %v9208_v57  ;;  %v5962_v12 = vadd.f32 %v5961_v19, %v5960_v10 }
 0x4e9   : > { %v6100_v21 = vpop.f32.mrb[181].mxu1 }
 0x4ea   : > { %v6101_v36 = vadd.f32 %v6100_v21, %v6099_v2  ;;  %v6102_v51 = vpop.f32.mrb[182].mxu1  ;;  %v6638_v54 = vadd.f32 %v5962_v12, %v9210_v11  ;;  %v9298_v56 = vadd.f32 %v6632_v53, %v6095_v38 }
 0x4eb   : > { %v6103_v25 = vpop.f32.mrb[183].mxu1 }
 0x4ec   : > { %v6104_v42 = vadd.f32 %v6103_v25, %v6102_v51  ;;  %v5963_v3 = vpop.f32.mrb[20].mxu0  ;;  %v9300_v58 = vadd.f32 %v6638_v54, %v6098_v16 }
 0x4ed   : > { %v5964_v9 = vpop.f32.mrb[21].mxu0 }
 0x4ee   : > { %v5965_v47 = vadd.f32 %v5964_v9, %v5963_v3  ;;  %v5966_v4 = vpop.f32.mrb[22].mxu0 }
 0x4ef   : > { %v5967_v18 = vpop.f32.mrb[23].mxu0 }
 0x4f0   : > { %v6105_v5 = vpop.f32.mrb[184].mxu1  ;;  %v6629_v57 = vadd.f32 %v5965_v47, %v9212_v39  ;;  %v5968_v30 = vadd.f32 %v5967_v18, %v5966_v4 }
 0x4f1   : > { %v6106_v46 = vpop.f32.mrb[185].mxu1 }
 0x4f2   : > { %v6107_v23 = vadd.f32 %v6106_v46, %v6105_v5  ;;  %v6108_v49 = vpop.f32.mrb[186].mxu1  ;;  %v6635_v11 = vadd.f32 %v5968_v30, %v9214_v34  ;;  %v9304_v38 = vadd.f32 %v6629_v57, %v6101_v36 }
 0x4f3   : > { %v6109_v14 = vpop.f32.mrb[187].mxu1 }
 0x4f4   : > { %v6110_v29 = vadd.f32 %v6109_v14, %v6108_v49  ;;  %v5969_v61 = vpop.f32.mrb[24].mxu0  ;;  %v9306_v8 = vadd.f32 %v6635_v11, %v6104_v42 }
 0x4f5   : > { %v5970_v16 = vpop.f32.mrb[25].mxu0 }
 0x4f6   : > { %v5971_v13 = vadd.f32 %v5970_v16, %v5969_v61  ;;  %v5972_v6 = vpop.f32.mrb[26].mxu0 }
 0x4f7   : > { %v5973_v24 = vpop.f32.mrb[27].mxu0 }
 0x4f8   : > { %v6111_v10 = vpop.f32.mrb[188].mxu1  ;;  %v6644_v39 = vadd.f32 %v5971_v13, %v9216_v20  ;;  %v5974_v19 = vadd.f32 %v5973_v24, %v5972_v6 }
 0x4f9   : > { %v6112_v2 = vpop.f32.mrb[189].mxu1 }
 0x4fa   : > { %v6113_v53 = vadd.f32 %v6112_v2, %v6111_v10  ;;  %v6114_v12 = vpop.f32.mrb[190].mxu1  ;;  %v6650_v34 = vadd.f32 %v5974_v19, %v9218_v55  ;;  %v9310_v36 = vadd.f32 %v6644_v39, %v6107_v23  ;;  %v9321_v23 = vld [vmem:[%s9788_s4] ss:$0 sm:$0xff] }
 0x4fb   : > { %v6115_v21 = vpop.f32.mrb[191].mxu1 }
 0x4fc   : > { %v6116_v51 = vadd.f32 %v6115_v21, %v6114_v12  ;;  %v5975_v54 = vpop.f32.mrb[28].mxu0  ;;  %v9312_v25 = vadd.f32 %v6650_v34, %v6110_v29 }
 0x4fd   : > { %v5976_v42 = vpop.f32.mrb[29].mxu0 }
 0x4fe   : > { %v5977_v3 = vadd.f32 %v5976_v42, %v5975_v54  ;;  %v5978_v9 = vpop.f32.mrb[30].mxu0 }
 0x4ff   : > { %v5979_v47 = vpop.f32.mrb[31].mxu0 }
 0x500   : > { %v6399_v4 = vpop.f32.mrb[96].mxu1  ;;  %v6641_v20 = vadd.f32 %v5977_v3, %v9220_v48  ;;  %v5980_v18 = vadd.f32 %v5979_v47, %v5978_v9 }
 0x501   : > { %v6559_v5 = vadd.f32 %v9232_v0, %v6399_v4  ;;  %v4639_v57 = vpop.f32.mrb[97].mxu1 }
 0x502   : > { %v6562_v55 = vadd.f32 %v9226_v33, %v4639_v57  ;;  %v6400_v30 = vpop.f32.mrb[98].mxu1  ;;  %v6647_v46 = vadd.f32 %v5980_v18, %v9222_v40  ;;  %v9324_v14 = vadd.f32 %v6641_v20, %v6113_v53 }
 0x503   : > { %v6565_v49 = vadd.f32 %v9234_v50, %v6400_v30  ;;  %v4642_v11 = vpop.f32.mrb[99].mxu1  ;;  %v9336_v40 = vadd.f32 %v6559_v5, %v9321_v23 }
 0x504   : > { %v6568_v48 = vadd.f32 %v9228_v1, %v4642_v11  ;;  %v9327_v29 = vadd.f32 %v6647_v46, %v6116_v51  ;;  %v9330_v0 = vadd.f32 %v6562_v55, %v9321_v23 }
 0x505   : > { %v9342_v1 = vadd.f32 %v6565_v49, %v9321_v23 }
 0x506   : > { %v9333_v33 = vadd.f32 %v6568_v48, %v9321_v23 }
 0x508   : > { %v4836_v61 = vadd.f32 %v9333_v33, %v9330_v0  ;;  %v6403_v50 = vpop.f32.mrb[100].mxu1 }
 0x509   : > { %v6571_v16 = vadd.f32 %v9244_v41, %v6403_v50  ;;  %v4655_v13 = vpop.f32.mrb[101].mxu1 }
 0x50a   : > { %v4837_v6 = vadd.f32 %v4836_v61, %v9336_v40  ;;  %v6574_v24 = vadd.f32 %v9238_v26, %v4655_v13  ;;  %v6404_v10 = vpop.f32.mrb[102].mxu1 }
 0x50b   : > { %v6577_v39 = vadd.f32 %v9246_v37, %v6404_v10  ;;  %v4658_v19 = vpop.f32.mrb[103].mxu1  ;;  %v9357_v21 = vadd.f32 %v6571_v16, %v9321_v23 }
 0x50c   : > { %v9348_v2 = vadd.f32 %v6574_v24, %v9321_v23  ;;  %v4838_v53 = vadd.f32 %v4837_v6, %v9342_v1  ;;  %v6580_v12 = vadd.f32 %v9240_v22, %v4658_v19 }
 0x50d   : > { %v9362_v42 = vadd.f32 %v6577_v39, %v9321_v23 }
 0x50e   : > { %v4839_v41 = vadd.f32 %v4838_v53, %v9348_v2  ;;  %v9354_v34 = vadd.f32 %v6580_v12, %v9321_v23 }
 0x510   : > { %v4840_v26 = vadd.f32 %v4839_v41, %v9354_v34  ;;  %v6407_v51 = vpop.f32.mrb[104].mxu1 }
 0x511   : > { %v6583_v37 = vadd.f32 %v9256_v35, %v6407_v51  ;;  %v4671_v54 = vpop.f32.mrb[105].mxu1 }
 0x512   : > { %v4841_v3 = vadd.f32 %v4840_v26, %v9357_v21  ;;  %v6586_v22 = vadd.f32 %v9250_v52, %v4671_v54  ;;  %v6408_v9 = vpop.f32.mrb[106].mxu1 }
 0x513   : > { %v6589_v47 = vadd.f32 %v9258_v45, %v6408_v9  ;;  %v4674_v4 = vpop.f32.mrb[107].mxu1  ;;  %v9377_v55 = vadd.f32 %v6583_v37, %v9321_v23 }
 0x514   : > { %v9368_v20 = vadd.f32 %v6586_v22, %v9321_v23  ;;  %v4842_v18 = vadd.f32 %v4841_v3, %v9362_v42  ;;  %v6592_v5 = vadd.f32 %v9252_v60, %v4674_v4 }
 0x515   : > { %v9382_v49 = vadd.f32 %v6589_v47, %v9321_v23 }
 0x516   : > { %v4843_v35 = vadd.f32 %v4842_v18, %v9368_v20  ;;  %v9374_v57 = vadd.f32 %v6592_v5, %v9321_v23 }
 0x518   : > { %v4844_v52 = vadd.f32 %v4843_v35, %v9374_v57  ;;  %v6411_v30 = vpop.f32.mrb[108].mxu1 }
 0x519   : > { %v6595_v45 = vadd.f32 %v9268_v44, %v6411_v30  ;;  %v4687_v46 = vpop.f32.mrb[109].mxu1 }
 0x51a   : > { %v4845_v11 = vadd.f32 %v4844_v52, %v9377_v55  ;;  %v6598_v60 = vadd.f32 %v9262_v63, %v4687_v46  ;;  %v6412_v48 = vpop.f32.mrb[110].mxu1 }
 0x51b   : > { %v6601_v61 = vadd.f32 %v9270_v43, %v6412_v48  ;;  %v4690_v50 = vpop.f32.mrb[111].mxu1  ;;  %v9397_v10 = vadd.f32 %v6595_v45, %v9321_v23 }
 0x51c   : > { %v9388_v16 = vadd.f32 %v6598_v60, %v9321_v23  ;;  %v4846_v13 = vadd.f32 %v4845_v11, %v9382_v49  ;;  %v6604_v6 = vadd.f32 %v9264_v15, %v4690_v50 }
 0x51d   : > { %v9402_v53 = vadd.f32 %v6601_v61, %v9321_v23 }
 0x51e   : > { %v4847_v44 = vadd.f32 %v4846_v13, %v9388_v16  ;;  %v9394_v24 = vadd.f32 %v6604_v6, %v9321_v23 }
 0x520   : > { %v4848_v63 = vadd.f32 %v4847_v44, %v9394_v24  ;;  %v6415_v39 = vpop.f32.mrb[112].mxu1 }
 0x521   : > { %v6607_v43 = vadd.f32 %v9280_v31, %v6415_v39  ;;  %v4703_v19 = vpop.f32.mrb[113].mxu1 }
 0x522   : > { %v4849_v12 = vadd.f32 %v4848_v63, %v9397_v10  ;;  %v6610_v15 = vadd.f32 %v9274_v59, %v4703_v19  ;;  %v6416_v41 = vpop.f32.mrb[114].mxu1 }
 0x523   : > { %v6613_v26 = vadd.f32 %v9282_v17, %v6416_v41  ;;  %v4706_v51 = vpop.f32.mrb[115].mxu1  ;;  %v9417_v9 = vadd.f32 %v6607_v43, %v9321_v23 }
 0x524   : > { %v9408_v37 = vadd.f32 %v6610_v15, %v9321_v23  ;;  %v4850_v54 = vadd.f32 %v4849_v12, %v9402_v53  ;;  %v6616_v3 = vadd.f32 %v9276_v7, %v4706_v51 }
 0x525   : > { %v9422_v18 = vadd.f32 %v6613_v26, %v9321_v23 }
 0x526   : > { %v4851_v31 = vadd.f32 %v4850_v54, %v9408_v37  ;;  %v9414_v22 = vadd.f32 %v6616_v3, %v9321_v23 }
 0x528   : > { %v4852_v59 = vadd.f32 %v4851_v31, %v9414_v22  ;;  %v6419_v47 = vpop.f32.mrb[116].mxu1 }
 0x529   : > { %v6619_v17 = vadd.f32 %v9292_v62, %v6419_v47  ;;  %v4719_v4 = vpop.f32.mrb[117].mxu1 }
 0x52a   : > { %v4853_v5 = vadd.f32 %v4852_v59, %v9417_v9  ;;  %v6622_v7 = vadd.f32 %v9286_v28, %v4719_v4  ;;  %v6420_v35 = vpop.f32.mrb[118].mxu1 }
 0x52b   : > { %v6625_v52 = vadd.f32 %v9294_v32, %v6420_v35  ;;  %v4722_v30 = vpop.f32.mrb[119].mxu1  ;;  %v4826_v48 = vadd.f32 %v6619_v17, %v9321_v23 }
 0x52c   : > { %v4824_v45 = vadd.f32 %v6622_v7, %v9321_v23  ;;  %v4854_v46 = vadd.f32 %v4853_v5, %v9422_v18  ;;  %v6628_v11 = vadd.f32 %v9288_v27, %v4722_v30 }
 0x52d   : > { %v4827_v6 = vadd.f32 %v6625_v52, %v9321_v23 }
 0x52e   : > { %v4855_v60 = vadd.f32 %v4854_v46, %v4824_v45  ;;  %v4825_v62 = vadd.f32 %v6628_v11, %v9321_v23 }
 0x530   : > { %v4856_v61 = vadd.f32 %v4855_v60, %v4825_v62  ;;  %v6423_v50 = vpop.f32.mrb[120].mxu1 }
 0x531   : > { %v6631_v13 = vadd.f32 %v9304_v38, %v6423_v50  ;;  %v4735_v28 = vpop.f32.mrb[121].mxu1 }
 0x532   : > { %v4857_v32 = vadd.f32 %v4856_v61, %v4826_v48  ;;  %v6634_v44 = vadd.f32 %v9298_v56, %v4735_v28  ;;  %v6424_v63 = vpop.f32.mrb[122].mxu1 }
 0x533   : > { %v6637_v39 = vadd.f32 %v9306_v8, %v6424_v63  ;;  %v4738_v43 = vpop.f32.mrb[123].mxu1  ;;  %v4830_v38 = vadd.f32 %v6631_v13, %v9321_v23 }
 0x534   : > { %v4828_v27 = vadd.f32 %v6634_v44, %v9321_v23  ;;  %v4858_v19 = vadd.f32 %v4857_v32, %v4827_v6  ;;  %v6640_v12 = vadd.f32 %v9300_v58, %v4738_v43 }
 0x535   : > { %v4831_v56 = vadd.f32 %v6637_v39, %v9321_v23 }
 0x536   : > { %v4859_v15 = vadd.f32 %v4858_v19, %v4828_v27  ;;  %v4829_v41 = vadd.f32 %v6640_v12, %v9321_v23 }
 0x538   : > { %v4860_v26 = vadd.f32 %v4859_v15, %v4829_v41  ;;  %v6427_v51 = vpop.f32.mrb[124].mxu1 }
 0x539   : > { %v6643_v54 = vadd.f32 %v9324_v14, %v6427_v51  ;;  %v4751_v3 = vpop.f32.mrb[125].mxu1 }
 0x53a   : > { %v4861_v31 = vadd.f32 %v4860_v26, %v4830_v38  ;;  %v6646_v8 = vadd.f32 %v9310_v36, %v4751_v3  ;;  %v6428_v59 = vpop.f32.mrb[126].mxu1 }
 0x53b   : > { %v6649_v47 = vadd.f32 %v9327_v29, %v6428_v59  ;;  %v4754_v17 = vpop.f32.mrb[127].mxu1  ;;  %v4834_v14 = vadd.f32 %v6643_v54, %v9321_v23 }
 0x53c   : > { %v4832_v58 = vadd.f32 %v6646_v8, %v9321_v23  ;;  %v4862_v4 = vadd.f32 %v4861_v31, %v4831_v56  ;;  %v6652_v5 = vadd.f32 %v9312_v25, %v4754_v17 }
 0x53d   : > { %v4835_v30 = vadd.f32 %v6649_v47, %v9321_v23 }
 0x53e   : > { %v4863_v7 = vadd.f32 %v4862_v4, %v4832_v58  ;;  %v4833_v35 = vadd.f32 %v6652_v5, %v9321_v23 }
 0x540   : > { %v4864_v52 = vadd.f32 %v4863_v7, %v4833_v35 }
 0x542   : > { %v4865_v46 = vadd.f32 %v4864_v52, %v4834_v14 }
 0x544   : > { %v4866_v11 = vadd.f32 %v4865_v46, %v4835_v30 }
 0x546   : > { %v4867_v36 = vrot.slane %v4866_v11, 4 }
 0x548   : > { %v4868_v60 = vadd.f32 %v4867_v36, %v4866_v11 }
 0x54a   : > { %v4869_v61 = vrot.slane %v4868_v60, 2 }
 0x54c   : > { %v4870_v29 = vadd.f32 %v4869_v61, %v4868_v60 }
 0x54e   : > { %v4871_v50 = vrot.slane %v4870_v29, 1 }
 0x550   : > { %v4872_v13 = vadd.f32 %v4871_v50, %v4870_v29 }
 0x552   : > { %v4873_v28 = vmul.f32 0.00390625, %v4872_v13 }
 0x554   : > { %v9450_v32 = vsub.f32 %v9368_v20, %v4873_v28  ;;  %v9453_v25 = vsub.f32 %v9374_v57, %v4873_v28  ;;  %v9456_v44 = vsub.f32 %v9377_v55, %v4873_v28  ;;  %v9459_v23 = vsub.f32 %v9382_v49, %v4873_v28 }
 0x555   : > { %v9462_v63 = vsub.f32 %v9388_v16, %v4873_v28  ;;  %v9465_v39 = vsub.f32 %v9394_v24, %v4873_v28  ;;  %v9468_v43 = vsub.f32 %v9397_v10, %v4873_v28  ;;  %v9471_v20 = vsub.f32 %v9402_v53, %v4873_v28 }
 0x556   : > { %v9474_v57 = vsub.f32 %v9408_v37, %v4873_v28  ;;  %v9477_v55 = vsub.f32 %v9414_v22, %v4873_v28  ;;  %v9480_v49 = vsub.f32 %v9417_v9, %v4873_v28  ;;  %v9483_v16 = vsub.f32 %v9422_v18, %v4873_v28 }
 0x557   : > { %v9485_v24 = vsub.f32 %v4824_v45, %v4873_v28  ;;  %v9487_v19 = vsub.f32 %v4825_v62, %v4873_v28  ;;  %v9489_v10 = vsub.f32 %v4826_v48, %v4873_v28  ;;  %v9491_v53 = vsub.f32 %v4827_v6, %v4873_v28 }
 0x558   : > { %v9493_v12 = vsub.f32 %v4828_v27, %v4873_v28  ;;  %v9495_v37 = vsub.f32 %v4829_v41, %v4873_v28  ;;  %v9497_v22 = vsub.f32 %v4830_v38, %v4873_v28  ;;  %v9499_v15 = vsub.f32 %v4831_v56, %v4873_v28 }
 0x559   : > { %v9501_v9 = vsub.f32 %v4832_v58, %v4873_v28  ;;  %v9503_v18 = vsub.f32 %v4833_v35, %v4873_v28  ;;  %v9505_v45 = vsub.f32 %v4834_v14, %v4873_v28  ;;  %v9507_v62 = vsub.f32 %v4835_v30, %v4873_v28 }
 0x55a   : > { %v9510_v48 = vsub.f32 %v9330_v0, %v4873_v28  ;;  %v9513_v6 = vsub.f32 %v9333_v33, %v4873_v28  ;;  %v9516_v27 = vsub.f32 %v9336_v40, %v4873_v28  ;;  %v9523_v26 = vsub.f32 %v9342_v1, %v4873_v28 }
 0x55b   : > { %v9526_v51 = vsub.f32 %v9348_v2, %v4873_v28  ;;  %v9531_v54 = vsub.f32 %v9354_v34, %v4873_v28  ;;  %v9536_v56 = vsub.f32 %v9357_v21, %v4873_v28  ;;  %v9541_v2 = vsub.f32 %v9362_v42, %v4873_v28 }
 0x55c   : > { %v4906_v41 = vmul.f32 %v9510_v48, %v9510_v48  ;;  %v4907_v38 = vmul.f32 %v9513_v6, %v9513_v6  ;;  %v4908_v0 = vmul.f32 %v9516_v27, %v9516_v27  ;;  %v4909_v40 = vmul.f32 %v9523_v26, %v9523_v26 }
 0x55d   : > { %v4910_v1 = vmul.f32 %v9526_v51, %v9526_v51  ;;  %v4911_v8 = vmul.f32 %v9531_v54, %v9531_v54  ;;  %v4912_v34 = vmul.f32 %v9536_v56, %v9536_v56  ;;  %v4913_v17 = vmul.f32 %v9541_v2, %v9541_v2 }
 0x55e   : > { %v4938_v33 = vadd.f32 %v4907_v38, %v4906_v41  ;;  %v4914_v58 = vmul.f32 %v9450_v32, %v9450_v32  ;;  %v4915_v42 = vmul.f32 %v9453_v25, %v9453_v25  ;;  %v4916_v7 = vmul.f32 %v9456_v44, %v9456_v44 }
 0x55f   : > { %v4917_v14 = vmul.f32 %v9459_v23, %v9459_v23  ;;  %v4918_v30 = vmul.f32 %v9462_v63, %v9462_v63  ;;  %v4919_v11 = vmul.f32 %v9465_v39, %v9465_v39  ;;  %v4920_v60 = vmul.f32 %v9468_v43, %v9468_v43 }
 0x560   : > { %v4939_v3 = vadd.f32 %v4938_v33, %v4908_v0  ;;  %v4921_v29 = vmul.f32 %v9471_v20, %v9471_v20  ;;  %v4922_v13 = vmul.f32 %v9474_v57, %v9474_v57  ;;  %v4923_v41 = vmul.f32 %v9477_v55, %v9477_v55 }
 0x561   : > { %v4924_v0 = vmul.f32 %v9480_v49, %v9480_v49 }
 0x562   : > { %v4940_v31 = vadd.f32 %v4939_v3, %v4909_v40  ;;  %v4925_v40 = vmul.f32 %v9483_v16, %v9483_v16 }
 0x564   : > { %v4941_v59 = vadd.f32 %v4940_v31, %v4910_v1  ;;  %v4926_v1 = vmul.f32 %v9485_v24, %v9485_v24 }
 0x566   : > { %v4942_v47 = vadd.f32 %v4941_v59, %v4911_v8  ;;  %v4927_v8 = vmul.f32 %v9487_v19, %v9487_v19 }
 0x568   : > { %v4943_v21 = vadd.f32 %v4942_v47, %v4912_v34  ;;  %v4928_v34 = vmul.f32 %v9489_v10, %v9489_v10 }
 0x56a   : > { %v4944_v4 = vadd.f32 %v4943_v21, %v4913_v17  ;;  %v4929_v17 = vmul.f32 %v9491_v53, %v9491_v53 }
 0x56c   : > { %v4945_v5 = vadd.f32 %v4944_v4, %v4914_v58  ;;  %v4930_v58 = vmul.f32 %v9493_v12, %v9493_v12 }
 0x56e   : > { %v4946_v35 = vadd.f32 %v4945_v5, %v4915_v42  ;;  %v4931_v42 = vmul.f32 %v9495_v37, %v9495_v37 }
 0x570   : > { %v4947_v52 = vadd.f32 %v4946_v35, %v4916_v7  ;;  %v4932_v7 = vmul.f32 %v9497_v22, %v9497_v22 }
 0x572   : > { %v4948_v46 = vadd.f32 %v4947_v52, %v4917_v14  ;;  %v4933_v14 = vmul.f32 %v9499_v15, %v9499_v15 }
 0x574   : > { %v4949_v36 = vadd.f32 %v4948_v46, %v4918_v30  ;;  %v4934_v30 = vmul.f32 %v9501_v9, %v9501_v9 }
 0x576   : > { %v4950_v61 = vadd.f32 %v4949_v36, %v4919_v11  ;;  %v4935_v11 = vmul.f32 %v9503_v18, %v9503_v18 }
 0x578   : > { %v4951_v50 = vadd.f32 %v4950_v61, %v4920_v60  ;;  %v4936_v60 = vmul.f32 %v9505_v45, %v9505_v45 }
 0x57a   : > { %v4952_v28 = vadd.f32 %v4951_v50, %v4921_v29  ;;  %v4937_v29 = vmul.f32 %v9507_v62, %v9507_v62 }
 0x57c   : > { %v4953_v38 = vadd.f32 %v4952_v28, %v4922_v13 }
 0x57e   : > { %v4954_v33 = vadd.f32 %v4953_v38, %v4923_v41 }
 0x580   : > { %v4955_v3 = vadd.f32 %v4954_v33, %v4924_v0 }
 0x582   : > { %v4956_v31 = vadd.f32 %v4955_v3, %v4925_v40 }
 0x584   : > { %v4957_v59 = vadd.f32 %v4956_v31, %v4926_v1 }
 0x586   : > { %v4958_v47 = vadd.f32 %v4957_v59, %v4927_v8 }
 0x588   : > { %v4959_v21 = vadd.f32 %v4958_v47, %v4928_v34 }
 0x58a   : > { %v4960_v4 = vadd.f32 %v4959_v21, %v4929_v17 }
 0x58c   : > { %v4961_v5 = vadd.f32 %v4960_v4, %v4930_v58 }
 0x58e   : > { %v4962_v35 = vadd.f32 %v4961_v5, %v4931_v42 }
 0x590   : > { %v4963_v52 = vadd.f32 %v4962_v35, %v4932_v7  ;;  %v6965_v7 = vld [vmem:[%s7305_s6 + $0x20] sm:$0xff]  ;;  %v6966_v35 = vld [vmem:[%s7305_s6 + $0x28] sm:$0xff] }
 0x592   : > { %v4964_v46 = vadd.f32 %v4963_v52, %v4933_v14  ;;  %v6967_v14 = vld [vmem:[%s7305_s6 + $0x30] sm:$0xff] }
 0x594   : > { %v4965_v36 = vadd.f32 %v4964_v46, %v4934_v30  ;;  %v6968_v30 = vld [vmem:[%s7305_s6 + $0x38] sm:$0xff] }
 0x596   : > { %v4966_v61 = vadd.f32 %v4965_v36, %v4935_v11  ;;  %v6969_v11 = vld [vmem:[%s7305_s6 + $0x40] sm:$0xff] }
 0x598   : > { %v4967_v50 = vadd.f32 %v4966_v61, %v4936_v60  ;;  %v6970_v60 = vld [vmem:[%s7305_s6 + $0x48] sm:$0xff] }
 0x59a   : > { %v4968_v13 = vadd.f32 %v4967_v50, %v4937_v29  ;;  %v6971_v29 = vld [vmem:[%s7305_s6 + $0x50] sm:$0xff] }
 0x59c   : > { %v4969_v28 = vrot.slane %v4968_v13, 4 }
 0x59e   : > { %v4970_v41 = vadd.f32 %v4969_v28, %v4968_v13  ;;  %v6972_v13 = vld [vmem:[%s7305_s6 + $0x58] sm:$0xff] }
 0x5a0   : > { %v4971_v38 = vrot.slane %v4970_v41, 2 }
 0x5a2   : > { %v4972_v0 = vadd.f32 %v4971_v38, %v4970_v41  ;;  %v6973_v41 = vld [vmem:[%s7305_s6 + $0x60] sm:$0xff] }
 0x5a4   : > { %v4973_v33 = vrot.slane %v4972_v0, 1 }
 0x5a6   : > { %v4974_v40 = vadd.f32 %v4973_v33, %v4972_v0  ;;  %v6974_v0 = vld [vmem:[%s7305_s6 + $0x68] sm:$0xff] }
 0x5a8   : > { %v4975_v3 = vmul.f32 0.00390625, %v4974_v40  ;;  %v6975_v40 = vld [vmem:[%s7305_s6 + $0x70] sm:$0xff] }
 0x5aa   : > { %v4976_v1 = vadd.f32 1e-05, %v4975_v3 }
 0x5ac   : > { %6959 = vrsqrt.f32 %v4976_v1  ;;  %v6976_v1 = vld [vmem:[%s7305_s6 + $0x78] sm:$0xff] }
 0x5b6   : > { %v6960_v31 = vpop.eup %6959 }
 0x5b7   : > { %v4978_v8 = vmul.f32 %v6960_v31, %v9510_v48  ;;  %v4979_v59 = vmul.f32 %v6960_v31, %v9513_v6  ;;  %v4980_v34 = vmul.f32 %v6960_v31, %v9516_v27  ;;  %v4981_v47 = vmul.f32 %v6960_v31, %v9523_v26 }
 0x5b8   : > { %v4982_v17 = vmul.f32 %v6960_v31, %v9526_v51  ;;  %v4983_v21 = vmul.f32 %v6960_v31, %v9531_v54  ;;  %v4984_v58 = vmul.f32 %v6960_v31, %v9536_v56  ;;  %v4985_v4 = vmul.f32 %v6960_v31, %v9541_v2 }
 0x5b9   : > { %v4986_v42 = vmul.f32 %v6960_v31, %v9450_v32  ;;  %v4987_v5 = vmul.f32 %v6960_v31, %v9453_v25  ;;  %v4988_v48 = vmul.f32 %v6960_v31, %v9456_v44  ;;  %v4989_v6 = vmul.f32 %v6960_v31, %v9459_v23 }
 0x5ba   : > { %v4990_v27 = vmul.f32 %v6960_v31, %v9462_v63  ;;  %v4991_v26 = vmul.f32 %v6960_v31, %v9465_v39  ;;  %v4992_v51 = vmul.f32 %v6960_v31, %v9468_v43  ;;  %v4993_v54 = vmul.f32 %v6960_v31, %v9471_v20 }
 0x5bb   : > { %v4994_v56 = vmul.f32 %v6960_v31, %v9474_v57  ;;  %v4995_v2 = vmul.f32 %v6960_v31, %v9477_v55  ;;  %v4996_v32 = vmul.f32 %v6960_v31, %v9480_v49  ;;  %v4997_v25 = vmul.f32 %v6960_v31, %v9483_v16 }
 0x5bc   : > { %v9623_v44 = vmul.f32 %v6960_v31, %v9485_v24  ;;  %v9626_v23 = vmul.f32 %v6960_v31, %v9487_v19  ;;  %v9629_v63 = vmul.f32 %v6960_v31, %v9489_v10  ;;  %v9632_v39 = vmul.f32 %v6960_v31, %v9491_v53  ;;  %v6961_v10 = vld [vmem:[%s7305_s6] sm:$0xff] }
 0x5bd   : > { %v9635_v43 = vmul.f32 %v6960_v31, %v9493_v12  ;;  %v9638_v20 = vmul.f32 %v6960_v31, %v9495_v37  ;;  %v9641_v57 = vmul.f32 %v6960_v31, %v9497_v22  ;;  %v9644_v55 = vmul.f32 %v6960_v31, %v9499_v15  ;;  %v6962_v12 = vld [vmem:[%s7305_s6 + $0x8] sm:$0xff]  ;;  %v6963_v22 = vld [vmem:[%s7305_s6 + $0x10] sm:$0xff] }
 0x5be   : > { %v9652_v49 = vmul.f32 %v6960_v31, %v9501_v9  ;;  %v9655_v16 = vmul.f32 %v6960_v31, %v9503_v18  ;;  %v9658_v24 = vmul.f32 %v6960_v31, %v9505_v45  ;;  %v9661_v19 = vmul.f32 %v6960_v31, %v9507_v62  ;;  %v6964_v9 = vld [vmem:[%s7305_s6 + $0x18] sm:$0xff] }
 0x5bf   : > { %v5010_v53 = vadd.f32 %v6961_v10, %v4978_v8  ;;  %v5011_v37 = vadd.f32 %v6962_v12, %v4979_v59  ;;  %v5012_v15 = vadd.f32 %v6963_v22, %v4980_v34  ;;  %v5013_v18 = vadd.f32 %v6964_v9, %v4981_v47  ;;  %v6977_v8 = vld [vmem:[%s7305_s6 + $0x80] sm:$0xff]  ;;  %v6978_v34 = vld [vmem:[%s7305_s6 + $0x88] sm:$0xff]  ;;  %v6991_v10 = vld [vmem:[%s7305_s6 + $0xf0] sm:$0xff] }
 0x5c0   : > { %v5014_v45 = vadd.f32 %v6965_v7, %v4982_v17  ;;  %v5015_v62 = vadd.f32 %v6966_v35, %v4983_v21  ;;  %v5016_v52 = vadd.f32 %v6967_v14, %v4984_v58  ;;  %v5017_v46 = vadd.f32 %v6968_v30, %v4985_v4  ;;  %v6979_v17 = vld [vmem:[%s7305_s6 + $0x90] sm:$0xff]  ;;  %v6980_v58 = vld [vmem:[%s7305_s6 + $0x98] sm:$0xff] }
 0x5c1   : > { %v5018_v36 = vadd.f32 %v6969_v11, %v4986_v42  ;;  %v5019_v61 = vadd.f32 %v6970_v60, %v4987_v5  ;;  %v5020_v50 = vadd.f32 %v6971_v29, %v4988_v48  ;;  %v5021_v28 = vadd.f32 %v6972_v13, %v4989_v6  ;;  %5043 = vst.msk [vmem:[%s9649_s7] sm:$0xff] %vm5042_vm5, %v5010_v53  ;;  %v6981_v42 = vld [vmem:[%s7305_s6 + $0xa0] sm:$0xff]  ;;  %v6982_v48 = vld [vmem:[%s7305_s6 + $0xa8] sm:$0xff]  ;;  %v6992_v12 = vld [vmem:[%s7305_s6 + $0xf8] sm:$0xff] }
 0x5c2   : > { %5044 = vst.msk [vmem:[%s9649_s7 + $0x8] sm:$0xff] %vm5042_vm5, %v5011_v37  ;;  %5045 = vst.msk [vmem:[%s9649_s7 + $0x10] sm:$0xff] %vm5042_vm5, %v5012_v15  ;;  %v5022_v38 = vadd.f32 %v6973_v41, %v4990_v27  ;;  %v5023_v33 = vadd.f32 %v6974_v0, %v4991_v26  ;;  %v5024_v3 = vadd.f32 %v6975_v40, %v4992_v51  ;;  %v6983_v27 = vld [vmem:[%s7305_s6 + $0xb0] sm:$0xff]  ;;  %v6984_v51 = vld [vmem:[%s7305_s6 + $0xb8] sm:$0xff] }
 0x5c3   : > { %5046 = vst.msk [vmem:[%s9649_s7 + $0x18] sm:$0xff] %vm5042_vm5, %v5013_v18  ;;  %v5025_v31 = vadd.f32 %v6976_v1, %v4993_v54  ;;  %5047 = vst.msk [vmem:[%s9649_s7 + $0x20] sm:$0xff] %vm5042_vm5, %v5014_v45  ;;  %v5026_v59 = vadd.f32 %v6977_v8, %v4994_v56  ;;  %v5027_v47 = vadd.f32 %v6978_v34, %v4995_v2  ;;  %v6985_v56 = vld [vmem:[%s7305_s6 + $0xc0] sm:$0xff] }
 0x5c4   : > { %5048 = vst.msk [vmem:[%s9649_s7 + $0x28] sm:$0xff] %vm5042_vm5, %v5015_v62  ;;  %5049 = vst.msk [vmem:[%s9649_s7 + $0x30] sm:$0xff] %vm5042_vm5, %v5016_v52  ;;  %v5028_v21 = vadd.f32 %v6979_v17, %v4996_v32  ;;  %v5029_v4 = vadd.f32 %v6980_v58, %v4997_v25  ;;  %v5030_v5 = vadd.f32 %v6981_v42, %v9623_v44  ;;  %v6986_v32 = vld [vmem:[%s7305_s6 + $0xc8] sm:$0xff]  ;;  %v6987_v44 = vld [vmem:[%s7305_s6 + $0xd0] sm:$0xff] }
 0x5c5   : > { %5050 = vst.msk [vmem:[%s9649_s7 + $0x38] sm:$0xff] %vm5042_vm5, %v5017_v46  ;;  %5051 = vst.msk [vmem:[%s9649_s7 + $0x40] sm:$0xff] %vm5042_vm5, %v5018_v36  ;;  %v5031_v6 = vadd.f32 %v6982_v48, %v9626_v23  ;;  %v5032_v26 = vadd.f32 %v6983_v27, %v9629_v63  ;;  %v5033_v54 = vadd.f32 %v6984_v51, %v9632_v39  ;;  %v6988_v63 = vld [vmem:[%s7305_s6 + $0xd8] sm:$0xff] }
 0x5c6   : > { %5052 = vst.msk [vmem:[%s9649_s7 + $0x48] sm:$0xff] %vm5042_vm5, %v5019_v61  ;;  %5053 = vst.msk [vmem:[%s9649_s7 + $0x50] sm:$0xff] %vm5042_vm5, %v5020_v50  ;;  %v5034_v2 = vadd.f32 %v6985_v56, %v9635_v43  ;;  %v5035_v25 = vadd.f32 %v6986_v32, %v9638_v20  ;;  %v5036_v23 = vadd.f32 %v6987_v44, %v9641_v57  ;;  %v6989_v43 = vld [vmem:[%s7305_s6 + $0xe0] sm:$0xff]  ;;  %v6990_v57 = vld [vmem:[%s7305_s6 + $0xe8] sm:$0xff] }
 0x5c7   : > { %5054 = vst.msk [vmem:[%s9649_s7 + $0x58] sm:$0xff] %vm5042_vm5, %v5021_v28  ;;  %5055 = vst.msk [vmem:[%s9649_s7 + $0x60] sm:$0xff] %vm5042_vm5, %v5022_v38  ;;  %v5037_v39 = vadd.f32 %v6988_v63, %v9644_v55  ;;  %v5038_v20 = vadd.f32 %v6989_v43, %v9652_v49  ;;  %v5039_v55 = vadd.f32 %v6990_v57, %v9655_v16 }
 0x5c8   : > { %5056 = vst.msk [vmem:[%s9649_s7 + $0x68] sm:$0xff] %vm5042_vm5, %v5023_v33  ;;  %5057 = vst.msk [vmem:[%s9649_s7 + $0x70] sm:$0xff] %vm5042_vm5, %v5024_v3  ;;  %v5040_v53 = vadd.f32 %v6991_v10, %v9658_v24  ;;  %v5041_v37 = vadd.f32 %v6992_v12, %v9661_v19 }
 0x5c9   : > { %5058 = vst.msk [vmem:[%s9649_s7 + $0x78] sm:$0xff] %vm5042_vm5, %v5025_v31  ;;  %5059 = vst.msk [vmem:[%s9649_s7 + $0x80] sm:$0xff] %vm5042_vm5, %v5026_v59 }
 0x5ca   : > { %5060 = vst.msk [vmem:[%s9649_s7 + $0x88] sm:$0xff] %vm5042_vm5, %v5027_v47  ;;  %5061 = vst.msk [vmem:[%s9649_s7 + $0x90] sm:$0xff] %vm5042_vm5, %v5028_v21 }
 0x5cb   : > { %5062 = vst.msk [vmem:[%s9649_s7 + $0x98] sm:$0xff] %vm5042_vm5, %v5029_v4  ;;  %5063 = vst.msk [vmem:[%s9649_s7 + $0xa0] sm:$0xff] %vm5042_vm5, %v5030_v5 }
 0x5cc   : > { %5064 = vst.msk [vmem:[%s9649_s7 + $0xa8] sm:$0xff] %vm5042_vm5, %v5031_v6  ;;  %5065 = vst.msk [vmem:[%s9649_s7 + $0xb0] sm:$0xff] %vm5042_vm5, %v5032_v26 }
 0x5cd   : > { %5066 = vst.msk [vmem:[%s9649_s7 + $0xb8] sm:$0xff] %vm5042_vm5, %v5033_v54  ;;  %5067 = vst.msk [vmem:[%s9649_s7 + $0xc0] sm:$0xff] %vm5042_vm5, %v5034_v2 }
 0x5ce   : > { %5068 = vst.msk [vmem:[%s9649_s7 + $0xc8] sm:$0xff] %vm5042_vm5, %v5035_v25  ;;  %5069 = vst.msk [vmem:[%s9649_s7 + $0xd0] sm:$0xff] %vm5042_vm5, %v5036_v23 }
 0x5cf   : > { %5070 = vst.msk [vmem:[%s9649_s7 + $0xd8] sm:$0xff] %vm5042_vm5, %v5037_v39  ;;  %5071 = vst.msk [vmem:[%s9649_s7 + $0xe0] sm:$0xff] %vm5042_vm5, %v5038_v20 }
 0x5d0   : > { %5072 = vst.msk [vmem:[%s9649_s7 + $0xe8] sm:$0xff] %vm5042_vm5, %v5039_v55  ;;  %5073 = vst.msk [vmem:[%s9649_s7 + $0xf0] sm:$0xff] %vm5042_vm5, %v5040_v53 }
 0x5d1   : > { %5074 = vst.msk [vmem:[%s9649_s7 + $0xf8] sm:$0xff] %vm5042_vm5, %v5041_v37 }
 0x5d2 PF: > { %p16_p9 = scmp.ge.s32.totalorder %s7249_s10, 4   ;;  %s9857_s18 = smov %s7109_s19 }
 0x5d3   : > { %s9858_s19 = smov %s7113_s20  ;;  %s9859_s20 = smov %s7260_s15 }
 0x5d4   : > { %s9860_s21 = smov %s7249_s10  ;;  %18 = sbr.rel (!%p16_p9) target bundleno = 4 (0x4), region = 92 }
 0x5db   :  { %5096 = vsyncpa [#allocation3], 1 }
 0x5dc   :  { %5098 = vsyncpa [#allocation3 + $0x1], 1 }
 0x5dd   :  { %5099 = vsyncpa [#allocation5], 1 }

</bundles_post_ra>
